<compile_context>
chip_gen: v7x
topology: tpu7x:2x2x1
jax: 0.10.0
libtpu: 0.0.40
codegen_flags: <defaults>
</compile_context>

<pallas_src>
import math
import functools

import jax
import jax.numpy as jnp
from jax.experimental import pallas as pl
from jax.experimental.pallas import tpu as pltpu


# ----------------------------------------------------------------------------
# In-kernel MAB given per-head, already-projected queries (bias included).
#   MAB(Q, K) = O + relu(fc_o(O)),  O = cat_h(Q_h + softmax(Q_h K_h^T/sqrt(D)) V_h)
# ----------------------------------------------------------------------------
def _mab(qh_heads, kf, bt, nk, wk_heads, bk_heads, wv_heads, bv_heads, wo, bo, scale):
    """qh_heads: list of H arrays [bt, nq, ds]; kf: [bt*nk, dk] flattened keys.

    wk_heads/wv_heads: lists of H arrays [dk, ds]; bk_heads/bv_heads: [1, ds].
    wo: [D, D]; bo: [1, D].  Returns [bt, nq, D]."""
    heads = []
    for h, q_h in enumerate(qh_heads):
        ds = q_h.shape[-1]
        k_h = (jnp.dot(kf, wk_heads[h], preferred_element_type=jnp.float32)
               + bk_heads[h]).reshape(bt, nk, ds)
        v_h = (jnp.dot(kf, wv_heads[h], preferred_element_type=jnp.float32)
               + bv_heads[h]).reshape(bt, nk, ds)
        s = jnp.einsum('bqe,bke->bqk', q_h, k_h,
                       preferred_element_type=jnp.float32) * scale
        s = s - jnp.max(s, axis=-1, keepdims=True)
        p = jnp.exp(s)
        p = p * pl.reciprocal(jnp.sum(p, axis=-1, keepdims=True), approx=True)
        heads.append(q_h + jnp.einsum('bqk,bke->bqe', p, v_h,
                                      preferred_element_type=jnp.float32))
    o = jnp.concatenate(heads, axis=-1)                 # [bt, nq, D] (single lane merge)
    nq, dv = o.shape[1], o.shape[2]
    of = o.reshape(bt * nq, dv)
    ff = jnp.dot(of, wo, preferred_element_type=jnp.float32) + bo
    return (of + jnp.maximum(ff, 0.0)).reshape(bt, nq, dv)


# ----------------------------------------------------------------------------
# The single fused SetTransformer kernel: ISAB1 -> ISAB2 -> PMA -> Linear.
# ----------------------------------------------------------------------------
def _make_kernel(bt, n, num_inds, num_out, dh, d_pad, num_heads):
    ds = dh // num_heads
    scale = 1.0 / math.sqrt(dh)                         # matches torch: 1/sqrt(dim_V)
    H = num_heads

    def kernel(x_ref, w6_ref, w128_ref, b_ref, wo_ref, bo_ref,
               wout_ref, bout_ref, qi1_ref, qi2_ref, qs_ref, o_ref):
        w6 = lambda i: [w6_ref[i, h] for h in range(H)]
        w128 = lambda i: [w128_ref[i, h] for h in range(H)]
        bias = lambda i: [b_ref[i, h] for h in range(H)]

        x = x_ref[...].astype(jnp.float32)              # [bt, n, dx]
        dx = x.shape[-1]
        xf = x.reshape(bt * n, dx)                      # flatten batch into sublanes

        # ---------------- ISAB1 ----------------
        # H1 = MAB(I1, X); queries (I1 @ Wq + bq) are batch-invariant -> hoisted (qi1).
        qh = [jnp.broadcast_to(qi1_ref[h][None], (bt, num_inds, ds)) for h in range(H)]
        h1 = _mab(qh, xf, bt, n, w6(0), bias(0), w6(1), bias(1),
                  wo_ref[0], bo_ref[0], scale)          # [bt, num_inds, dh]
        h1f = h1.reshape(bt * num_inds, dh)

        # Z1 = MAB(X, H1)
        qh = [(jnp.dot(xf, w6_ref[2, h], preferred_element_type=jnp.float32)
               + b_ref[2, h]).reshape(bt, n, ds) for h in range(H)]
        z1 = _mab(qh, h1f, bt, num_inds, w128(0), bias(3), w128(1), bias(4),
                  wo_ref[1], bo_ref[1], scale)          # [bt, n, dh]
        z1f = z1.reshape(bt * n, dh)

        # ---------------- ISAB2 ----------------
        qh = [jnp.broadcast_to(qi2_ref[h][None], (bt, num_inds, ds)) for h in range(H)]
        h2 = _mab(qh, z1f, bt, n, w128(2), bias(5), w128(3), bias(6),
                  wo_ref[2], bo_ref[2], scale)
        h2f = h2.reshape(bt * num_inds, dh)

        qh = [(jnp.dot(z1f, w128_ref[4, h], preferred_element_type=jnp.float32)
               + b_ref[7, h]).reshape(bt, n, ds) for h in range(H)]
        z2 = _mab(qh, h2f, bt, num_inds, w128(5), bias(8), w128(6), bias(9),
                  wo_ref[3], bo_ref[3], scale)
        z2f = z2.reshape(bt * n, dh)

        # ------ Decoder: Dropout(id) -> PMA -> Dropout(id) -> Linear ------
        # TODO(synk): training-mode dropout not implemented (eval-mode identity).
        qh = [jnp.broadcast_to(qs_ref[h][None], (bt, num_out, ds)) for h in range(H)]
        p = _mab(qh, z2f, bt, n, w128(7), bias(10), w128(8), bias(11),
                 wo_ref[4], bo_ref[4], scale)           # [bt, num_out, dh]
        pf = p.reshape(bt * num_out, dh)
        y = jnp.dot(pf, wout_ref[...], preferred_element_type=jnp.float32) + bout_ref[...]
        o_ref[...] = y.reshape(bt, num_out, d_pad).astype(o_ref.dtype)

    return kernel


def _pick_block_b(B, max_bt=8):
    """Largest divisor of B that is <= max_bt, preferring >= 2 grid steps."""
    divs = [d for d in range(1, min(B, max_bt) + 1) if B % d == 0]
    two_step = [d for d in divs if B // d >= 2]
    return (two_step or divs)[-1]


def set_transformer_forward(X, packed, *, num_heads=4, dim_output=64, block_b=None):
    """X: [B, N, dim_input] -> [B, dim_output]."""
    X = X.astype(jnp.float32)
    B, N, dx = X.shape
    dh = packed["wo"].shape[-1]
    num_inds = packed["qi1"].shape[1]
    num_out = packed["qs"].shape[1]
    d_pad = packed["wout"].shape[-1]

    bt = _pick_block_b(B) if block_b is None else block_b
    assert B % bt == 0
    grid = (B // bt,)

    consts = [packed["w6"], packed["w128"], packed["b"], packed["wo"], packed["bo"],
              packed["wout"], packed["bout"], packed["qi1"], packed["qi2"], packed["qs"]]

    def const_spec(a):
        zeros = (0,) * a.ndim
        return pl.BlockSpec(a.shape, lambda i, _z=zeros: _z)   # VMEM-resident constants

    in_specs = ([pl.BlockSpec((bt, N, dx), lambda i: (i, 0, 0))]
                + [const_spec(a) for a in consts])

    out = pl.pallas_call(
        _make_kernel(bt, N, num_inds, num_out, dh, d_pad, num_heads),
        out_shape=jax.ShapeDtypeStruct((B, num_out, d_pad), jnp.float32),
        grid=grid,
        in_specs=in_specs,
        out_specs=pl.BlockSpec((bt, num_out, d_pad), lambda i: (i, 0, 0)),
        compiler_params=pltpu.CompilerParams(
            dimension_semantics=("parallel",),          # shard batch blocks across TCs
            vmem_limit_bytes=32 * 1024 * 1024,          # ~3 MiB used; safe on v7x 64 MiB
        ),
    )(X, *consts)

    out = out[..., :dim_output]                         # drop lane padding
    return out[:, 0, :] if num_out == 1 else out        # squeeze(1)


# ----------------------------------------------------------------------------
# Parameter initialization (deterministic, synthetic) — mirrors the torch module
# ----------------------------------------------------------------------------
def init_linear(key, din, dout):
    k1, k2 = jax.random.split(key)
    bound = 1.0 / math.sqrt(din)
    w = jax.random.uniform(k1, (din, dout), jnp.float32, -bound, bound)
    b = jax.random.uniform(k2, (1, dout), jnp.float32, -bound, bound)
    return w, b


def init_mab(key, dim_q, dim_k, dim_v):
    ks = jax.random.split(key, 4)
    wq, bq = init_linear(ks[0], dim_q, dim_v)
    wk, bk = init_linear(ks[1], dim_k, dim_v)
    wv, bv = init_linear(ks[2], dim_k, dim_v)
    wo, bo = init_linear(ks[3], dim_v, dim_v)
    return dict(wq=wq, bq=bq, wk=wk, bk=bk, wv=wv, bv=bv, wo=wo, bo=bo)


def xavier_uniform(key, shape):
    fan_in, fan_out = shape[-2], shape[-1]
    limit = math.sqrt(6.0 / (fan_in + fan_out))
    return jax.random.uniform(key, shape, jnp.float32, -limit, limit)


def init_set_transformer(key, dim_input=6, num_outputs=1, dim_output=64,
                         num_inds=32, dim_hidden=128, num_heads=4):
    ks = jax.random.split(key, 9)
    params = {
        "isab1": {
            "I": xavier_uniform(ks[0], (1, num_inds, dim_hidden)),
            "mab0": init_mab(ks[1], dim_hidden, dim_input, dim_hidden),
            "mab1": init_mab(ks[2], dim_input, dim_hidden, dim_hidden),
        },
        "isab2": {
            "I": xavier_uniform(ks[3], (1, num_inds, dim_hidden)),
            "mab0": init_mab(ks[4], dim_hidden, dim_hidden, dim_hidden),
            "mab1": init_mab(ks[5], dim_hidden, dim_hidden, dim_hidden),
        },
        "pma": {
            "S": xavier_uniform(ks[6], (1, num_outputs, dim_hidden)),
            "mab": init_mab(ks[7], dim_hidden, dim_hidden, dim_hidden),
        },
    }
    w_out, b_out = init_linear(ks[8], dim_hidden, dim_output)
    params["out_w"] = w_out
    params["out_b"] = b_out
    return params


# ----------------------------------------------------------------------------
# One-time parameter packing: per-head weight pre-split, hoisted I/S query
# projections, stacked operands, and init-time output-lane padding.
# ----------------------------------------------------------------------------
def pack_params(params, num_heads=4):
    H = num_heads
    dh = params["out_w"].shape[0]
    ds = dh // H

    def split_w(w):                       # [din, dh] -> [H, din, ds]
        return jnp.stack([w[:, h * ds:(h + 1) * ds] for h in range(H)], axis=0)

    def split_b(b):                       # [1, dh] -> [H, 1, ds]
        return jnp.stack([b[:, h * ds:(h + 1) * ds] for h in range(H)], axis=0)

    def hoist_q(seed, m):                 # (seed @ Wq + bq) head-split -> [H, Nq, ds]
        q = seed[0] @ m["wq"] + m["bq"]
        return jnp.stack([q[:, h * ds:(h + 1) * ds] for h in range(H)], axis=0)

    i1m0, i1m1 = params["isab1"]["mab0"], params["isab1"]["mab1"]
    i2m0, i2m1 = params["isab2"]["mab0"], params["isab2"]["mab1"]
    pm = params["pma"]["mab"]

    w6 = jnp.stack([split_w(i1m0["wk"]), split_w(i1m0["wv"]), split_w(i1m1["wq"])])
    w128 = jnp.stack([split_w(i1m1["wk"]), split_w(i1m1["wv"]),
                      split_w(i2m0["wk"]), split_w(i2m0["wv"]),
                      split_w(i2m1["wq"]), split_w(i2m1["wk"]), split_w(i2m1["wv"]),
                      split_w(pm["wk"]), split_w(pm["wv"])])
    b = jnp.stack([split_b(i1m0["bk"]), split_b(i1m0["bv"]),
                   split_b(i1m1["bq"]), split_b(i1m1["bk"]), split_b(i1m1["bv"]),
                   split_b(i2m0["bk"]), split_b(i2m0["bv"]),
                   split_b(i2m1["bq"]), split_b(i2m1["bk"]), split_b(i2m1["bv"]),
                   split_b(pm["bk"]), split_b(pm["bv"])])
    wo = jnp.stack([i1m0["wo"], i1m1["wo"], i2m0["wo"], i2m1["wo"], pm["wo"]])
    bo = jnp.stack([i1m0["bo"], i1m1["bo"], i2m0["bo"], i2m1["bo"], pm["bo"]])

    dim_output = params["out_w"].shape[1]
    d_pad = ((dim_output + 127) // 128) * 128
    wout = jnp.zeros((dh, d_pad), jnp.float32).at[:, :dim_output].set(params["out_w"])
    bout = jnp.zeros((1, d_pad), jnp.float32).at[:, :dim_output].set(params["out_b"])

    return {"w6": w6, "w128": w128, "b": b, "wo": wo, "bo": bo,
            "wout": wout, "bout": bout,
            "qi1": hoist_q(params["isab1"]["I"], i1m0),
            "qi2": hoist_q(params["isab2"]["I"], i2m0),
            "qs": hoist_q(params["pma"]["S"], pm)}


# ----------------------------------------------------------------------------
# Pure-JAX reference (mirrors the PyTorch SetTransformer math exactly)
# ----------------------------------------------------------------------------
def mab_ref(Qin, Kin, p, num_heads):
    dim_v = p["wq"].shape[1]
    ds = dim_v // num_heads
    Q = Qin @ p["wq"] + p["bq"]
    K = Kin @ p["wk"] + p["bk"]
    V = Kin @ p["wv"] + p["bv"]
    outs = []
    for h in range(num_heads):
        Qh = Q[..., h * ds:(h + 1) * ds]
        Kh = K[..., h * ds:(h + 1) * ds]
        Vh = V[..., h * ds:(h + 1) * ds]
        S = jnp.einsum("bqd,bkd->bqk", Qh, Kh) / math.sqrt(dim_v)
        A = jax.nn.softmax(S, axis=-1)
        outs.append(Qh + jnp.einsum("bqk,bkd->bqd", A, Vh))
    O = jnp.concatenate(outs, axis=-1)
    return O + jax.nn.relu(O @ p["wo"] + p["bo"])


def set_transformer_ref(X, params, num_heads=4):
    B = X.shape[0]
    tile = lambda p: jnp.broadcast_to(p, (B,) + p.shape[1:])
    H = mab_ref(tile(params["isab1"]["I"]), X, params["isab1"]["mab0"], num_heads)
    Z = mab_ref(X, H, params["isab1"]["mab1"], num_heads)
    H = mab_ref(tile(params["isab2"]["I"]), Z, params["isab2"]["mab0"], num_heads)
    Z = mab_ref(Z, H, params["isab2"]["mab1"], num_heads)
    P = mab_ref(tile(params["pma"]["S"]), Z, params["pma"]["mab"], num_heads)
    out = P @ params["out_w"] + params["out_b"]
    return out[:, 0, :]


# ----------------------------------------------------------------------------
if __name__ == "__main__":
    key = jax.random.PRNGKey(0)
    k_param, k_x = jax.random.split(key)

    # Module defaults: dim_input=6, num_outputs=1, dim_output=64,
    #                  num_inds=32, dim_hidden=128, num_heads=4, ln=False
    B, N, dim_input = 2, 16, 6
    num_heads = 4

    params = init_set_transformer(k_param, dim_input=dim_input, num_outputs=1,
                                  dim_output=64, num_inds=32, dim_hidden=128,
                                  num_heads=num_heads)
    packed = pack_params(params, num_heads=num_heads)   # one-time packing/hoisting
    X = jax.random.normal(k_x, (B, N, dim_input), jnp.float32)

    fwd = jax.jit(functools.partial(set_transformer_forward,
                                    num_heads=num_heads, dim_output=64))
    out = jax.block_until_ready(fwd(X, packed))
    assert out.shape == (B, 64), out.shape

    # Tolerance slightly relaxed for the approx (EUP) reciprocal in the softmax.
    ref = set_transformer_ref(X, params, num_heads=num_heads)
    err = float(jnp.max(jnp.abs(out - ref)))
    assert jnp.allclose(out, ref, atol=5e-3, rtol=5e-3), err

    print("KERNEL_OK")
</pallas_src>

<mosaic_0001>
module attributes {stable_mosaic.version = 11 : i64} {
  func.func @kernel(%arg0: i32, %arg1: memref<1x16x6xf32, #tpu.memory_space<vmem>>, %arg2: memref<3x4x6x32xf32, #tpu.memory_space<vmem>>, %arg3: memref<9x4x128x32xf32, #tpu.memory_space<vmem>>, %arg4: memref<12x4x1x32xf32, #tpu.memory_space<vmem>>, %arg5: memref<5x128x128xf32, #tpu.memory_space<vmem>>, %arg6: memref<5x1x128xf32, #tpu.memory_space<vmem>>, %arg7: memref<128x128xf32, #tpu.memory_space<vmem>>, %arg8: memref<1x128xf32, #tpu.memory_space<vmem>>, %arg9: memref<4x32x32xf32, #tpu.memory_space<vmem>>, %arg10: memref<4x32x32xf32, #tpu.memory_space<vmem>>, %arg11: memref<4x1x32xf32, #tpu.memory_space<vmem>>, %arg12: memref<1x1x128xf32, #tpu.memory_space<vmem>>) attributes {dimension_semantics = [#tpu.dimension_semantics<parallel>], iteration_bounds = array<i64: 2>, scalar_prefetch = 0 : i64, scratch_operands = 0 : i64, tpu.core_type = #tpu.core_type<tc>, window_params = [{transform_indices = @transform_0, window_bounds = array<i64: 1, 16, 6>}, {pipeline_mode = #tpu.pipeline_mode<synchronous>, transform_indices = @transform_1, window_bounds = array<i64: 3, 4, 6, 32>}, {pipeline_mode = #tpu.pipeline_mode<synchronous>, transform_indices = @transform_2, window_bounds = array<i64: 9, 4, 128, 32>}, {pipeline_mode = #tpu.pipeline_mode<synchronous>, transform_indices = @transform_3, window_bounds = array<i64: 12, 4, 1, 32>}, {pipeline_mode = #tpu.pipeline_mode<synchronous>, transform_indices = @transform_4, window_bounds = array<i64: 5, 128, 128>}, {pipeline_mode = #tpu.pipeline_mode<synchronous>, transform_indices = @transform_5, window_bounds = array<i64: 5, 1, 128>}, {pipeline_mode = #tpu.pipeline_mode<synchronous>, transform_indices = @transform_6, window_bounds = array<i64: 128, 128>}, {pipeline_mode = #tpu.pipeline_mode<synchronous>, transform_indices = @transform_7, window_bounds = array<i64: 1, 128>}, {pipeline_mode = #tpu.pipeline_mode<synchronous>, transform_indices = @transform_8, window_bounds = array<i64: 4, 32, 32>}, {pipeline_mode = #tpu.pipeline_mode<synchronous>, transform_indices = @transform_9, window_bounds = array<i64: 4, 32, 32>}, {pipeline_mode = #tpu.pipeline_mode<synchronous>, transform_indices = @transform_10, window_bounds = array<i64: 4, 1, 32>}, {transform_indices = @transform_11, window_bounds = array<i64: 1, 1, 128>}]} {
    %c0 = arith.constant 0 : index
    %c0_0 = arith.constant 0 : index
    %c0_1 = arith.constant 0 : index
    %0 = vector.load %arg1[%c0, %c0_0, %c0_1] : memref<1x16x6xf32, #tpu.memory_space<vmem>>, vector<1x16x6xf32>
    %1 = vector.shape_cast %0 : vector<1x16x6xf32> to vector<16x6xf32>
    %c0_2 = arith.constant 0 : index
    %c0_3 = arith.constant 0 : index
    %c0_4 = arith.constant 0 : index
    %2 = vector.load %arg9[%c0_2, %c0_3, %c0_4] : memref<4x32x32xf32, #tpu.memory_space<vmem>>, vector<1x32x32xf32>
    %3 = vector.shape_cast %2 : vector<1x32x32xf32> to vector<32x32xf32>
    %4 = vector.shape_cast %3 : vector<32x32xf32> to vector<1x32x32xf32>
    %c1 = arith.constant 1 : index
    %c0_5 = arith.constant 0 : index
    %c0_6 = arith.constant 0 : index
    %5 = vector.load %arg9[%c1, %c0_5, %c0_6] : memref<4x32x32xf32, #tpu.memory_space<vmem>>, vector<1x32x32xf32>
    %6 = vector.shape_cast %5 : vector<1x32x32xf32> to vector<32x32xf32>
    %7 = vector.shape_cast %6 : vector<32x32xf32> to vector<1x32x32xf32>
    %c2 = arith.constant 2 : index
    %c0_7 = arith.constant 0 : index
    %c0_8 = arith.constant 0 : index
    %8 = vector.load %arg9[%c2, %c0_7, %c0_8] : memref<4x32x32xf32, #tpu.memory_space<vmem>>, vector<1x32x32xf32>
    %9 = vector.shape_cast %8 : vector<1x32x32xf32> to vector<32x32xf32>
    %10 = vector.shape_cast %9 : vector<32x32xf32> to vector<1x32x32xf32>
    %c3 = arith.constant 3 : index
    %c0_9 = arith.constant 0 : index
    %c0_10 = arith.constant 0 : index
    %11 = vector.load %arg9[%c3, %c0_9, %c0_10] : memref<4x32x32xf32, #tpu.memory_space<vmem>>, vector<1x32x32xf32>
    %12 = vector.shape_cast %11 : vector<1x32x32xf32> to vector<32x32xf32>
    %13 = vector.shape_cast %12 : vector<32x32xf32> to vector<1x32x32xf32>
    %c0_11 = arith.constant 0 : index
    %c0_12 = arith.constant 0 : index
    %c0_13 = arith.constant 0 : index
    %c0_14 = arith.constant 0 : index
    %14 = vector.load %arg2[%c0_11, %c0_12, %c0_13, %c0_14] : memref<3x4x6x32xf32, #tpu.memory_space<vmem>>, vector<1x1x6x32xf32>
    %15 = vector.shape_cast %14 : vector<1x1x6x32xf32> to vector<6x32xf32>
    %c0_15 = arith.constant 0 : index
    %c1_16 = arith.constant 1 : index
    %c0_17 = arith.constant 0 : index
    %c0_18 = arith.constant 0 : index
    %16 = vector.load %arg2[%c0_15, %c1_16, %c0_17, %c0_18] : memref<3x4x6x32xf32, #tpu.memory_space<vmem>>, vector<1x1x6x32xf32>
    %17 = vector.shape_cast %16 : vector<1x1x6x32xf32> to vector<6x32xf32>
    %c0_19 = arith.constant 0 : index
    %c2_20 = arith.constant 2 : index
    %c0_21 = arith.constant 0 : index
    %c0_22 = arith.constant 0 : index
    %18 = vector.load %arg2[%c0_19, %c2_20, %c0_21, %c0_22] : memref<3x4x6x32xf32, #tpu.memory_space<vmem>>, vector<1x1x6x32xf32>
    %19 = vector.shape_cast %18 : vector<1x1x6x32xf32> to vector<6x32xf32>
    %c0_23 = arith.constant 0 : index
    %c3_24 = arith.constant 3 : index
    %c0_25 = arith.constant 0 : index
    %c0_26 = arith.constant 0 : index
    %20 = vector.load %arg2[%c0_23, %c3_24, %c0_25, %c0_26] : memref<3x4x6x32xf32, #tpu.memory_space<vmem>>, vector<1x1x6x32xf32>
    %21 = vector.shape_cast %20 : vector<1x1x6x32xf32> to vector<6x32xf32>
    %c0_27 = arith.constant 0 : index
    %c0_28 = arith.constant 0 : index
    %c0_29 = arith.constant 0 : index
    %c0_30 = arith.constant 0 : index
    %22 = vector.load %arg4[%c0_27, %c0_28, %c0_29, %c0_30] : memref<12x4x1x32xf32, #tpu.memory_space<vmem>>, vector<1x1x1x32xf32>
    %23 = vector.shape_cast %22 : vector<1x1x1x32xf32> to vector<1x32xf32>
    %c0_31 = arith.constant 0 : index
    %c1_32 = arith.constant 1 : index
    %c0_33 = arith.constant 0 : index
    %c0_34 = arith.constant 0 : index
    %24 = vector.load %arg4[%c0_31, %c1_32, %c0_33, %c0_34] : memref<12x4x1x32xf32, #tpu.memory_space<vmem>>, vector<1x1x1x32xf32>
    %25 = vector.shape_cast %24 : vector<1x1x1x32xf32> to vector<1x32xf32>
    %c0_35 = arith.constant 0 : index
    %c2_36 = arith.constant 2 : index
    %c0_37 = arith.constant 0 : index
    %c0_38 = arith.constant 0 : index
    %26 = vector.load %arg4[%c0_35, %c2_36, %c0_37, %c0_38] : memref<12x4x1x32xf32, #tpu.memory_space<vmem>>, vector<1x1x1x32xf32>
    %27 = vector.shape_cast %26 : vector<1x1x1x32xf32> to vector<1x32xf32>
    %c0_39 = arith.constant 0 : index
    %c3_40 = arith.constant 3 : index
    %c0_41 = arith.constant 0 : index
    %c0_42 = arith.constant 0 : index
    %28 = vector.load %arg4[%c0_39, %c3_40, %c0_41, %c0_42] : memref<12x4x1x32xf32, #tpu.memory_space<vmem>>, vector<1x1x1x32xf32>
    %29 = vector.shape_cast %28 : vector<1x1x1x32xf32> to vector<1x32xf32>
    %c1_43 = arith.constant 1 : index
    %c0_44 = arith.constant 0 : index
    %c0_45 = arith.constant 0 : index
    %c0_46 = arith.constant 0 : index
    %30 = vector.load %arg2[%c1_43, %c0_44, %c0_45, %c0_46] : memref<3x4x6x32xf32, #tpu.memory_space<vmem>>, vector<1x1x6x32xf32>
    %31 = vector.shape_cast %30 : vector<1x1x6x32xf32> to vector<6x32xf32>
    %c1_47 = arith.constant 1 : index
    %c1_48 = arith.constant 1 : index
    %c0_49 = arith.constant 0 : index
    %c0_50 = arith.constant 0 : index
    %32 = vector.load %arg2[%c1_47, %c1_48, %c0_49, %c0_50] : memref<3x4x6x32xf32, #tpu.memory_space<vmem>>, vector<1x1x6x32xf32>
    %33 = vector.shape_cast %32 : vector<1x1x6x32xf32> to vector<6x32xf32>
    %c1_51 = arith.constant 1 : index
    %c2_52 = arith.constant 2 : index
    %c0_53 = arith.constant 0 : index
    %c0_54 = arith.constant 0 : index
    %34 = vector.load %arg2[%c1_51, %c2_52, %c0_53, %c0_54] : memref<3x4x6x32xf32, #tpu.memory_space<vmem>>, vector<1x1x6x32xf32>
    %35 = vector.shape_cast %34 : vector<1x1x6x32xf32> to vector<6x32xf32>
    %c1_55 = arith.constant 1 : index
    %c3_56 = arith.constant 3 : index
    %c0_57 = arith.constant 0 : index
    %c0_58 = arith.constant 0 : index
    %36 = vector.load %arg2[%c1_55, %c3_56, %c0_57, %c0_58] : memref<3x4x6x32xf32, #tpu.memory_space<vmem>>, vector<1x1x6x32xf32>
    %37 = vector.shape_cast %36 : vector<1x1x6x32xf32> to vector<6x32xf32>
    %c1_59 = arith.constant 1 : index
    %c0_60 = arith.constant 0 : index
    %c0_61 = arith.constant 0 : index
    %c0_62 = arith.constant 0 : index
    %38 = vector.load %arg4[%c1_59, %c0_60, %c0_61, %c0_62] : memref<12x4x1x32xf32, #tpu.memory_space<vmem>>, vector<1x1x1x32xf32>
    %39 = vector.shape_cast %38 : vector<1x1x1x32xf32> to vector<1x32xf32>
    %c1_63 = arith.constant 1 : index
    %c1_64 = arith.constant 1 : index
    %c0_65 = arith.constant 0 : index
    %c0_66 = arith.constant 0 : index
    %40 = vector.load %arg4[%c1_63, %c1_64, %c0_65, %c0_66] : memref<12x4x1x32xf32, #tpu.memory_space<vmem>>, vector<1x1x1x32xf32>
    %41 = vector.shape_cast %40 : vector<1x1x1x32xf32> to vector<1x32xf32>
    %c1_67 = arith.constant 1 : index
    %c2_68 = arith.constant 2 : index
    %c0_69 = arith.constant 0 : index
    %c0_70 = arith.constant 0 : index
    %42 = vector.load %arg4[%c1_67, %c2_68, %c0_69, %c0_70] : memref<12x4x1x32xf32, #tpu.memory_space<vmem>>, vector<1x1x1x32xf32>
    %43 = vector.shape_cast %42 : vector<1x1x1x32xf32> to vector<1x32xf32>
    %c1_71 = arith.constant 1 : index
    %c3_72 = arith.constant 3 : index
    %c0_73 = arith.constant 0 : index
    %c0_74 = arith.constant 0 : index
    %44 = vector.load %arg4[%c1_71, %c3_72, %c0_73, %c0_74] : memref<12x4x1x32xf32, #tpu.memory_space<vmem>>, vector<1x1x1x32xf32>
    %45 = vector.shape_cast %44 : vector<1x1x1x32xf32> to vector<1x32xf32>
    %c0_75 = arith.constant 0 : index
    %c0_76 = arith.constant 0 : index
    %c0_77 = arith.constant 0 : index
    %46 = vector.load %arg5[%c0_75, %c0_76, %c0_77] : memref<5x128x128xf32, #tpu.memory_space<vmem>>, vector<1x128x128xf32>
    %47 = vector.shape_cast %46 : vector<1x128x128xf32> to vector<128x128xf32>
    %c0_78 = arith.constant 0 : index
    %c0_79 = arith.constant 0 : index
    %c0_80 = arith.constant 0 : index
    %48 = vector.load %arg6[%c0_78, %c0_79, %c0_80] : memref<5x1x128xf32, #tpu.memory_space<vmem>>, vector<1x1x128xf32>
    %49 = vector.shape_cast %48 : vector<1x1x128xf32> to vector<1x128xf32>
    %cst = arith.constant dense<0.000000e+00> : vector<16x32xf32>
    %50 = tpu.matmul %1, %15, %cst {dimension_numbers = #tpu.dot_dimension_numbers<[1], [0], [0], [1], [0, 0, 1, 1], [], []>} : vector<16x6xf32>, vector<6x32xf32>, vector<16x32xf32> -> vector<16x32xf32>
    %51 = vector.broadcast %23 : vector<1x32xf32> to vector<16x32xf32>
    %52 = arith.addf %50, %51 : vector<16x32xf32>
    %53 = vector.shape_cast %52 : vector<16x32xf32> to vector<1x16x32xf32>
    %cst_81 = arith.constant dense<0.000000e+00> : vector<16x32xf32>
    %54 = tpu.matmul %1, %31, %cst_81 {dimension_numbers = #tpu.dot_dimension_numbers<[1], [0], [0], [1], [0, 0, 1, 1], [], []>} : vector<16x6xf32>, vector<6x32xf32>, vector<16x32xf32> -> vector<16x32xf32>
    %55 = vector.broadcast %39 : vector<1x32xf32> to vector<16x32xf32>
    %56 = arith.addf %54, %55 : vector<16x32xf32>
    %57 = vector.shape_cast %56 : vector<16x32xf32> to vector<1x16x32xf32>
    "tpu.trace_start"() <{level = 10 : i32, message = "bqe,bke->bqk"}> : () -> ()
    %cst_82 = arith.constant dense<0.000000e+00> : vector<1x32x16xf32>
    %58 = tpu.matmul %4, %53, %cst_82 {dimension_numbers = #tpu.dot_dimension_numbers<[2], [2], [1], [1], [0, 0, 0, 1, 1, 1], [0], [0]>} : vector<1x32x32xf32>, vector<1x16x32xf32>, vector<1x32x16xf32> -> vector<1x32x16xf32>
    "tpu.trace_stop"() : () -> ()
    %cst_83 = arith.constant 0.0883883461 : f32
    %59 = vector.broadcast %cst_83 : f32 to vector<1x32x16xf32>
    %60 = arith.mulf %58, %59 : vector<1x32x16xf32>
    %cst_84 = arith.constant dense<0xFF800000> : vector<1x32xf32>
    %61 = vector.multi_reduction <maximumf>, %60, %cst_84 [2] : vector<1x32x16xf32> to vector<1x32xf32>
    %62 = vector.shape_cast %61 : vector<1x32xf32> to vector<1x32x1xf32>
    %63 = vector.broadcast %62 : vector<1x32x1xf32> to vector<1x32x16xf32>
    %64 = arith.subf %60, %63 : vector<1x32x16xf32>
    %65 = math.exp %64 : vector<1x32x16xf32>
    %cst_85 = arith.constant dense<0.000000e+00> : vector<1x32xf32>
    %66 = vector.multi_reduction <add>, %65, %cst_85 [2] : vector<1x32x16xf32> to vector<1x32xf32>
    %67 = vector.shape_cast %66 : vector<1x32xf32> to vector<1x32x1xf32>
    %68 = tpu.reciprocal %67 {approx = true} : vector<1x32x1xf32> -> vector<1x32x1xf32>
    %69 = vector.broadcast %68 : vector<1x32x1xf32> to vector<1x32x16xf32>
    %70 = arith.mulf %65, %69 : vector<1x32x16xf32>
    "tpu.trace_start"() <{level = 10 : i32, message = "bqk,bke->bqe"}> : () -> ()
    %cst_86 = arith.constant dense<0.000000e+00> : vector<1x32x32xf32>
    %71 = tpu.matmul %70, %57, %cst_86 {dimension_numbers = #tpu.dot_dimension_numbers<[2], [1], [1], [2], [0, 0, 0, 1, 1, 2], [0], [0]>} : vector<1x32x16xf32>, vector<1x16x32xf32>, vector<1x32x32xf32> -> vector<1x32x32xf32>
    "tpu.trace_stop"() : () -> ()
    %72 = arith.addf %4, %71 : vector<1x32x32xf32>
    %cst_87 = arith.constant dense<0.000000e+00> : vector<16x32xf32>
    %73 = tpu.matmul %1, %17, %cst_87 {dimension_numbers = #tpu.dot_dimension_numbers<[1], [0], [0], [1], [0, 0, 1, 1], [], []>} : vector<16x6xf32>, vector<6x32xf32>, vector<16x32xf32> -> vector<16x32xf32>
    %74 = vector.broadcast %25 : vector<1x32xf32> to vector<16x32xf32>
    %75 = arith.addf %73, %74 : vector<16x32xf32>
    %76 = vector.shape_cast %75 : vector<16x32xf32> to vector<1x16x32xf32>
    %cst_88 = arith.constant dense<0.000000e+00> : vector<16x32xf32>
    %77 = tpu.matmul %1, %33, %cst_88 {dimension_numbers = #tpu.dot_dimension_numbers<[1], [0], [0], [1], [0, 0, 1, 1], [], []>} : vector<16x6xf32>, vector<6x32xf32>, vector<16x32xf32> -> vector<16x32xf32>
    %78 = vector.broadcast %41 : vector<1x32xf32> to vector<16x32xf32>
    %79 = arith.addf %77, %78 : vector<16x32xf32>
    %80 = vector.shape_cast %79 : vector<16x32xf32> to vector<1x16x32xf32>
    "tpu.trace_start"() <{level = 10 : i32, message = "bqe,bke->bqk"}> : () -> ()
    %cst_89 = arith.constant dense<0.000000e+00> : vector<1x32x16xf32>
    %81 = tpu.matmul %7, %76, %cst_89 {dimension_numbers = #tpu.dot_dimension_numbers<[2], [2], [1], [1], [0, 0, 0, 1, 1, 1], [0], [0]>} : vector<1x32x32xf32>, vector<1x16x32xf32>, vector<1x32x16xf32> -> vector<1x32x16xf32>
    "tpu.trace_stop"() : () -> ()
    %cst_90 = arith.constant 0.0883883461 : f32
    %82 = vector.broadcast %cst_90 : f32 to vector<1x32x16xf32>
    %83 = arith.mulf %81, %82 : vector<1x32x16xf32>
    %cst_91 = arith.constant dense<0xFF800000> : vector<1x32xf32>
    %84 = vector.multi_reduction <maximumf>, %83, %cst_91 [2] : vector<1x32x16xf32> to vector<1x32xf32>
    %85 = vector.shape_cast %84 : vector<1x32xf32> to vector<1x32x1xf32>
    %86 = vector.broadcast %85 : vector<1x32x1xf32> to vector<1x32x16xf32>
    %87 = arith.subf %83, %86 : vector<1x32x16xf32>
    %88 = math.exp %87 : vector<1x32x16xf32>
    %cst_92 = arith.constant dense<0.000000e+00> : vector<1x32xf32>
    %89 = vector.multi_reduction <add>, %88, %cst_92 [2] : vector<1x32x16xf32> to vector<1x32xf32>
    %90 = vector.shape_cast %89 : vector<1x32xf32> to vector<1x32x1xf32>
    %91 = tpu.reciprocal %90 {approx = true} : vector<1x32x1xf32> -> vector<1x32x1xf32>
    %92 = vector.broadcast %91 : vector<1x32x1xf32> to vector<1x32x16xf32>
    %93 = arith.mulf %88, %92 : vector<1x32x16xf32>
    "tpu.trace_start"() <{level = 10 : i32, message = "bqk,bke->bqe"}> : () -> ()
    %cst_93 = arith.constant dense<0.000000e+00> : vector<1x32x32xf32>
    %94 = tpu.matmul %93, %80, %cst_93 {dimension_numbers = #tpu.dot_dimension_numbers<[2], [1], [1], [2], [0, 0, 0, 1, 1, 2], [0], [0]>} : vector<1x32x16xf32>, vector<1x16x32xf32>, vector<1x32x32xf32> -> vector<1x32x32xf32>
    "tpu.trace_stop"() : () -> ()
    %95 = arith.addf %7, %94 : vector<1x32x32xf32>
    %cst_94 = arith.constant dense<0.000000e+00> : vector<16x32xf32>
    %96 = tpu.matmul %1, %19, %cst_94 {dimension_numbers = #tpu.dot_dimension_numbers<[1], [0], [0], [1], [0, 0, 1, 1], [], []>} : vector<16x6xf32>, vector<6x32xf32>, vector<16x32xf32> -> vector<16x32xf32>
    %97 = vector.broadcast %27 : vector<1x32xf32> to vector<16x32xf32>
    %98 = arith.addf %96, %97 : vector<16x32xf32>
    %99 = vector.shape_cast %98 : vector<16x32xf32> to vector<1x16x32xf32>
    %cst_95 = arith.constant dense<0.000000e+00> : vector<16x32xf32>
    %100 = tpu.matmul %1, %35, %cst_95 {dimension_numbers = #tpu.dot_dimension_numbers<[1], [0], [0], [1], [0, 0, 1, 1], [], []>} : vector<16x6xf32>, vector<6x32xf32>, vector<16x32xf32> -> vector<16x32xf32>
    %101 = vector.broadcast %43 : vector<1x32xf32> to vector<16x32xf32>
    %102 = arith.addf %100, %101 : vector<16x32xf32>
    %103 = vector.shape_cast %102 : vector<16x32xf32> to vector<1x16x32xf32>
    "tpu.trace_start"() <{level = 10 : i32, message = "bqe,bke->bqk"}> : () -> ()
    %cst_96 = arith.constant dense<0.000000e+00> : vector<1x32x16xf32>
    %104 = tpu.matmul %10, %99, %cst_96 {dimension_numbers = #tpu.dot_dimension_numbers<[2], [2], [1], [1], [0, 0, 0, 1, 1, 1], [0], [0]>} : vector<1x32x32xf32>, vector<1x16x32xf32>, vector<1x32x16xf32> -> vector<1x32x16xf32>
    "tpu.trace_stop"() : () -> ()
    %cst_97 = arith.constant 0.0883883461 : f32
    %105 = vector.broadcast %cst_97 : f32 to vector<1x32x16xf32>
    %106 = arith.mulf %104, %105 : vector<1x32x16xf32>
    %cst_98 = arith.constant dense<0xFF800000> : vector<1x32xf32>
    %107 = vector.multi_reduction <maximumf>, %106, %cst_98 [2] : vector<1x32x16xf32> to vector<1x32xf32>
    %108 = vector.shape_cast %107 : vector<1x32xf32> to vector<1x32x1xf32>
    %109 = vector.broadcast %108 : vector<1x32x1xf32> to vector<1x32x16xf32>
    %110 = arith.subf %106, %109 : vector<1x32x16xf32>
    %111 = math.exp %110 : vector<1x32x16xf32>
    %cst_99 = arith.constant dense<0.000000e+00> : vector<1x32xf32>
    %112 = vector.multi_reduction <add>, %111, %cst_99 [2] : vector<1x32x16xf32> to vector<1x32xf32>
    %113 = vector.shape_cast %112 : vector<1x32xf32> to vector<1x32x1xf32>
    %114 = tpu.reciprocal %113 {approx = true} : vector<1x32x1xf32> -> vector<1x32x1xf32>
    %115 = vector.broadcast %114 : vector<1x32x1xf32> to vector<1x32x16xf32>
    %116 = arith.mulf %111, %115 : vector<1x32x16xf32>
    "tpu.trace_start"() <{level = 10 : i32, message = "bqk,bke->bqe"}> : () -> ()
    %cst_100 = arith.constant dense<0.000000e+00> : vector<1x32x32xf32>
    %117 = tpu.matmul %116, %103, %cst_100 {dimension_numbers = #tpu.dot_dimension_numbers<[2], [1], [1], [2], [0, 0, 0, 1, 1, 2], [0], [0]>} : vector<1x32x16xf32>, vector<1x16x32xf32>, vector<1x32x32xf32> -> vector<1x32x32xf32>
    "tpu.trace_stop"() : () -> ()
    %118 = arith.addf %10, %117 : vector<1x32x32xf32>
    %cst_101 = arith.constant dense<0.000000e+00> : vector<16x32xf32>
    %119 = tpu.matmul %1, %21, %cst_101 {dimension_numbers = #tpu.dot_dimension_numbers<[1], [0], [0], [1], [0, 0, 1, 1], [], []>} : vector<16x6xf32>, vector<6x32xf32>, vector<16x32xf32> -> vector<16x32xf32>
    %120 = vector.broadcast %29 : vector<1x32xf32> to vector<16x32xf32>
    %121 = arith.addf %119, %120 : vector<16x32xf32>
    %122 = vector.shape_cast %121 : vector<16x32xf32> to vector<1x16x32xf32>
    %cst_102 = arith.constant dense<0.000000e+00> : vector<16x32xf32>
    %123 = tpu.matmul %1, %37, %cst_102 {dimension_numbers = #tpu.dot_dimension_numbers<[1], [0], [0], [1], [0, 0, 1, 1], [], []>} : vector<16x6xf32>, vector<6x32xf32>, vector<16x32xf32> -> vector<16x32xf32>
    %124 = vector.broadcast %45 : vector<1x32xf32> to vector<16x32xf32>
    %125 = arith.addf %123, %124 : vector<16x32xf32>
    %126 = vector.shape_cast %125 : vector<16x32xf32> to vector<1x16x32xf32>
    "tpu.trace_start"() <{level = 10 : i32, message = "bqe,bke->bqk"}> : () -> ()
    %cst_103 = arith.constant dense<0.000000e+00> : vector<1x32x16xf32>
    %127 = tpu.matmul %13, %122, %cst_103 {dimension_numbers = #tpu.dot_dimension_numbers<[2], [2], [1], [1], [0, 0, 0, 1, 1, 1], [0], [0]>} : vector<1x32x32xf32>, vector<1x16x32xf32>, vector<1x32x16xf32> -> vector<1x32x16xf32>
    "tpu.trace_stop"() : () -> ()
    %cst_104 = arith.constant 0.0883883461 : f32
    %128 = vector.broadcast %cst_104 : f32 to vector<1x32x16xf32>
    %129 = arith.mulf %127, %128 : vector<1x32x16xf32>
    %cst_105 = arith.constant dense<0xFF800000> : vector<1x32xf32>
    %130 = vector.multi_reduction <maximumf>, %129, %cst_105 [2] : vector<1x32x16xf32> to vector<1x32xf32>
    %131 = vector.shape_cast %130 : vector<1x32xf32> to vector<1x32x1xf32>
    %132 = vector.broadcast %131 : vector<1x32x1xf32> to vector<1x32x16xf32>
    %133 = arith.subf %129, %132 : vector<1x32x16xf32>
    %134 = math.exp %133 : vector<1x32x16xf32>
    %cst_106 = arith.constant dense<0.000000e+00> : vector<1x32xf32>
    %135 = vector.multi_reduction <add>, %134, %cst_106 [2] : vector<1x32x16xf32> to vector<1x32xf32>
    %136 = vector.shape_cast %135 : vector<1x32xf32> to vector<1x32x1xf32>
    %137 = tpu.reciprocal %136 {approx = true} : vector<1x32x1xf32> -> vector<1x32x1xf32>
    %138 = vector.broadcast %137 : vector<1x32x1xf32> to vector<1x32x16xf32>
    %139 = arith.mulf %134, %138 : vector<1x32x16xf32>
    "tpu.trace_start"() <{level = 10 : i32, message = "bqk,bke->bqe"}> : () -> ()
    %cst_107 = arith.constant dense<0.000000e+00> : vector<1x32x32xf32>
    %140 = tpu.matmul %139, %126, %cst_107 {dimension_numbers = #tpu.dot_dimension_numbers<[2], [1], [1], [2], [0, 0, 0, 1, 1, 2], [0], [0]>} : vector<1x32x16xf32>, vector<1x16x32xf32>, vector<1x32x32xf32> -> vector<1x32x32xf32>
    "tpu.trace_stop"() : () -> ()
    %141 = arith.addf %13, %140 : vector<1x32x32xf32>
    %142 = tpu.concatenate %72, %95, %118, %141 in 2 : vector<1x32x32xf32>, vector<1x32x32xf32>, vector<1x32x32xf32>, vector<1x32x32xf32> -> vector<1x32x128xf32>
    %143 = vector.shape_cast %142 : vector<1x32x128xf32> to vector<32x128xf32>
    %cst_108 = arith.constant dense<0.000000e+00> : vector<32x128xf32>
    %144 = tpu.matmul %143, %47, %cst_108 {dimension_numbers = #tpu.dot_dimension_numbers<[1], [0], [0], [1], [0, 0, 1, 1], [], []>} : vector<32x128xf32>, vector<128x128xf32>, vector<32x128xf32> -> vector<32x128xf32>
    %145 = vector.broadcast %49 : vector<1x128xf32> to vector<32x128xf32>
    %146 = arith.addf %144, %145 : vector<32x128xf32>
    %cst_109 = arith.constant 0.000000e+00 : f32
    %147 = vector.broadcast %cst_109 : f32 to vector<32x128xf32>
    %148 = arith.maximumf %146, %147 : vector<32x128xf32>
    %149 = arith.addf %143, %148 : vector<32x128xf32>
    %150 = vector.shape_cast %149 : vector<32x128xf32> to vector<1x32x128xf32>
    %151 = vector.shape_cast %150 : vector<1x32x128xf32> to vector<32x128xf32>
    %c2_110 = arith.constant 2 : index
    %c0_111 = arith.constant 0 : index
    %c0_112 = arith.constant 0 : index
    %c0_113 = arith.constant 0 : index
    %152 = vector.load %arg2[%c2_110, %c0_111, %c0_112, %c0_113] : memref<3x4x6x32xf32, #tpu.memory_space<vmem>>, vector<1x1x6x32xf32>
    %153 = vector.shape_cast %152 : vector<1x1x6x32xf32> to vector<6x32xf32>
    %cst_114 = arith.constant dense<0.000000e+00> : vector<16x32xf32>
    %154 = tpu.matmul %1, %153, %cst_114 {dimension_numbers = #tpu.dot_dimension_numbers<[1], [0], [0], [1], [0, 0, 1, 1], [], []>} : vector<16x6xf32>, vector<6x32xf32>, vector<16x32xf32> -> vector<16x32xf32>
    %c2_115 = arith.constant 2 : index
    %c0_116 = arith.constant 0 : index
    %c0_117 = arith.constant 0 : index
    %c0_118 = arith.constant 0 : index
    %155 = vector.load %arg4[%c2_115, %c0_116, %c0_117, %c0_118] : memref<12x4x1x32xf32, #tpu.memory_space<vmem>>, vector<1x1x1x32xf32>
    %156 = vector.shape_cast %155 : vector<1x1x1x32xf32> to vector<1x32xf32>
    %157 = vector.broadcast %156 : vector<1x32xf32> to vector<16x32xf32>
    %158 = arith.addf %154, %157 : vector<16x32xf32>
    %159 = vector.shape_cast %158 : vector<16x32xf32> to vector<1x16x32xf32>
    %c2_119 = arith.constant 2 : index
    %c1_120 = arith.constant 1 : index
    %c0_121 = arith.constant 0 : index
    %c0_122 = arith.constant 0 : index
    %160 = vector.load %arg2[%c2_119, %c1_120, %c0_121, %c0_122] : memref<3x4x6x32xf32, #tpu.memory_space<vmem>>, vector<1x1x6x32xf32>
    %161 = vector.shape_cast %160 : vector<1x1x6x32xf32> to vector<6x32xf32>
    %cst_123 = arith.constant dense<0.000000e+00> : vector<16x32xf32>
    %162 = tpu.matmul %1, %161, %cst_123 {dimension_numbers = #tpu.dot_dimension_numbers<[1], [0], [0], [1], [0, 0, 1, 1], [], []>} : vector<16x6xf32>, vector<6x32xf32>, vector<16x32xf32> -> vector<16x32xf32>
    %c2_124 = arith.constant 2 : index
    %c1_125 = arith.constant 1 : index
    %c0_126 = arith.constant 0 : index
    %c0_127 = arith.constant 0 : index
    %163 = vector.load %arg4[%c2_124, %c1_125, %c0_126, %c0_127] : memref<12x4x1x32xf32, #tpu.memory_space<vmem>>, vector<1x1x1x32xf32>
    %164 = vector.shape_cast %163 : vector<1x1x1x32xf32> to vector<1x32xf32>
    %165 = vector.broadcast %164 : vector<1x32xf32> to vector<16x32xf32>
    %166 = arith.addf %162, %165 : vector<16x32xf32>
    %167 = vector.shape_cast %166 : vector<16x32xf32> to vector<1x16x32xf32>
    %c2_128 = arith.constant 2 : index
    %c2_129 = arith.constant 2 : index
    %c0_130 = arith.constant 0 : index
    %c0_131 = arith.constant 0 : index
    %168 = vector.load %arg2[%c2_128, %c2_129, %c0_130, %c0_131] : memref<3x4x6x32xf32, #tpu.memory_space<vmem>>, vector<1x1x6x32xf32>
    %169 = vector.shape_cast %168 : vector<1x1x6x32xf32> to vector<6x32xf32>
    %cst_132 = arith.constant dense<0.000000e+00> : vector<16x32xf32>
    %170 = tpu.matmul %1, %169, %cst_132 {dimension_numbers = #tpu.dot_dimension_numbers<[1], [0], [0], [1], [0, 0, 1, 1], [], []>} : vector<16x6xf32>, vector<6x32xf32>, vector<16x32xf32> -> vector<16x32xf32>
    %c2_133 = arith.constant 2 : index
    %c2_134 = arith.constant 2 : index
    %c0_135 = arith.constant 0 : index
    %c0_136 = arith.constant 0 : index
    %171 = vector.load %arg4[%c2_133, %c2_134, %c0_135, %c0_136] : memref<12x4x1x32xf32, #tpu.memory_space<vmem>>, vector<1x1x1x32xf32>
    %172 = vector.shape_cast %171 : vector<1x1x1x32xf32> to vector<1x32xf32>
    %173 = vector.broadcast %172 : vector<1x32xf32> to vector<16x32xf32>
    %174 = arith.addf %170, %173 : vector<16x32xf32>
    %175 = vector.shape_cast %174 : vector<16x32xf32> to vector<1x16x32xf32>
    %c2_137 = arith.constant 2 : index
    %c3_138 = arith.constant 3 : index
    %c0_139 = arith.constant 0 : index
    %c0_140 = arith.constant 0 : index
    %176 = vector.load %arg2[%c2_137, %c3_138, %c0_139, %c0_140] : memref<3x4x6x32xf32, #tpu.memory_space<vmem>>, vector<1x1x6x32xf32>
    %177 = vector.shape_cast %176 : vector<1x1x6x32xf32> to vector<6x32xf32>
    %cst_141 = arith.constant dense<0.000000e+00> : vector<16x32xf32>
    %178 = tpu.matmul %1, %177, %cst_141 {dimension_numbers = #tpu.dot_dimension_numbers<[1], [0], [0], [1], [0, 0, 1, 1], [], []>} : vector<16x6xf32>, vector<6x32xf32>, vector<16x32xf32> -> vector<16x32xf32>
    %c2_142 = arith.constant 2 : index
    %c3_143 = arith.constant 3 : index
    %c0_144 = arith.constant 0 : index
    %c0_145 = arith.constant 0 : index
    %179 = vector.load %arg4[%c2_142, %c3_143, %c0_144, %c0_145] : memref<12x4x1x32xf32, #tpu.memory_space<vmem>>, vector<1x1x1x32xf32>
    %180 = vector.shape_cast %179 : vector<1x1x1x32xf32> to vector<1x32xf32>
    %181 = vector.broadcast %180 : vector<1x32xf32> to vector<16x32xf32>
    %182 = arith.addf %178, %181 : vector<16x32xf32>
    %183 = vector.shape_cast %182 : vector<16x32xf32> to vector<1x16x32xf32>
    %c0_146 = arith.constant 0 : index
    %c0_147 = arith.constant 0 : index
    %c0_148 = arith.constant 0 : index
    %c0_149 = arith.constant 0 : index
    %184 = vector.load %arg3[%c0_146, %c0_147, %c0_148, %c0_149] : memref<9x4x128x32xf32, #tpu.memory_space<vmem>>, vector<1x1x128x32xf32>
    %185 = vector.shape_cast %184 : vector<1x1x128x32xf32> to vector<128x32xf32>
    %c0_150 = arith.constant 0 : index
    %c1_151 = arith.constant 1 : index
    %c0_152 = arith.constant 0 : index
    %c0_153 = arith.constant 0 : index
    %186 = vector.load %arg3[%c0_150, %c1_151, %c0_152, %c0_153] : memref<9x4x128x32xf32, #tpu.memory_space<vmem>>, vector<1x1x128x32xf32>
    %187 = vector.shape_cast %186 : vector<1x1x128x32xf32> to vector<128x32xf32>
    %c0_154 = arith.constant 0 : index
    %c2_155 = arith.constant 2 : index
    %c0_156 = arith.constant 0 : index
    %c0_157 = arith.constant 0 : index
    %188 = vector.load %arg3[%c0_154, %c2_155, %c0_156, %c0_157] : memref<9x4x128x32xf32, #tpu.memory_space<vmem>>, vector<1x1x128x32xf32>
    %189 = vector.shape_cast %188 : vector<1x1x128x32xf32> to vector<128x32xf32>
    %c0_158 = arith.constant 0 : index
    %c3_159 = arith.constant 3 : index
    %c0_160 = arith.constant 0 : index
    %c0_161 = arith.constant 0 : index
    %190 = vector.load %arg3[%c0_158, %c3_159, %c0_160, %c0_161] : memref<9x4x128x32xf32, #tpu.memory_space<vmem>>, vector<1x1x128x32xf32>
    %191 = vector.shape_cast %190 : vector<1x1x128x32xf32> to vector<128x32xf32>
    %c3_162 = arith.constant 3 : index
    %c0_163 = arith.constant 0 : index
    %c0_164 = arith.constant 0 : index
    %c0_165 = arith.constant 0 : index
    %192 = vector.load %arg4[%c3_162, %c0_163, %c0_164, %c0_165] : memref<12x4x1x32xf32, #tpu.memory_space<vmem>>, vector<1x1x1x32xf32>
    %193 = vector.shape_cast %192 : vector<1x1x1x32xf32> to vector<1x32xf32>
    %c3_166 = arith.constant 3 : index
    %c1_167 = arith.constant 1 : index
    %c0_168 = arith.constant 0 : index
    %c0_169 = arith.constant 0 : index
    %194 = vector.load %arg4[%c3_166, %c1_167, %c0_168, %c0_169] : memref<12x4x1x32xf32, #tpu.memory_space<vmem>>, vector<1x1x1x32xf32>
    %195 = vector.shape_cast %194 : vector<1x1x1x32xf32> to vector<1x32xf32>
    %c3_170 = arith.constant 3 : index
    %c2_171 = arith.constant 2 : index
    %c0_172 = arith.constant 0 : index
    %c0_173 = arith.constant 0 : index
    %196 = vector.load %arg4[%c3_170, %c2_171, %c0_172, %c0_173] : memref<12x4x1x32xf32, #tpu.memory_space<vmem>>, vector<1x1x1x32xf32>
    %197 = vector.shape_cast %196 : vector<1x1x1x32xf32> to vector<1x32xf32>
    %c3_174 = arith.constant 3 : index
    %c3_175 = arith.constant 3 : index
    %c0_176 = arith.constant 0 : index
    %c0_177 = arith.constant 0 : index
    %198 = vector.load %arg4[%c3_174, %c3_175, %c0_176, %c0_177] : memref<12x4x1x32xf32, #tpu.memory_space<vmem>>, vector<1x1x1x32xf32>
    %199 = vector.shape_cast %198 : vector<1x1x1x32xf32> to vector<1x32xf32>
    %c1_178 = arith.constant 1 : index
    %c0_179 = arith.constant 0 : index
    %c0_180 = arith.constant 0 : index
    %c0_181 = arith.constant 0 : index
    %200 = vector.load %arg3[%c1_178, %c0_179, %c0_180, %c0_181] : memref<9x4x128x32xf32, #tpu.memory_space<vmem>>, vector<1x1x128x32xf32>
    %201 = vector.shape_cast %200 : vector<1x1x128x32xf32> to vector<128x32xf32>
    %c1_182 = arith.constant 1 : index
    %c1_183 = arith.constant 1 : index
    %c0_184 = arith.constant 0 : index
    %c0_185 = arith.constant 0 : index
    %202 = vector.load %arg3[%c1_182, %c1_183, %c0_184, %c0_185] : memref<9x4x128x32xf32, #tpu.memory_space<vmem>>, vector<1x1x128x32xf32>
    %203 = vector.shape_cast %202 : vector<1x1x128x32xf32> to vector<128x32xf32>
    %c1_186 = arith.constant 1 : index
    %c2_187 = arith.constant 2 : index
    %c0_188 = arith.constant 0 : index
    %c0_189 = arith.constant 0 : index
    %204 = vector.load %arg3[%c1_186, %c2_187, %c0_188, %c0_189] : memref<9x4x128x32xf32, #tpu.memory_space<vmem>>, vector<1x1x128x32xf32>
    %205 = vector.shape_cast %204 : vector<1x1x128x32xf32> to vector<128x32xf32>
    %c1_190 = arith.constant 1 : index
    %c3_191 = arith.constant 3 : index
    %c0_192 = arith.constant 0 : index
    %c0_193 = arith.constant 0 : index
    %206 = vector.load %arg3[%c1_190, %c3_191, %c0_192, %c0_193] : memref<9x4x128x32xf32, #tpu.memory_space<vmem>>, vector<1x1x128x32xf32>
    %207 = vector.shape_cast %206 : vector<1x1x128x32xf32> to vector<128x32xf32>
    %c4 = arith.constant 4 : index
    %c0_194 = arith.constant 0 : index
    %c0_195 = arith.constant 0 : index
    %c0_196 = arith.constant 0 : index
    %208 = vector.load %arg4[%c4, %c0_194, %c0_195, %c0_196] : memref<12x4x1x32xf32, #tpu.memory_space<vmem>>, vector<1x1x1x32xf32>
    %209 = vector.shape_cast %208 : vector<1x1x1x32xf32> to vector<1x32xf32>
    %c4_197 = arith.constant 4 : index
    %c1_198 = arith.constant 1 : index
    %c0_199 = arith.constant 0 : index
    %c0_200 = arith.constant 0 : index
    %210 = vector.load %arg4[%c4_197, %c1_198, %c0_199, %c0_200] : memref<12x4x1x32xf32, #tpu.memory_space<vmem>>, vector<1x1x1x32xf32>
    %211 = vector.shape_cast %210 : vector<1x1x1x32xf32> to vector<1x32xf32>
    %c4_201 = arith.constant 4 : index
    %c2_202 = arith.constant 2 : index
    %c0_203 = arith.constant 0 : index
    %c0_204 = arith.constant 0 : index
    %212 = vector.load %arg4[%c4_201, %c2_202, %c0_203, %c0_204] : memref<12x4x1x32xf32, #tpu.memory_space<vmem>>, vector<1x1x1x32xf32>
    %213 = vector.shape_cast %212 : vector<1x1x1x32xf32> to vector<1x32xf32>
    %c4_205 = arith.constant 4 : index
    %c3_206 = arith.constant 3 : index
    %c0_207 = arith.constant 0 : index
    %c0_208 = arith.constant 0 : index
    %214 = vector.load %arg4[%c4_205, %c3_206, %c0_207, %c0_208] : memref<12x4x1x32xf32, #tpu.memory_space<vmem>>, vector<1x1x1x32xf32>
    %215 = vector.shape_cast %214 : vector<1x1x1x32xf32> to vector<1x32xf32>
    %c1_209 = arith.constant 1 : index
    %c0_210 = arith.constant 0 : index
    %c0_211 = arith.constant 0 : index
    %216 = vector.load %arg5[%c1_209, %c0_210, %c0_211] : memref<5x128x128xf32, #tpu.memory_space<vmem>>, vector<1x128x128xf32>
    %217 = vector.shape_cast %216 : vector<1x128x128xf32> to vector<128x128xf32>
    %c1_212 = arith.constant 1 : index
    %c0_213 = arith.constant 0 : index
    %c0_214 = arith.constant 0 : index
    %218 = vector.load %arg6[%c1_212, %c0_213, %c0_214] : memref<5x1x128xf32, #tpu.memory_space<vmem>>, vector<1x1x128xf32>
    %219 = vector.shape_cast %218 : vector<1x1x128xf32> to vector<1x128xf32>
    %cst_215 = arith.constant dense<0.000000e+00> : vector<32x32xf32>
    %220 = tpu.matmul %151, %185, %cst_215 {dimension_numbers = #tpu.dot_dimension_numbers<[1], [0], [0], [1], [0, 0, 1, 1], [], []>} : vector<32x128xf32>, vector<128x32xf32>, vector<32x32xf32> -> vector<32x32xf32>
    %221 = vector.broadcast %193 : vector<1x32xf32> to vector<32x32xf32>
    %222 = arith.addf %220, %221 : vector<32x32xf32>
    %223 = vector.shape_cast %222 : vector<32x32xf32> to vector<1x32x32xf32>
    %cst_216 = arith.constant dense<0.000000e+00> : vector<32x32xf32>
    %224 = tpu.matmul %151, %201, %cst_216 {dimension_numbers = #tpu.dot_dimension_numbers<[1], [0], [0], [1], [0, 0, 1, 1], [], []>} : vector<32x128xf32>, vector<128x32xf32>, vector<32x32xf32> -> vector<32x32xf32>
    %225 = vector.broadcast %209 : vector<1x32xf32> to vector<32x32xf32>
    %226 = arith.addf %224, %225 : vector<32x32xf32>
    %227 = vector.shape_cast %226 : vector<32x32xf32> to vector<1x32x32xf32>
    "tpu.trace_start"() <{level = 10 : i32, message = "bqe,bke->bqk"}> : () -> ()
    %cst_217 = arith.constant dense<0.000000e+00> : vector<1x16x32xf32>
    %228 = tpu.matmul %159, %223, %cst_217 {dimension_numbers = #tpu.dot_dimension_numbers<[2], [2], [1], [1], [0, 0, 0, 1, 1, 1], [0], [0]>} : vector<1x16x32xf32>, vector<1x32x32xf32>, vector<1x16x32xf32> -> vector<1x16x32xf32>
    "tpu.trace_stop"() : () -> ()
    %cst_218 = arith.constant 0.0883883461 : f32
    %229 = vector.broadcast %cst_218 : f32 to vector<1x16x32xf32>
    %230 = arith.mulf %228, %229 : vector<1x16x32xf32>
    %cst_219 = arith.constant dense<0xFF800000> : vector<1x16xf32>
    %231 = vector.multi_reduction <maximumf>, %230, %cst_219 [2] : vector<1x16x32xf32> to vector<1x16xf32>
    %232 = vector.shape_cast %231 : vector<1x16xf32> to vector<1x16x1xf32>
    %233 = vector.broadcast %232 : vector<1x16x1xf32> to vector<1x16x32xf32>
    %234 = arith.subf %230, %233 : vector<1x16x32xf32>
    %235 = math.exp %234 : vector<1x16x32xf32>
    %cst_220 = arith.constant dense<0.000000e+00> : vector<1x16xf32>
    %236 = vector.multi_reduction <add>, %235, %cst_220 [2] : vector<1x16x32xf32> to vector<1x16xf32>
    %237 = vector.shape_cast %236 : vector<1x16xf32> to vector<1x16x1xf32>
    %238 = tpu.reciprocal %237 {approx = true} : vector<1x16x1xf32> -> vector<1x16x1xf32>
    %239 = vector.broadcast %238 : vector<1x16x1xf32> to vector<1x16x32xf32>
    %240 = arith.mulf %235, %239 : vector<1x16x32xf32>
    "tpu.trace_start"() <{level = 10 : i32, message = "bqk,bke->bqe"}> : () -> ()
    %cst_221 = arith.constant dense<0.000000e+00> : vector<1x16x32xf32>
    %241 = tpu.matmul %240, %227, %cst_221 {dimension_numbers = #tpu.dot_dimension_numbers<[2], [1], [1], [2], [0, 0, 0, 1, 1, 2], [0], [0]>} : vector<1x16x32xf32>, vector<1x32x32xf32>, vector<1x16x32xf32> -> vector<1x16x32xf32>
    "tpu.trace_stop"() : () -> ()
    %242 = arith.addf %159, %241 : vector<1x16x32xf32>
    %cst_222 = arith.constant dense<0.000000e+00> : vector<32x32xf32>
    %243 = tpu.matmul %151, %187, %cst_222 {dimension_numbers = #tpu.dot_dimension_numbers<[1], [0], [0], [1], [0, 0, 1, 1], [], []>} : vector<32x128xf32>, vector<128x32xf32>, vector<32x32xf32> -> vector<32x32xf32>
    %244 = vector.broadcast %195 : vector<1x32xf32> to vector<32x32xf32>
    %245 = arith.addf %243, %244 : vector<32x32xf32>
    %246 = vector.shape_cast %245 : vector<32x32xf32> to vector<1x32x32xf32>
    %cst_223 = arith.constant dense<0.000000e+00> : vector<32x32xf32>
    %247 = tpu.matmul %151, %203, %cst_223 {dimension_numbers = #tpu.dot_dimension_numbers<[1], [0], [0], [1], [0, 0, 1, 1], [], []>} : vector<32x128xf32>, vector<128x32xf32>, vector<32x32xf32> -> vector<32x32xf32>
    %248 = vector.broadcast %211 : vector<1x32xf32> to vector<32x32xf32>
    %249 = arith.addf %247, %248 : vector<32x32xf32>
    %250 = vector.shape_cast %249 : vector<32x32xf32> to vector<1x32x32xf32>
    "tpu.trace_start"() <{level = 10 : i32, message = "bqe,bke->bqk"}> : () -> ()
    %cst_224 = arith.constant dense<0.000000e+00> : vector<1x16x32xf32>
    %251 = tpu.matmul %167, %246, %cst_224 {dimension_numbers = #tpu.dot_dimension_numbers<[2], [2], [1], [1], [0, 0, 0, 1, 1, 1], [0], [0]>} : vector<1x16x32xf32>, vector<1x32x32xf32>, vector<1x16x32xf32> -> vector<1x16x32xf32>
    "tpu.trace_stop"() : () -> ()
    %cst_225 = arith.constant 0.0883883461 : f32
    %252 = vector.broadcast %cst_225 : f32 to vector<1x16x32xf32>
    %253 = arith.mulf %251, %252 : vector<1x16x32xf32>
    %cst_226 = arith.constant dense<0xFF800000> : vector<1x16xf32>
    %254 = vector.multi_reduction <maximumf>, %253, %cst_226 [2] : vector<1x16x32xf32> to vector<1x16xf32>
    %255 = vector.shape_cast %254 : vector<1x16xf32> to vector<1x16x1xf32>
    %256 = vector.broadcast %255 : vector<1x16x1xf32> to vector<1x16x32xf32>
    %257 = arith.subf %253, %256 : vector<1x16x32xf32>
    %258 = math.exp %257 : vector<1x16x32xf32>
    %cst_227 = arith.constant dense<0.000000e+00> : vector<1x16xf32>
    %259 = vector.multi_reduction <add>, %258, %cst_227 [2] : vector<1x16x32xf32> to vector<1x16xf32>
    %260 = vector.shape_cast %259 : vector<1x16xf32> to vector<1x16x1xf32>
    %261 = tpu.reciprocal %260 {approx = true} : vector<1x16x1xf32> -> vector<1x16x1xf32>
    %262 = vector.broadcast %261 : vector<1x16x1xf32> to vector<1x16x32xf32>
    %263 = arith.mulf %258, %262 : vector<1x16x32xf32>
    "tpu.trace_start"() <{level = 10 : i32, message = "bqk,bke->bqe"}> : () -> ()
    %cst_228 = arith.constant dense<0.000000e+00> : vector<1x16x32xf32>
    %264 = tpu.matmul %263, %250, %cst_228 {dimension_numbers = #tpu.dot_dimension_numbers<[2], [1], [1], [2], [0, 0, 0, 1, 1, 2], [0], [0]>} : vector<1x16x32xf32>, vector<1x32x32xf32>, vector<1x16x32xf32> -> vector<1x16x32xf32>
    "tpu.trace_stop"() : () -> ()
    %265 = arith.addf %167, %264 : vector<1x16x32xf32>
    %cst_229 = arith.constant dense<0.000000e+00> : vector<32x32xf32>
    %266 = tpu.matmul %151, %189, %cst_229 {dimension_numbers = #tpu.dot_dimension_numbers<[1], [0], [0], [1], [0, 0, 1, 1], [], []>} : vector<32x128xf32>, vector<128x32xf32>, vector<32x32xf32> -> vector<32x32xf32>
    %267 = vector.broadcast %197 : vector<1x32xf32> to vector<32x32xf32>
    %268 = arith.addf %266, %267 : vector<32x32xf32>
    %269 = vector.shape_cast %268 : vector<32x32xf32> to vector<1x32x32xf32>
    %cst_230 = arith.constant dense<0.000000e+00> : vector<32x32xf32>
    %270 = tpu.matmul %151, %205, %cst_230 {dimension_numbers = #tpu.dot_dimension_numbers<[1], [0], [0], [1], [0, 0, 1, 1], [], []>} : vector<32x128xf32>, vector<128x32xf32>, vector<32x32xf32> -> vector<32x32xf32>
    %271 = vector.broadcast %213 : vector<1x32xf32> to vector<32x32xf32>
    %272 = arith.addf %270, %271 : vector<32x32xf32>
    %273 = vector.shape_cast %272 : vector<32x32xf32> to vector<1x32x32xf32>
    "tpu.trace_start"() <{level = 10 : i32, message = "bqe,bke->bqk"}> : () -> ()
    %cst_231 = arith.constant dense<0.000000e+00> : vector<1x16x32xf32>
    %274 = tpu.matmul %175, %269, %cst_231 {dimension_numbers = #tpu.dot_dimension_numbers<[2], [2], [1], [1], [0, 0, 0, 1, 1, 1], [0], [0]>} : vector<1x16x32xf32>, vector<1x32x32xf32>, vector<1x16x32xf32> -> vector<1x16x32xf32>
    "tpu.trace_stop"() : () -> ()
    %cst_232 = arith.constant 0.0883883461 : f32
    %275 = vector.broadcast %cst_232 : f32 to vector<1x16x32xf32>
    %276 = arith.mulf %274, %275 : vector<1x16x32xf32>
    %cst_233 = arith.constant dense<0xFF800000> : vector<1x16xf32>
    %277 = vector.multi_reduction <maximumf>, %276, %cst_233 [2] : vector<1x16x32xf32> to vector<1x16xf32>
    %278 = vector.shape_cast %277 : vector<1x16xf32> to vector<1x16x1xf32>
    %279 = vector.broadcast %278 : vector<1x16x1xf32> to vector<1x16x32xf32>
    %280 = arith.subf %276, %279 : vector<1x16x32xf32>
    %281 = math.exp %280 : vector<1x16x32xf32>
    %cst_234 = arith.constant dense<0.000000e+00> : vector<1x16xf32>
    %282 = vector.multi_reduction <add>, %281, %cst_234 [2] : vector<1x16x32xf32> to vector<1x16xf32>
    %283 = vector.shape_cast %282 : vector<1x16xf32> to vector<1x16x1xf32>
    %284 = tpu.reciprocal %283 {approx = true} : vector<1x16x1xf32> -> vector<1x16x1xf32>
    %285 = vector.broadcast %284 : vector<1x16x1xf32> to vector<1x16x32xf32>
    %286 = arith.mulf %281, %285 : vector<1x16x32xf32>
    "tpu.trace_start"() <{level = 10 : i32, message = "bqk,bke->bqe"}> : () -> ()
    %cst_235 = arith.constant dense<0.000000e+00> : vector<1x16x32xf32>
    %287 = tpu.matmul %286, %273, %cst_235 {dimension_numbers = #tpu.dot_dimension_numbers<[2], [1], [1], [2], [0, 0, 0, 1, 1, 2], [0], [0]>} : vector<1x16x32xf32>, vector<1x32x32xf32>, vector<1x16x32xf32> -> vector<1x16x32xf32>
    "tpu.trace_stop"() : () -> ()
    %288 = arith.addf %175, %287 : vector<1x16x32xf32>
    %cst_236 = arith.constant dense<0.000000e+00> : vector<32x32xf32>
    %289 = tpu.matmul %151, %191, %cst_236 {dimension_numbers = #tpu.dot_dimension_numbers<[1], [0], [0], [1], [0, 0, 1, 1], [], []>} : vector<32x128xf32>, vector<128x32xf32>, vector<32x32xf32> -> vector<32x32xf32>
    %290 = vector.broadcast %199 : vector<1x32xf32> to vector<32x32xf32>
    %291 = arith.addf %289, %290 : vector<32x32xf32>
    %292 = vector.shape_cast %291 : vector<32x32xf32> to vector<1x32x32xf32>
    %cst_237 = arith.constant dense<0.000000e+00> : vector<32x32xf32>
    %293 = tpu.matmul %151, %207, %cst_237 {dimension_numbers = #tpu.dot_dimension_numbers<[1], [0], [0], [1], [0, 0, 1, 1], [], []>} : vector<32x128xf32>, vector<128x32xf32>, vector<32x32xf32> -> vector<32x32xf32>
    %294 = vector.broadcast %215 : vector<1x32xf32> to vector<32x32xf32>
    %295 = arith.addf %293, %294 : vector<32x32xf32>
    %296 = vector.shape_cast %295 : vector<32x32xf32> to vector<1x32x32xf32>
    "tpu.trace_start"() <{level = 10 : i32, message = "bqe,bke->bqk"}> : () -> ()
    %cst_238 = arith.constant dense<0.000000e+00> : vector<1x16x32xf32>
    %297 = tpu.matmul %183, %292, %cst_238 {dimension_numbers = #tpu.dot_dimension_numbers<[2], [2], [1], [1], [0, 0, 0, 1, 1, 1], [0], [0]>} : vector<1x16x32xf32>, vector<1x32x32xf32>, vector<1x16x32xf32> -> vector<1x16x32xf32>
    "tpu.trace_stop"() : () -> ()
    %cst_239 = arith.constant 0.0883883461 : f32
    %298 = vector.broadcast %cst_239 : f32 to vector<1x16x32xf32>
    %299 = arith.mulf %297, %298 : vector<1x16x32xf32>
    %cst_240 = arith.constant dense<0xFF800000> : vector<1x16xf32>
    %300 = vector.multi_reduction <maximumf>, %299, %cst_240 [2] : vector<1x16x32xf32> to vector<1x16xf32>
    %301 = vector.shape_cast %300 : vector<1x16xf32> to vector<1x16x1xf32>
    %302 = vector.broadcast %301 : vector<1x16x1xf32> to vector<1x16x32xf32>
    %303 = arith.subf %299, %302 : vector<1x16x32xf32>
    %304 = math.exp %303 : vector<1x16x32xf32>
    %cst_241 = arith.constant dense<0.000000e+00> : vector<1x16xf32>
    %305 = vector.multi_reduction <add>, %304, %cst_241 [2] : vector<1x16x32xf32> to vector<1x16xf32>
    %306 = vector.shape_cast %305 : vector<1x16xf32> to vector<1x16x1xf32>
    %307 = tpu.reciprocal %306 {approx = true} : vector<1x16x1xf32> -> vector<1x16x1xf32>
    %308 = vector.broadcast %307 : vector<1x16x1xf32> to vector<1x16x32xf32>
    %309 = arith.mulf %304, %308 : vector<1x16x32xf32>
    "tpu.trace_start"() <{level = 10 : i32, message = "bqk,bke->bqe"}> : () -> ()
    %cst_242 = arith.constant dense<0.000000e+00> : vector<1x16x32xf32>
    %310 = tpu.matmul %309, %296, %cst_242 {dimension_numbers = #tpu.dot_dimension_numbers<[2], [1], [1], [2], [0, 0, 0, 1, 1, 2], [0], [0]>} : vector<1x16x32xf32>, vector<1x32x32xf32>, vector<1x16x32xf32> -> vector<1x16x32xf32>
    "tpu.trace_stop"() : () -> ()
    %311 = arith.addf %183, %310 : vector<1x16x32xf32>
    %312 = tpu.concatenate %242, %265, %288, %311 in 2 : vector<1x16x32xf32>, vector<1x16x32xf32>, vector<1x16x32xf32>, vector<1x16x32xf32> -> vector<1x16x128xf32>
    %313 = vector.shape_cast %312 : vector<1x16x128xf32> to vector<16x128xf32>
    %cst_243 = arith.constant dense<0.000000e+00> : vector<16x128xf32>
    %314 = tpu.matmul %313, %217, %cst_243 {dimension_numbers = #tpu.dot_dimension_numbers<[1], [0], [0], [1], [0, 0, 1, 1], [], []>} : vector<16x128xf32>, vector<128x128xf32>, vector<16x128xf32> -> vector<16x128xf32>
    %315 = vector.broadcast %219 : vector<1x128xf32> to vector<16x128xf32>
    %316 = arith.addf %314, %315 : vector<16x128xf32>
    %cst_244 = arith.constant 0.000000e+00 : f32
    %317 = vector.broadcast %cst_244 : f32 to vector<16x128xf32>
    %318 = arith.maximumf %316, %317 : vector<16x128xf32>
    %319 = arith.addf %313, %318 : vector<16x128xf32>
    %320 = vector.shape_cast %319 : vector<16x128xf32> to vector<1x16x128xf32>
    %321 = vector.shape_cast %320 : vector<1x16x128xf32> to vector<16x128xf32>
    %c0_245 = arith.constant 0 : index
    %c0_246 = arith.constant 0 : index
    %c0_247 = arith.constant 0 : index
    %322 = vector.load %arg10[%c0_245, %c0_246, %c0_247] : memref<4x32x32xf32, #tpu.memory_space<vmem>>, vector<1x32x32xf32>
    %323 = vector.shape_cast %322 : vector<1x32x32xf32> to vector<32x32xf32>
    %324 = vector.shape_cast %323 : vector<32x32xf32> to vector<1x32x32xf32>
    %c1_248 = arith.constant 1 : index
    %c0_249 = arith.constant 0 : index
    %c0_250 = arith.constant 0 : index
    %325 = vector.load %arg10[%c1_248, %c0_249, %c0_250] : memref<4x32x32xf32, #tpu.memory_space<vmem>>, vector<1x32x32xf32>
    %326 = vector.shape_cast %325 : vector<1x32x32xf32> to vector<32x32xf32>
    %327 = vector.shape_cast %326 : vector<32x32xf32> to vector<1x32x32xf32>
    %c2_251 = arith.constant 2 : index
    %c0_252 = arith.constant 0 : index
    %c0_253 = arith.constant 0 : index
    %328 = vector.load %arg10[%c2_251, %c0_252, %c0_253] : memref<4x32x32xf32, #tpu.memory_space<vmem>>, vector<1x32x32xf32>
    %329 = vector.shape_cast %328 : vector<1x32x32xf32> to vector<32x32xf32>
    %330 = vector.shape_cast %329 : vector<32x32xf32> to vector<1x32x32xf32>
    %c3_254 = arith.constant 3 : index
    %c0_255 = arith.constant 0 : index
    %c0_256 = arith.constant 0 : index
    %331 = vector.load %arg10[%c3_254, %c0_255, %c0_256] : memref<4x32x32xf32, #tpu.memory_space<vmem>>, vector<1x32x32xf32>
    %332 = vector.shape_cast %331 : vector<1x32x32xf32> to vector<32x32xf32>
    %333 = vector.shape_cast %332 : vector<32x32xf32> to vector<1x32x32xf32>
    %c2_257 = arith.constant 2 : index
    %c0_258 = arith.constant 0 : index
    %c0_259 = arith.constant 0 : index
    %c0_260 = arith.constant 0 : index
    %334 = vector.load %arg3[%c2_257, %c0_258, %c0_259, %c0_260] : memref<9x4x128x32xf32, #tpu.memory_space<vmem>>, vector<1x1x128x32xf32>
    %335 = vector.shape_cast %334 : vector<1x1x128x32xf32> to vector<128x32xf32>
    %c2_261 = arith.constant 2 : index
    %c1_262 = arith.constant 1 : index
    %c0_263 = arith.constant 0 : index
    %c0_264 = arith.constant 0 : index
    %336 = vector.load %arg3[%c2_261, %c1_262, %c0_263, %c0_264] : memref<9x4x128x32xf32, #tpu.memory_space<vmem>>, vector<1x1x128x32xf32>
    %337 = vector.shape_cast %336 : vector<1x1x128x32xf32> to vector<128x32xf32>
    %c2_265 = arith.constant 2 : index
    %c2_266 = arith.constant 2 : index
    %c0_267 = arith.constant 0 : index
    %c0_268 = arith.constant 0 : index
    %338 = vector.load %arg3[%c2_265, %c2_266, %c0_267, %c0_268] : memref<9x4x128x32xf32, #tpu.memory_space<vmem>>, vector<1x1x128x32xf32>
    %339 = vector.shape_cast %338 : vector<1x1x128x32xf32> to vector<128x32xf32>
    %c2_269 = arith.constant 2 : index
    %c3_270 = arith.constant 3 : index
    %c0_271 = arith.constant 0 : index
    %c0_272 = arith.constant 0 : index
    %340 = vector.load %arg3[%c2_269, %c3_270, %c0_271, %c0_272] : memref<9x4x128x32xf32, #tpu.memory_space<vmem>>, vector<1x1x128x32xf32>
    %341 = vector.shape_cast %340 : vector<1x1x128x32xf32> to vector<128x32xf32>
    %c5 = arith.constant 5 : index
    %c0_273 = arith.constant 0 : index
    %c0_274 = arith.constant 0 : index
    %c0_275 = arith.constant 0 : index
    %342 = vector.load %arg4[%c5, %c0_273, %c0_274, %c0_275] : memref<12x4x1x32xf32, #tpu.memory_space<vmem>>, vector<1x1x1x32xf32>
    %343 = vector.shape_cast %342 : vector<1x1x1x32xf32> to vector<1x32xf32>
    %c5_276 = arith.constant 5 : index
    %c1_277 = arith.constant 1 : index
    %c0_278 = arith.constant 0 : index
    %c0_279 = arith.constant 0 : index
    %344 = vector.load %arg4[%c5_276, %c1_277, %c0_278, %c0_279] : memref<12x4x1x32xf32, #tpu.memory_space<vmem>>, vector<1x1x1x32xf32>
    %345 = vector.shape_cast %344 : vector<1x1x1x32xf32> to vector<1x32xf32>
    %c5_280 = arith.constant 5 : index
    %c2_281 = arith.constant 2 : index
    %c0_282 = arith.constant 0 : index
    %c0_283 = arith.constant 0 : index
    %346 = vector.load %arg4[%c5_280, %c2_281, %c0_282, %c0_283] : memref<12x4x1x32xf32, #tpu.memory_space<vmem>>, vector<1x1x1x32xf32>
    %347 = vector.shape_cast %346 : vector<1x1x1x32xf32> to vector<1x32xf32>
    %c5_284 = arith.constant 5 : index
    %c3_285 = arith.constant 3 : index
    %c0_286 = arith.constant 0 : index
    %c0_287 = arith.constant 0 : index
    %348 = vector.load %arg4[%c5_284, %c3_285, %c0_286, %c0_287] : memref<12x4x1x32xf32, #tpu.memory_space<vmem>>, vector<1x1x1x32xf32>
    %349 = vector.shape_cast %348 : vector<1x1x1x32xf32> to vector<1x32xf32>
    %c3_288 = arith.constant 3 : index
    %c0_289 = arith.constant 0 : index
    %c0_290 = arith.constant 0 : index
    %c0_291 = arith.constant 0 : index
    %350 = vector.load %arg3[%c3_288, %c0_289, %c0_290, %c0_291] : memref<9x4x128x32xf32, #tpu.memory_space<vmem>>, vector<1x1x128x32xf32>
    %351 = vector.shape_cast %350 : vector<1x1x128x32xf32> to vector<128x32xf32>
    %c3_292 = arith.constant 3 : index
    %c1_293 = arith.constant 1 : index
    %c0_294 = arith.constant 0 : index
    %c0_295 = arith.constant 0 : index
    %352 = vector.load %arg3[%c3_292, %c1_293, %c0_294, %c0_295] : memref<9x4x128x32xf32, #tpu.memory_space<vmem>>, vector<1x1x128x32xf32>
    %353 = vector.shape_cast %352 : vector<1x1x128x32xf32> to vector<128x32xf32>
    %c3_296 = arith.constant 3 : index
    %c2_297 = arith.constant 2 : index
    %c0_298 = arith.constant 0 : index
    %c0_299 = arith.constant 0 : index
    %354 = vector.load %arg3[%c3_296, %c2_297, %c0_298, %c0_299] : memref<9x4x128x32xf32, #tpu.memory_space<vmem>>, vector<1x1x128x32xf32>
    %355 = vector.shape_cast %354 : vector<1x1x128x32xf32> to vector<128x32xf32>
    %c3_300 = arith.constant 3 : index
    %c3_301 = arith.constant 3 : index
    %c0_302 = arith.constant 0 : index
    %c0_303 = arith.constant 0 : index
    %356 = vector.load %arg3[%c3_300, %c3_301, %c0_302, %c0_303] : memref<9x4x128x32xf32, #tpu.memory_space<vmem>>, vector<1x1x128x32xf32>
    %357 = vector.shape_cast %356 : vector<1x1x128x32xf32> to vector<128x32xf32>
    %c6 = arith.constant 6 : index
    %c0_304 = arith.constant 0 : index
    %c0_305 = arith.constant 0 : index
    %c0_306 = arith.constant 0 : index
    %358 = vector.load %arg4[%c6, %c0_304, %c0_305, %c0_306] : memref<12x4x1x32xf32, #tpu.memory_space<vmem>>, vector<1x1x1x32xf32>
    %359 = vector.shape_cast %358 : vector<1x1x1x32xf32> to vector<1x32xf32>
    %c6_307 = arith.constant 6 : index
    %c1_308 = arith.constant 1 : index
    %c0_309 = arith.constant 0 : index
    %c0_310 = arith.constant 0 : index
    %360 = vector.load %arg4[%c6_307, %c1_308, %c0_309, %c0_310] : memref<12x4x1x32xf32, #tpu.memory_space<vmem>>, vector<1x1x1x32xf32>
    %361 = vector.shape_cast %360 : vector<1x1x1x32xf32> to vector<1x32xf32>
    %c6_311 = arith.constant 6 : index
    %c2_312 = arith.constant 2 : index
    %c0_313 = arith.constant 0 : index
    %c0_314 = arith.constant 0 : index
    %362 = vector.load %arg4[%c6_311, %c2_312, %c0_313, %c0_314] : memref<12x4x1x32xf32, #tpu.memory_space<vmem>>, vector<1x1x1x32xf32>
    %363 = vector.shape_cast %362 : vector<1x1x1x32xf32> to vector<1x32xf32>
    %c6_315 = arith.constant 6 : index
    %c3_316 = arith.constant 3 : index
    %c0_317 = arith.constant 0 : index
    %c0_318 = arith.constant 0 : index
    %364 = vector.load %arg4[%c6_315, %c3_316, %c0_317, %c0_318] : memref<12x4x1x32xf32, #tpu.memory_space<vmem>>, vector<1x1x1x32xf32>
    %365 = vector.shape_cast %364 : vector<1x1x1x32xf32> to vector<1x32xf32>
    %c2_319 = arith.constant 2 : index
    %c0_320 = arith.constant 0 : index
    %c0_321 = arith.constant 0 : index
    %366 = vector.load %arg5[%c2_319, %c0_320, %c0_321] : memref<5x128x128xf32, #tpu.memory_space<vmem>>, vector<1x128x128xf32>
    %367 = vector.shape_cast %366 : vector<1x128x128xf32> to vector<128x128xf32>
    %c2_322 = arith.constant 2 : index
    %c0_323 = arith.constant 0 : index
    %c0_324 = arith.constant 0 : index
    %368 = vector.load %arg6[%c2_322, %c0_323, %c0_324] : memref<5x1x128xf32, #tpu.memory_space<vmem>>, vector<1x1x128xf32>
    %369 = vector.shape_cast %368 : vector<1x1x128xf32> to vector<1x128xf32>
    %cst_325 = arith.constant dense<0.000000e+00> : vector<16x32xf32>
    %370 = tpu.matmul %321, %335, %cst_325 {dimension_numbers = #tpu.dot_dimension_numbers<[1], [0], [0], [1], [0, 0, 1, 1], [], []>} : vector<16x128xf32>, vector<128x32xf32>, vector<16x32xf32> -> vector<16x32xf32>
    %371 = vector.broadcast %343 : vector<1x32xf32> to vector<16x32xf32>
    %372 = arith.addf %370, %371 : vector<16x32xf32>
    %373 = vector.shape_cast %372 : vector<16x32xf32> to vector<1x16x32xf32>
    %cst_326 = arith.constant dense<0.000000e+00> : vector<16x32xf32>
    %374 = tpu.matmul %321, %351, %cst_326 {dimension_numbers = #tpu.dot_dimension_numbers<[1], [0], [0], [1], [0, 0, 1, 1], [], []>} : vector<16x128xf32>, vector<128x32xf32>, vector<16x32xf32> -> vector<16x32xf32>
    %375 = vector.broadcast %359 : vector<1x32xf32> to vector<16x32xf32>
    %376 = arith.addf %374, %375 : vector<16x32xf32>
    %377 = vector.shape_cast %376 : vector<16x32xf32> to vector<1x16x32xf32>
    "tpu.trace_start"() <{level = 10 : i32, message = "bqe,bke->bqk"}> : () -> ()
    %cst_327 = arith.constant dense<0.000000e+00> : vector<1x32x16xf32>
    %378 = tpu.matmul %324, %373, %cst_327 {dimension_numbers = #tpu.dot_dimension_numbers<[2], [2], [1], [1], [0, 0, 0, 1, 1, 1], [0], [0]>} : vector<1x32x32xf32>, vector<1x16x32xf32>, vector<1x32x16xf32> -> vector<1x32x16xf32>
    "tpu.trace_stop"() : () -> ()
    %cst_328 = arith.constant 0.0883883461 : f32
    %379 = vector.broadcast %cst_328 : f32 to vector<1x32x16xf32>
    %380 = arith.mulf %378, %379 : vector<1x32x16xf32>
    %cst_329 = arith.constant dense<0xFF800000> : vector<1x32xf32>
    %381 = vector.multi_reduction <maximumf>, %380, %cst_329 [2] : vector<1x32x16xf32> to vector<1x32xf32>
    %382 = vector.shape_cast %381 : vector<1x32xf32> to vector<1x32x1xf32>
    %383 = vector.broadcast %382 : vector<1x32x1xf32> to vector<1x32x16xf32>
    %384 = arith.subf %380, %383 : vector<1x32x16xf32>
    %385 = math.exp %384 : vector<1x32x16xf32>
    %cst_330 = arith.constant dense<0.000000e+00> : vector<1x32xf32>
    %386 = vector.multi_reduction <add>, %385, %cst_330 [2] : vector<1x32x16xf32> to vector<1x32xf32>
    %387 = vector.shape_cast %386 : vector<1x32xf32> to vector<1x32x1xf32>
    %388 = tpu.reciprocal %387 {approx = true} : vector<1x32x1xf32> -> vector<1x32x1xf32>
    %389 = vector.broadcast %388 : vector<1x32x1xf32> to vector<1x32x16xf32>
    %390 = arith.mulf %385, %389 : vector<1x32x16xf32>
    "tpu.trace_start"() <{level = 10 : i32, message = "bqk,bke->bqe"}> : () -> ()
    %cst_331 = arith.constant dense<0.000000e+00> : vector<1x32x32xf32>
    %391 = tpu.matmul %390, %377, %cst_331 {dimension_numbers = #tpu.dot_dimension_numbers<[2], [1], [1], [2], [0, 0, 0, 1, 1, 2], [0], [0]>} : vector<1x32x16xf32>, vector<1x16x32xf32>, vector<1x32x32xf32> -> vector<1x32x32xf32>
    "tpu.trace_stop"() : () -> ()
    %392 = arith.addf %324, %391 : vector<1x32x32xf32>
    %cst_332 = arith.constant dense<0.000000e+00> : vector<16x32xf32>
    %393 = tpu.matmul %321, %337, %cst_332 {dimension_numbers = #tpu.dot_dimension_numbers<[1], [0], [0], [1], [0, 0, 1, 1], [], []>} : vector<16x128xf32>, vector<128x32xf32>, vector<16x32xf32> -> vector<16x32xf32>
    %394 = vector.broadcast %345 : vector<1x32xf32> to vector<16x32xf32>
    %395 = arith.addf %393, %394 : vector<16x32xf32>
    %396 = vector.shape_cast %395 : vector<16x32xf32> to vector<1x16x32xf32>
    %cst_333 = arith.constant dense<0.000000e+00> : vector<16x32xf32>
    %397 = tpu.matmul %321, %353, %cst_333 {dimension_numbers = #tpu.dot_dimension_numbers<[1], [0], [0], [1], [0, 0, 1, 1], [], []>} : vector<16x128xf32>, vector<128x32xf32>, vector<16x32xf32> -> vector<16x32xf32>
    %398 = vector.broadcast %361 : vector<1x32xf32> to vector<16x32xf32>
    %399 = arith.addf %397, %398 : vector<16x32xf32>
    %400 = vector.shape_cast %399 : vector<16x32xf32> to vector<1x16x32xf32>
    "tpu.trace_start"() <{level = 10 : i32, message = "bqe,bke->bqk"}> : () -> ()
    %cst_334 = arith.constant dense<0.000000e+00> : vector<1x32x16xf32>
    %401 = tpu.matmul %327, %396, %cst_334 {dimension_numbers = #tpu.dot_dimension_numbers<[2], [2], [1], [1], [0, 0, 0, 1, 1, 1], [0], [0]>} : vector<1x32x32xf32>, vector<1x16x32xf32>, vector<1x32x16xf32> -> vector<1x32x16xf32>
    "tpu.trace_stop"() : () -> ()
    %cst_335 = arith.constant 0.0883883461 : f32
    %402 = vector.broadcast %cst_335 : f32 to vector<1x32x16xf32>
    %403 = arith.mulf %401, %402 : vector<1x32x16xf32>
    %cst_336 = arith.constant dense<0xFF800000> : vector<1x32xf32>
    %404 = vector.multi_reduction <maximumf>, %403, %cst_336 [2] : vector<1x32x16xf32> to vector<1x32xf32>
    %405 = vector.shape_cast %404 : vector<1x32xf32> to vector<1x32x1xf32>
    %406 = vector.broadcast %405 : vector<1x32x1xf32> to vector<1x32x16xf32>
    %407 = arith.subf %403, %406 : vector<1x32x16xf32>
    %408 = math.exp %407 : vector<1x32x16xf32>
    %cst_337 = arith.constant dense<0.000000e+00> : vector<1x32xf32>
    %409 = vector.multi_reduction <add>, %408, %cst_337 [2] : vector<1x32x16xf32> to vector<1x32xf32>
    %410 = vector.shape_cast %409 : vector<1x32xf32> to vector<1x32x1xf32>
    %411 = tpu.reciprocal %410 {approx = true} : vector<1x32x1xf32> -> vector<1x32x1xf32>
    %412 = vector.broadcast %411 : vector<1x32x1xf32> to vector<1x32x16xf32>
    %413 = arith.mulf %408, %412 : vector<1x32x16xf32>
    "tpu.trace_start"() <{level = 10 : i32, message = "bqk,bke->bqe"}> : () -> ()
    %cst_338 = arith.constant dense<0.000000e+00> : vector<1x32x32xf32>
    %414 = tpu.matmul %413, %400, %cst_338 {dimension_numbers = #tpu.dot_dimension_numbers<[2], [1], [1], [2], [0, 0, 0, 1, 1, 2], [0], [0]>} : vector<1x32x16xf32>, vector<1x16x32xf32>, vector<1x32x32xf32> -> vector<1x32x32xf32>
    "tpu.trace_stop"() : () -> ()
    %415 = arith.addf %327, %414 : vector<1x32x32xf32>
    %cst_339 = arith.constant dense<0.000000e+00> : vector<16x32xf32>
    %416 = tpu.matmul %321, %339, %cst_339 {dimension_numbers = #tpu.dot_dimension_numbers<[1], [0], [0], [1], [0, 0, 1, 1], [], []>} : vector<16x128xf32>, vector<128x32xf32>, vector<16x32xf32> -> vector<16x32xf32>
    %417 = vector.broadcast %347 : vector<1x32xf32> to vector<16x32xf32>
    %418 = arith.addf %416, %417 : vector<16x32xf32>
    %419 = vector.shape_cast %418 : vector<16x32xf32> to vector<1x16x32xf32>
    %cst_340 = arith.constant dense<0.000000e+00> : vector<16x32xf32>
    %420 = tpu.matmul %321, %355, %cst_340 {dimension_numbers = #tpu.dot_dimension_numbers<[1], [0], [0], [1], [0, 0, 1, 1], [], []>} : vector<16x128xf32>, vector<128x32xf32>, vector<16x32xf32> -> vector<16x32xf32>
    %421 = vector.broadcast %363 : vector<1x32xf32> to vector<16x32xf32>
    %422 = arith.addf %420, %421 : vector<16x32xf32>
    %423 = vector.shape_cast %422 : vector<16x32xf32> to vector<1x16x32xf32>
    "tpu.trace_start"() <{level = 10 : i32, message = "bqe,bke->bqk"}> : () -> ()
    %cst_341 = arith.constant dense<0.000000e+00> : vector<1x32x16xf32>
    %424 = tpu.matmul %330, %419, %cst_341 {dimension_numbers = #tpu.dot_dimension_numbers<[2], [2], [1], [1], [0, 0, 0, 1, 1, 1], [0], [0]>} : vector<1x32x32xf32>, vector<1x16x32xf32>, vector<1x32x16xf32> -> vector<1x32x16xf32>
    "tpu.trace_stop"() : () -> ()
    %cst_342 = arith.constant 0.0883883461 : f32
    %425 = vector.broadcast %cst_342 : f32 to vector<1x32x16xf32>
    %426 = arith.mulf %424, %425 : vector<1x32x16xf32>
    %cst_343 = arith.constant dense<0xFF800000> : vector<1x32xf32>
    %427 = vector.multi_reduction <maximumf>, %426, %cst_343 [2] : vector<1x32x16xf32> to vector<1x32xf32>
    %428 = vector.shape_cast %427 : vector<1x32xf32> to vector<1x32x1xf32>
    %429 = vector.broadcast %428 : vector<1x32x1xf32> to vector<1x32x16xf32>
    %430 = arith.subf %426, %429 : vector<1x32x16xf32>
    %431 = math.exp %430 : vector<1x32x16xf32>
    %cst_344 = arith.constant dense<0.000000e+00> : vector<1x32xf32>
    %432 = vector.multi_reduction <add>, %431, %cst_344 [2] : vector<1x32x16xf32> to vector<1x32xf32>
    %433 = vector.shape_cast %432 : vector<1x32xf32> to vector<1x32x1xf32>
    %434 = tpu.reciprocal %433 {approx = true} : vector<1x32x1xf32> -> vector<1x32x1xf32>
    %435 = vector.broadcast %434 : vector<1x32x1xf32> to vector<1x32x16xf32>
    %436 = arith.mulf %431, %435 : vector<1x32x16xf32>
    "tpu.trace_start"() <{level = 10 : i32, message = "bqk,bke->bqe"}> : () -> ()
    %cst_345 = arith.constant dense<0.000000e+00> : vector<1x32x32xf32>
    %437 = tpu.matmul %436, %423, %cst_345 {dimension_numbers = #tpu.dot_dimension_numbers<[2], [1], [1], [2], [0, 0, 0, 1, 1, 2], [0], [0]>} : vector<1x32x16xf32>, vector<1x16x32xf32>, vector<1x32x32xf32> -> vector<1x32x32xf32>
    "tpu.trace_stop"() : () -> ()
    %438 = arith.addf %330, %437 : vector<1x32x32xf32>
    %cst_346 = arith.constant dense<0.000000e+00> : vector<16x32xf32>
    %439 = tpu.matmul %321, %341, %cst_346 {dimension_numbers = #tpu.dot_dimension_numbers<[1], [0], [0], [1], [0, 0, 1, 1], [], []>} : vector<16x128xf32>, vector<128x32xf32>, vector<16x32xf32> -> vector<16x32xf32>
    %440 = vector.broadcast %349 : vector<1x32xf32> to vector<16x32xf32>
    %441 = arith.addf %439, %440 : vector<16x32xf32>
    %442 = vector.shape_cast %441 : vector<16x32xf32> to vector<1x16x32xf32>
    %cst_347 = arith.constant dense<0.000000e+00> : vector<16x32xf32>
    %443 = tpu.matmul %321, %357, %cst_347 {dimension_numbers = #tpu.dot_dimension_numbers<[1], [0], [0], [1], [0, 0, 1, 1], [], []>} : vector<16x128xf32>, vector<128x32xf32>, vector<16x32xf32> -> vector<16x32xf32>
    %444 = vector.broadcast %365 : vector<1x32xf32> to vector<16x32xf32>
    %445 = arith.addf %443, %444 : vector<16x32xf32>
    %446 = vector.shape_cast %445 : vector<16x32xf32> to vector<1x16x32xf32>
    "tpu.trace_start"() <{level = 10 : i32, message = "bqe,bke->bqk"}> : () -> ()
    %cst_348 = arith.constant dense<0.000000e+00> : vector<1x32x16xf32>
    %447 = tpu.matmul %333, %442, %cst_348 {dimension_numbers = #tpu.dot_dimension_numbers<[2], [2], [1], [1], [0, 0, 0, 1, 1, 1], [0], [0]>} : vector<1x32x32xf32>, vector<1x16x32xf32>, vector<1x32x16xf32> -> vector<1x32x16xf32>
    "tpu.trace_stop"() : () -> ()
    %cst_349 = arith.constant 0.0883883461 : f32
    %448 = vector.broadcast %cst_349 : f32 to vector<1x32x16xf32>
    %449 = arith.mulf %447, %448 : vector<1x32x16xf32>
    %cst_350 = arith.constant dense<0xFF800000> : vector<1x32xf32>
    %450 = vector.multi_reduction <maximumf>, %449, %cst_350 [2] : vector<1x32x16xf32> to vector<1x32xf32>
    %451 = vector.shape_cast %450 : vector<1x32xf32> to vector<1x32x1xf32>
    %452 = vector.broadcast %451 : vector<1x32x1xf32> to vector<1x32x16xf32>
    %453 = arith.subf %449, %452 : vector<1x32x16xf32>
    %454 = math.exp %453 : vector<1x32x16xf32>
    %cst_351 = arith.constant dense<0.000000e+00> : vector<1x32xf32>
    %455 = vector.multi_reduction <add>, %454, %cst_351 [2] : vector<1x32x16xf32> to vector<1x32xf32>
    %456 = vector.shape_cast %455 : vector<1x32xf32> to vector<1x32x1xf32>
    %457 = tpu.reciprocal %456 {approx = true} : vector<1x32x1xf32> -> vector<1x32x1xf32>
    %458 = vector.broadcast %457 : vector<1x32x1xf32> to vector<1x32x16xf32>
    %459 = arith.mulf %454, %458 : vector<1x32x16xf32>
    "tpu.trace_start"() <{level = 10 : i32, message = "bqk,bke->bqe"}> : () -> ()
    %cst_352 = arith.constant dense<0.000000e+00> : vector<1x32x32xf32>
    %460 = tpu.matmul %459, %446, %cst_352 {dimension_numbers = #tpu.dot_dimension_numbers<[2], [1], [1], [2], [0, 0, 0, 1, 1, 2], [0], [0]>} : vector<1x32x16xf32>, vector<1x16x32xf32>, vector<1x32x32xf32> -> vector<1x32x32xf32>
    "tpu.trace_stop"() : () -> ()
    %461 = arith.addf %333, %460 : vector<1x32x32xf32>
    %462 = tpu.concatenate %392, %415, %438, %461 in 2 : vector<1x32x32xf32>, vector<1x32x32xf32>, vector<1x32x32xf32>, vector<1x32x32xf32> -> vector<1x32x128xf32>
    %463 = vector.shape_cast %462 : vector<1x32x128xf32> to vector<32x128xf32>
    %cst_353 = arith.constant dense<0.000000e+00> : vector<32x128xf32>
    %464 = tpu.matmul %463, %367, %cst_353 {dimension_numbers = #tpu.dot_dimension_numbers<[1], [0], [0], [1], [0, 0, 1, 1], [], []>} : vector<32x128xf32>, vector<128x128xf32>, vector<32x128xf32> -> vector<32x128xf32>
    %465 = vector.broadcast %369 : vector<1x128xf32> to vector<32x128xf32>
    %466 = arith.addf %464, %465 : vector<32x128xf32>
    %cst_354 = arith.constant 0.000000e+00 : f32
    %467 = vector.broadcast %cst_354 : f32 to vector<32x128xf32>
    %468 = arith.maximumf %466, %467 : vector<32x128xf32>
    %469 = arith.addf %463, %468 : vector<32x128xf32>
    %470 = vector.shape_cast %469 : vector<32x128xf32> to vector<1x32x128xf32>
    %471 = vector.shape_cast %470 : vector<1x32x128xf32> to vector<32x128xf32>
    %c4_355 = arith.constant 4 : index
    %c0_356 = arith.constant 0 : index
    %c0_357 = arith.constant 0 : index
    %c0_358 = arith.constant 0 : index
    %472 = vector.load %arg3[%c4_355, %c0_356, %c0_357, %c0_358] : memref<9x4x128x32xf32, #tpu.memory_space<vmem>>, vector<1x1x128x32xf32>
    %473 = vector.shape_cast %472 : vector<1x1x128x32xf32> to vector<128x32xf32>
    %cst_359 = arith.constant dense<0.000000e+00> : vector<16x32xf32>
    %474 = tpu.matmul %321, %473, %cst_359 {dimension_numbers = #tpu.dot_dimension_numbers<[1], [0], [0], [1], [0, 0, 1, 1], [], []>} : vector<16x128xf32>, vector<128x32xf32>, vector<16x32xf32> -> vector<16x32xf32>
    %c7 = arith.constant 7 : index
    %c0_360 = arith.constant 0 : index
    %c0_361 = arith.constant 0 : index
    %c0_362 = arith.constant 0 : index
    %475 = vector.load %arg4[%c7, %c0_360, %c0_361, %c0_362] : memref<12x4x1x32xf32, #tpu.memory_space<vmem>>, vector<1x1x1x32xf32>
    %476 = vector.shape_cast %475 : vector<1x1x1x32xf32> to vector<1x32xf32>
    %477 = vector.broadcast %476 : vector<1x32xf32> to vector<16x32xf32>
    %478 = arith.addf %474, %477 : vector<16x32xf32>
    %479 = vector.shape_cast %478 : vector<16x32xf32> to vector<1x16x32xf32>
    %c4_363 = arith.constant 4 : index
    %c1_364 = arith.constant 1 : index
    %c0_365 = arith.constant 0 : index
    %c0_366 = arith.constant 0 : index
    %480 = vector.load %arg3[%c4_363, %c1_364, %c0_365, %c0_366] : memref<9x4x128x32xf32, #tpu.memory_space<vmem>>, vector<1x1x128x32xf32>
    %481 = vector.shape_cast %480 : vector<1x1x128x32xf32> to vector<128x32xf32>
    %cst_367 = arith.constant dense<0.000000e+00> : vector<16x32xf32>
    %482 = tpu.matmul %321, %481, %cst_367 {dimension_numbers = #tpu.dot_dimension_numbers<[1], [0], [0], [1], [0, 0, 1, 1], [], []>} : vector<16x128xf32>, vector<128x32xf32>, vector<16x32xf32> -> vector<16x32xf32>
    %c7_368 = arith.constant 7 : index
    %c1_369 = arith.constant 1 : index
    %c0_370 = arith.constant 0 : index
    %c0_371 = arith.constant 0 : index
    %483 = vector.load %arg4[%c7_368, %c1_369, %c0_370, %c0_371] : memref<12x4x1x32xf32, #tpu.memory_space<vmem>>, vector<1x1x1x32xf32>
    %484 = vector.shape_cast %483 : vector<1x1x1x32xf32> to vector<1x32xf32>
    %485 = vector.broadcast %484 : vector<1x32xf32> to vector<16x32xf32>
    %486 = arith.addf %482, %485 : vector<16x32xf32>
    %487 = vector.shape_cast %486 : vector<16x32xf32> to vector<1x16x32xf32>
    %c4_372 = arith.constant 4 : index
    %c2_373 = arith.constant 2 : index
    %c0_374 = arith.constant 0 : index
    %c0_375 = arith.constant 0 : index
    %488 = vector.load %arg3[%c4_372, %c2_373, %c0_374, %c0_375] : memref<9x4x128x32xf32, #tpu.memory_space<vmem>>, vector<1x1x128x32xf32>
    %489 = vector.shape_cast %488 : vector<1x1x128x32xf32> to vector<128x32xf32>
    %cst_376 = arith.constant dense<0.000000e+00> : vector<16x32xf32>
    %490 = tpu.matmul %321, %489, %cst_376 {dimension_numbers = #tpu.dot_dimension_numbers<[1], [0], [0], [1], [0, 0, 1, 1], [], []>} : vector<16x128xf32>, vector<128x32xf32>, vector<16x32xf32> -> vector<16x32xf32>
    %c7_377 = arith.constant 7 : index
    %c2_378 = arith.constant 2 : index
    %c0_379 = arith.constant 0 : index
    %c0_380 = arith.constant 0 : index
    %491 = vector.load %arg4[%c7_377, %c2_378, %c0_379, %c0_380] : memref<12x4x1x32xf32, #tpu.memory_space<vmem>>, vector<1x1x1x32xf32>
    %492 = vector.shape_cast %491 : vector<1x1x1x32xf32> to vector<1x32xf32>
    %493 = vector.broadcast %492 : vector<1x32xf32> to vector<16x32xf32>
    %494 = arith.addf %490, %493 : vector<16x32xf32>
    %495 = vector.shape_cast %494 : vector<16x32xf32> to vector<1x16x32xf32>
    %c4_381 = arith.constant 4 : index
    %c3_382 = arith.constant 3 : index
    %c0_383 = arith.constant 0 : index
    %c0_384 = arith.constant 0 : index
    %496 = vector.load %arg3[%c4_381, %c3_382, %c0_383, %c0_384] : memref<9x4x128x32xf32, #tpu.memory_space<vmem>>, vector<1x1x128x32xf32>
    %497 = vector.shape_cast %496 : vector<1x1x128x32xf32> to vector<128x32xf32>
    %cst_385 = arith.constant dense<0.000000e+00> : vector<16x32xf32>
    %498 = tpu.matmul %321, %497, %cst_385 {dimension_numbers = #tpu.dot_dimension_numbers<[1], [0], [0], [1], [0, 0, 1, 1], [], []>} : vector<16x128xf32>, vector<128x32xf32>, vector<16x32xf32> -> vector<16x32xf32>
    %c7_386 = arith.constant 7 : index
    %c3_387 = arith.constant 3 : index
    %c0_388 = arith.constant 0 : index
    %c0_389 = arith.constant 0 : index
    %499 = vector.load %arg4[%c7_386, %c3_387, %c0_388, %c0_389] : memref<12x4x1x32xf32, #tpu.memory_space<vmem>>, vector<1x1x1x32xf32>
    %500 = vector.shape_cast %499 : vector<1x1x1x32xf32> to vector<1x32xf32>
    %501 = vector.broadcast %500 : vector<1x32xf32> to vector<16x32xf32>
    %502 = arith.addf %498, %501 : vector<16x32xf32>
    %503 = vector.shape_cast %502 : vector<16x32xf32> to vector<1x16x32xf32>
    %c5_390 = arith.constant 5 : index
    %c0_391 = arith.constant 0 : index
    %c0_392 = arith.constant 0 : index
    %c0_393 = arith.constant 0 : index
    %504 = vector.load %arg3[%c5_390, %c0_391, %c0_392, %c0_393] : memref<9x4x128x32xf32, #tpu.memory_space<vmem>>, vector<1x1x128x32xf32>
    %505 = vector.shape_cast %504 : vector<1x1x128x32xf32> to vector<128x32xf32>
    %c5_394 = arith.constant 5 : index
    %c1_395 = arith.constant 1 : index
    %c0_396 = arith.constant 0 : index
    %c0_397 = arith.constant 0 : index
    %506 = vector.load %arg3[%c5_394, %c1_395, %c0_396, %c0_397] : memref<9x4x128x32xf32, #tpu.memory_space<vmem>>, vector<1x1x128x32xf32>
    %507 = vector.shape_cast %506 : vector<1x1x128x32xf32> to vector<128x32xf32>
    %c5_398 = arith.constant 5 : index
    %c2_399 = arith.constant 2 : index
    %c0_400 = arith.constant 0 : index
    %c0_401 = arith.constant 0 : index
    %508 = vector.load %arg3[%c5_398, %c2_399, %c0_400, %c0_401] : memref<9x4x128x32xf32, #tpu.memory_space<vmem>>, vector<1x1x128x32xf32>
    %509 = vector.shape_cast %508 : vector<1x1x128x32xf32> to vector<128x32xf32>
    %c5_402 = arith.constant 5 : index
    %c3_403 = arith.constant 3 : index
    %c0_404 = arith.constant 0 : index
    %c0_405 = arith.constant 0 : index
    %510 = vector.load %arg3[%c5_402, %c3_403, %c0_404, %c0_405] : memref<9x4x128x32xf32, #tpu.memory_space<vmem>>, vector<1x1x128x32xf32>
    %511 = vector.shape_cast %510 : vector<1x1x128x32xf32> to vector<128x32xf32>
    %c8 = arith.constant 8 : index
    %c0_406 = arith.constant 0 : index
    %c0_407 = arith.constant 0 : index
    %c0_408 = arith.constant 0 : index
    %512 = vector.load %arg4[%c8, %c0_406, %c0_407, %c0_408] : memref<12x4x1x32xf32, #tpu.memory_space<vmem>>, vector<1x1x1x32xf32>
    %513 = vector.shape_cast %512 : vector<1x1x1x32xf32> to vector<1x32xf32>
    %c8_409 = arith.constant 8 : index
    %c1_410 = arith.constant 1 : index
    %c0_411 = arith.constant 0 : index
    %c0_412 = arith.constant 0 : index
    %514 = vector.load %arg4[%c8_409, %c1_410, %c0_411, %c0_412] : memref<12x4x1x32xf32, #tpu.memory_space<vmem>>, vector<1x1x1x32xf32>
    %515 = vector.shape_cast %514 : vector<1x1x1x32xf32> to vector<1x32xf32>
    %c8_413 = arith.constant 8 : index
    %c2_414 = arith.constant 2 : index
    %c0_415 = arith.constant 0 : index
    %c0_416 = arith.constant 0 : index
    %516 = vector.load %arg4[%c8_413, %c2_414, %c0_415, %c0_416] : memref<12x4x1x32xf32, #tpu.memory_space<vmem>>, vector<1x1x1x32xf32>
    %517 = vector.shape_cast %516 : vector<1x1x1x32xf32> to vector<1x32xf32>
    %c8_417 = arith.constant 8 : index
    %c3_418 = arith.constant 3 : index
    %c0_419 = arith.constant 0 : index
    %c0_420 = arith.constant 0 : index
    %518 = vector.load %arg4[%c8_417, %c3_418, %c0_419, %c0_420] : memref<12x4x1x32xf32, #tpu.memory_space<vmem>>, vector<1x1x1x32xf32>
    %519 = vector.shape_cast %518 : vector<1x1x1x32xf32> to vector<1x32xf32>
    %c6_421 = arith.constant 6 : index
    %c0_422 = arith.constant 0 : index
    %c0_423 = arith.constant 0 : index
    %c0_424 = arith.constant 0 : index
    %520 = vector.load %arg3[%c6_421, %c0_422, %c0_423, %c0_424] : memref<9x4x128x32xf32, #tpu.memory_space<vmem>>, vector<1x1x128x32xf32>
    %521 = vector.shape_cast %520 : vector<1x1x128x32xf32> to vector<128x32xf32>
    %c6_425 = arith.constant 6 : index
    %c1_426 = arith.constant 1 : index
    %c0_427 = arith.constant 0 : index
    %c0_428 = arith.constant 0 : index
    %522 = vector.load %arg3[%c6_425, %c1_426, %c0_427, %c0_428] : memref<9x4x128x32xf32, #tpu.memory_space<vmem>>, vector<1x1x128x32xf32>
    %523 = vector.shape_cast %522 : vector<1x1x128x32xf32> to vector<128x32xf32>
    %c6_429 = arith.constant 6 : index
    %c2_430 = arith.constant 2 : index
    %c0_431 = arith.constant 0 : index
    %c0_432 = arith.constant 0 : index
    %524 = vector.load %arg3[%c6_429, %c2_430, %c0_431, %c0_432] : memref<9x4x128x32xf32, #tpu.memory_space<vmem>>, vector<1x1x128x32xf32>
    %525 = vector.shape_cast %524 : vector<1x1x128x32xf32> to vector<128x32xf32>
    %c6_433 = arith.constant 6 : index
    %c3_434 = arith.constant 3 : index
    %c0_435 = arith.constant 0 : index
    %c0_436 = arith.constant 0 : index
    %526 = vector.load %arg3[%c6_433, %c3_434, %c0_435, %c0_436] : memref<9x4x128x32xf32, #tpu.memory_space<vmem>>, vector<1x1x128x32xf32>
    %527 = vector.shape_cast %526 : vector<1x1x128x32xf32> to vector<128x32xf32>
    %c9 = arith.constant 9 : index
    %c0_437 = arith.constant 0 : index
    %c0_438 = arith.constant 0 : index
    %c0_439 = arith.constant 0 : index
    %528 = vector.load %arg4[%c9, %c0_437, %c0_438, %c0_439] : memref<12x4x1x32xf32, #tpu.memory_space<vmem>>, vector<1x1x1x32xf32>
    %529 = vector.shape_cast %528 : vector<1x1x1x32xf32> to vector<1x32xf32>
    %c9_440 = arith.constant 9 : index
    %c1_441 = arith.constant 1 : index
    %c0_442 = arith.constant 0 : index
    %c0_443 = arith.constant 0 : index
    %530 = vector.load %arg4[%c9_440, %c1_441, %c0_442, %c0_443] : memref<12x4x1x32xf32, #tpu.memory_space<vmem>>, vector<1x1x1x32xf32>
    %531 = vector.shape_cast %530 : vector<1x1x1x32xf32> to vector<1x32xf32>
    %c9_444 = arith.constant 9 : index
    %c2_445 = arith.constant 2 : index
    %c0_446 = arith.constant 0 : index
    %c0_447 = arith.constant 0 : index
    %532 = vector.load %arg4[%c9_444, %c2_445, %c0_446, %c0_447] : memref<12x4x1x32xf32, #tpu.memory_space<vmem>>, vector<1x1x1x32xf32>
    %533 = vector.shape_cast %532 : vector<1x1x1x32xf32> to vector<1x32xf32>
    %c9_448 = arith.constant 9 : index
    %c3_449 = arith.constant 3 : index
    %c0_450 = arith.constant 0 : index
    %c0_451 = arith.constant 0 : index
    %534 = vector.load %arg4[%c9_448, %c3_449, %c0_450, %c0_451] : memref<12x4x1x32xf32, #tpu.memory_space<vmem>>, vector<1x1x1x32xf32>
    %535 = vector.shape_cast %534 : vector<1x1x1x32xf32> to vector<1x32xf32>
    %c3_452 = arith.constant 3 : index
    %c0_453 = arith.constant 0 : index
    %c0_454 = arith.constant 0 : index
    %536 = vector.load %arg5[%c3_452, %c0_453, %c0_454] : memref<5x128x128xf32, #tpu.memory_space<vmem>>, vector<1x128x128xf32>
    %537 = vector.shape_cast %536 : vector<1x128x128xf32> to vector<128x128xf32>
    %c3_455 = arith.constant 3 : index
    %c0_456 = arith.constant 0 : index
    %c0_457 = arith.constant 0 : index
    %538 = vector.load %arg6[%c3_455, %c0_456, %c0_457] : memref<5x1x128xf32, #tpu.memory_space<vmem>>, vector<1x1x128xf32>
    %539 = vector.shape_cast %538 : vector<1x1x128xf32> to vector<1x128xf32>
    %cst_458 = arith.constant dense<0.000000e+00> : vector<32x32xf32>
    %540 = tpu.matmul %471, %505, %cst_458 {dimension_numbers = #tpu.dot_dimension_numbers<[1], [0], [0], [1], [0, 0, 1, 1], [], []>} : vector<32x128xf32>, vector<128x32xf32>, vector<32x32xf32> -> vector<32x32xf32>
    %541 = vector.broadcast %513 : vector<1x32xf32> to vector<32x32xf32>
    %542 = arith.addf %540, %541 : vector<32x32xf32>
    %543 = vector.shape_cast %542 : vector<32x32xf32> to vector<1x32x32xf32>
    %cst_459 = arith.constant dense<0.000000e+00> : vector<32x32xf32>
    %544 = tpu.matmul %471, %521, %cst_459 {dimension_numbers = #tpu.dot_dimension_numbers<[1], [0], [0], [1], [0, 0, 1, 1], [], []>} : vector<32x128xf32>, vector<128x32xf32>, vector<32x32xf32> -> vector<32x32xf32>
    %545 = vector.broadcast %529 : vector<1x32xf32> to vector<32x32xf32>
    %546 = arith.addf %544, %545 : vector<32x32xf32>
    %547 = vector.shape_cast %546 : vector<32x32xf32> to vector<1x32x32xf32>
    "tpu.trace_start"() <{level = 10 : i32, message = "bqe,bke->bqk"}> : () -> ()
    %cst_460 = arith.constant dense<0.000000e+00> : vector<1x16x32xf32>
    %548 = tpu.matmul %479, %543, %cst_460 {dimension_numbers = #tpu.dot_dimension_numbers<[2], [2], [1], [1], [0, 0, 0, 1, 1, 1], [0], [0]>} : vector<1x16x32xf32>, vector<1x32x32xf32>, vector<1x16x32xf32> -> vector<1x16x32xf32>
    "tpu.trace_stop"() : () -> ()
    %cst_461 = arith.constant 0.0883883461 : f32
    %549 = vector.broadcast %cst_461 : f32 to vector<1x16x32xf32>
    %550 = arith.mulf %548, %549 : vector<1x16x32xf32>
    %cst_462 = arith.constant dense<0xFF800000> : vector<1x16xf32>
    %551 = vector.multi_reduction <maximumf>, %550, %cst_462 [2] : vector<1x16x32xf32> to vector<1x16xf32>
    %552 = vector.shape_cast %551 : vector<1x16xf32> to vector<1x16x1xf32>
    %553 = vector.broadcast %552 : vector<1x16x1xf32> to vector<1x16x32xf32>
    %554 = arith.subf %550, %553 : vector<1x16x32xf32>
    %555 = math.exp %554 : vector<1x16x32xf32>
    %cst_463 = arith.constant dense<0.000000e+00> : vector<1x16xf32>
    %556 = vector.multi_reduction <add>, %555, %cst_463 [2] : vector<1x16x32xf32> to vector<1x16xf32>
    %557 = vector.shape_cast %556 : vector<1x16xf32> to vector<1x16x1xf32>
    %558 = tpu.reciprocal %557 {approx = true} : vector<1x16x1xf32> -> vector<1x16x1xf32>
    %559 = vector.broadcast %558 : vector<1x16x1xf32> to vector<1x16x32xf32>
    %560 = arith.mulf %555, %559 : vector<1x16x32xf32>
    "tpu.trace_start"() <{level = 10 : i32, message = "bqk,bke->bqe"}> : () -> ()
    %cst_464 = arith.constant dense<0.000000e+00> : vector<1x16x32xf32>
    %561 = tpu.matmul %560, %547, %cst_464 {dimension_numbers = #tpu.dot_dimension_numbers<[2], [1], [1], [2], [0, 0, 0, 1, 1, 2], [0], [0]>} : vector<1x16x32xf32>, vector<1x32x32xf32>, vector<1x16x32xf32> -> vector<1x16x32xf32>
    "tpu.trace_stop"() : () -> ()
    %562 = arith.addf %479, %561 : vector<1x16x32xf32>
    %cst_465 = arith.constant dense<0.000000e+00> : vector<32x32xf32>
    %563 = tpu.matmul %471, %507, %cst_465 {dimension_numbers = #tpu.dot_dimension_numbers<[1], [0], [0], [1], [0, 0, 1, 1], [], []>} : vector<32x128xf32>, vector<128x32xf32>, vector<32x32xf32> -> vector<32x32xf32>
    %564 = vector.broadcast %515 : vector<1x32xf32> to vector<32x32xf32>
    %565 = arith.addf %563, %564 : vector<32x32xf32>
    %566 = vector.shape_cast %565 : vector<32x32xf32> to vector<1x32x32xf32>
    %cst_466 = arith.constant dense<0.000000e+00> : vector<32x32xf32>
    %567 = tpu.matmul %471, %523, %cst_466 {dimension_numbers = #tpu.dot_dimension_numbers<[1], [0], [0], [1], [0, 0, 1, 1], [], []>} : vector<32x128xf32>, vector<128x32xf32>, vector<32x32xf32> -> vector<32x32xf32>
    %568 = vector.broadcast %531 : vector<1x32xf32> to vector<32x32xf32>
    %569 = arith.addf %567, %568 : vector<32x32xf32>
    %570 = vector.shape_cast %569 : vector<32x32xf32> to vector<1x32x32xf32>
    "tpu.trace_start"() <{level = 10 : i32, message = "bqe,bke->bqk"}> : () -> ()
    %cst_467 = arith.constant dense<0.000000e+00> : vector<1x16x32xf32>
    %571 = tpu.matmul %487, %566, %cst_467 {dimension_numbers = #tpu.dot_dimension_numbers<[2], [2], [1], [1], [0, 0, 0, 1, 1, 1], [0], [0]>} : vector<1x16x32xf32>, vector<1x32x32xf32>, vector<1x16x32xf32> -> vector<1x16x32xf32>
    "tpu.trace_stop"() : () -> ()
    %cst_468 = arith.constant 0.0883883461 : f32
    %572 = vector.broadcast %cst_468 : f32 to vector<1x16x32xf32>
    %573 = arith.mulf %571, %572 : vector<1x16x32xf32>
    %cst_469 = arith.constant dense<0xFF800000> : vector<1x16xf32>
    %574 = vector.multi_reduction <maximumf>, %573, %cst_469 [2] : vector<1x16x32xf32> to vector<1x16xf32>
    %575 = vector.shape_cast %574 : vector<1x16xf32> to vector<1x16x1xf32>
    %576 = vector.broadcast %575 : vector<1x16x1xf32> to vector<1x16x32xf32>
    %577 = arith.subf %573, %576 : vector<1x16x32xf32>
    %578 = math.exp %577 : vector<1x16x32xf32>
    %cst_470 = arith.constant dense<0.000000e+00> : vector<1x16xf32>
    %579 = vector.multi_reduction <add>, %578, %cst_470 [2] : vector<1x16x32xf32> to vector<1x16xf32>
    %580 = vector.shape_cast %579 : vector<1x16xf32> to vector<1x16x1xf32>
    %581 = tpu.reciprocal %580 {approx = true} : vector<1x16x1xf32> -> vector<1x16x1xf32>
    %582 = vector.broadcast %581 : vector<1x16x1xf32> to vector<1x16x32xf32>
    %583 = arith.mulf %578, %582 : vector<1x16x32xf32>
    "tpu.trace_start"() <{level = 10 : i32, message = "bqk,bke->bqe"}> : () -> ()
    %cst_471 = arith.constant dense<0.000000e+00> : vector<1x16x32xf32>
    %584 = tpu.matmul %583, %570, %cst_471 {dimension_numbers = #tpu.dot_dimension_numbers<[2], [1], [1], [2], [0, 0, 0, 1, 1, 2], [0], [0]>} : vector<1x16x32xf32>, vector<1x32x32xf32>, vector<1x16x32xf32> -> vector<1x16x32xf32>
    "tpu.trace_stop"() : () -> ()
    %585 = arith.addf %487, %584 : vector<1x16x32xf32>
    %cst_472 = arith.constant dense<0.000000e+00> : vector<32x32xf32>
    %586 = tpu.matmul %471, %509, %cst_472 {dimension_numbers = #tpu.dot_dimension_numbers<[1], [0], [0], [1], [0, 0, 1, 1], [], []>} : vector<32x128xf32>, vector<128x32xf32>, vector<32x32xf32> -> vector<32x32xf32>
    %587 = vector.broadcast %517 : vector<1x32xf32> to vector<32x32xf32>
    %588 = arith.addf %586, %587 : vector<32x32xf32>
    %589 = vector.shape_cast %588 : vector<32x32xf32> to vector<1x32x32xf32>
    %cst_473 = arith.constant dense<0.000000e+00> : vector<32x32xf32>
    %590 = tpu.matmul %471, %525, %cst_473 {dimension_numbers = #tpu.dot_dimension_numbers<[1], [0], [0], [1], [0, 0, 1, 1], [], []>} : vector<32x128xf32>, vector<128x32xf32>, vector<32x32xf32> -> vector<32x32xf32>
    %591 = vector.broadcast %533 : vector<1x32xf32> to vector<32x32xf32>
    %592 = arith.addf %590, %591 : vector<32x32xf32>
    %593 = vector.shape_cast %592 : vector<32x32xf32> to vector<1x32x32xf32>
    "tpu.trace_start"() <{level = 10 : i32, message = "bqe,bke->bqk"}> : () -> ()
    %cst_474 = arith.constant dense<0.000000e+00> : vector<1x16x32xf32>
    %594 = tpu.matmul %495, %589, %cst_474 {dimension_numbers = #tpu.dot_dimension_numbers<[2], [2], [1], [1], [0, 0, 0, 1, 1, 1], [0], [0]>} : vector<1x16x32xf32>, vector<1x32x32xf32>, vector<1x16x32xf32> -> vector<1x16x32xf32>
    "tpu.trace_stop"() : () -> ()
    %cst_475 = arith.constant 0.0883883461 : f32
    %595 = vector.broadcast %cst_475 : f32 to vector<1x16x32xf32>
    %596 = arith.mulf %594, %595 : vector<1x16x32xf32>
    %cst_476 = arith.constant dense<0xFF800000> : vector<1x16xf32>
    %597 = vector.multi_reduction <maximumf>, %596, %cst_476 [2] : vector<1x16x32xf32> to vector<1x16xf32>
    %598 = vector.shape_cast %597 : vector<1x16xf32> to vector<1x16x1xf32>
    %599 = vector.broadcast %598 : vector<1x16x1xf32> to vector<1x16x32xf32>
    %600 = arith.subf %596, %599 : vector<1x16x32xf32>
    %601 = math.exp %600 : vector<1x16x32xf32>
    %cst_477 = arith.constant dense<0.000000e+00> : vector<1x16xf32>
    %602 = vector.multi_reduction <add>, %601, %cst_477 [2] : vector<1x16x32xf32> to vector<1x16xf32>
    %603 = vector.shape_cast %602 : vector<1x16xf32> to vector<1x16x1xf32>
    %604 = tpu.reciprocal %603 {approx = true} : vector<1x16x1xf32> -> vector<1x16x1xf32>
    %605 = vector.broadcast %604 : vector<1x16x1xf32> to vector<1x16x32xf32>
    %606 = arith.mulf %601, %605 : vector<1x16x32xf32>
    "tpu.trace_start"() <{level = 10 : i32, message = "bqk,bke->bqe"}> : () -> ()
    %cst_478 = arith.constant dense<0.000000e+00> : vector<1x16x32xf32>
    %607 = tpu.matmul %606, %593, %cst_478 {dimension_numbers = #tpu.dot_dimension_numbers<[2], [1], [1], [2], [0, 0, 0, 1, 1, 2], [0], [0]>} : vector<1x16x32xf32>, vector<1x32x32xf32>, vector<1x16x32xf32> -> vector<1x16x32xf32>
    "tpu.trace_stop"() : () -> ()
    %608 = arith.addf %495, %607 : vector<1x16x32xf32>
    %cst_479 = arith.constant dense<0.000000e+00> : vector<32x32xf32>
    %609 = tpu.matmul %471, %511, %cst_479 {dimension_numbers = #tpu.dot_dimension_numbers<[1], [0], [0], [1], [0, 0, 1, 1], [], []>} : vector<32x128xf32>, vector<128x32xf32>, vector<32x32xf32> -> vector<32x32xf32>
    %610 = vector.broadcast %519 : vector<1x32xf32> to vector<32x32xf32>
    %611 = arith.addf %609, %610 : vector<32x32xf32>
    %612 = vector.shape_cast %611 : vector<32x32xf32> to vector<1x32x32xf32>
    %cst_480 = arith.constant dense<0.000000e+00> : vector<32x32xf32>
    %613 = tpu.matmul %471, %527, %cst_480 {dimension_numbers = #tpu.dot_dimension_numbers<[1], [0], [0], [1], [0, 0, 1, 1], [], []>} : vector<32x128xf32>, vector<128x32xf32>, vector<32x32xf32> -> vector<32x32xf32>
    %614 = vector.broadcast %535 : vector<1x32xf32> to vector<32x32xf32>
    %615 = arith.addf %613, %614 : vector<32x32xf32>
    %616 = vector.shape_cast %615 : vector<32x32xf32> to vector<1x32x32xf32>
    "tpu.trace_start"() <{level = 10 : i32, message = "bqe,bke->bqk"}> : () -> ()
    %cst_481 = arith.constant dense<0.000000e+00> : vector<1x16x32xf32>
    %617 = tpu.matmul %503, %612, %cst_481 {dimension_numbers = #tpu.dot_dimension_numbers<[2], [2], [1], [1], [0, 0, 0, 1, 1, 1], [0], [0]>} : vector<1x16x32xf32>, vector<1x32x32xf32>, vector<1x16x32xf32> -> vector<1x16x32xf32>
    "tpu.trace_stop"() : () -> ()
    %cst_482 = arith.constant 0.0883883461 : f32
    %618 = vector.broadcast %cst_482 : f32 to vector<1x16x32xf32>
    %619 = arith.mulf %617, %618 : vector<1x16x32xf32>
    %cst_483 = arith.constant dense<0xFF800000> : vector<1x16xf32>
    %620 = vector.multi_reduction <maximumf>, %619, %cst_483 [2] : vector<1x16x32xf32> to vector<1x16xf32>
    %621 = vector.shape_cast %620 : vector<1x16xf32> to vector<1x16x1xf32>
    %622 = vector.broadcast %621 : vector<1x16x1xf32> to vector<1x16x32xf32>
    %623 = arith.subf %619, %622 : vector<1x16x32xf32>
    %624 = math.exp %623 : vector<1x16x32xf32>
    %cst_484 = arith.constant dense<0.000000e+00> : vector<1x16xf32>
    %625 = vector.multi_reduction <add>, %624, %cst_484 [2] : vector<1x16x32xf32> to vector<1x16xf32>
    %626 = vector.shape_cast %625 : vector<1x16xf32> to vector<1x16x1xf32>
    %627 = tpu.reciprocal %626 {approx = true} : vector<1x16x1xf32> -> vector<1x16x1xf32>
    %628 = vector.broadcast %627 : vector<1x16x1xf32> to vector<1x16x32xf32>
    %629 = arith.mulf %624, %628 : vector<1x16x32xf32>
    "tpu.trace_start"() <{level = 10 : i32, message = "bqk,bke->bqe"}> : () -> ()
    %cst_485 = arith.constant dense<0.000000e+00> : vector<1x16x32xf32>
    %630 = tpu.matmul %629, %616, %cst_485 {dimension_numbers = #tpu.dot_dimension_numbers<[2], [1], [1], [2], [0, 0, 0, 1, 1, 2], [0], [0]>} : vector<1x16x32xf32>, vector<1x32x32xf32>, vector<1x16x32xf32> -> vector<1x16x32xf32>
    "tpu.trace_stop"() : () -> ()
    %631 = arith.addf %503, %630 : vector<1x16x32xf32>
    %632 = tpu.concatenate %562, %585, %608, %631 in 2 : vector<1x16x32xf32>, vector<1x16x32xf32>, vector<1x16x32xf32>, vector<1x16x32xf32> -> vector<1x16x128xf32>
    %633 = vector.shape_cast %632 : vector<1x16x128xf32> to vector<16x128xf32>
    %cst_486 = arith.constant dense<0.000000e+00> : vector<16x128xf32>
    %634 = tpu.matmul %633, %537, %cst_486 {dimension_numbers = #tpu.dot_dimension_numbers<[1], [0], [0], [1], [0, 0, 1, 1], [], []>} : vector<16x128xf32>, vector<128x128xf32>, vector<16x128xf32> -> vector<16x128xf32>
    %635 = vector.broadcast %539 : vector<1x128xf32> to vector<16x128xf32>
    %636 = arith.addf %634, %635 : vector<16x128xf32>
    %cst_487 = arith.constant 0.000000e+00 : f32
    %637 = vector.broadcast %cst_487 : f32 to vector<16x128xf32>
    %638 = arith.maximumf %636, %637 : vector<16x128xf32>
    %639 = arith.addf %633, %638 : vector<16x128xf32>
    %640 = vector.shape_cast %639 : vector<16x128xf32> to vector<1x16x128xf32>
    %641 = vector.shape_cast %640 : vector<1x16x128xf32> to vector<16x128xf32>
    %c0_488 = arith.constant 0 : index
    %c0_489 = arith.constant 0 : index
    %c0_490 = arith.constant 0 : index
    %642 = vector.load %arg11[%c0_488, %c0_489, %c0_490] : memref<4x1x32xf32, #tpu.memory_space<vmem>>, vector<1x1x32xf32>
    %643 = vector.shape_cast %642 : vector<1x1x32xf32> to vector<1x32xf32>
    %644 = vector.shape_cast %643 : vector<1x32xf32> to vector<1x1x32xf32>
    %c1_491 = arith.constant 1 : index
    %c0_492 = arith.constant 0 : index
    %c0_493 = arith.constant 0 : index
    %645 = vector.load %arg11[%c1_491, %c0_492, %c0_493] : memref<4x1x32xf32, #tpu.memory_space<vmem>>, vector<1x1x32xf32>
    %646 = vector.shape_cast %645 : vector<1x1x32xf32> to vector<1x32xf32>
    %647 = vector.shape_cast %646 : vector<1x32xf32> to vector<1x1x32xf32>
    %c2_494 = arith.constant 2 : index
    %c0_495 = arith.constant 0 : index
    %c0_496 = arith.constant 0 : index
    %648 = vector.load %arg11[%c2_494, %c0_495, %c0_496] : memref<4x1x32xf32, #tpu.memory_space<vmem>>, vector<1x1x32xf32>
    %649 = vector.shape_cast %648 : vector<1x1x32xf32> to vector<1x32xf32>
    %650 = vector.shape_cast %649 : vector<1x32xf32> to vector<1x1x32xf32>
    %c3_497 = arith.constant 3 : index
    %c0_498 = arith.constant 0 : index
    %c0_499 = arith.constant 0 : index
    %651 = vector.load %arg11[%c3_497, %c0_498, %c0_499] : memref<4x1x32xf32, #tpu.memory_space<vmem>>, vector<1x1x32xf32>
    %652 = vector.shape_cast %651 : vector<1x1x32xf32> to vector<1x32xf32>
    %653 = vector.shape_cast %652 : vector<1x32xf32> to vector<1x1x32xf32>
    %c7_500 = arith.constant 7 : index
    %c0_501 = arith.constant 0 : index
    %c0_502 = arith.constant 0 : index
    %c0_503 = arith.constant 0 : index
    %654 = vector.load %arg3[%c7_500, %c0_501, %c0_502, %c0_503] : memref<9x4x128x32xf32, #tpu.memory_space<vmem>>, vector<1x1x128x32xf32>
    %655 = vector.shape_cast %654 : vector<1x1x128x32xf32> to vector<128x32xf32>
    %c7_504 = arith.constant 7 : index
    %c1_505 = arith.constant 1 : index
    %c0_506 = arith.constant 0 : index
    %c0_507 = arith.constant 0 : index
    %656 = vector.load %arg3[%c7_504, %c1_505, %c0_506, %c0_507] : memref<9x4x128x32xf32, #tpu.memory_space<vmem>>, vector<1x1x128x32xf32>
    %657 = vector.shape_cast %656 : vector<1x1x128x32xf32> to vector<128x32xf32>
    %c7_508 = arith.constant 7 : index
    %c2_509 = arith.constant 2 : index
    %c0_510 = arith.constant 0 : index
    %c0_511 = arith.constant 0 : index
    %658 = vector.load %arg3[%c7_508, %c2_509, %c0_510, %c0_511] : memref<9x4x128x32xf32, #tpu.memory_space<vmem>>, vector<1x1x128x32xf32>
    %659 = vector.shape_cast %658 : vector<1x1x128x32xf32> to vector<128x32xf32>
    %c7_512 = arith.constant 7 : index
    %c3_513 = arith.constant 3 : index
    %c0_514 = arith.constant 0 : index
    %c0_515 = arith.constant 0 : index
    %660 = vector.load %arg3[%c7_512, %c3_513, %c0_514, %c0_515] : memref<9x4x128x32xf32, #tpu.memory_space<vmem>>, vector<1x1x128x32xf32>
    %661 = vector.shape_cast %660 : vector<1x1x128x32xf32> to vector<128x32xf32>
    %c10 = arith.constant 10 : index
    %c0_516 = arith.constant 0 : index
    %c0_517 = arith.constant 0 : index
    %c0_518 = arith.constant 0 : index
    %662 = vector.load %arg4[%c10, %c0_516, %c0_517, %c0_518] : memref<12x4x1x32xf32, #tpu.memory_space<vmem>>, vector<1x1x1x32xf32>
    %663 = vector.shape_cast %662 : vector<1x1x1x32xf32> to vector<1x32xf32>
    %c10_519 = arith.constant 10 : index
    %c1_520 = arith.constant 1 : index
    %c0_521 = arith.constant 0 : index
    %c0_522 = arith.constant 0 : index
    %664 = vector.load %arg4[%c10_519, %c1_520, %c0_521, %c0_522] : memref<12x4x1x32xf32, #tpu.memory_space<vmem>>, vector<1x1x1x32xf32>
    %665 = vector.shape_cast %664 : vector<1x1x1x32xf32> to vector<1x32xf32>
    %c10_523 = arith.constant 10 : index
    %c2_524 = arith.constant 2 : index
    %c0_525 = arith.constant 0 : index
    %c0_526 = arith.constant 0 : index
    %666 = vector.load %arg4[%c10_523, %c2_524, %c0_525, %c0_526] : memref<12x4x1x32xf32, #tpu.memory_space<vmem>>, vector<1x1x1x32xf32>
    %667 = vector.shape_cast %666 : vector<1x1x1x32xf32> to vector<1x32xf32>
    %c10_527 = arith.constant 10 : index
    %c3_528 = arith.constant 3 : index
    %c0_529 = arith.constant 0 : index
    %c0_530 = arith.constant 0 : index
    %668 = vector.load %arg4[%c10_527, %c3_528, %c0_529, %c0_530] : memref<12x4x1x32xf32, #tpu.memory_space<vmem>>, vector<1x1x1x32xf32>
    %669 = vector.shape_cast %668 : vector<1x1x1x32xf32> to vector<1x32xf32>
    %c8_531 = arith.constant 8 : index
    %c0_532 = arith.constant 0 : index
    %c0_533 = arith.constant 0 : index
    %c0_534 = arith.constant 0 : index
    %670 = vector.load %arg3[%c8_531, %c0_532, %c0_533, %c0_534] : memref<9x4x128x32xf32, #tpu.memory_space<vmem>>, vector<1x1x128x32xf32>
    %671 = vector.shape_cast %670 : vector<1x1x128x32xf32> to vector<128x32xf32>
    %c8_535 = arith.constant 8 : index
    %c1_536 = arith.constant 1 : index
    %c0_537 = arith.constant 0 : index
    %c0_538 = arith.constant 0 : index
    %672 = vector.load %arg3[%c8_535, %c1_536, %c0_537, %c0_538] : memref<9x4x128x32xf32, #tpu.memory_space<vmem>>, vector<1x1x128x32xf32>
    %673 = vector.shape_cast %672 : vector<1x1x128x32xf32> to vector<128x32xf32>
    %c8_539 = arith.constant 8 : index
    %c2_540 = arith.constant 2 : index
    %c0_541 = arith.constant 0 : index
    %c0_542 = arith.constant 0 : index
    %674 = vector.load %arg3[%c8_539, %c2_540, %c0_541, %c0_542] : memref<9x4x128x32xf32, #tpu.memory_space<vmem>>, vector<1x1x128x32xf32>
    %675 = vector.shape_cast %674 : vector<1x1x128x32xf32> to vector<128x32xf32>
    %c8_543 = arith.constant 8 : index
    %c3_544 = arith.constant 3 : index
    %c0_545 = arith.constant 0 : index
    %c0_546 = arith.constant 0 : index
    %676 = vector.load %arg3[%c8_543, %c3_544, %c0_545, %c0_546] : memref<9x4x128x32xf32, #tpu.memory_space<vmem>>, vector<1x1x128x32xf32>
    %677 = vector.shape_cast %676 : vector<1x1x128x32xf32> to vector<128x32xf32>
    %c11 = arith.constant 11 : index
    %c0_547 = arith.constant 0 : index
    %c0_548 = arith.constant 0 : index
    %c0_549 = arith.constant 0 : index
    %678 = vector.load %arg4[%c11, %c0_547, %c0_548, %c0_549] : memref<12x4x1x32xf32, #tpu.memory_space<vmem>>, vector<1x1x1x32xf32>
    %679 = vector.shape_cast %678 : vector<1x1x1x32xf32> to vector<1x32xf32>
    %c11_550 = arith.constant 11 : index
    %c1_551 = arith.constant 1 : index
    %c0_552 = arith.constant 0 : index
    %c0_553 = arith.constant 0 : index
    %680 = vector.load %arg4[%c11_550, %c1_551, %c0_552, %c0_553] : memref<12x4x1x32xf32, #tpu.memory_space<vmem>>, vector<1x1x1x32xf32>
    %681 = vector.shape_cast %680 : vector<1x1x1x32xf32> to vector<1x32xf32>
    %c11_554 = arith.constant 11 : index
    %c2_555 = arith.constant 2 : index
    %c0_556 = arith.constant 0 : index
    %c0_557 = arith.constant 0 : index
    %682 = vector.load %arg4[%c11_554, %c2_555, %c0_556, %c0_557] : memref<12x4x1x32xf32, #tpu.memory_space<vmem>>, vector<1x1x1x32xf32>
    %683 = vector.shape_cast %682 : vector<1x1x1x32xf32> to vector<1x32xf32>
    %c11_558 = arith.constant 11 : index
    %c3_559 = arith.constant 3 : index
    %c0_560 = arith.constant 0 : index
    %c0_561 = arith.constant 0 : index
    %684 = vector.load %arg4[%c11_558, %c3_559, %c0_560, %c0_561] : memref<12x4x1x32xf32, #tpu.memory_space<vmem>>, vector<1x1x1x32xf32>
    %685 = vector.shape_cast %684 : vector<1x1x1x32xf32> to vector<1x32xf32>
    %c4_562 = arith.constant 4 : index
    %c0_563 = arith.constant 0 : index
    %c0_564 = arith.constant 0 : index
    %686 = vector.load %arg5[%c4_562, %c0_563, %c0_564] : memref<5x128x128xf32, #tpu.memory_space<vmem>>, vector<1x128x128xf32>
    %687 = vector.shape_cast %686 : vector<1x128x128xf32> to vector<128x128xf32>
    %c4_565 = arith.constant 4 : index
    %c0_566 = arith.constant 0 : index
    %c0_567 = arith.constant 0 : index
    %688 = vector.load %arg6[%c4_565, %c0_566, %c0_567] : memref<5x1x128xf32, #tpu.memory_space<vmem>>, vector<1x1x128xf32>
    %689 = vector.shape_cast %688 : vector<1x1x128xf32> to vector<1x128xf32>
    %cst_568 = arith.constant dense<0.000000e+00> : vector<16x32xf32>
    %690 = tpu.matmul %641, %655, %cst_568 {dimension_numbers = #tpu.dot_dimension_numbers<[1], [0], [0], [1], [0, 0, 1, 1], [], []>} : vector<16x128xf32>, vector<128x32xf32>, vector<16x32xf32> -> vector<16x32xf32>
    %691 = vector.broadcast %663 : vector<1x32xf32> to vector<16x32xf32>
    %692 = arith.addf %690, %691 : vector<16x32xf32>
    %693 = vector.shape_cast %692 : vector<16x32xf32> to vector<1x16x32xf32>
    %cst_569 = arith.constant dense<0.000000e+00> : vector<16x32xf32>
    %694 = tpu.matmul %641, %671, %cst_569 {dimension_numbers = #tpu.dot_dimension_numbers<[1], [0], [0], [1], [0, 0, 1, 1], [], []>} : vector<16x128xf32>, vector<128x32xf32>, vector<16x32xf32> -> vector<16x32xf32>
    %695 = vector.broadcast %679 : vector<1x32xf32> to vector<16x32xf32>
    %696 = arith.addf %694, %695 : vector<16x32xf32>
    %697 = vector.shape_cast %696 : vector<16x32xf32> to vector<1x16x32xf32>
    "tpu.trace_start"() <{level = 10 : i32, message = "bqe,bke->bqk"}> : () -> ()
    %cst_570 = arith.constant dense<0.000000e+00> : vector<1x1x16xf32>
    %698 = tpu.matmul %644, %693, %cst_570 {dimension_numbers = #tpu.dot_dimension_numbers<[2], [2], [1], [1], [0, 0, 0, 1, 1, 1], [0], [0]>} : vector<1x1x32xf32>, vector<1x16x32xf32>, vector<1x1x16xf32> -> vector<1x1x16xf32>
    "tpu.trace_stop"() : () -> ()
    %cst_571 = arith.constant 0.0883883461 : f32
    %699 = vector.broadcast %cst_571 : f32 to vector<1x1x16xf32>
    %700 = arith.mulf %698, %699 : vector<1x1x16xf32>
    %cst_572 = arith.constant dense<0xFF800000> : vector<1x1xf32>
    %701 = vector.multi_reduction <maximumf>, %700, %cst_572 [2] : vector<1x1x16xf32> to vector<1x1xf32>
    %702 = vector.shape_cast %701 : vector<1x1xf32> to vector<1x1x1xf32>
    %703 = vector.broadcast %702 : vector<1x1x1xf32> to vector<1x1x16xf32>
    %704 = arith.subf %700, %703 : vector<1x1x16xf32>
    %705 = math.exp %704 : vector<1x1x16xf32>
    %cst_573 = arith.constant dense<0.000000e+00> : vector<1x1xf32>
    %706 = vector.multi_reduction <add>, %705, %cst_573 [2] : vector<1x1x16xf32> to vector<1x1xf32>
    %707 = vector.shape_cast %706 : vector<1x1xf32> to vector<1x1x1xf32>
    %708 = tpu.reciprocal %707 {approx = true} : vector<1x1x1xf32> -> vector<1x1x1xf32>
    %709 = vector.broadcast %708 : vector<1x1x1xf32> to vector<1x1x16xf32>
    %710 = arith.mulf %705, %709 : vector<1x1x16xf32>
    "tpu.trace_start"() <{level = 10 : i32, message = "bqk,bke->bqe"}> : () -> ()
    %cst_574 = arith.constant dense<0.000000e+00> : vector<1x1x32xf32>
    %711 = tpu.matmul %710, %697, %cst_574 {dimension_numbers = #tpu.dot_dimension_numbers<[2], [1], [1], [2], [0, 0, 0, 1, 1, 2], [0], [0]>} : vector<1x1x16xf32>, vector<1x16x32xf32>, vector<1x1x32xf32> -> vector<1x1x32xf32>
    "tpu.trace_stop"() : () -> ()
    %712 = arith.addf %644, %711 : vector<1x1x32xf32>
    %cst_575 = arith.constant dense<0.000000e+00> : vector<16x32xf32>
    %713 = tpu.matmul %641, %657, %cst_575 {dimension_numbers = #tpu.dot_dimension_numbers<[1], [0], [0], [1], [0, 0, 1, 1], [], []>} : vector<16x128xf32>, vector<128x32xf32>, vector<16x32xf32> -> vector<16x32xf32>
    %714 = vector.broadcast %665 : vector<1x32xf32> to vector<16x32xf32>
    %715 = arith.addf %713, %714 : vector<16x32xf32>
    %716 = vector.shape_cast %715 : vector<16x32xf32> to vector<1x16x32xf32>
    %cst_576 = arith.constant dense<0.000000e+00> : vector<16x32xf32>
    %717 = tpu.matmul %641, %673, %cst_576 {dimension_numbers = #tpu.dot_dimension_numbers<[1], [0], [0], [1], [0, 0, 1, 1], [], []>} : vector<16x128xf32>, vector<128x32xf32>, vector<16x32xf32> -> vector<16x32xf32>
    %718 = vector.broadcast %681 : vector<1x32xf32> to vector<16x32xf32>
    %719 = arith.addf %717, %718 : vector<16x32xf32>
    %720 = vector.shape_cast %719 : vector<16x32xf32> to vector<1x16x32xf32>
    "tpu.trace_start"() <{level = 10 : i32, message = "bqe,bke->bqk"}> : () -> ()
    %cst_577 = arith.constant dense<0.000000e+00> : vector<1x1x16xf32>
    %721 = tpu.matmul %647, %716, %cst_577 {dimension_numbers = #tpu.dot_dimension_numbers<[2], [2], [1], [1], [0, 0, 0, 1, 1, 1], [0], [0]>} : vector<1x1x32xf32>, vector<1x16x32xf32>, vector<1x1x16xf32> -> vector<1x1x16xf32>
    "tpu.trace_stop"() : () -> ()
    %cst_578 = arith.constant 0.0883883461 : f32
    %722 = vector.broadcast %cst_578 : f32 to vector<1x1x16xf32>
    %723 = arith.mulf %721, %722 : vector<1x1x16xf32>
    %cst_579 = arith.constant dense<0xFF800000> : vector<1x1xf32>
    %724 = vector.multi_reduction <maximumf>, %723, %cst_579 [2] : vector<1x1x16xf32> to vector<1x1xf32>
    %725 = vector.shape_cast %724 : vector<1x1xf32> to vector<1x1x1xf32>
    %726 = vector.broadcast %725 : vector<1x1x1xf32> to vector<1x1x16xf32>
    %727 = arith.subf %723, %726 : vector<1x1x16xf32>
    %728 = math.exp %727 : vector<1x1x16xf32>
    %cst_580 = arith.constant dense<0.000000e+00> : vector<1x1xf32>
    %729 = vector.multi_reduction <add>, %728, %cst_580 [2] : vector<1x1x16xf32> to vector<1x1xf32>
    %730 = vector.shape_cast %729 : vector<1x1xf32> to vector<1x1x1xf32>
    %731 = tpu.reciprocal %730 {approx = true} : vector<1x1x1xf32> -> vector<1x1x1xf32>
    %732 = vector.broadcast %731 : vector<1x1x1xf32> to vector<1x1x16xf32>
    %733 = arith.mulf %728, %732 : vector<1x1x16xf32>
    "tpu.trace_start"() <{level = 10 : i32, message = "bqk,bke->bqe"}> : () -> ()
    %cst_581 = arith.constant dense<0.000000e+00> : vector<1x1x32xf32>
    %734 = tpu.matmul %733, %720, %cst_581 {dimension_numbers = #tpu.dot_dimension_numbers<[2], [1], [1], [2], [0, 0, 0, 1, 1, 2], [0], [0]>} : vector<1x1x16xf32>, vector<1x16x32xf32>, vector<1x1x32xf32> -> vector<1x1x32xf32>
    "tpu.trace_stop"() : () -> ()
    %735 = arith.addf %647, %734 : vector<1x1x32xf32>
    %cst_582 = arith.constant dense<0.000000e+00> : vector<16x32xf32>
    %736 = tpu.matmul %641, %659, %cst_582 {dimension_numbers = #tpu.dot_dimension_numbers<[1], [0], [0], [1], [0, 0, 1, 1], [], []>} : vector<16x128xf32>, vector<128x32xf32>, vector<16x32xf32> -> vector<16x32xf32>
    %737 = vector.broadcast %667 : vector<1x32xf32> to vector<16x32xf32>
    %738 = arith.addf %736, %737 : vector<16x32xf32>
    %739 = vector.shape_cast %738 : vector<16x32xf32> to vector<1x16x32xf32>
    %cst_583 = arith.constant dense<0.000000e+00> : vector<16x32xf32>
    %740 = tpu.matmul %641, %675, %cst_583 {dimension_numbers = #tpu.dot_dimension_numbers<[1], [0], [0], [1], [0, 0, 1, 1], [], []>} : vector<16x128xf32>, vector<128x32xf32>, vector<16x32xf32> -> vector<16x32xf32>
    %741 = vector.broadcast %683 : vector<1x32xf32> to vector<16x32xf32>
    %742 = arith.addf %740, %741 : vector<16x32xf32>
    %743 = vector.shape_cast %742 : vector<16x32xf32> to vector<1x16x32xf32>
    "tpu.trace_start"() <{level = 10 : i32, message = "bqe,bke->bqk"}> : () -> ()
    %cst_584 = arith.constant dense<0.000000e+00> : vector<1x1x16xf32>
    %744 = tpu.matmul %650, %739, %cst_584 {dimension_numbers = #tpu.dot_dimension_numbers<[2], [2], [1], [1], [0, 0, 0, 1, 1, 1], [0], [0]>} : vector<1x1x32xf32>, vector<1x16x32xf32>, vector<1x1x16xf32> -> vector<1x1x16xf32>
    "tpu.trace_stop"() : () -> ()
    %cst_585 = arith.constant 0.0883883461 : f32
    %745 = vector.broadcast %cst_585 : f32 to vector<1x1x16xf32>
    %746 = arith.mulf %744, %745 : vector<1x1x16xf32>
    %cst_586 = arith.constant dense<0xFF800000> : vector<1x1xf32>
    %747 = vector.multi_reduction <maximumf>, %746, %cst_586 [2] : vector<1x1x16xf32> to vector<1x1xf32>
    %748 = vector.shape_cast %747 : vector<1x1xf32> to vector<1x1x1xf32>
    %749 = vector.broadcast %748 : vector<1x1x1xf32> to vector<1x1x16xf32>
    %750 = arith.subf %746, %749 : vector<1x1x16xf32>
    %751 = math.exp %750 : vector<1x1x16xf32>
    %cst_587 = arith.constant dense<0.000000e+00> : vector<1x1xf32>
    %752 = vector.multi_reduction <add>, %751, %cst_587 [2] : vector<1x1x16xf32> to vector<1x1xf32>
    %753 = vector.shape_cast %752 : vector<1x1xf32> to vector<1x1x1xf32>
    %754 = tpu.reciprocal %753 {approx = true} : vector<1x1x1xf32> -> vector<1x1x1xf32>
    %755 = vector.broadcast %754 : vector<1x1x1xf32> to vector<1x1x16xf32>
    %756 = arith.mulf %751, %755 : vector<1x1x16xf32>
    "tpu.trace_start"() <{level = 10 : i32, message = "bqk,bke->bqe"}> : () -> ()
    %cst_588 = arith.constant dense<0.000000e+00> : vector<1x1x32xf32>
    %757 = tpu.matmul %756, %743, %cst_588 {dimension_numbers = #tpu.dot_dimension_numbers<[2], [1], [1], [2], [0, 0, 0, 1, 1, 2], [0], [0]>} : vector<1x1x16xf32>, vector<1x16x32xf32>, vector<1x1x32xf32> -> vector<1x1x32xf32>
    "tpu.trace_stop"() : () -> ()
    %758 = arith.addf %650, %757 : vector<1x1x32xf32>
    %cst_589 = arith.constant dense<0.000000e+00> : vector<16x32xf32>
    %759 = tpu.matmul %641, %661, %cst_589 {dimension_numbers = #tpu.dot_dimension_numbers<[1], [0], [0], [1], [0, 0, 1, 1], [], []>} : vector<16x128xf32>, vector<128x32xf32>, vector<16x32xf32> -> vector<16x32xf32>
    %760 = vector.broadcast %669 : vector<1x32xf32> to vector<16x32xf32>
    %761 = arith.addf %759, %760 : vector<16x32xf32>
    %762 = vector.shape_cast %761 : vector<16x32xf32> to vector<1x16x32xf32>
    %cst_590 = arith.constant dense<0.000000e+00> : vector<16x32xf32>
    %763 = tpu.matmul %641, %677, %cst_590 {dimension_numbers = #tpu.dot_dimension_numbers<[1], [0], [0], [1], [0, 0, 1, 1], [], []>} : vector<16x128xf32>, vector<128x32xf32>, vector<16x32xf32> -> vector<16x32xf32>
    %764 = vector.broadcast %685 : vector<1x32xf32> to vector<16x32xf32>
    %765 = arith.addf %763, %764 : vector<16x32xf32>
    %766 = vector.shape_cast %765 : vector<16x32xf32> to vector<1x16x32xf32>
    "tpu.trace_start"() <{level = 10 : i32, message = "bqe,bke->bqk"}> : () -> ()
    %cst_591 = arith.constant dense<0.000000e+00> : vector<1x1x16xf32>
    %767 = tpu.matmul %653, %762, %cst_591 {dimension_numbers = #tpu.dot_dimension_numbers<[2], [2], [1], [1], [0, 0, 0, 1, 1, 1], [0], [0]>} : vector<1x1x32xf32>, vector<1x16x32xf32>, vector<1x1x16xf32> -> vector<1x1x16xf32>
    "tpu.trace_stop"() : () -> ()
    %cst_592 = arith.constant 0.0883883461 : f32
    %768 = vector.broadcast %cst_592 : f32 to vector<1x1x16xf32>
    %769 = arith.mulf %767, %768 : vector<1x1x16xf32>
    %cst_593 = arith.constant dense<0xFF800000> : vector<1x1xf32>
    %770 = vector.multi_reduction <maximumf>, %769, %cst_593 [2] : vector<1x1x16xf32> to vector<1x1xf32>
    %771 = vector.shape_cast %770 : vector<1x1xf32> to vector<1x1x1xf32>
    %772 = vector.broadcast %771 : vector<1x1x1xf32> to vector<1x1x16xf32>
    %773 = arith.subf %769, %772 : vector<1x1x16xf32>
    %774 = math.exp %773 : vector<1x1x16xf32>
    %cst_594 = arith.constant dense<0.000000e+00> : vector<1x1xf32>
    %775 = vector.multi_reduction <add>, %774, %cst_594 [2] : vector<1x1x16xf32> to vector<1x1xf32>
    %776 = vector.shape_cast %775 : vector<1x1xf32> to vector<1x1x1xf32>
    %777 = tpu.reciprocal %776 {approx = true} : vector<1x1x1xf32> -> vector<1x1x1xf32>
    %778 = vector.broadcast %777 : vector<1x1x1xf32> to vector<1x1x16xf32>
    %779 = arith.mulf %774, %778 : vector<1x1x16xf32>
    "tpu.trace_start"() <{level = 10 : i32, message = "bqk,bke->bqe"}> : () -> ()
    %cst_595 = arith.constant dense<0.000000e+00> : vector<1x1x32xf32>
    %780 = tpu.matmul %779, %766, %cst_595 {dimension_numbers = #tpu.dot_dimension_numbers<[2], [1], [1], [2], [0, 0, 0, 1, 1, 2], [0], [0]>} : vector<1x1x16xf32>, vector<1x16x32xf32>, vector<1x1x32xf32> -> vector<1x1x32xf32>
    "tpu.trace_stop"() : () -> ()
    %781 = arith.addf %653, %780 : vector<1x1x32xf32>
    %782 = tpu.concatenate %712, %735, %758, %781 in 2 : vector<1x1x32xf32>, vector<1x1x32xf32>, vector<1x1x32xf32>, vector<1x1x32xf32> -> vector<1x1x128xf32>
    %783 = vector.shape_cast %782 : vector<1x1x128xf32> to vector<1x128xf32>
    %cst_596 = arith.constant dense<0.000000e+00> : vector<1x128xf32>
    %784 = tpu.matmul %783, %687, %cst_596 {dimension_numbers = #tpu.dot_dimension_numbers<[1], [0], [0], [1], [0, 0, 1, 1], [], []>} : vector<1x128xf32>, vector<128x128xf32>, vector<1x128xf32> -> vector<1x128xf32>
    %785 = arith.addf %784, %689 : vector<1x128xf32>
    %cst_597 = arith.constant 0.000000e+00 : f32
    %786 = vector.broadcast %cst_597 : f32 to vector<1x128xf32>
    %787 = arith.maximumf %785, %786 : vector<1x128xf32>
    %788 = arith.addf %783, %787 : vector<1x128xf32>
    %789 = vector.shape_cast %788 : vector<1x128xf32> to vector<1x1x128xf32>
    %790 = vector.shape_cast %789 : vector<1x1x128xf32> to vector<1x128xf32>
    %c0_598 = arith.constant 0 : index
    %c0_599 = arith.constant 0 : index
    %791 = vector.load %arg7[%c0_598, %c0_599] : memref<128x128xf32, #tpu.memory_space<vmem>>, vector<128x128xf32>
    %cst_600 = arith.constant dense<0.000000e+00> : vector<1x128xf32>
    %792 = tpu.matmul %790, %791, %cst_600 {dimension_numbers = #tpu.dot_dimension_numbers<[1], [0], [0], [1], [0, 0, 1, 1], [], []>} : vector<1x128xf32>, vector<128x128xf32>, vector<1x128xf32> -> vector<1x128xf32>
    %c0_601 = arith.constant 0 : index
    %c0_602 = arith.constant 0 : index
    %793 = vector.load %arg8[%c0_601, %c0_602] : memref<1x128xf32, #tpu.memory_space<vmem>>, vector<1x128xf32>
    %794 = arith.addf %792, %793 : vector<1x128xf32>
    %795 = vector.shape_cast %794 : vector<1x128xf32> to vector<1x1x128xf32>
    %c0_603 = arith.constant 0 : index
    %c0_604 = arith.constant 0 : index
    %c0_605 = arith.constant 0 : index
    %796 = vector.load %arg12[%c0_603, %c0_604, %c0_605] : memref<1x1x128xf32, #tpu.memory_space<vmem>>, vector<1x1x128xf32>
    tpu.vector_store %arg12[%c0_603, %c0_604, %c0_605], %795 {strides = array<i32>} : memref<1x1x128xf32, #tpu.memory_space<vmem>>, vector<1x1x128xf32>,
    return
  }
  func.func @transform_0(%arg0: i32) -> (i32, i32, i32) {
    %c0_i32 = arith.constant 0 : i32
    %c0_i32_0 = arith.constant 0 : i32
    %c0_i32_1 = arith.constant 0 : i32
    return %arg0, %c0_i32, %c0_i32_0 : i32, i32, i32
  }
  func.func @transform_1(%arg0: i32) -> (i32, i32, i32, i32) {
    %c0_i32 = arith.constant 0 : i32
    %c0_i32_0 = arith.constant 0 : i32
    %c0_i32_1 = arith.constant 0 : i32
    %c0_i32_2 = arith.constant 0 : i32
    %c0_i32_3 = arith.constant 0 : i32
    return %c0_i32, %c0_i32_0, %c0_i32_1, %c0_i32_2 : i32, i32, i32, i32
  }
  func.func @transform_2(%arg0: i32) -> (i32, i32, i32, i32) {
    %c0_i32 = arith.constant 0 : i32
    %c0_i32_0 = arith.constant 0 : i32
    %c0_i32_1 = arith.constant 0 : i32
    %c0_i32_2 = arith.constant 0 : i32
    %c0_i32_3 = arith.constant 0 : i32
    return %c0_i32, %c0_i32_0, %c0_i32_1, %c0_i32_2 : i32, i32, i32, i32
  }
  func.func @transform_3(%arg0: i32) -> (i32, i32, i32, i32) {
    %c0_i32 = arith.constant 0 : i32
    %c0_i32_0 = arith.constant 0 : i32
    %c0_i32_1 = arith.constant 0 : i32
    %c0_i32_2 = arith.constant 0 : i32
    %c0_i32_3 = arith.constant 0 : i32
    return %c0_i32, %c0_i32_0, %c0_i32_1, %c0_i32_2 : i32, i32, i32, i32
  }
  func.func @transform_4(%arg0: i32) -> (i32, i32, i32) {
    %c0_i32 = arith.constant 0 : i32
    %c0_i32_0 = arith.constant 0 : i32
    %c0_i32_1 = arith.constant 0 : i32
    %c0_i32_2 = arith.constant 0 : i32
    return %c0_i32, %c0_i32_0, %c0_i32_1 : i32, i32, i32
  }
  func.func @transform_5(%arg0: i32) -> (i32, i32, i32) {
    %c0_i32 = arith.constant 0 : i32
    %c0_i32_0 = arith.constant 0 : i32
    %c0_i32_1 = arith.constant 0 : i32
    %c0_i32_2 = arith.constant 0 : i32
    return %c0_i32, %c0_i32_0, %c0_i32_1 : i32, i32, i32
  }
  func.func @transform_6(%arg0: i32) -> (i32, i32) {
    %c0_i32 = arith.constant 0 : i32
    %c0_i32_0 = arith.constant 0 : i32
    %c0_i32_1 = arith.constant 0 : i32
    return %c0_i32, %c0_i32_0 : i32, i32
  }
  func.func @transform_7(%arg0: i32) -> (i32, i32) {
    %c0_i32 = arith.constant 0 : i32
    %c0_i32_0 = arith.constant 0 : i32
    %c0_i32_1 = arith.constant 0 : i32
    return %c0_i32, %c0_i32_0 : i32, i32
  }
  func.func @transform_8(%arg0: i32) -> (i32, i32, i32) {
    %c0_i32 = arith.constant 0 : i32
    %c0_i32_0 = arith.constant 0 : i32
    %c0_i32_1 = arith.constant 0 : i32
    %c0_i32_2 = arith.constant 0 : i32
    return %c0_i32, %c0_i32_0, %c0_i32_1 : i32, i32, i32
  }
  func.func @transform_9(%arg0: i32) -> (i32, i32, i32) {
    %c0_i32 = arith.constant 0 : i32
    %c0_i32_0 = arith.constant 0 : i32
    %c0_i32_1 = arith.constant 0 : i32
    %c0_i32_2 = arith.constant 0 : i32
    return %c0_i32, %c0_i32_0, %c0_i32_1 : i32, i32, i32
  }
  func.func @transform_10(%arg0: i32) -> (i32, i32, i32) {
    %c0_i32 = arith.constant 0 : i32
    %c0_i32_0 = arith.constant 0 : i32
    %c0_i32_1 = arith.constant 0 : i32
    %c0_i32_2 = arith.constant 0 : i32
    return %c0_i32, %c0_i32_0, %c0_i32_1 : i32, i32, i32
  }
  func.func @transform_11(%arg0: i32) -> (i32, i32, i32) {
    %c0_i32 = arith.constant 0 : i32
    %c0_i32_0 = arith.constant 0 : i32
    %c0_i32_1 = arith.constant 0 : i32
    return %arg0, %c0_i32, %c0_i32_0 : i32, i32, i32
  }
}

</mosaic_0001>

<bundles_post_ra>
// kernel: set_transformer_forward.1
= control target key start
LH: loop header
LB: loop body
LE: loop exit
PB: predicated region body
PF: predicated region fallthrough
CT: control target
= control target key end

     0   :  { %s19963_s0 = inlined_call_operand.vmem [shape: f32[2,16,6], index: 0, kind: input, shape index: {}]   ;;  %s19964_s1 = inlined_call_operand.vmem [shape: f32[3,4,6,32], index: 1, kind: input, shape index: {}]   ;;  %s19965_s2 = inlined_call_operand.vmem [shape: f32[9,4,128,32], index: 2, kind: input, shape index: {}]   ;;  %s19966_s3 = inlined_call_operand.vmem [shape: f32[12,4,1,32], index: 3, kind: input, shape index: {}]   ;;  %s19967_s4 = inlined_call_operand.vmem [shape: f32[5,128,128], index: 4, kind: input, shape index: {}]   ;;  %s19968_s5 = inlined_call_operand.vmem [shape: f32[5,1,128], index: 5, kind: input, shape index: {}]   ;;  %s19969_s6 = inlined_call_operand.vmem [shape: f32[128,128], index: 6, kind: input, shape index: {}]   ;;  %s19970_s7 = inlined_call_operand.vmem [shape: f32[1,128], index: 7, kind: input, shape index: {}]   ;;  %s19971_s8 = inlined_call_operand.vmem [shape: f32[4,32,32], index: 8, kind: input, shape index: {}]   ;;  %s19972_s9 = inlined_call_operand.vmem [shape: f32[4,32,32], index: 9, kind: input, shape index: {}]   ;;  %s19973_s10 = inlined_call_operand.vmem [shape: f32[4,1,32], index: 10, kind: input, shape index: {}]   ;;  %s19974_s11 = inlined_call_operand.hbm [shape: f32[2,1,128], index: 11, kind: output, shape index: {}]  }
   0x1   :  { %19981 = sst [smem:[#allocation5_spill]] %s19963_s0 }
   0x2   :  { %19982 = sst [smem:[#allocation6_spill]] %s19964_s1 }
   0x3   :  { %19983 = sst [smem:[#allocation7_spill]] %s19971_s8 }
   0x4   :  { %16 = vsyncpa [#allocation3], 0 }
   0x5   :  { %18 = vsyncpa [#allocation3 + $0x1], 0  ;;  %s16407_s17 = smov 0   ;;  %s16409_s18 = smov 0  }
   0x6   :  { %s16411_s19 = smov 0   ;;  %s16413_s20 = smov 0  }
   0x7 LB: > { %s16428_s21 = sadd.s32 4294967295, %s16338_s20   ;;  %s10429_s22 = sadd.s32 4294967294, %s16338_s20   ;;  %s16338_s20 = sphi %s16413_s20, %s19997_s20   ;;  %s16334_s19 = sphi %s16411_s19, %s19996_s19   ;;  %s16330_s18 = sphi %s16409_s18, %s19995_s18   ;;  %s16326_s17 = sphi %s16407_s17, %s19994_s17  }
   0x8   : > { %s16432_s23 = sadd.s32 1, %s16338_s20   ;;  %s267_s24 = sadd.s32 1, %s16334_s19 }
   0x9   : > { %s264_s25 = ssub.s32 %s16338_s20, %s16432_s23  ;;  %p277_p0 = scmp.ne.s32.totalorder %s16334_s19, %s16330_s18 }
   0xa   : > { %p265_p1 = scmp.eq.s32.totalorder %s264_s25, 0  ;;  %p278_p2 = scmp.eq.s32.totalorder %s16428_s21, 1 }
   0xb   : > { %p283_p3 = scmp.ne.s32.totalorder %s16330_s18, %s16326_s17  ;;  %p284_p4 = scmp.eq.s32.totalorder %s10429_s22, 1 }
   0xc   : > { %s16443_s26 = scalar_select %p265_p1, %s16334_s19, %s267_s24  }
   0xd   : > { %p16445_p5 = por %p278_p2, %p277_p0  ;;  %p16449_p6 = por %p284_p4, %p283_p3 }
   0xe   : > { %p10432_p7 = scmp.ge.s32.totalorder %s16338_s20, 1  ;;  %p340_p8 = scmp.lt.s32.totalorder %s16338_s20, 3 }
  0x10   : > { %p341_p9 = pnand %p10432_p7, %p340_p8 }
  0x11   : > { %s19986_s1 = sld [smem:[#allocation6_spill]] (!%p341_p9)  ;;  %vm465_vm0 = vcmask (!%p341_p9), 1045504   ;;  %p379_p10 = scmp.lt.s32.totalorder (!%p341_p9), %s16428_s21, 1  ;;  %vm458_vm1 = vcmask (!%p341_p9), 48128   ;;  %vm628_vm2 = vcmask (!%p341_p9), 261120   ;;  %vm736_vm4 = vcmask (!%p341_p9), 130048  }
  0x12   : > { %344 = sbr.rel (%p341_p9) target bundleno = 16465 (0x4051), region = 64  ;;  %s19987_s0 = sld [smem:[#allocation5_spill]] (!%p341_p9)  ;;  %v10461_v4 = vld [vmem:[%s19966_s3] ss:$0 sm:$0xff] (!%p341_p9)  ;;  %vm16484_vm3 = vmpackc.low (!%p341_p9), %vm628_vm2, %vm628_vm2  ;;  %v10465_v48 = vld [vmem:[%s19966_s3 + $0x4] ss:$0 sm:$0xff] (!%p341_p9) }
  0x13   : > { %s19988_s8 = sld [smem:[#allocation7_spill]] (!%p341_p9)  ;;  %s19975_s25 = smov (!%p341_p9), 32   ;;  %vm2194_vm5 = vcmask (!%p341_p9), 523264   ;;  %vm2199_vm6 = vcmask (!%p341_p9), 785408   ;;  %vm16344_vm7 = vmmov (!%p341_p9), 0   ;;  %vm9107_vm8 = vcmask (!%p341_p9), 122880  }
  0x14   : > { %s19977_s29 = smov (!%p341_p9), 64   ;;  %s19991_s14 = smov (!%p341_p9), 64  }
  0x15   : > { %s377_s15 = sand.u32 (!%p341_p9), 1, %s16330_s18  }
  0x17   : > { %v405_v0 = vld [vmem:[%s19986_s1] sm:$0x3f] (!%p341_p9)  ;;  %v10447_v53 = vld [vmem:[%s19986_s1 + $0x8] sm:$0x3f] (!%p341_p9) }
  0x18   : > { %12442 = vmatprep.subr.msk.mxu0 (!%p341_p9), %vm465_vm0, %v405_v0  ;;  %v10453_v14 = vld [vmem:[%s19986_s1 + $0x20] sm:$0x3f] (!%p341_p9) }
  0x19   : > { %12443 = vmatpush3.msk.msra.mxu0 %vm465_vm0, %v405_v0  ;;  %s380_s12 = scalar_select %p379_p10, %s16428_s21, 1  ;;  %v386_v3 = vld [vmem:[%s19988_s8] sm:$0xff]  ;;  %v387_v11 = vld [vmem:[%s19988_s8 + $0x8] sm:$0xff]  ;;  %v388_v12 = vld [vmem:[%s19988_s8 + $0x10] sm:$0xff]  ;;  %12447 = vmatprep.subr.msk.mxu1 %vm465_vm0, %v10453_v14 }
  0x1a   : > { %v389_v13 = vld [vmem:[%s19988_s8 + $0x18] sm:$0xff]  ;;  %12448 = vmatpush3.msk.msra.mxu1 %vm465_vm0, %v10453_v14 }
  0x1b   : > { %s11399_s13 = sshll.u32 %s380_s12, 4  ;;  %s19992_s12 = smov 32  }
  0x1c   : > { %s383_s16 = scalar_lea.vmem %s19987_s0, %s11399_s13 }
  0x1d   : > { %v16465_v1 = vld [vmem:[%s383_s16] sm:$0xff]  ;;  %v16467_v2 = vld [vmem:[%s383_s16 + $0x8] sm:$0xff] }
  0x1e   : > { %12444 = vmatprep.mubr.msk.f32.mxu0 %vm458_vm1, %v16465_v1  ;;  %12449 = vmatprep.mubr.msk.f32.mxu1 %vm458_vm1, %v16465_v1 }
  0x1f   : > { %12445 = vmatmul.mubr.msk.f32.vlgmr.msra.gmra.mrb[0].mxu0 %vm458_vm1, %v16467_v2  ;;  %12450 = vmatmul.mubr.msk.f32.vlgmr.msra.gmra.mrb[0].mxu1 %vm458_vm1, %v16467_v2 }
  0x20   : > { %12456 = vmatprep.mubr.msk.f32.mxu0 %vm628_vm2, %v386_v3 }
  0xf2   : > { %v12446_v5 = vpop.f32.mrb[0].mxu0  ;;  %v12451_v47 = vpop.f32.mrb[0].mxu1 }
  0xf3   : > { %v541_v6 = vadd.f32 %v12446_v5, %v10461_v4  ;;  %v535_v7 = vpop.f32.mrb[1].mxu0  ;;  %v625_v49 = vadd.f32 %v12451_v47, %v10465_v48  ;;  %v619_v50 = vpop.f32.mrb[1].mxu1 }
  0xf4   : > { %v536_v8 = vadd.f32 %v10461_v4, %v535_v7  ;;  %v620_v51 = vadd.f32 %v10465_v48, %v619_v50  ;;  %v16540_v4 = vld [vmem:[%s19988_s8 + $0x20] sm:$0xff] }
  0xf6   : > { %v14418_v10 = vpack.c.bf16 %v541_v6, %v536_v8  ;;  %v14424_v52 = vpack.c.bf16 %v625_v49, %v620_v51 }
  0xf8   : > { %14420 = vmatprep.subr.msk.bf16.mxu0 %vm16484_vm3, %v14418_v10  ;;  %14425 = vmatprep.subr.bf16.mxu1 %v14424_v52 }
  0xf9   : > { %14423 = vmatpush3.bf16.xpose.msk.msra.mxu0 %vm16484_vm3, %v14418_v10  ;;  %14427 = vmatpush3.bf16.msra.mxu1 %v14424_v52  ;;  %v10479_v10 = vld [vmem:[%s19966_s3 + $0x1] ss:$0 sm:$0xff] }
  0xfa   : > { %12472 = vmatprep.subr.msk.mxu1 %vm465_vm0, %v10447_v53 }
 0x100   : > { %12457 = vmatmul.mubr.msk.f32.vlgmr.msra.gmra.mrb[2].mxu0 %vm628_vm2, %v387_v11 }
 0x101   : > { %12459 = vmatprep.mubr.msk.f32.mxu0 %vm628_vm2, %v388_v12 }
 0x104   : > { %12460 = vmatmul.mubr.msk.f32.gmra.mrb[4].mxu0 %vm628_vm2, %v389_v13 }
 0x105   : > { %12479 = vmatprep.mubr.msk.f32.mxu0 %vm458_vm1, %v16465_v1 }
 0x1d3   : > { %v12458_v15 = vpop.f32.mrb[2].mxu0 }
 0x1d4   : > { %v713_v16 = vpop.f32.mrb[3].mxu0  ;;  %v733_v18 = vmul.f32 0.088388346, %v12458_v15 }
 0x1d5   : > { %v732_v17 = vmul.f32 0.088388346, %v713_v16  ;;  %v16562_v16 = vld [vmem:[%s19988_s8 + $0x28] sm:$0xff] }
 0x1d6   : > { %v740_v24 = vsel %vm736_vm4, %v733_v18, -inf }
 0x1d7   : > { %v12461_v19 = vpop.f32.mrb[4].mxu0  ;;  %v737_v20 = vsel %vm736_vm4, %v732_v17, -inf }
 0x1d8   : > { %738 = vmax.xlane.f32.xlu0 %v737_v20  ;;  %v723_v21 = vpop.f32.mrb[5].mxu0  ;;  %v735_v23 = vmul.f32 0.088388346, %v12461_v19  ;;  %v10454_v19 = vld [vmem:[%s19986_s1 + $0x28] sm:$0x3f] }
 0x1d9   : > { %v734_v22 = vmul.f32 0.088388346, %v723_v21  ;;  %12477 = vmatprep.subr.msk.mxu0 %vm465_vm0, %v10454_v19 }
 0x1da   : > { %v746_v26 = vsel %vm736_vm4, %v735_v23, -inf  ;;  %12478 = vmatpush3.msk.msra.mxu0 %vm465_vm0, %v10454_v19 }
 0x1db   : > { %v743_v25 = vsel %vm736_vm4, %v734_v22, -inf  ;;  %12480 = vmatmul.mubr.msk.f32.vlgmr.msra.gmra.mrb[6].mxu0 %vm458_vm1, %v16467_v2 }
 0x1dc   : > { %741 = vmax.xlane.f32.xlu0 %v740_v24  ;;  %744 = vmax.xlane.f32.xlu1 %v743_v25 }
 0x1e0   : > { %747 = vmax.xlane.f32.xlu1 %v746_v26 }
 0x265   : > { %v739_v27 = vpop.xlane.xlu0 %738 }
 0x266   : > { %v749_v28 = vsub.f32 %v732_v17, %v739_v27  ;;  %v16567_v17 = vld [vmem:[%s19988_s8 + $0x30] sm:$0xff] }
 0x268   : > { %v753_v29 = vmul.f32 1.442695, %v749_v28 }
 0x269   : > { %v742_v30 = vpop.xlane.xlu0 %741  ;;  %v745_v31 = vpop.xlane.xlu1 %744 }
 0x26a   : > { %16059 = vpow2.f32 %v753_v29  ;;  %v750_v32 = vsub.f32 %v733_v18, %v742_v30  ;;  %v751_v33 = vsub.f32 %v734_v22, %v745_v31  ;;  %v16576_v18 = vld [vmem:[%s19988_s8 + $0x38] sm:$0xff] }
 0x26c   : > { %v755_v34 = vmul.f32 1.442695, %v750_v32  ;;  %v757_v35 = vmul.f32 1.442695, %v751_v33 }
 0x26d   : > { %v748_v36 = vpop.xlane.xlu1 %747 }
 0x26e   : > { %16061 = vpow2.f32 %v755_v34  ;;  %v752_v37 = vsub.f32 %v735_v23, %v748_v36 }
 0x26f   : > { %16063 = vpow2.f32 %v757_v35 }
 0x270   : > { %v759_v38 = vmul.f32 1.442695, %v752_v37 }
 0x272   : > { %16065 = vpow2.f32 %v759_v38 }
 0x274   : > { %v16060_v39 = vpop.eup %16059 }
 0x275   : > { %v761_v40 = vsel %vm736_vm4, %v16060_v39, 0.0 }
 0x276   : > { %762 = vadd.xlane.f32.xlu0 %v761_v40 }
 0x278   : > { %v16062_v41 = vpop.eup %16061 }
 0x279   : > { %v16064_v42 = vpop.eup %16063  ;;  %v764_v43 = vsel %vm736_vm4, %v16062_v41, 0.0 }
 0x27a   : > { %765 = vadd.xlane.f32.xlu1 %v764_v43  ;;  %v767_v44 = vsel %vm736_vm4, %v16064_v42, 0.0 }
 0x27b   : > { %768 = vadd.xlane.f32.xlu0 %v767_v44 }
 0x27c   : > { %v16066_v45 = vpop.eup %16065 }
 0x27d   : > { %v770_v46 = vsel %vm736_vm4, %v16066_v45, 0.0 }
 0x27e   : > { %771 = vadd.xlane.f32.xlu1 %v770_v46 }
 0x2ae   : > { %v12481_v52 = vpop.f32.mrb[6].mxu0 }
 0x303   : > { %v763_v54 = vpop.xlane.xlu0 %762 }
 0x304   : > { %16067 = vrcp.f32 %v763_v54 }
 0x307   : > { %v766_v55 = vpop.xlane.xlu1 %765 }
 0x308   : > { %v769_v56 = vpop.xlane.xlu0 %768  ;;  %16069 = vrcp.f32 %v766_v55  ;;  %v1041_v55 = vpop.f32.mrb[7].mxu0 }
 0x309   : > { %16071 = vrcp.f32 %v769_v56 }
 0x30b   : > { %v772_v57 = vpop.xlane.xlu1 %771 }
 0x30c   : > { %16073 = vrcp.f32 %v772_v57 }
 0x30e   : > { %v16068_v58 = vpop.eup %16067 }
 0x30f   : > { %v777_v59 = vmul.f32 %v16068_v58, %v16060_v39  ;;  %v10448_v58 = vld [vmem:[%s19986_s1 + $0x10] sm:$0x3f] }
 0x311   : > { %12466 = vmatprep.mubr.msk.f32.mxu1 %vm736_vm4, %v777_v59 }
 0x312   : > { %v16070_v60 = vpop.eup %16069 }
 0x313   : > { %v16072_v61 = vpop.eup %16071  ;;  %v778_v62 = vmul.f32 %v16070_v60, %v16062_v41 }
 0x314   : > { %v779_v63 = vmul.f32 %v16072_v61, %v16064_v42 }
 0x315   : > { %12467 = vmatmul.mubr.msk.f32.vlgmr.msra.gmra.mrb[2].mxu1 %vm736_vm4, %v778_v62 }
 0x316   : > { %v16074_v0 = vpop.eup %16073  ;;  %12473 = vmatpush3.msk.msra.mxu1 %vm465_vm0, %v10447_v53  ;;  %12469 = vmatprep.mubr.msk.f32.mxu1 %vm736_vm4, %v779_v63  ;;  %v10483_v53 = vld [vmem:[%s19966_s3 + $0x5] ss:$0 sm:$0xff] }
 0x317   : > { %v780_v3 = vmul.f32 %v16074_v0, %v16066_v45  ;;  %v1047_v54 = vadd.f32 %v12481_v52, %v10483_v53  ;;  %v1042_v56 = vadd.f32 %v10483_v53, %v1041_v55 }
 0x319   : > { %12470 = vmatmul.mubr.msk.f32.gmra.mrb[4].mxu1 %vm736_vm4, %v780_v3  ;;  %v14434_v57 = vpack.c.bf16 %v1047_v54, %v1042_v56 }
 0x31a   : > { %12474 = vmatprep.mubr.msk.f32.mxu1 %vm458_vm1, %v16465_v1 }
 0x31b   : > { %14435 = vmatprep.subr.bf16.mxu0 %v14434_v57 }
 0x31c   : > { %14437 = vmatpush3.bf16.msra.mxu0 %v14434_v57 }
 0x31d   : > { %12475 = vmatmul.mubr.msk.f32.vlgmr.msra.gmra.mrb[6].mxu1 %vm458_vm1, %v16467_v2  ;;  %12502 = vmatprep.subr.msk.mxu0 %vm465_vm0, %v10448_v58 }
 0x31e   : > { %12486 = vmatprep.mubr.msk.f32.mxu1 %vm628_vm2, %v16540_v4 }
 0x3e8   : > { %v16544_v5 = vpop.f32.mrb[2].mxu1 }
 0x3e9   : > { %v16546_v6 = vpop.f32.mrb[3].mxu1 }
 0x3ec   : > { %v16548_v7 = vpop.f32.mrb[4].mxu1 }
 0x3ed   : > { %v16550_v8 = vpop.f32.mrb[5].mxu1 }
 0x3f0   : > { %v12476_v11 = vpop.f32.mrb[6].mxu1 }
 0x3f1   : > { %v963_v12 = vadd.f32 %v12476_v11, %v10479_v10  ;;  %v957_v13 = vpop.f32.mrb[7].mxu1 }
 0x3f2   : > { %v958_v14 = vadd.f32 %v10479_v10, %v957_v13 }
 0x3f4   : > { %v14428_v15 = vpack.c.bf16 %v963_v12, %v958_v14 }
 0x3f6   : > { %14430 = vmatprep.subr.msk.bf16.mxu1 %vm16484_vm3, %v14428_v15 }
 0x3f7   : > { %14433 = vmatpush3.bf16.xpose.msk.msra.mxu1 %vm16484_vm3, %v14428_v15  ;;  %v16616_v15 = vld [vmem:[%s19988_s8 + $0x40] sm:$0xff] }
 0x3fe   : > { %12487 = vmatmul.mubr.msk.f32.vlgmr.msra.gmra.mrb[8].mxu1 %vm628_vm2, %v16562_v16 }
 0x3ff   : > { %12489 = vmatprep.mubr.msk.f32.mxu1 %vm628_vm2, %v16567_v17 }
 0x402   : > { %12490 = vmatmul.mubr.msk.f32.gmra.mrb[10].mxu1 %vm628_vm2, %v16576_v18 }
 0x403   : > { %12509 = vmatprep.mubr.msk.f32.mxu1 %vm458_vm1, %v16465_v1 }
 0x4d1   : > { %v12488_v20 = vpop.f32.mrb[8].mxu1 }
 0x4d2   : > { %v1154_v21 = vmul.f32 0.088388346, %v12488_v20  ;;  %v1134_v22 = vpop.f32.mrb[9].mxu1 }
 0x4d3   : > { %v1153_v23 = vmul.f32 0.088388346, %v1134_v22 }
 0x4d4   : > { %v1160_v24 = vsel %vm736_vm4, %v1154_v21, -inf }
 0x4d5   : > { %1161 = vmax.xlane.f32.xlu1 %v1160_v24  ;;  %v12491_v25 = vpop.f32.mrb[10].mxu1  ;;  %v1157_v26 = vsel %vm736_vm4, %v1153_v23, -inf }
 0x4d6   : > { %v1156_v27 = vmul.f32 0.088388346, %v12491_v25  ;;  %1158 = vmax.xlane.f32.xlu0 %v1157_v26  ;;  %v1144_v28 = vpop.f32.mrb[11].mxu1 }
 0x4d7   : > { %v1155_v29 = vmul.f32 0.088388346, %v1144_v28 }
 0x4d8   : > { %v1166_v30 = vsel %vm736_vm4, %v1156_v27, -inf }
 0x4d9   : > { %1167 = vmax.xlane.f32.xlu1 %v1166_v30  ;;  %v1163_v31 = vsel %vm736_vm4, %v1155_v29, -inf  ;;  %v16643_v30 = vld [vmem:[%s19988_s8 + $0x50] sm:$0xff] }
 0x4da   : > { %1164 = vmax.xlane.f32.xlu0 %v1163_v31  ;;  %v16652_v31 = vld [vmem:[%s19988_s8 + $0x58] sm:$0xff] }
 0x562   : > { %v1162_v32 = vpop.xlane.xlu1 %1161 }
 0x563   : > { %v1170_v33 = vsub.f32 %v1154_v21, %v1162_v32  ;;  %v1159_v34 = vpop.xlane.xlu0 %1158  ;;  %v10455_v32 = vld [vmem:[%s19986_s1 + $0x30] sm:$0x3f] }
 0x564   : > { %v1169_v35 = vsub.f32 %v1153_v23, %v1159_v34  ;;  %v10497_v23 = vld [vmem:[%s19966_s3 + $0x2] ss:$0 sm:$0xff]  ;;  %12507 = vmatprep.subr.msk.mxu1 %vm465_vm0, %v10455_v32 }
 0x565   : > { %v1175_v36 = vmul.f32 1.442695, %v1170_v33  ;;  %12508 = vmatpush3.msk.msra.mxu1 %vm465_vm0, %v10455_v32 }
 0x566   : > { %v1173_v37 = vmul.f32 1.442695, %v1169_v35  ;;  %v1168_v38 = vpop.xlane.xlu1 %1167  ;;  %12510 = vmatmul.mubr.msk.f32.vlgmr.msra.gmra.mrb[12].mxu1 %vm458_vm1, %v16467_v2 }
 0x567   : > { %16075 = vpow2.f32 %v1175_v36  ;;  %v1172_v39 = vsub.f32 %v1156_v27, %v1168_v38  ;;  %v1165_v40 = vpop.xlane.xlu0 %1164 }
 0x568   : > { %16077 = vpow2.f32 %v1173_v37  ;;  %v1171_v41 = vsub.f32 %v1155_v29, %v1165_v40  ;;  %v16638_v29 = vld [vmem:[%s19988_s8 + $0x48] sm:$0xff] }
 0x569   : > { %v1179_v42 = vmul.f32 1.442695, %v1172_v39 }
 0x56a   : > { %v1177_v43 = vmul.f32 1.442695, %v1171_v41 }
 0x56b   : > { %16079 = vpow2.f32 %v1179_v42 }
 0x56c   : > { %16081 = vpow2.f32 %v1177_v43 }
 0x571   : > { %v16076_v44 = vpop.eup %16075 }
 0x572   : > { %v16078_v45 = vpop.eup %16077  ;;  %v1184_v46 = vsel %vm736_vm4, %v16076_v44, 0.0 }
 0x573   : > { %1185 = vadd.xlane.f32.xlu1 %v1184_v46  ;;  %v1181_v47 = vsel %vm736_vm4, %v16078_v45, 0.0 }
 0x574   : > { %1182 = vadd.xlane.f32.xlu0 %v1181_v47 }
 0x575   : > { %v16080_v48 = vpop.eup %16079 }
 0x576   : > { %v16082_v49 = vpop.eup %16081  ;;  %v1190_v50 = vsel %vm736_vm4, %v16080_v48, 0.0 }
 0x577   : > { %1191 = vadd.xlane.f32.xlu1 %v1190_v50  ;;  %v1187_v51 = vsel %vm736_vm4, %v16082_v49, 0.0 }
 0x578   : > { %1188 = vadd.xlane.f32.xlu0 %v1187_v51 }
 0x600   : > { %v1186_v59 = vpop.xlane.xlu1 %1185 }
 0x601   : > { %16083 = vrcp.f32 %v1186_v59  ;;  %v1183_v60 = vpop.xlane.xlu0 %1182 }
 0x602   : > { %16085 = vrcp.f32 %v1183_v60 }
 0x604   : > { %v1192_v61 = vpop.xlane.xlu1 %1191 }
 0x605   : > { %16087 = vrcp.f32 %v1192_v61  ;;  %v1189_v62 = vpop.xlane.xlu0 %1188 }
 0x606   : > { %16089 = vrcp.f32 %v1189_v62 }
 0x60b   : > { %v16084_v63 = vpop.eup %16083 }
 0x60c   : > { %v16086_v0 = vpop.eup %16085  ;;  %v1198_v10 = vmul.f32 %v16084_v63, %v16076_v44 }
 0x60d   : > { %v1197_v3 = vmul.f32 %v16086_v0, %v16078_v45 }
 0x60f   : > { %v16088_v11 = vpop.eup %16087  ;;  %12496 = vmatprep.mubr.msk.f32.mxu0 %vm736_vm4, %v1197_v3 }
 0x610   : > { %v16090_v12 = vpop.eup %16089  ;;  %12497 = vmatmul.mubr.msk.f32.vlgmr.msra.gmra.mrb[8].mxu0 %vm736_vm4, %v1198_v10  ;;  %v1200_v14 = vmul.f32 %v16088_v11, %v16080_v48  ;;  %v10501_v10 = vld [vmem:[%s19966_s3 + $0x6] ss:$0 sm:$0xff] }
 0x611   : > { %12503 = vmatpush3.msk.msra.mxu0 %vm465_vm0, %v10448_v58  ;;  %v1199_v13 = vmul.f32 %v16090_v12, %v16082_v49 }
 0x613   : > { %12499 = vmatprep.mubr.msk.f32.mxu0 %vm736_vm4, %v1199_v13 }
 0x614   : > { %12500 = vmatmul.mubr.msk.f32.gmra.mrb[10].mxu0 %vm736_vm4, %v1200_v14 }
 0x615   : > { %12504 = vmatprep.mubr.msk.f32.mxu0 %vm458_vm1, %v16465_v1 }
 0x618   : > { %12505 = vmatmul.mubr.msk.f32.vlgmr.msra.gmra.mrb[12].mxu0 %vm458_vm1, %v16467_v2 }
 0x619   : > { %12516 = vmatprep.mubr.msk.f32.mxu0 %vm628_vm2, %v16616_v15 }
 0x639   : > { %v12511_v3 = vpop.f32.mrb[12].mxu1 }
 0x63a   : > { %v1467_v11 = vadd.f32 %v12511_v3, %v10501_v10  ;;  %v1461_v12 = vpop.f32.mrb[13].mxu1 }
 0x63b   : > { %v1462_v13 = vadd.f32 %v10501_v10, %v1461_v12 }
 0x63d   : > { %v14444_v14 = vpack.c.bf16 %v1467_v11, %v1462_v13 }
 0x63f   : > { %14445 = vmatprep.subr.bf16.mxu1 %v14444_v14 }
 0x640   : > { %14447 = vmatpush3.bf16.msra.mxu1 %v14444_v14 }
 0x6e3   : > { %v16620_v19 = vpop.f32.mrb[8].mxu0 }
 0x6e4   : > { %v16622_v20 = vpop.f32.mrb[9].mxu0 }
 0x6e7   : > { %v16624_v21 = vpop.f32.mrb[10].mxu0 }
 0x6e8   : > { %v16626_v22 = vpop.f32.mrb[11].mxu0 }
 0x6eb   : > { %v12506_v24 = vpop.f32.mrb[12].mxu0 }
 0x6ec   : > { %v1383_v25 = vadd.f32 %v12506_v24, %v10497_v23  ;;  %v1377_v26 = vpop.f32.mrb[13].mxu0 }
 0x6ed   : > { %v1378_v27 = vadd.f32 %v10497_v23, %v1377_v26  ;;  %v10449_v23 = vld [vmem:[%s19986_s1 + $0x18] sm:$0x3f] }
 0x6ee   : > { %12532 = vmatprep.subr.msk.mxu1 %vm465_vm0, %v10449_v23 }
 0x6ef   : > { %v14438_v28 = vpack.c.bf16 %v1383_v25, %v1378_v27 }
 0x6f1   : > { %14440 = vmatprep.subr.msk.bf16.mxu0 %vm16484_vm3, %v14438_v28 }
 0x6f2   : > { %14443 = vmatpush3.bf16.xpose.msk.msra.mxu0 %vm16484_vm3, %v14438_v28 }
 0x6f9   : > { %12517 = vmatmul.mubr.msk.f32.vlgmr.msra.gmra.mrb[14].mxu0 %vm628_vm2, %v16638_v29 }
 0x6fa   : > { %12519 = vmatprep.mubr.msk.f32.mxu0 %vm628_vm2, %v16643_v30 }
 0x6fd   : > { %12520 = vmatmul.mubr.msk.f32.gmra.mrb[16].mxu0 %vm628_vm2, %v16652_v31 }
 0x6fe   : > { %12539 = vmatprep.mubr.msk.f32.mxu0 %vm458_vm1, %v16465_v1 }
 0x7cc   : > { %v12518_v33 = vpop.f32.mrb[14].mxu0 }
 0x7cd   : > { %v1574_v34 = vmul.f32 0.088388346, %v12518_v33  ;;  %v1554_v35 = vpop.f32.mrb[15].mxu0 }
 0x7ce   : > { %v1573_v36 = vmul.f32 0.088388346, %v1554_v35 }
 0x7cf   : > { %v1580_v37 = vsel %vm736_vm4, %v1574_v34, -inf }
 0x7d0   : > { %1581 = vmax.xlane.f32.xlu1 %v1580_v37  ;;  %v12521_v38 = vpop.f32.mrb[16].mxu0  ;;  %v1577_v39 = vsel %vm736_vm4, %v1573_v36, -inf }
 0x7d1   : > { %v1576_v40 = vmul.f32 0.088388346, %v12521_v38  ;;  %1578 = vmax.xlane.f32.xlu0 %v1577_v39  ;;  %v1564_v41 = vpop.f32.mrb[17].mxu0  ;;  %v16692_v39 = vld [vmem:[%s19988_s8 + $0x60] sm:$0xff] }
 0x7d2   : > { %v1575_v42 = vmul.f32 0.088388346, %v1564_v41 }
 0x7d3   : > { %v1586_v43 = vsel %vm736_vm4, %v1576_v40, -inf }
 0x7d4   : > { %1587 = vmax.xlane.f32.xlu1 %v1586_v43  ;;  %v1583_v44 = vsel %vm736_vm4, %v1575_v42, -inf }
 0x7d5   : > { %1584 = vmax.xlane.f32.xlu0 %v1583_v44  ;;  %v10515_v44 = vld [vmem:[%s19966_s3 + $0x3] ss:$0 sm:$0xff] }
 0x85d   : > { %v1582_v45 = vpop.xlane.xlu1 %1581 }
 0x85e   : > { %v1590_v46 = vsub.f32 %v1574_v34, %v1582_v45  ;;  %v1579_v47 = vpop.xlane.xlu0 %1578 }
 0x85f   : > { %v1589_v48 = vsub.f32 %v1573_v36, %v1579_v47 }
 0x860   : > { %v1595_v49 = vmul.f32 1.442695, %v1590_v46 }
 0x861   : > { %v1593_v50 = vmul.f32 1.442695, %v1589_v48  ;;  %v1588_v51 = vpop.xlane.xlu1 %1587 }
 0x862   : > { %16091 = vpow2.f32 %v1595_v49  ;;  %v1592_v52 = vsub.f32 %v1576_v40, %v1588_v51  ;;  %v1585_v53 = vpop.xlane.xlu0 %1584  ;;  %v16719_v51 = vld [vmem:[%s19988_s8 + $0x70] sm:$0xff] }
 0x863   : > { %16093 = vpow2.f32 %v1593_v50  ;;  %v1591_v54 = vsub.f32 %v1575_v42, %v1585_v53  ;;  %v16714_v50 = vld [vmem:[%s19988_s8 + $0x68] sm:$0xff]  ;;  %v10456_v53 = vld [vmem:[%s19986_s1 + $0x38] sm:$0x3f] }
 0x864   : > { %v1599_v55 = vmul.f32 1.442695, %v1592_v52  ;;  %v16728_v52 = vld [vmem:[%s19988_s8 + $0x78] sm:$0xff]  ;;  %12537 = vmatprep.subr.msk.mxu0 %vm465_vm0, %v10456_v53 }
 0x865   : > { %v1597_v56 = vmul.f32 1.442695, %v1591_v54  ;;  %12538 = vmatpush3.msk.msra.mxu0 %vm465_vm0, %v10456_v53 }
 0x866   : > { %16095 = vpow2.f32 %v1599_v55  ;;  %12540 = vmatmul.mubr.msk.f32.vlgmr.msra.gmra.mrb[18].mxu0 %vm458_vm1, %v16467_v2 }
 0x867   : > { %16097 = vpow2.f32 %v1597_v56 }
 0x86c   : > { %v16092_v57 = vpop.eup %16091 }
 0x86d   : > { %v16094_v58 = vpop.eup %16093  ;;  %v1604_v59 = vsel %vm736_vm4, %v16092_v57, 0.0 }
 0x86e   : > { %1605 = vadd.xlane.f32.xlu1 %v1604_v59  ;;  %v1601_v60 = vsel %vm736_vm4, %v16094_v58, 0.0 }
 0x86f   : > { %1602 = vadd.xlane.f32.xlu0 %v1601_v60 }
 0x870   : > { %v16096_v61 = vpop.eup %16095 }
 0x871   : > { %v16098_v62 = vpop.eup %16097  ;;  %v1610_v63 = vsel %vm736_vm4, %v16096_v61, 0.0 }
 0x872   : > { %1611 = vadd.xlane.f32.xlu1 %v1610_v63  ;;  %v1607_v0 = vsel %vm736_vm4, %v16098_v62, 0.0 }
 0x873   : > { %1608 = vadd.xlane.f32.xlu0 %v1607_v0 }
 0x8fb   : > { %v1606_v24 = vpop.xlane.xlu1 %1605 }
 0x8fc   : > { %16099 = vrcp.f32 %v1606_v24  ;;  %v1603_v25 = vpop.xlane.xlu0 %1602 }
 0x8fd   : > { %16101 = vrcp.f32 %v1603_v25 }
 0x8ff   : > { %v1612_v26 = vpop.xlane.xlu1 %1611 }
 0x900   : > { %16103 = vrcp.f32 %v1612_v26  ;;  %v1609_v27 = vpop.xlane.xlu0 %1608 }
 0x901   : > { %16105 = vrcp.f32 %v1609_v27 }
 0x906   : > { %v16100_v28 = vpop.eup %16099 }
 0x907   : > { %v16102_v32 = vpop.eup %16101  ;;  %v1618_v34 = vmul.f32 %v16100_v28, %v16092_v57 }
 0x908   : > { %v1617_v33 = vmul.f32 %v16102_v32, %v16094_v58 }
 0x90a   : > { %v16104_v35 = vpop.eup %16103  ;;  %12526 = vmatprep.mubr.msk.f32.mxu1 %vm736_vm4, %v1617_v33 }
 0x90b   : > { %v16106_v36 = vpop.eup %16105  ;;  %12527 = vmatmul.mubr.msk.f32.vlgmr.msra.gmra.mrb[14].mxu1 %vm736_vm4, %v1618_v34  ;;  %v1620_v38 = vmul.f32 %v16104_v35, %v16096_v61 }
 0x90c   : > { %12533 = vmatpush3.msk.msra.mxu1 %vm465_vm0, %v10449_v23  ;;  %v1619_v37 = vmul.f32 %v16106_v36, %v16098_v62 }
 0x90e   : > { %12529 = vmatprep.mubr.msk.f32.mxu1 %vm736_vm4, %v1619_v37 }
 0x90f   : > { %12530 = vmatmul.mubr.msk.f32.gmra.mrb[16].mxu1 %vm736_vm4, %v1620_v38 }
 0x910   : > { %12534 = vmatprep.mubr.msk.f32.mxu1 %vm458_vm1, %v16465_v1 }
 0x913   : > { %12535 = vmatmul.mubr.msk.f32.vlgmr.msra.gmra.mrb[18].mxu1 %vm458_vm1, %v16467_v2 }
 0x914   : > { %12546 = vmatprep.mubr.msk.f32.mxu1 %vm628_vm2, %v16692_v39 }
 0x9de   : > { %v16696_v40 = vpop.f32.mrb[14].mxu1 }
 0x9df   : > { %v16698_v41 = vpop.f32.mrb[15].mxu1 }
 0x9e2   : > { %v16700_v42 = vpop.f32.mrb[16].mxu1 }
 0x9e3   : > { %v16702_v43 = vpop.f32.mrb[17].mxu1 }
 0x9e6   : > { %v12536_v45 = vpop.f32.mrb[18].mxu1 }
 0x9e7   : > { %v1803_v46 = vadd.f32 %v12536_v45, %v10515_v44  ;;  %v1797_v47 = vpop.f32.mrb[19].mxu1 }
 0x9e8   : > { %v1798_v48 = vadd.f32 %v10515_v44, %v1797_v47  ;;  %v10519_v47 = vld [vmem:[%s19966_s3 + $0x7] ss:$0 sm:$0xff] }
 0x9ea   : > { %v14448_v49 = vpack.c.bf16 %v1803_v46, %v1798_v48  ;;  %v12541_v46 = vpop.f32.mrb[18].mxu0 }
 0x9eb   : > { %v1887_v48 = vadd.f32 %v12541_v46, %v10519_v47 }
 0x9ec   : > { %14450 = vmatprep.subr.msk.bf16.mxu1 %vm16484_vm3, %v14448_v49 }
 0x9ed   : > { %14453 = vmatpush3.bf16.xpose.msk.msra.mxu1 %vm16484_vm3, %v14448_v49  ;;  %v1881_v49 = vpop.f32.mrb[19].mxu0 }
 0x9ee   : > { %v1882_v53 = vadd.f32 %v10519_v47, %v1881_v49 }
 0x9f4   : > { %12547 = vmatmul.mubr.msk.f32.vlgmr.msra.gmra.mrb[20].mxu1 %vm628_vm2, %v16714_v50 }
 0x9f5   : > { %12549 = vmatprep.mubr.msk.f32.mxu1 %vm628_vm2, %v16719_v51 }
 0x9f8   : > { %12550 = vmatmul.mubr.msk.f32.gmra.mrb[22].mxu1 %vm628_vm2, %v16728_v52 }
 0x9f9   : > { %12602 = vmatprep.mubr.msk.f32.mxu1 %vm458_vm1, %v16465_v1 }
 0xac7   : > { %v12548_v54 = vpop.f32.mrb[20].mxu1 }
 0xac8   : > { %v1994_v55 = vmul.f32 0.088388346, %v12548_v54  ;;  %v1974_v56 = vpop.f32.mrb[21].mxu1  ;;  %v1299_v54 = vadd.f32 %v16620_v19, %v16562_v16  ;;  %v1300_v16 = vadd.f32 %v16567_v17, %v16626_v22  ;;  %v1301_v19 = vadd.f32 %v16624_v21, %v16576_v18 }
 0xac9   : > { %v1993_v57 = vmul.f32 0.088388346, %v1974_v56  ;;  %v1718_v56 = vadd.f32 %v16616_v15, %v16698_v41 }
 0xaca   : > { %v2000_v58 = vsel %vm736_vm4, %v1994_v55, -inf }
 0xacb   : > { %2001 = vmax.xlane.f32.xlu1 %v2000_v58  ;;  %v12551_v59 = vpop.f32.mrb[22].mxu1  ;;  %v1997_v60 = vsel %vm736_vm4, %v1993_v57, -inf  ;;  %v1719_v58 = vadd.f32 %v16696_v40, %v16638_v29 }
 0xacc   : > { %v1996_v61 = vmul.f32 0.088388346, %v12551_v59  ;;  %1998 = vmax.xlane.f32.xlu0 %v1997_v60  ;;  %v1984_v62 = vpop.f32.mrb[23].mxu1 }
 0xacd   : > { %v1995_v63 = vmul.f32 0.088388346, %v1984_v62  ;;  %v436_v62 = vld [vmem:[%s19967_s4 + $0x8] sm:$0xff] }
 0xace   : > { %v2006_v0 = vsel %vm736_vm4, %v1996_v61, -inf }
 0xacf   : > { %2007 = vmax.xlane.f32.xlu1 %v2006_v0  ;;  %v2003_v3 = vsel %vm736_vm4, %v1995_v63, -inf }
 0xad0   : > { %2004 = vmax.xlane.f32.xlu0 %v2003_v3  ;;  %v438_v3 = vld [vmem:[%s19967_s4 + $0x18] sm:$0xff] }
 0xb58   : > { %v2002_v10 = vpop.xlane.xlu1 %2001 }
 0xb59   : > { %v2010_v11 = vsub.f32 %v1994_v55, %v2002_v10  ;;  %v1999_v12 = vpop.xlane.xlu0 %1998  ;;  %v14454_v55 = vpack.c.bf16 %v1887_v48, %v1882_v53  ;;  %v10534_v48 = vld [vmem:[%s19986_s1 + $0x40] sm:$0x3f]  ;;  %v10540_v53 = vld [vmem:[%s19986_s1 + $0x48] sm:$0x3f] }
 0xb5a   : > { %v2009_v13 = vsub.f32 %v1993_v57, %v1999_v12  ;;  %v1298_v57 = vadd.f32 %v16540_v4, %v16622_v20  ;;  %v440_v12 = vld [vmem:[%s19967_s4 + $0x28] sm:$0xff]  ;;  %12600 = vmatprep.subr.msk.mxu1 %vm465_vm0, %v10534_v48 }
 0xb5b   : > { %v2015_v14 = vmul.f32 1.442695, %v2010_v11  ;;  %14455 = vmatprep.subr.bf16.mxu0 %v14454_v55  ;;  %v439_v11 = vld [vmem:[%s19967_s4 + $0x20] sm:$0xff]  ;;  %12601 = vmatpush3.msk.msra.mxu1 %vm465_vm0, %v10534_v48 }
 0xb5c   : > { %v2013_v23 = vmul.f32 1.442695, %v2009_v13  ;;  %v2008_v24 = vpop.xlane.xlu1 %2007  ;;  %14457 = vmatpush3.bf16.msra.mxu0 %v14454_v55  ;;  %v14466_v13 = vpack.c.bf16 %v440_v12, %v439_v11  ;;  %12603 = vmatmul.mubr.msk.f32.vlgmr.msra.gmra.mrb[24].mxu1 %vm458_vm1, %v16467_v2  ;;  %v10546_v55 = vld [vmem:[%s19986_s1 + $0x50] sm:$0x3f]  ;;  %v16267_v11 = vld [vmem:[%s19988_s8] sm:$0xff] }
 0xb5d   : > { %16107 = vpow2.f32 %v2015_v14  ;;  %v2012_v25 = vsub.f32 %v1996_v61, %v2008_v24  ;;  %v2005_v26 = vpop.xlane.xlu0 %2004  ;;  %v435_v61 = vld [vmem:[%s19967_s4] sm:$0xff]  ;;  %v441_v14 = vld [vmem:[%s19967_s4 + $0x30] sm:$0xff]  ;;  %12605 = vmatprep.subr.msk.mxu1 %vm465_vm0, %v10540_v53  ;;  %12607 = vmatprep.mubr.msk.f32.mxu1 %vm458_vm1, %v16465_v1  ;;  %v878_v12 = vadd.f32 %v16267_v11, %v16546_v6  ;;  %v17033_v11 = vld [vmem:[%s19966_s3 + $0xb] ss:$0 sm:$0xff] }
 0xb5e   : > { %16109 = vpow2.f32 %v2013_v23  ;;  %v2011_v27 = vsub.f32 %v1995_v63, %v2005_v26  ;;  %v437_v63 = vld [vmem:[%s19967_s4 + $0x10] sm:$0xff]  ;;  %v14458_v0 = vpack.c.bf16 %v436_v62, %v435_v61  ;;  %v442_v23 = vld [vmem:[%s19967_s4 + $0x38] sm:$0xff]  ;;  %v444_v26 = vld [vmem:[%s19967_s4 + $0x48] sm:$0xff]  ;;  %12606 = vmatpush3.msk.msra.mxu1 %vm465_vm0, %v10540_v53 }
 0xb5f   : > { %v2019_v28 = vmul.f32 1.442695, %v2012_v25  ;;  %v14462_v10 = vpack.c.bf16 %v438_v3, %v437_v63  ;;  %v14470_v24 = vpack.c.bf16 %v442_v23, %v441_v14  ;;  %v443_v25 = vld [vmem:[%s19967_s4 + $0x40] sm:$0xff]  ;;  %12610 = vmatprep.subr.msk.mxu1 %vm465_vm0, %v10546_v55  ;;  %v10612_v23 = vld [vmem:[%s19965_s2 + $0x210] sm:$0xff]  ;;  %v10617_v53 = vld [vmem:[%s19965_s2 + $0x238] sm:$0xff] }
 0xb60   : > { %v2017_v32 = vmul.f32 1.442695, %v2011_v27  ;;  %14459 = vmatprep.subr.bf16.mxu0 %v14458_v0  ;;  %v14474_v27 = vpack.c.bf16 %v444_v26, %v443_v25  ;;  %12608 = vmatmul.mubr.msk.f32.vlgmr.msra.gmra.mrb[26].mxu1 %vm458_vm1, %v16467_v2 }
 0xb61   : > { %16111 = vpow2.f32 %v2019_v28  ;;  %v445_v28 = vld [vmem:[%s19967_s4 + $0x50] sm:$0xff]  ;;  %12611 = vmatpush3.msk.msra.mxu1 %vm465_vm0, %v10546_v55  ;;  %12612 = vmatprep.mubr.msk.f32.mxu1 %vm458_vm1, %v16465_v1 }
 0xb62   : > { %16113 = vpow2.f32 %v2017_v32  ;;  %v446_v32 = vld [vmem:[%s19967_s4 + $0x58] sm:$0xff] }
 0xb64   : > { %12613 = vmatmul.mubr.msk.f32.vlgmr.msra.gmra.mrb[28].mxu1 %vm458_vm1, %v16467_v2 }
 0xb65   : > { %12617 = vmatprep.mubr.msk.f32.mxu1 %vm458_vm1, %v16465_v1  ;;  %v2661_v1 = vld [vmem:[%s19965_s2 + $0x30] sm:$0xff] }
 0xb67   : > { %v16108_v33 = vpop.eup %16107 }
 0xb68   : > { %v16110_v34 = vpop.eup %16109  ;;  %v2024_v35 = vsel %vm736_vm4, %v16108_v33, 0.0 }
 0xb69   : > { %2025 = vadd.xlane.f32.xlu1 %v2024_v35  ;;  %v2021_v36 = vsel %vm736_vm4, %v16110_v34, 0.0  ;;  %v448_v35 = vld [vmem:[%s19967_s4 + $0x68] sm:$0xff] }
 0xb6a   : > { %2022 = vadd.xlane.f32.xlu0 %v2021_v36 }
 0xb6b   : > { %v16112_v37 = vpop.eup %16111 }
 0xb6c   : > { %v16114_v38 = vpop.eup %16113  ;;  %v2030_v44 = vsel %vm736_vm4, %v16112_v37, 0.0 }
 0xb6d   : > { %2031 = vadd.xlane.f32.xlu1 %v2030_v44  ;;  %v2027_v45 = vsel %vm736_vm4, %v16114_v38, 0.0 }
 0xb6e   : > { %2028 = vadd.xlane.f32.xlu0 %v2027_v45 }
 0xb7e   : > { %2148 = vrot.lane.b32.xlu1 %v1299_v54, %s19975_s25  ;;  %v10611_v54 = vld [vmem:[%s19965_s2 + $0x208] sm:$0xff] }
 0xb82   : > { %2162 = vrot.lane.b32.xlu1 %v1718_v56, %s19977_s29 }
 0xb84   : > { %2146 = vrot.lane.b32.xlu0 %v1298_v57, %s19975_s25  ;;  %v1721_v57 = vadd.f32 %v16700_v42, %v16652_v31  ;;  %v10552_v31 = vld [vmem:[%s19986_s1 + $0x58] sm:$0x3f]  ;;  %v2655_v42 = vld [vmem:[%s19965_s2] sm:$0xff] }
 0xb85   : > { %12615 = vmatprep.subr.msk.mxu1 %vm465_vm0, %v10552_v31 }
 0xb86   : > { %2164 = vrot.lane.b32.xlu1 %v1719_v58, %s19977_s29  ;;  %12616 = vmatpush3.msk.msra.mxu1 %vm465_vm0, %v10552_v31  ;;  %v10619_v31 = vld [vmem:[%s19965_s2 + $0x248] sm:$0xff]  ;;  %s11396_s29 = sshll.u32 %s16428_s21, 4  ;;  %s16346_s21 = smov [#allocation2]  }
 0xb87   : > { %12618 = vmatmul.mubr.msk.f32.vlgmr.msra.gmra.mrb[30].mxu1 %vm458_vm1, %v16467_v2  ;;  %v2664_v2 = vld [vmem:[%s19965_s2 + $0x48] sm:$0xff]  ;;  %s16280_s30 = sshll.u32 %s16346_s21, 4  ;;  %s16281_s30 = int_to_ptr.vmem [resolvable:$false] %s16280_s30 }
 0xb88   : > { %2150 = vrot.lane.b32.xlu0 %v1300_v16, %s19975_s25  ;;  %v1720_v16 = vadd.f32 %v16643_v30, %v16702_v43  ;;  %v2656_v30 = vld [vmem:[%s19965_s2 + $0x8] sm:$0xff]  ;;  %s16282_s13 = scalar_lea.vmem %s16281_s30, 32 }
 0xb8a   : > { %2152 = vrot.lane.b32.xlu1 %v1301_v19, %s19975_s25  ;;  %s19979_s25 = smov 96  }
 0xbf6   : > { %v2026_v4 = vpop.xlane.xlu1 %2025 }
 0xbf7   : > { %16115 = vrcp.f32 %v2026_v4  ;;  %v2023_v15 = vpop.xlane.xlu0 %2022  ;;  %v14490_v4 = vpack.c.bf16 %v2656_v30, %v2655_v42  ;;  %v10620_v30 = vld [vmem:[%s19965_s2 + $0x250] sm:$0xff] }
 0xbf8   : > { %16117 = vrcp.f32 %v2023_v15  ;;  %v2657_v15 = vld [vmem:[%s19965_s2 + $0x10] sm:$0xff] }
 0xbf9   : > { %14491 = vmatprep.subr.bf16.mxu1 %v14490_v4 }
 0xbfa   : > { %v2032_v20 = vpop.xlane.xlu1 %2031  ;;  %14493 = vmatpush3.bf16.msra.mxu1 %v14490_v4  ;;  %v2667_v4 = vld [vmem:[%s19965_s2 + $0x60] sm:$0xff] }
 0xbfb   : > { %16119 = vrcp.f32 %v2032_v20  ;;  %v2029_v29 = vpop.xlane.xlu0 %2028  ;;  %v2659_v20 = vld [vmem:[%s19965_s2 + $0x20] sm:$0xff] }
 0xbfc   : > { %16121 = vrcp.f32 %v2029_v29  ;;  %v2660_v29 = vld [vmem:[%s19965_s2 + $0x28] sm:$0xff] }
 0xbfe   : > { %v2149_v61 = vpop.permute.xlu1 %2148 }
 0xc01   : > { %v16116_v40 = vpop.eup %16115 }
 0xc02   : > { %v16118_v41 = vpop.eup %16117  ;;  %v2038_v22 = vmul.f32 %v16116_v40, %v16108_v33  ;;  %v14478_v33 = vpack.c.bf16 %v446_v32, %v445_v28  ;;  %v14498_v40 = vpack.c.bf16 %v2660_v29, %v2659_v20  ;;  %v2163_v62 = vpop.permute.xlu1 %2162  ;;  %v10623_v20 = vld [vmem:[%s19965_s2 + $0x268] sm:$0xff] }
 0xc03   : > { %v2037_v17 = vmul.f32 %v16118_v41, %v16110_v34  ;;  %v447_v34 = vld [vmem:[%s19967_s4 + $0x60] sm:$0xff]  ;;  %v2662_v41 = vld [vmem:[%s19965_s2 + $0x38] sm:$0xff] }
 0xc04   : > { %v14482_v36 = vpack.c.bf16 %v448_v35, %v447_v34  ;;  %v10614_v35 = vld [vmem:[%s19965_s2 + $0x220] sm:$0xff] }
 0xc05   : > { %v16120_v59 = vpop.eup %16119  ;;  %12556 = vmatprep.mubr.msk.f32.mxu0 %vm736_vm4, %v2037_v17  ;;  %v14502_v17 = vpack.c.bf16 %v2662_v41, %v2661_v1  ;;  %v2670_v1 = vld [vmem:[%s19965_s2 + $0x78] sm:$0xff]  ;;  %v10624_v41 = vld [vmem:[%s19965_s2 + $0x270] sm:$0xff] }
 0xc06   : > { %v16122_v18 = vpop.eup %16121  ;;  %12557 = vmatmul.mubr.msk.f32.vlgmr.msra.gmra.mrb[20].mxu0 %vm736_vm4, %v2038_v22  ;;  %v2040_v60 = vmul.f32 %v16120_v59, %v16112_v37  ;;  %v449_v37 = vld [vmem:[%s19967_s4 + $0x70] sm:$0xff]  ;;  %v2663_v22 = vld [vmem:[%s19965_s2 + $0x40] sm:$0xff]  ;;  %v2165_v63 = vpop.permute.xlu1 %2164 }
 0xc07   : > { %v2039_v21 = vmul.f32 %v16122_v18, %v16114_v38  ;;  %14461 = vmatpush3.bf16.msra.mxu0 %v14458_v0  ;;  %v450_v38 = vld [vmem:[%s19967_s4 + $0x78] sm:$0xff]  ;;  %v14506_v59 = vpack.c.bf16 %v2664_v2, %v2663_v22  ;;  %v2665_v18 = vld [vmem:[%s19965_s2 + $0x50] sm:$0xff]  ;;  %v2147_v0 = vpop.permute.xlu0 %2146 }
 0xc08   : > { %14463 = vmatprep.subr.bf16.mxu0 %v14462_v10  ;;  %v14486_v44 = vpack.c.bf16 %v450_v38, %v449_v37  ;;  %v2190_v25 = vsel %vm628_vm2, %v878_v12, %v2147_v0  ;;  %v10625_v22 = vld [vmem:[%s19965_s2 + $0x278] sm:$0xff] }
 0xc09   : > { %12559 = vmatprep.mubr.msk.f32.mxu0 %vm736_vm4, %v2039_v21  ;;  %v2666_v21 = vld [vmem:[%s19965_s2 + $0x58] sm:$0xff]  ;;  %v14550_v2 = vpack.c.bf16 %v10625_v22, %v10624_v41  ;;  %v10560_v41 = vld [vmem:[%s19965_s2 + $0x90] sm:$0xff] }
 0xc0a   : > { %12560 = vmatmul.mubr.msk.f32.gmra.mrb[22].mxu0 %vm736_vm4, %v2040_v60  ;;  %v14510_v60 = vpack.c.bf16 %v2666_v21, %v2665_v18  ;;  %v2153_v3 = vpop.permute.xlu1 %2152  ;;  %v10536_v18 = vld [vmem:[%s19966_s3 + $0x8] ss:$0 sm:$0xff]  ;;  %v17016_v21 = vld [vmem:[%s19966_s3 + $0x9] ss:$0 sm:$0xff] }
 0xc0b   : > { %14465 = vmatpush3.bf16.msra.mxu0 %v14462_v10  ;;  %v2151_v10 = vpop.permute.xlu0 %2150 }
 0xc0c   : > { %14467 = vmatprep.subr.bf16.mxu0 %v14466_v13 }
 0xc0f   : > { %14469 = vmatpush3.bf16.msra.mxu0 %v14466_v13  ;;  %v16268_v13 = vld [vmem:[%s19988_s8 + $0x8] sm:$0xff] }
 0xc10   : > { %14471 = vmatprep.subr.bf16.mxu0 %v14470_v24  ;;  %v879_v14 = vadd.f32 %v16268_v13, %v16544_v5 }
 0xc12   : > { %v2191_v6 = vsel %vm628_vm2, %v879_v14, %v2149_v61 }
 0xc13   : > { %14473 = vmatpush3.bf16.msra.mxu0 %v14470_v24  ;;  %v10613_v24 = vld [vmem:[%s19965_s2 + $0x218] sm:$0xff]  ;;  %v2196_v32 = vsel %vm2194_vm5, %v2191_v6, %v2165_v63  ;;  %v17023_v63 = vld [vmem:[%s19966_s3 + $0xa] ss:$0 sm:$0xff] }
 0xc14   : > { %14475 = vmatprep.subr.bf16.mxu0 %v14474_v27 }
 0xc17   : > { %14477 = vmatpush3.bf16.msra.mxu0 %v14474_v27  ;;  %v2195_v27 = vsel %vm2194_vm5, %v2190_v25, %v2163_v62  ;;  %v10533_v25 = vld [vmem:[%s19968_s5] ss:$0 sm:$0xff] }
 0xc18   : > { %14479 = vmatprep.subr.bf16.mxu0 %v14478_v33 }
 0xc1b   : > { %14481 = vmatpush3.bf16.msra.mxu0 %v14478_v33  ;;  %v14526_v33 = vpack.c.bf16 %v10613_v24, %v10612_v23 }
 0xc1c   : > { %14483 = vmatprep.subr.bf16.mxu0 %v14482_v36 }
 0xc1f   : > { %14485 = vmatpush3.bf16.msra.mxu0 %v14482_v36  ;;  %v10615_v36 = vld [vmem:[%s19965_s2 + $0x228] sm:$0xff] }
 0xc20   : > { %14487 = vmatprep.subr.bf16.mxu0 %v14486_v44 }
 0xc23   : > { %14489 = vmatpush3.bf16.msra.mxu0 %v14486_v44  ;;  %v16269_v44 = vld [vmem:[%s19988_s8 + $0x10] sm:$0xff] }
 0xcd9   : > { %v12558_v45 = vpop.f32.mrb[20].mxu0 }
 0xcda   : > { %v2139_v46 = vadd.f32 %v12558_v45, %v16714_v50  ;;  %v2119_v47 = vpop.f32.mrb[21].mxu0  ;;  %v10610_v50 = vld [vmem:[%s19965_s2 + $0x200] sm:$0xff]  ;;  %v880_v45 = vadd.f32 %v16269_v44, %v16550_v8 }
 0xcdb   : > { %v2138_v49 = vadd.f32 %v16692_v39, %v2119_v47  ;;  %v16845_v56 = vpack.c.bf16 %v10611_v54, %v10610_v50  ;;  %v16270_v47 = vld [vmem:[%s19988_s8 + $0x18] sm:$0xff]  ;;  %s378_s8 = scalar_lea.vmem [#allocation2], %s377_s15 }
 0xcdc   : > { %2180 = vrot.lane.b32.xlu1 %v2139_v46, %s19979_s25  ;;  %v14530_v46 = vpack.c.bf16 %v10615_v36, %v10614_v35  ;;  %v881_v48 = vadd.f32 %v16270_v47, %v16548_v7  ;;  %v2192_v50 = vsel %vm628_vm2, %v880_v45, %v2151_v10  ;;  %s10374_s22 = sshll.u32 %s378_s8, 4  ;;  %s19923_s22 = int_to_ptr.vmem [resolvable:$true] %s10374_s22 }
 0xcdd   : > { %v12561_v39 = vpop.f32.mrb[22].mxu0  ;;  %2178 = vrot.lane.b32.xlu0 %v2138_v49, %s19979_s25  ;;  %14523 = vmatprep.subr.bf16.mxu0 %v16845_v56  ;;  %v10616_v49 = vld [vmem:[%s19965_s2 + $0x230] sm:$0xff]  ;;  %s16276_s1 = scalar_lea.vmem %s19923_s22, 16  ;;  %p16283_p0 = scmp.lt.s32.totalorder %s19923_s22, %s16281_s30 }
 0xcde   : > { %v2129_v58 = vpop.f32.mrb[23].mxu0  ;;  %v2141_v43 = vadd.f32 %v12561_v39, %v16728_v52  ;;  %v2658_v52 = vld [vmem:[%s19965_s2 + $0x18] sm:$0xff]  ;;  %v2193_v8 = vsel %vm628_vm2, %v881_v48, %v2153_v3  ;;  %p16277_p11 = scmp.ne.s32.totalorder %s19923_s22, %s16276_s1  ;;  %p16284_p1 = scmp.lt.s32.totalorder %s16282_s13, %s16276_s1 }
 0xcdf   : > { %v2140_v19 = vadd.f32 %v16719_v51, %v2129_v58  ;;  %v14494_v51 = vpack.c.bf16 %v2658_v52, %v2657_v15  ;;  %v2668_v15 = vld [vmem:[%s19965_s2 + $0x68] sm:$0xff]  ;;  %v10622_v52 = vld [vmem:[%s19965_s2 + $0x260] sm:$0xff] }
 0xce0   : > { %2168 = vrot.lane.b32.xlu1 %v1721_v57, %s19991_s14  ;;  %v14534_v57 = vpack.c.bf16 %v10617_v53, %v10616_v49  ;;  %v14546_v29 = vpack.c.bf16 %v10623_v20, %v10622_v52  ;;  %v10695_v49 = vld [vmem:[%s19966_s3 + $0xc] ss:$0 sm:$0xff]  ;;  %v10696_v53 = vld [vmem:[%s19966_s3 + $0x10] ss:$0 sm:$0xff]  ;;  %p16278_p12 = pnand %p16277_p11, %p16445_p5  ;;  %p16285_p2 = por %p16284_p1, %p16283_p0 }
 0xce1   : > { %2166 = vrot.lane.b32.xlu0 %v1720_v16, %s19991_s14  ;;  %14495 = vmatprep.subr.bf16.mxu1 %v14494_v51  ;;  %v10618_v16 = vld [vmem:[%s19965_s2 + $0x240] sm:$0xff]  ;;  %v10559_v52 = vld [vmem:[%s19965_s2 + $0x88] sm:$0xff] }
 0xce2   : > { %14497 = vmatpush3.bf16.msra.mxu1 %v14494_v51  ;;  %v14538_v42 = vpack.c.bf16 %v10619_v31, %v10618_v16  ;;  %v14514_v51 = vpack.c.bf16 %v2668_v15, %v2667_v4  ;;  %v10558_v15 = vld [vmem:[%s19965_s2 + $0x80] sm:$0xff]  ;;  %p16279_p13 = pneg %p16278_p12 }
 0xce3   : > { %14499 = vmatprep.subr.bf16.mxu1 %v14498_v40 }
 0xce4   : > { %2184 = vrot.lane.b32.xlu1 %v2141_v43, %s19979_s25  ;;  %v10621_v43 = vld [vmem:[%s19965_s2 + $0x258] sm:$0xff]  ;;  %p16286_p3 = pnand %p16285_p2, %p16279_p13 }
 0xce5   : > { %2182 = vrot.lane.b32.xlu0 %v2140_v19, %s19979_s25  ;;  %v14542_v19 = vpack.c.bf16 %v10621_v43, %v10620_v30  ;;  %s19993_s25 = smov 96  }
 0xce6   : > { %14501 = vmatpush3.bf16.msra.mxu1 %v14498_v40  ;;  %v2669_v40 = vld [vmem:[%s19965_s2 + $0x70] sm:$0xff] }
 0xce7   : > { %14503 = vmatprep.subr.bf16.mxu1 %v14502_v17 }
 0xcea   : > { %14505 = vmatpush3.bf16.msra.mxu1 %v14502_v17  ;;  %v14518_v17 = vpack.c.bf16 %v2670_v1, %v2669_v40  ;;  %v14574_v1 = vpack.c.bf16 %v10559_v52, %v10558_v15  ;;  %v10645_v15 = vld [vmem:[%s19965_s2 + $0x318] sm:$0xff] }
 0xceb   : > { %14507 = vmatprep.subr.bf16.mxu1 %v14506_v59 }
 0xcee   : > { %14509 = vmatpush3.bf16.msra.mxu1 %v14506_v59  ;;  %v12604_v59 = vpop.f32.mrb[24].mxu1 }
 0xcef   : > { %14511 = vmatprep.subr.bf16.mxu1 %v14510_v60  ;;  %v2382_v61 = vpop.f32.mrb[25].mxu1 }
 0xcf0   : > { %v12609_v62 = vpop.f32.mrb[26].mxu1  ;;  %v17061_v48 = vadd.f32 %v10536_v18, %v2382_v61  ;;  %v10564_v61 = vld [vmem:[%s19965_s2 + $0xb0] sm:$0xff] }
 0xcf1   : > { %v17026_v0 = vadd.f32 %v12609_v62, %v17016_v21  ;;  %v17028_v3 = vpop.f32.mrb[27].mxu1  ;;  %v10565_v62 = vld [vmem:[%s19965_s2 + $0xb8] sm:$0xff] }
 0xcf2   : > { %14513 = vmatpush3.bf16.msra.mxu1 %v14510_v60  ;;  %v17018_v60 = vadd.f32 %v12604_v59, %v10536_v18  ;;  %v12614_v10 = vpop.f32.mrb[28].mxu1  ;;  %v10563_v59 = vld [vmem:[%s19965_s2 + $0xa8] sm:$0xff] }
 0xcf3   : > { %14515 = vmatprep.subr.bf16.mxu1 %v14514_v51  ;;  %v17036_v12 = vadd.f32 %v12614_v10, %v17023_v63  ;;  %v17038_v13 = vpop.f32.mrb[29].mxu1  ;;  %v14586_v10 = vpack.c.bf16 %v10565_v62, %v10564_v61  ;;  %v10654_v62 = vld [vmem:[%s19965_s2 + $0x360] sm:$0xff] }
 0xcf4   : > { %v12619_v14 = vpop.f32.mrb[30].mxu1 }
 0xcf5   : > { %v17041_v23 = vadd.f32 %v12619_v14, %v17033_v11  ;;  %v17043_v24 = vpop.f32.mrb[31].mxu1  ;;  %v10566_v14 = vld [vmem:[%s19965_s2 + $0xc0] sm:$0xff] }
 0xcf6   : > { %14517 = vmatpush3.bf16.msra.mxu1 %v14514_v51 }
 0xcf7   : > { %14519 = vmatprep.subr.bf16.mxu1 %v14518_v17 }
 0xcfa   : > { %14521 = vmatpush3.bf16.msra.mxu1 %v14518_v17  ;;  %v10561_v17 = vld [vmem:[%s19965_s2 + $0x98] sm:$0xff] }
 0xcfb   : > { %v14578_v22 = vpack.c.bf16 %v10561_v17, %v10560_v41  ;;  %v10650_v17 = vld [vmem:[%s19965_s2 + $0x340] sm:$0xff] }
 0xd4e   : > { %v2181_v26 = vpop.permute.xlu1 %2180 }
 0xd4f   : > { %v2179_v28 = vpop.permute.xlu0 %2178  ;;  %v16937_v34 = vsel %vm2199_vm6, %v2196_v32, %v2181_v26 }
 0xd50   : > { %v16934_v5 = vsel %vm2199_vm6, %v2195_v27, %v2179_v28 }
 0xd51   : > { %12594 = vmatprep.mubr.f32.mxu0 %v16934_v5 }
 0xd52   : > { %v2169_v37 = vpop.permute.xlu1 %2168  ;;  %12595 = vmatmul.mubr.f32.vlgmr.msra.gmra.mrb[24].mxu0 %v16937_v34 }
 0xd53   : > { %v2167_v38 = vpop.permute.xlu0 %2166  ;;  %14525 = vmatpush3.bf16.msra.mxu0 %v16845_v56  ;;  %v2198_v56 = vsel %vm2194_vm5, %v2193_v8, %v2169_v37 }
 0xd54   : > { %14527 = vmatprep.subr.bf16.mxu0 %v14526_v33  ;;  %v2197_v39 = vsel %vm2194_vm5, %v2192_v50, %v2167_v38 }
 0xd56   : > { %v2185_v54 = vpop.permute.xlu1 %2184 }
 0xd57   : > { %v2183_v55 = vpop.permute.xlu0 %2182  ;;  %14529 = vmatpush3.bf16.msra.mxu0 %v14526_v33  ;;  %v16971_v58 = vsel %vm2199_vm6, %v2198_v56, %v2185_v54 }
 0xd58   : > { %v16967_v7 = vsel %vm2199_vm6, %v2197_v39, %v2183_v55  ;;  %14531 = vmatprep.subr.bf16.mxu0 %v14530_v46 }
 0xd59   : > { %12597 = vmatprep.mubr.f32.mxu0 %v16967_v7 }
 0xd5a   : > { %12598 = vmatmul.mubr.f32.gmra.mrb[26].mxu0 %v16971_v58 }
 0xd5b   : > { %14533 = vmatpush3.bf16.msra.mxu0 %v14530_v46 }
 0xd5c   : > { %14535 = vmatprep.subr.bf16.mxu0 %v14534_v57 }
 0xd5f   : > { %14537 = vmatpush3.bf16.msra.mxu0 %v14534_v57 }
 0xd60   : > { %14539 = vmatprep.subr.bf16.mxu0 %v14538_v42 }
 0xd63   : > { %14541 = vmatpush3.bf16.msra.mxu0 %v14538_v42 }
 0xd64   : > { %14543 = vmatprep.subr.bf16.mxu0 %v14542_v19 }
 0xd67   : > { %14545 = vmatpush3.bf16.msra.mxu0 %v14542_v19 }
 0xd68   : > { %14547 = vmatprep.subr.bf16.mxu0 %v14546_v29 }
 0xd6b   : > { %14549 = vmatpush3.bf16.msra.mxu0 %v14546_v29 }
 0xd6c   : > { %14551 = vmatprep.subr.bf16.mxu0 %v14550_v2 }
 0xd6f   : > { %14553 = vmatpush3.bf16.msra.mxu0 %v14550_v2  ;;  %v10562_v2 = vld [vmem:[%s19965_s2 + $0xa0] sm:$0xff] }
 0xd70   : > { %v14582_v18 = vpack.c.bf16 %v10563_v59, %v10562_v2  ;;  %v10652_v59 = vld [vmem:[%s19965_s2 + $0x350] sm:$0xff] }
 0xe25   : > { %v12596_v26 = vpop.f32.mrb[24].mxu0 }
 0xe26   : > { %v2282_v6 = vadd.f32 %v12596_v26, %v10533_v25  ;;  %v2276_v27 = vpop.f32.mrb[25].mxu0 }
 0xe27   : > { %v2277_v28 = vadd.f32 %v10533_v25, %v2276_v27  ;;  %v10569_v27 = vld [vmem:[%s19965_s2 + $0xd8] sm:$0xff] }
 0xe28   : > { %v2296_v32 = vmax.f32 %v2282_v6, 0.0  ;;  %v10568_v6 = vld [vmem:[%s19965_s2 + $0xd0] sm:$0xff] }
 0xe29   : > { %v2295_v33 = vmax.f32 %v2277_v28, 0.0  ;;  %v14594_v28 = vpack.c.bf16 %v10569_v27, %v10568_v6 }
 0xe2a   : > { %v17052_v36 = vadd.f32 %v2296_v32, %v16937_v34  ;;  %v10570_v32 = vld [vmem:[%s19965_s2 + $0xe0] sm:$0xff] }
 0xe2b   : > { %v17049_v35 = vadd.f32 %v2295_v33, %v16934_v5  ;;  %v10571_v33 = vld [vmem:[%s19965_s2 + $0xe8] sm:$0xff] }
 0xe2d   : > { %v12599_v37 = vpop.f32.mrb[26].mxu0  ;;  %12652 = vmatprep.mubr.f32.mxu1 %v17049_v35  ;;  %12690 = vmatprep.mubr.f32.mxu0 %v17049_v35 }
 0xe2e   : > { %v2292_v38 = vadd.f32 %v12599_v37, %v10533_v25  ;;  %v2286_v44 = vpop.f32.mrb[27].mxu0  ;;  %12653 = vmatmul.mubr.f32.vlgmr.msra.gmra.mrb[32].mxu1 %v17052_v36  ;;  %12691 = vmatmul.mubr.f32.vlgmr.msra.gmra.mrb[28].mxu0 %v17052_v36  ;;  %v14598_v37 = vpack.c.bf16 %v10571_v33, %v10570_v32 }
 0xe2f   : > { %v2287_v45 = vadd.f32 %v10533_v25, %v2286_v44  ;;  %v10567_v25 = vld [vmem:[%s19965_s2 + $0xc8] sm:$0xff]  ;;  %v10573_v44 = vld [vmem:[%s19965_s2 + $0xf8] sm:$0xff] }
 0xe30   : > { %v2298_v46 = vmax.f32 %v2292_v38, 0.0  ;;  %v14590_v26 = vpack.c.bf16 %v10567_v25, %v10566_v14  ;;  %v10572_v38 = vld [vmem:[%s19965_s2 + $0xf0] sm:$0xff] }
 0xe31   : > { %v2297_v47 = vmax.f32 %v2287_v45, 0.0  ;;  %v14602_v45 = vpack.c.bf16 %v10573_v44, %v10572_v38  ;;  %v10656_v25 = vld [vmem:[%s19965_s2 + $0x370] sm:$0xff] }
 0xe32   : > { %v17064_v34 = vadd.f32 %v2298_v46, %v16971_v58  ;;  %v17141_v46 = vadd.f32 %v17016_v21, %v17028_v3  ;;  %v10705_v21 = vld [vmem:[%s19966_s3 + $0xd] ss:$0 sm:$0xff] }
 0xe33   : > { %v17059_v5 = vadd.f32 %v2297_v47, %v16967_v7 }
 0xe35   : > { %12655 = vmatprep.mubr.f32.mxu1 %v17059_v5  ;;  %12693 = vmatprep.mubr.f32.mxu0 %v17059_v5 }
 0xe36   : > { %12656 = vmatmul.mubr.f32.gmra.mrb[34].mxu1 %v17064_v34  ;;  %12694 = vmatmul.mubr.f32.gmra.mrb[30].mxu0 %v17064_v34 }
 0xe37   : > { %12704 = vmatprep.mubr.msk.f32.mxu1 %vm628_vm2, %v17061_v48 }
 0xf01   : > { %v12654_v50 = vpop.f32.mrb[32].mxu1  ;;  %v12692_v54 = vpop.f32.mrb[28].mxu0 }
 0xf02   : > { %v2903_v8 = vadd.f32 %v12654_v50, %v10695_v49  ;;  %v2994_v39 = vadd.f32 %v12692_v54, %v10696_v53  ;;  %v2897_v55 = vpop.f32.mrb[33].mxu1  ;;  %v2988_v56 = vpop.f32.mrb[29].mxu0 }
 0xf03   : > { %v2898_v7 = vadd.f32 %v10695_v49, %v2897_v55  ;;  %v2989_v57 = vadd.f32 %v10696_v53, %v2988_v56 }
 0xf05   : > { %v14554_v58 = vpack.c.bf16 %v2903_v8, %v2898_v7  ;;  %v14566_v16 = vpack.c.bf16 %v2994_v39, %v2989_v57 }
 0xf07   : > { %14556 = vmatprep.subr.msk.bf16.mxu1 %vm16484_vm3, %v14554_v58  ;;  %14567 = vmatprep.subr.bf16.mxu0 %v14566_v16 }
 0xf08   : > { %14559 = vmatpush3.bf16.xpose.msk.msra.mxu1 %vm16484_vm3, %v14554_v58  ;;  %14569 = vmatpush3.bf16.msra.mxu0 %v14566_v16 }
 0xf09   : > { %v12657_v31 = vpop.f32.mrb[34].mxu1  ;;  %v12695_v42 = vpop.f32.mrb[30].mxu0 }
 0xf0a   : > { %v2913_v30 = vadd.f32 %v12657_v31, %v10695_v49  ;;  %v3004_v43 = vadd.f32 %v12695_v42, %v10696_v53  ;;  %v2907_v19 = vpop.f32.mrb[35].mxu1  ;;  %v2998_v4 = vpop.f32.mrb[31].mxu0 }
 0xf0b   : > { %v2908_v51 = vadd.f32 %v10695_v49, %v2907_v19  ;;  %v2999_v20 = vadd.f32 %v10696_v53, %v2998_v4  ;;  %v10644_v4 = vld [vmem:[%s19965_s2 + $0x310] sm:$0xff] }
 0xf0c   : > { %v14694_v52 = vpack.c.bf16 %v10645_v15, %v10644_v4 }
 0xf0d   : > { %v14560_v29 = vpack.c.bf16 %v2913_v30, %v2908_v51  ;;  %v14570_v40 = vpack.c.bf16 %v3004_v43, %v2999_v20  ;;  %v10642_v30 = vld [vmem:[%s19965_s2 + $0x300] sm:$0xff]  ;;  %v10643_v43 = vld [vmem:[%s19965_s2 + $0x308] sm:$0xff] }
 0xf0e   : > { %v14690_v19 = vpack.c.bf16 %v10643_v43, %v10642_v30  ;;  %v10646_v51 = vld [vmem:[%s19965_s2 + $0x320] sm:$0xff]  ;;  %v10647_v20 = vld [vmem:[%s19965_s2 + $0x328] sm:$0xff] }
 0xf0f   : > { %14562 = vmatprep.subr.msk.bf16.mxu1 %vm16484_vm3, %v14560_v29  ;;  %14571 = vmatprep.subr.bf16.mxu0 %v14570_v40 }
 0xf10   : > { %14565 = vmatpush3.bf16.xpose.msk.msra.mxu1 %vm16484_vm3, %v14560_v29  ;;  %14573 = vmatpush3.bf16.msra.mxu0 %v14570_v40  ;;  %v14698_v29 = vpack.c.bf16 %v10647_v20, %v10646_v51  ;;  %v10648_v40 = vld [vmem:[%s19965_s2 + $0x330] sm:$0xff] }
 0xf11   : > { %14575 = vmatprep.subr.bf16.mxu1 %v14574_v1 }
 0xf17   : > { %12705 = vmatmul.mubr.msk.f32.vlgmr.msra.gmra.mrb[36].mxu1 %vm628_vm2, %v17018_v60 }
 0xf18   : > { %14577 = vmatpush3.bf16.msra.mxu1 %v14574_v1  ;;  %12750 = vmatprep.mubr.f32.mxu1 %v17049_v35  ;;  %v10649_v1 = vld [vmem:[%s19965_s2 + $0x338] sm:$0xff] }
 0xf19   : > { %14579 = vmatprep.subr.bf16.mxu1 %v14578_v22  ;;  %v14702_v41 = vpack.c.bf16 %v10649_v1, %v10648_v40  ;;  %v10628_v40 = vld [vmem:[%s19965_s2 + $0x290] sm:$0xff]  ;;  %v10629_v1 = vld [vmem:[%s19965_s2 + $0x298] sm:$0xff] }
 0xf1c   : > { %14581 = vmatpush3.bf16.msra.mxu1 %v14578_v22  ;;  %v10651_v22 = vld [vmem:[%s19965_s2 + $0x348] sm:$0xff] }
 0xf1d   : > { %14583 = vmatprep.subr.bf16.mxu1 %v14582_v18  ;;  %v14706_v2 = vpack.c.bf16 %v10651_v22, %v10650_v17  ;;  %v14610_v22 = vpack.c.bf16 %v10629_v1, %v10628_v40 }
 0xf20   : > { %14585 = vmatpush3.bf16.msra.mxu1 %v14582_v18  ;;  %v10653_v18 = vld [vmem:[%s19965_s2 + $0x358] sm:$0xff] }
 0xf21   : > { %14587 = vmatprep.subr.bf16.mxu1 %v14586_v10  ;;  %v14710_v61 = vpack.c.bf16 %v10653_v18, %v10652_v59  ;;  %v10631_v59 = vld [vmem:[%s19965_s2 + $0x2a8] sm:$0xff] }
 0xf24   : > { %14589 = vmatpush3.bf16.msra.mxu1 %v14586_v10  ;;  %v10655_v10 = vld [vmem:[%s19965_s2 + $0x368] sm:$0xff] }
 0xf25   : > { %14591 = vmatprep.subr.bf16.mxu1 %v14590_v26  ;;  %v14714_v14 = vpack.c.bf16 %v10655_v10, %v10654_v62  ;;  %v10633_v62 = vld [vmem:[%s19965_s2 + $0x2b8] sm:$0xff] }
 0xf28   : > { %14593 = vmatpush3.bf16.msra.mxu1 %v14590_v26  ;;  %v10657_v26 = vld [vmem:[%s19965_s2 + $0x378] sm:$0xff] }
 0xf29   : > { %14595 = vmatprep.subr.bf16.mxu1 %v14594_v28  ;;  %v14718_v6 = vpack.c.bf16 %v10657_v26, %v10656_v25  ;;  %v10635_v25 = vld [vmem:[%s19965_s2 + $0x2c8] sm:$0xff] }
 0xf2c   : > { %14597 = vmatpush3.bf16.msra.mxu1 %v14594_v28 }
 0xf2d   : > { %14599 = vmatprep.subr.bf16.mxu1 %v14598_v37 }
 0xf30   : > { %14601 = vmatpush3.bf16.msra.mxu1 %v14598_v37 }
 0xf31   : > { %14603 = vmatprep.subr.bf16.mxu1 %v14602_v45 }
 0xf34   : > { %14605 = vmatpush3.bf16.msra.mxu1 %v14602_v45 }
 0xf37   : > { %12751 = vmatmul.mubr.f32.vlgmr.msra.gmra.mrb[38].mxu1 %v17052_v36 }
 0xf38   : > { %12753 = vmatprep.mubr.f32.mxu1 %v17059_v5 }
 0xf3b   : > { %12754 = vmatmul.mubr.f32.gmra.mrb[40].mxu1 %v17064_v34 }
 0xf3c   : > { %12802 = vmatprep.mubr.msk.f32.mxu1 %vm628_vm2, %v17141_v46 }
 0xfea   : > { %v12706_v47 = vpop.f32.mrb[36].mxu1 }
 0xfeb   : > { %v17146_v49 = vmul.f32 0.088388346, %v12706_v47  ;;  %v3091_v53 = vpop.f32.mrb[37].mxu1 }
 0xfec   : > { %v17148_v50 = vmul.f32 0.088388346, %v3091_v53 }
 0xfed   : > { %v3105_v54 = vsel %vm628_vm2, %v17146_v49, -inf }
 0xfee   : > { %3106 = vmax.xlane.f32.xlu1 %v3105_v54  ;;  %v3102_v8 = vsel %vm628_vm2, %v17148_v50, -inf  ;;  %v10626_v54 = vld [vmem:[%s19965_s2 + $0x280] sm:$0xff] }
 0xfef   : > { %3103 = vmax.xlane.f32.xlu0 %v3102_v8 }
0x100a   : > { %v12752_v3 = vpop.f32.mrb[38].mxu1 }
0x100b   : > { %v3285_v39 = vadd.f32 %v12752_v3, %v10705_v21  ;;  %v3279_v55 = vpop.f32.mrb[39].mxu1 }
0x100c   : > { %v3280_v56 = vadd.f32 %v10705_v21, %v3279_v55 }
0x100e   : > { %v14638_v7 = vpack.c.bf16 %v3285_v39, %v3280_v56  ;;  %v12755_v57 = vpop.f32.mrb[40].mxu1 }
0x100f   : > { %v3295_v58 = vadd.f32 %v12755_v57, %v10705_v21  ;;  %v3289_v16 = vpop.f32.mrb[41].mxu1 }
0x1010   : > { %v3290_v31 = vadd.f32 %v10705_v21, %v3289_v16  ;;  %14640 = vmatprep.subr.msk.bf16.mxu1 %vm16484_vm3, %v14638_v7 }
0x1011   : > { %14643 = vmatpush3.bf16.xpose.msk.msra.mxu1 %vm16484_vm3, %v14638_v7  ;;  %v10716_v7 = vld [vmem:[%s19966_s3 + $0x12] ss:$0 sm:$0xff] }
0x1012   : > { %v14644_v42 = vpack.c.bf16 %v3295_v58, %v3290_v31 }
0x1014   : > { %14646 = vmatprep.subr.msk.bf16.mxu1 %vm16484_vm3, %v14644_v42 }
0x1019   : > { %14649 = vmatpush3.bf16.xpose.msk.msra.mxu1 %vm16484_vm3, %v14644_v42 }
0x101a   : > { %14691 = vmatprep.subr.bf16.mxu1 %v14690_v19 }
0x1020   : > { %12803 = vmatmul.mubr.msk.f32.vlgmr.msra.gmra.mrb[42].mxu1 %vm628_vm2, %v17026_v0 }
0x1021   : > { %14693 = vmatpush3.bf16.msra.mxu1 %v14690_v19  ;;  %12886 = vmatprep.mubr.f32.mxu1 %v17049_v35 }
0x1022   : > { %14695 = vmatprep.subr.bf16.mxu1 %v14694_v52 }
0x1025   : > { %14697 = vmatpush3.bf16.msra.mxu1 %v14694_v52 }
0x1026   : > { %14699 = vmatprep.subr.bf16.mxu1 %v14698_v29 }
0x1029   : > { %14701 = vmatpush3.bf16.msra.mxu1 %v14698_v29 }
0x102a   : > { %14703 = vmatprep.subr.bf16.mxu1 %v14702_v41 }
0x102d   : > { %14705 = vmatpush3.bf16.msra.mxu1 %v14702_v41 }
0x102e   : > { %14707 = vmatprep.subr.bf16.mxu1 %v14706_v2 }
0x1031   : > { %14709 = vmatpush3.bf16.msra.mxu1 %v14706_v2  ;;  %v10630_v2 = vld [vmem:[%s19965_s2 + $0x2a0] sm:$0xff] }
0x1032   : > { %14711 = vmatprep.subr.bf16.mxu1 %v14710_v61  ;;  %v14614_v18 = vpack.c.bf16 %v10631_v59, %v10630_v2 }
0x1035   : > { %14713 = vmatpush3.bf16.msra.mxu1 %v14710_v61  ;;  %v10632_v61 = vld [vmem:[%s19965_s2 + $0x2b0] sm:$0xff] }
0x1036   : > { %14715 = vmatprep.subr.bf16.mxu1 %v14714_v14  ;;  %v14618_v10 = vpack.c.bf16 %v10633_v62, %v10632_v61  ;;  %v10578_v62 = vld [vmem:[%s19965_s2 + $0x120] sm:$0xff] }
0x1039   : > { %14717 = vmatpush3.bf16.msra.mxu1 %v14714_v14  ;;  %v10634_v14 = vld [vmem:[%s19965_s2 + $0x2c0] sm:$0xff] }
0x103a   : > { %14719 = vmatprep.subr.bf16.mxu1 %v14718_v6  ;;  %v14622_v26 = vpack.c.bf16 %v10635_v25, %v10634_v14  ;;  %v10580_v25 = vld [vmem:[%s19965_s2 + $0x130] sm:$0xff] }
0x103d   : > { %14721 = vmatpush3.bf16.msra.mxu1 %v14718_v6  ;;  %v10636_v6 = vld [vmem:[%s19965_s2 + $0x2d0] sm:$0xff] }
0x1040   : > { %12887 = vmatmul.mubr.f32.vlgmr.msra.gmra.mrb[44].mxu1 %v17052_v36 }
0x1041   : > { %12889 = vmatprep.mubr.f32.mxu1 %v17059_v5 }
0x1044   : > { %12890 = vmatmul.mubr.f32.gmra.mrb[46].mxu1 %v17064_v34 }
0x107b   : > { %v3107_v27 = vpop.xlane.xlu1 %3106 }
0x107c   : > { %v3109_v28 = vsub.f32 %v17146_v49, %v3107_v27  ;;  %v3104_v32 = vpop.xlane.xlu0 %3103  ;;  %v10627_v49 = vld [vmem:[%s19965_s2 + $0x288] sm:$0xff]  ;;  %v10637_v27 = vld [vmem:[%s19965_s2 + $0x2d8] sm:$0xff] }
0x107d   : > { %v3108_v33 = vsub.f32 %v17148_v50, %v3104_v32  ;;  %v14606_v50 = vpack.c.bf16 %v10627_v49, %v10626_v54  ;;  %v10638_v32 = vld [vmem:[%s19965_s2 + $0x2e0] sm:$0xff] }
0x107e   : > { %v3112_v37 = vmul.f32 1.442695, %v3109_v28  ;;  %v14626_v28 = vpack.c.bf16 %v10637_v27, %v10636_v6  ;;  %v10582_v27 = vld [vmem:[%s19965_s2 + $0x140] sm:$0xff] }
0x107f   : > { %v3110_v38 = vmul.f32 1.442695, %v3108_v33  ;;  %14607 = vmatprep.subr.bf16.mxu0 %v14606_v50  ;;  %v10639_v33 = vld [vmem:[%s19965_s2 + $0x2e8] sm:$0xff] }
0x1081   : > { %16123 = vpow2.f32 %v3110_v38  ;;  %v10640_v38 = vld [vmem:[%s19965_s2 + $0x2f0] sm:$0xff] }
0x1082   : > { %16125 = vpow2.f32 %v3112_v37  ;;  %v14630_v37 = vpack.c.bf16 %v10639_v33, %v10638_v32  ;;  %v10584_v33 = vld [vmem:[%s19965_s2 + $0x150] sm:$0xff] }
0x108b   : > { %v16124_v44 = vpop.eup %16123 }
0x108c   : > { %v3114_v45 = vsel %vm628_vm2, %v16124_v44, 0.0  ;;  %v16126_v47 = vpop.eup %16125 }
0x108d   : > { %3115 = vadd.xlane.f32.xlu0 %v3114_v45  ;;  %v3117_v53 = vsel %vm628_vm2, %v16126_v47, 0.0 }
0x1091   : > { %3118 = vadd.xlane.f32.xlu0 %v3117_v53 }
0x10f3   : > { %v12804_v8 = vpop.f32.mrb[42].mxu1 }
0x10f4   : > { %v17229_v21 = vmul.f32 0.088388346, %v12804_v8  ;;  %v3473_v3 = vpop.f32.mrb[43].mxu1 }
0x10f5   : > { %v17231_v39 = vmul.f32 0.088388346, %v3473_v3 }
0x10f6   : > { %v3487_v55 = vsel %vm628_vm2, %v17229_v21, -inf }
0x10f7   : > { %3488 = vmax.xlane.f32.xlu1 %v3487_v55  ;;  %v3484_v56 = vsel %vm628_vm2, %v17231_v39, -inf }
0x10f8   : > { %3485 = vmax.xlane.f32.xlu0 %v3484_v56 }
0x1113   : > { %v12888_v57 = vpop.f32.mrb[44].mxu1 }
0x1114   : > { %v3758_v58 = vadd.f32 %v12888_v57, %v10716_v7  ;;  %v3752_v16 = vpop.f32.mrb[45].mxu1 }
0x1115   : > { %v3753_v31 = vadd.f32 %v10716_v7, %v3752_v16 }
0x1117   : > { %v14734_v42 = vpack.c.bf16 %v3758_v58, %v3753_v31  ;;  %v12891_v30 = vpop.f32.mrb[46].mxu1 }
0x1118   : > { %v3768_v43 = vadd.f32 %v12891_v30, %v10716_v7  ;;  %v3762_v19 = vpop.f32.mrb[47].mxu1 }
0x1119   : > { %v3763_v4 = vadd.f32 %v10716_v7, %v3762_v19  ;;  %14735 = vmatprep.subr.bf16.mxu1 %v14734_v42 }
0x111a   : > { %14737 = vmatpush3.bf16.msra.mxu1 %v14734_v42  ;;  %v3116_v15 = vpop.xlane.xlu0 %3115 }
0x111b   : > { %v14738_v52 = vpack.c.bf16 %v3768_v43, %v3763_v4  ;;  %16127 = vrcp.f32 %v3116_v15 }
0x111d   : > { %14739 = vmatprep.subr.bf16.mxu1 %v14738_v52 }
0x111e   : > { %14741 = vmatpush3.bf16.msra.mxu1 %v14738_v52  ;;  %v3119_v51 = vpop.xlane.xlu0 %3118 }
0x111f   : > { %16129 = vrcp.f32 %v3119_v51  ;;  %v10574_v51 = vld [vmem:[%s19965_s2 + $0x100] sm:$0xff] }
0x1125   : > { %v16128_v20 = vpop.eup %16127 }
0x1126   : > { %v3122_v29 = vmul.f32 %v16128_v20, %v16124_v44  ;;  %v10641_v44 = vld [vmem:[%s19965_s2 + $0x2f8] sm:$0xff]  ;;  %v10575_v20 = vld [vmem:[%s19965_s2 + $0x108] sm:$0xff] }
0x1127   : > { %v14634_v45 = vpack.c.bf16 %v10641_v44, %v10640_v38  ;;  %v14658_v1 = vpack.c.bf16 %v10575_v20, %v10574_v51  ;;  %v10586_v44 = vld [vmem:[%s19965_s2 + $0x160] sm:$0xff] }
0x1128   : > { %12715 = vmatprep.mubr.msk.f32.mxu0 %vm628_vm2, %v3122_v29  ;;  %v10662_v20 = vld [vmem:[%s19965_s2 + $0x3a0] sm:$0xff] }
0x1129   : > { %v16130_v41 = vpop.eup %16129 }
0x112a   : > { %v3123_v17 = vmul.f32 %v16130_v41, %v16126_v47 }
0x112c   : > { %12716 = vmatmul.mubr.msk.f32.vlgmr.msra.gmra.mrb[32].mxu0 %vm628_vm2, %v3123_v17  ;;  %v10576_v17 = vld [vmem:[%s19965_s2 + $0x110] sm:$0xff] }
0x112d   : > { %14609 = vmatpush3.bf16.msra.mxu0 %v14606_v50  ;;  %12788 = vmatprep.mubr.f32.mxu0 %v17049_v35 }
0x112e   : > { %14611 = vmatprep.subr.bf16.mxu0 %v14610_v22 }
0x1131   : > { %14613 = vmatpush3.bf16.msra.mxu0 %v14610_v22  ;;  %v10577_v22 = vld [vmem:[%s19965_s2 + $0x118] sm:$0xff] }
0x1132   : > { %14615 = vmatprep.subr.bf16.mxu0 %v14614_v18  ;;  %v14662_v61 = vpack.c.bf16 %v10577_v22, %v10576_v17  ;;  %v10666_v22 = vld [vmem:[%s19965_s2 + $0x3c0] sm:$0xff] }
0x1135   : > { %14617 = vmatpush3.bf16.msra.mxu0 %v14614_v18 }
0x1136   : > { %14619 = vmatprep.subr.bf16.mxu0 %v14618_v10 }
0x1139   : > { %14621 = vmatpush3.bf16.msra.mxu0 %v14618_v10  ;;  %v10579_v10 = vld [vmem:[%s19965_s2 + $0x128] sm:$0xff] }
0x113a   : > { %14623 = vmatprep.subr.bf16.mxu0 %v14622_v26  ;;  %v14666_v14 = vpack.c.bf16 %v10579_v10, %v10578_v62  ;;  %v10670_v10 = vld [vmem:[%s19965_s2 + $0x3e0] sm:$0xff] }
0x113d   : > { %14625 = vmatpush3.bf16.msra.mxu0 %v14622_v26  ;;  %v10581_v26 = vld [vmem:[%s19965_s2 + $0x138] sm:$0xff] }
0x113e   : > { %14627 = vmatprep.subr.bf16.mxu0 %v14626_v28  ;;  %v14670_v6 = vpack.c.bf16 %v10581_v26, %v10580_v25  ;;  %v10672_v26 = vld [vmem:[%s19965_s2 + $0x3f0] sm:$0xff] }
0x1141   : > { %14629 = vmatpush3.bf16.msra.mxu0 %v14626_v28  ;;  %v10583_v28 = vld [vmem:[%s19965_s2 + $0x148] sm:$0xff] }
0x1142   : > { %14631 = vmatprep.subr.bf16.mxu0 %v14630_v37  ;;  %v14674_v32 = vpack.c.bf16 %v10583_v28, %v10582_v27 }
0x1145   : > { %14633 = vmatpush3.bf16.msra.mxu0 %v14630_v37  ;;  %v10585_v37 = vld [vmem:[%s19965_s2 + $0x158] sm:$0xff] }
0x1146   : > { %14635 = vmatprep.subr.bf16.mxu0 %v14634_v45  ;;  %v14678_v38 = vpack.c.bf16 %v10585_v37, %v10584_v33 }
0x1149   : > { %14637 = vmatpush3.bf16.msra.mxu0 %v14634_v45  ;;  %v10587_v45 = vld [vmem:[%s19965_s2 + $0x168] sm:$0xff] }
0x114c   : > { %12789 = vmatmul.mubr.f32.vlgmr.msra.gmra.mrb[34].mxu0 %v17052_v36 }
0x114d   : > { %12791 = vmatprep.mubr.f32.mxu0 %v17059_v5 }
0x1150   : > { %12792 = vmatmul.mubr.f32.gmra.mrb[36].mxu0 %v17064_v34 }
0x1184   : > { %v3489_v47 = vpop.xlane.xlu1 %3488 }
0x1185   : > { %v3491_v53 = vsub.f32 %v17229_v21, %v3489_v47  ;;  %v3486_v54 = vpop.xlane.xlu0 %3485  ;;  %v10706_v21 = vld [vmem:[%s19966_s3 + $0x11] ss:$0 sm:$0xff]  ;;  %v14682_v47 = vpack.c.bf16 %v10587_v45, %v10586_v44  ;;  %v10726_v45 = vld [vmem:[%s19966_s3 + $0x13] ss:$0 sm:$0xff] }
0x1186   : > { %v3490_v49 = vsub.f32 %v17231_v39, %v3486_v54  ;;  %v10589_v54 = vld [vmem:[%s19965_s2 + $0x178] sm:$0xff] }
0x1187   : > { %v3494_v50 = vmul.f32 1.442695, %v3491_v53  ;;  %v10588_v53 = vld [vmem:[%s19965_s2 + $0x170] sm:$0xff] }
0x1188   : > { %v3492_v8 = vmul.f32 1.442695, %v3490_v49  ;;  %v14686_v49 = vpack.c.bf16 %v10589_v54, %v10588_v53 }
0x1189   : > { %16131 = vpow2.f32 %v3494_v50  ;;  %v17354_v50 = vadd.f32 %v17023_v63, %v17038_v13 }
0x118a   : > { %16133 = vpow2.f32 %v3492_v8 }
0x1193   : > { %v16132_v3 = vpop.eup %16131 }
0x1194   : > { %v16134_v55 = vpop.eup %16133  ;;  %v3499_v56 = vsel %vm628_vm2, %v16132_v3, 0.0 }
0x1195   : > { %3500 = vadd.xlane.f32.xlu1 %v3499_v56  ;;  %v3496_v7 = vsel %vm628_vm2, %v16134_v55, 0.0 }
0x1196   : > { %3497 = vadd.xlane.f32.xlu0 %v3496_v7 }
0x11ff   : > { %v17292_v57 = vpop.f32.mrb[32].mxu0 }
0x1200   : > { %v17294_v58 = vpop.f32.mrb[33].mxu0 }
0x121f   : > { %v12790_v39 = vpop.f32.mrb[34].mxu0 }
0x1220   : > { %v3376_v16 = vadd.f32 %v12790_v39, %v10706_v21  ;;  %v3370_v31 = vpop.f32.mrb[35].mxu0 }
0x1221   : > { %v3371_v42 = vadd.f32 %v10706_v21, %v3370_v31 }
0x1222   : > { %v3501_v30 = vpop.xlane.xlu1 %3500 }
0x1223   : > { %v14650_v43 = vpack.c.bf16 %v3376_v16, %v3371_v42  ;;  %16135 = vrcp.f32 %v3501_v30  ;;  %v12793_v19 = vpop.f32.mrb[36].mxu0  ;;  %v3498_v4 = vpop.xlane.xlu0 %3497 }
0x1224   : > { %v3386_v15 = vadd.f32 %v12793_v19, %v10706_v21  ;;  %v3380_v52 = vpop.f32.mrb[37].mxu0  ;;  %16137 = vrcp.f32 %v3498_v4  ;;  %v10659_v19 = vld [vmem:[%s19965_s2 + $0x388] sm:$0xff] }
0x1225   : > { %v3381_v29 = vadd.f32 %v10706_v21, %v3380_v52  ;;  %14651 = vmatprep.subr.bf16.mxu0 %v14650_v43  ;;  %v10661_v52 = vld [vmem:[%s19965_s2 + $0x398] sm:$0xff] }
0x1226   : > { %14653 = vmatpush3.bf16.msra.mxu0 %v14650_v43  ;;  %v10658_v43 = vld [vmem:[%s19965_s2 + $0x380] sm:$0xff] }
0x1227   : > { %v14654_v40 = vpack.c.bf16 %v3386_v15, %v3381_v29  ;;  %v14774_v4 = vpack.c.bf16 %v10659_v19, %v10658_v43  ;;  %v10660_v15 = vld [vmem:[%s19965_s2 + $0x390] sm:$0xff]  ;;  %v10663_v29 = vld [vmem:[%s19965_s2 + $0x3a8] sm:$0xff] }
0x1228   : > { %v14778_v51 = vpack.c.bf16 %v10661_v52, %v10660_v15 }
0x1229   : > { %14655 = vmatprep.subr.bf16.mxu0 %v14654_v40 }
0x122a   : > { %14657 = vmatpush3.bf16.msra.mxu0 %v14654_v40  ;;  %v14782_v40 = vpack.c.bf16 %v10663_v29, %v10662_v20  ;;  %v10591_v20 = vld [vmem:[%s19965_s2 + $0x188] sm:$0xff] }
0x122b   : > { %14659 = vmatprep.subr.bf16.mxu0 %v14658_v1 }
0x122d   : > { %v16136_v41 = vpop.eup %16135 }
0x122e   : > { %v16138_v2 = vpop.eup %16137  ;;  %v3505_v18 = vmul.f32 %v16136_v41, %v16132_v3  ;;  %v10665_v41 = vld [vmem:[%s19965_s2 + $0x3b8] sm:$0xff] }
0x122f   : > { %v3504_v59 = vmul.f32 %v16138_v2, %v16134_v55  ;;  %v10715_v55 = vld [vmem:[%s19966_s3 + $0xe] ss:$0 sm:$0xff] }
0x1230   : > { %v10667_v2 = vld [vmem:[%s19965_s2 + $0x3c8] sm:$0xff] }
0x1231   : > { %12813 = vmatprep.mubr.msk.f32.mxu0 %vm628_vm2, %v3504_v59  ;;  %v14790_v59 = vpack.c.bf16 %v10667_v2, %v10666_v22  ;;  %v10593_v22 = vld [vmem:[%s19965_s2 + $0x198] sm:$0xff] }
0x1232   : > { %12814 = vmatmul.mubr.msk.f32.vlgmr.msra.gmra.mrb[38].mxu0 %vm628_vm2, %v3505_v18  ;;  %v10668_v18 = vld [vmem:[%s19965_s2 + $0x3d0] sm:$0xff] }
0x1233   : > { %14661 = vmatpush3.bf16.msra.mxu0 %v14658_v1  ;;  %12848 = vmatprep.mubr.f32.mxu0 %v17049_v35  ;;  %v10664_v1 = vld [vmem:[%s19965_s2 + $0x3b0] sm:$0xff] }
0x1234   : > { %14663 = vmatprep.subr.bf16.mxu0 %v14662_v61  ;;  %v14786_v17 = vpack.c.bf16 %v10665_v41, %v10664_v1 }
0x1237   : > { %14665 = vmatpush3.bf16.msra.mxu0 %v14662_v61  ;;  %v10669_v61 = vld [vmem:[%s19965_s2 + $0x3d8] sm:$0xff] }
0x1238   : > { %14667 = vmatprep.subr.bf16.mxu0 %v14666_v14  ;;  %v14794_v62 = vpack.c.bf16 %v10669_v61, %v10668_v18 }
0x123b   : > { %14669 = vmatpush3.bf16.msra.mxu0 %v14666_v14  ;;  %v10671_v14 = vld [vmem:[%s19965_s2 + $0x3e8] sm:$0xff] }
0x123c   : > { %14671 = vmatprep.subr.bf16.mxu0 %v14670_v6  ;;  %v14798_v25 = vpack.c.bf16 %v10671_v14, %v10670_v10  ;;  %v10595_v10 = vld [vmem:[%s19965_s2 + $0x1a8] sm:$0xff] }
0x123f   : > { %14673 = vmatpush3.bf16.msra.mxu0 %v14670_v6  ;;  %v10673_v6 = vld [vmem:[%s19965_s2 + $0x3f8] sm:$0xff] }
0x1240   : > { %14675 = vmatprep.subr.bf16.mxu0 %v14674_v32  ;;  %v14802_v27 = vpack.c.bf16 %v10673_v6, %v10672_v26  ;;  %v10597_v26 = vld [vmem:[%s19965_s2 + $0x1b8] sm:$0xff] }
0x1243   : > { %14677 = vmatpush3.bf16.msra.mxu0 %v14674_v32 }
0x1244   : > { %14679 = vmatprep.subr.bf16.mxu0 %v14678_v38 }
0x1247   : > { %14681 = vmatpush3.bf16.msra.mxu0 %v14678_v38 }
0x1248   : > { %14683 = vmatprep.subr.bf16.mxu0 %v14682_v47 }
0x124b   : > { %14685 = vmatpush3.bf16.msra.mxu0 %v14682_v47 }
0x124c   : > { %14687 = vmatprep.subr.bf16.mxu0 %v14686_v49 }
0x124f   : > { %14689 = vmatpush3.bf16.msra.mxu0 %v14686_v49 }
0x1252   : > { %12849 = vmatmul.mubr.f32.vlgmr.msra.gmra.mrb[40].mxu0 %v17052_v36 }
0x1253   : > { %12851 = vmatprep.mubr.f32.mxu0 %v17059_v5 }
0x1256   : > { %12852 = vmatmul.mubr.f32.gmra.mrb[42].mxu0 %v17064_v34 }
0x1257   : > { %12900 = vmatprep.mubr.msk.f32.mxu0 %vm628_vm2, %v17354_v50 }
0x1305   : > { %v17359_v8 = vpop.f32.mrb[38].mxu0 }
0x1306   : > { %v17361_v3 = vpop.f32.mrb[39].mxu0 }
0x1325   : > { %v12850_v56 = vpop.f32.mrb[40].mxu0 }
0x1326   : > { %v3667_v7 = vadd.f32 %v12850_v56, %v10715_v55  ;;  %v3661_v21 = vpop.f32.mrb[41].mxu0 }
0x1327   : > { %v3662_v39 = vadd.f32 %v10715_v55, %v3661_v21 }
0x1329   : > { %v14722_v16 = vpack.c.bf16 %v3667_v7, %v3662_v39  ;;  %v12853_v63 = vpop.f32.mrb[42].mxu0 }
0x132a   : > { %v3677_v13 = vadd.f32 %v12853_v63, %v10715_v55  ;;  %v3671_v31 = vpop.f32.mrb[43].mxu0 }
0x132b   : > { %v3672_v42 = vadd.f32 %v10715_v55, %v3671_v31  ;;  %14724 = vmatprep.subr.msk.bf16.mxu0 %vm16484_vm3, %v14722_v16 }
0x132c   : > { %14727 = vmatpush3.bf16.xpose.msk.msra.mxu0 %vm16484_vm3, %v14722_v16 }
0x132d   : > { %v14728_v30 = vpack.c.bf16 %v3677_v13, %v3672_v42 }
0x132f   : > { %14730 = vmatprep.subr.msk.bf16.mxu0 %vm16484_vm3, %v14728_v30 }
0x1334   : > { %14733 = vmatpush3.bf16.xpose.msk.msra.mxu0 %vm16484_vm3, %v14728_v30 }
0x1335   : > { %14775 = vmatprep.subr.bf16.mxu0 %v14774_v4 }
0x133b   : > { %12901 = vmatmul.mubr.msk.f32.vlgmr.msra.gmra.mrb[44].mxu0 %vm628_vm2, %v17036_v12 }
0x133c   : > { %14777 = vmatpush3.bf16.msra.mxu0 %v14774_v4  ;;  %12984 = vmatprep.mubr.f32.mxu0 %v17049_v35 }
0x133d   : > { %14779 = vmatprep.subr.bf16.mxu0 %v14778_v51 }
0x1340   : > { %14781 = vmatpush3.bf16.msra.mxu0 %v14778_v51  ;;  %v10590_v51 = vld [vmem:[%s19965_s2 + $0x180] sm:$0xff] }
0x1341   : > { %14783 = vmatprep.subr.bf16.mxu0 %v14782_v40  ;;  %v14742_v29 = vpack.c.bf16 %v10591_v20, %v10590_v51 }
0x1343   : > { %14743 = vmatprep.subr.bf16.mxu1 %v14742_v29 }
0x1344   : > { %14785 = vmatpush3.bf16.msra.mxu0 %v14782_v40 }
0x1345   : > { %14787 = vmatprep.subr.bf16.mxu0 %v14786_v17 }
0x1348   : > { %14789 = vmatpush3.bf16.msra.mxu0 %v14786_v17  ;;  %v10592_v17 = vld [vmem:[%s19965_s2 + $0x190] sm:$0xff] }
0x1349   : > { %14791 = vmatprep.subr.bf16.mxu0 %v14790_v59  ;;  %v14746_v61 = vpack.c.bf16 %v10593_v22, %v10592_v17 }
0x134c   : > { %14793 = vmatpush3.bf16.msra.mxu0 %v14790_v59 }
0x134d   : > { %14795 = vmatprep.subr.bf16.mxu0 %v14794_v62 }
0x1350   : > { %14797 = vmatpush3.bf16.msra.mxu0 %v14794_v62  ;;  %v10594_v62 = vld [vmem:[%s19965_s2 + $0x1a0] sm:$0xff] }
0x1351   : > { %14799 = vmatprep.subr.bf16.mxu0 %v14798_v25  ;;  %v14750_v14 = vpack.c.bf16 %v10595_v10, %v10594_v62 }
0x1354   : > { %14801 = vmatpush3.bf16.msra.mxu0 %v14798_v25  ;;  %v10596_v25 = vld [vmem:[%s19965_s2 + $0x1b0] sm:$0xff] }
0x1355   : > { %14803 = vmatprep.subr.bf16.mxu0 %v14802_v27  ;;  %v14754_v6 = vpack.c.bf16 %v10597_v26, %v10596_v25  ;;  %v10681_v26 = vld [vmem:[%s19967_s4 + $0x98] sm:$0xff] }
0x1358   : > { %14805 = vmatpush3.bf16.msra.mxu0 %v14802_v27  ;;  %v10598_v27 = vld [vmem:[%s19965_s2 + $0x1c0] sm:$0xff] }
0x135b   : > { %12985 = vmatmul.mubr.f32.vlgmr.msra.gmra.mrb[46].mxu0 %v17052_v36 }
0x135c   : > { %12987 = vmatprep.mubr.f32.mxu0 %v17059_v5 }
0x135f   : > { %12988 = vmatmul.mubr.f32.gmra.mrb[48].mxu0 %v17064_v34 }
0x140e   : > { %v12902_v28 = vpop.f32.mrb[44].mxu0 }
0x140f   : > { %v3865_v32 = vmul.f32 0.088388346, %v12902_v28  ;;  %v3855_v33 = vpop.f32.mrb[45].mxu0 }
0x1410   : > { %v3864_v37 = vmul.f32 0.088388346, %v3855_v33  ;;  %v10601_v33 = vld [vmem:[%s19965_s2 + $0x1d8] sm:$0xff] }
0x1411   : > { %v3869_v38 = vsel %vm628_vm2, %v3865_v32, -inf }
0x1412   : > { %3870 = vmax.xlane.f32.xlu1 %v3869_v38  ;;  %v3866_v44 = vsel %vm628_vm2, %v3864_v37, -inf  ;;  %v10602_v38 = vld [vmem:[%s19965_s2 + $0x1e0] sm:$0xff] }
0x1413   : > { %3867 = vmax.xlane.f32.xlu0 %v3866_v44  ;;  %v10603_v44 = vld [vmem:[%s19965_s2 + $0x1e8] sm:$0xff] }
0x142e   : > { %v12986_v47 = vpop.f32.mrb[46].mxu0 }
0x142f   : > { %v4140_v53 = vadd.f32 %v12986_v47, %v10726_v45  ;;  %v4134_v54 = vpop.f32.mrb[47].mxu0  ;;  %v10604_v47 = vld [vmem:[%s19965_s2 + $0x1f0] sm:$0xff] }
0x1430   : > { %v4135_v49 = vadd.f32 %v10726_v45, %v4134_v54 }
0x1432   : > { %v14818_v55 = vpack.c.bf16 %v4140_v53, %v4135_v49  ;;  %v12989_v56 = vpop.f32.mrb[48].mxu0  ;;  %v10605_v53 = vld [vmem:[%s19965_s2 + $0x1f8] sm:$0xff]  ;;  %v17490_v49 = vadd.f32 %v17033_v11, %v17043_v24 }
0x1433   : > { %v4150_v7 = vadd.f32 %v12989_v56, %v10726_v45  ;;  %v4144_v21 = vpop.f32.mrb[49].mxu0  ;;  %v14770_v54 = vpack.c.bf16 %v10605_v53, %v10604_v47  ;;  %v10688_v47 = vld [vmem:[%s19967_s4 + $0xd0] sm:$0xff]  ;;  %v10689_v53 = vld [vmem:[%s19967_s4 + $0xd8] sm:$0xff] }
0x1434   : > { %v4145_v39 = vadd.f32 %v10726_v45, %v4144_v21  ;;  %14819 = vmatprep.subr.bf16.mxu0 %v14818_v55  ;;  %v14766_v45 = vpack.c.bf16 %v10603_v44, %v10602_v38  ;;  %v10686_v38 = vld [vmem:[%s19967_s4 + $0xc0] sm:$0xff]  ;;  %v10687_v44 = vld [vmem:[%s19967_s4 + $0xc8] sm:$0xff] }
0x1435   : > { %14821 = vmatpush3.bf16.msra.mxu0 %v14818_v55 }
0x1436   : > { %v14822_v16 = vpack.c.bf16 %v4150_v7, %v4145_v39  ;;  %v10725_v7 = vld [vmem:[%s19966_s3 + $0xf] ss:$0 sm:$0xff] }
0x1438   : > { %14823 = vmatprep.subr.bf16.mxu0 %v14822_v16 }
0x1439   : > { %14825 = vmatpush3.bf16.msra.mxu0 %v14822_v16 }
0x149f   : > { %v3871_v63 = vpop.xlane.xlu1 %3870 }
0x14a0   : > { %v3873_v13 = vsub.f32 %v3865_v32, %v3871_v63  ;;  %v3868_v31 = vpop.xlane.xlu0 %3867  ;;  %v10600_v32 = vld [vmem:[%s19965_s2 + $0x1d0] sm:$0xff] }
0x14a1   : > { %v3872_v42 = vsub.f32 %v3864_v37, %v3868_v31  ;;  %v14762_v37 = vpack.c.bf16 %v10601_v33, %v10600_v32  ;;  %v10684_v32 = vld [vmem:[%s19967_s4 + $0xb0] sm:$0xff]  ;;  %v10685_v33 = vld [vmem:[%s19967_s4 + $0xb8] sm:$0xff] }
0x14a2   : > { %v3876_v30 = vmul.f32 1.442695, %v3873_v13 }
0x14a3   : > { %v3874_v43 = vmul.f32 1.442695, %v3872_v42 }
0x14a4   : > { %16139 = vpow2.f32 %v3876_v30 }
0x14a5   : > { %16141 = vpow2.f32 %v3874_v43 }
0x14ae   : > { %v16140_v19 = vpop.eup %16139 }
0x14af   : > { %v16142_v4 = vpop.eup %16141  ;;  %v3881_v15 = vsel %vm628_vm2, %v16140_v19, 0.0 }
0x14b0   : > { %3882 = vadd.xlane.f32.xlu1 %v3881_v15  ;;  %v3878_v52 = vsel %vm628_vm2, %v16142_v4, 0.0 }
0x14b1   : > { %3879 = vadd.xlane.f32.xlu0 %v3878_v52 }
0x153d   : > { %v3883_v40 = vpop.xlane.xlu1 %3882 }
0x153e   : > { %16143 = vrcp.f32 %v3883_v40  ;;  %v3880_v1 = vpop.xlane.xlu0 %3879 }
0x153f   : > { %16145 = vrcp.f32 %v3880_v1 }
0x1548   : > { %v16144_v41 = vpop.eup %16143 }
0x1549   : > { %v16146_v2 = vpop.eup %16145  ;;  %v3887_v18 = vmul.f32 %v16144_v41, %v16140_v19 }
0x154a   : > { %v3886_v59 = vmul.f32 %v16146_v2, %v16142_v4  ;;  %v3588_v2 = vadd.f32 %v17359_v8, %v17026_v0 }
0x154c   : > { %12911 = vmatprep.mubr.msk.f32.mxu1 %vm628_vm2, %v3886_v59 }
0x154d   : > { %12912 = vmatmul.mubr.msk.f32.vlgmr.msra.gmra.mrb[48].mxu1 %vm628_vm2, %v3887_v18  ;;  %v3587_v18 = vadd.f32 %v17361_v3, %v17141_v46  ;;  %v10679_v46 = vld [vmem:[%s19967_s4 + $0x88] sm:$0xff] }
0x154e   : > { %14745 = vmatpush3.bf16.msra.mxu1 %v14742_v29  ;;  %12946 = vmatprep.mubr.f32.mxu1 %v17049_v35  ;;  %v10599_v35 = vld [vmem:[%s19965_s2 + $0x1c8] sm:$0xff] }
0x154f   : > { %14747 = vmatprep.subr.bf16.mxu1 %v14746_v61  ;;  %v14758_v28 = vpack.c.bf16 %v10599_v35, %v10598_v27  ;;  %v10682_v27 = vld [vmem:[%s19967_s4 + $0xa0] sm:$0xff]  ;;  %v10683_v35 = vld [vmem:[%s19967_s4 + $0xa8] sm:$0xff] }
0x1552   : > { %14749 = vmatpush3.bf16.msra.mxu1 %v14746_v61 }
0x1553   : > { %14751 = vmatprep.subr.bf16.mxu1 %v14750_v14 }
0x1556   : > { %14753 = vmatpush3.bf16.msra.mxu1 %v14750_v14 }
0x1557   : > { %14755 = vmatprep.subr.bf16.mxu1 %v14754_v6 }
0x155a   : > { %14757 = vmatpush3.bf16.msra.mxu1 %v14754_v6 }
0x155b   : > { %14759 = vmatprep.subr.bf16.mxu1 %v14758_v28 }
0x155e   : > { %14761 = vmatpush3.bf16.msra.mxu1 %v14758_v28  ;;  %v14834_v28 = vpack.c.bf16 %v10683_v35, %v10682_v27  ;;  %v10822_v27 = vld [vmem:[%s19965_s2 + $0x630] sm:$0xff]  ;;  %v10823_v35 = vld [vmem:[%s19965_s2 + $0x638] sm:$0xff] }
0x155f   : > { %14763 = vmatprep.subr.bf16.mxu1 %v14762_v37 }
0x1562   : > { %14765 = vmatpush3.bf16.msra.mxu1 %v14762_v37  ;;  %v14838_v37 = vpack.c.bf16 %v10685_v33, %v10684_v32  ;;  %v10824_v32 = vld [vmem:[%s19965_s2 + $0x640] sm:$0xff]  ;;  %v10825_v33 = vld [vmem:[%s19965_s2 + $0x648] sm:$0xff] }
0x1563   : > { %14767 = vmatprep.subr.bf16.mxu1 %v14766_v45 }
0x1566   : > { %14769 = vmatpush3.bf16.msra.mxu1 %v14766_v45  ;;  %v14842_v45 = vpack.c.bf16 %v10687_v44, %v10686_v38  ;;  %v10826_v38 = vld [vmem:[%s19965_s2 + $0x650] sm:$0xff]  ;;  %v10827_v44 = vld [vmem:[%s19965_s2 + $0x658] sm:$0xff] }
0x1567   : > { %14771 = vmatprep.subr.bf16.mxu1 %v14770_v54 }
0x156a   : > { %14773 = vmatpush3.bf16.msra.mxu1 %v14770_v54  ;;  %v14846_v54 = vpack.c.bf16 %v10689_v53, %v10688_v47  ;;  %v10828_v47 = vld [vmem:[%s19965_s2 + $0x660] sm:$0xff]  ;;  %v10829_v53 = vld [vmem:[%s19965_s2 + $0x668] sm:$0xff] }
0x156d   : > { %12947 = vmatmul.mubr.f32.vlgmr.msra.gmra.mrb[50].mxu1 %v17052_v36 }
0x156e   : > { %12949 = vmatprep.mubr.f32.mxu1 %v17059_v5 }
0x1571   : > { %12950 = vmatmul.mubr.f32.gmra.mrb[52].mxu1 %v17064_v34 }
0x1572   : > { %12998 = vmatprep.mubr.msk.f32.mxu1 %vm628_vm2, %v17490_v49 }
0x1620   : > { %v12913_v55 = vpop.f32.mrb[48].mxu1 }
0x1621   : > { %v3960_v56 = vpop.f32.mrb[49].mxu1  ;;  %v3970_v61 = vadd.f32 %v12913_v55, %v17036_v12  ;;  %v10678_v12 = vld [vmem:[%s19967_s4 + $0x80] sm:$0xff] }
0x1622   : > { %v3969_v59 = vadd.f32 %v3960_v56, %v17354_v50  ;;  %v10680_v50 = vld [vmem:[%s19967_s4 + $0x90] sm:$0xff]  ;;  %v14826_v3 = vpack.c.bf16 %v10679_v46, %v10678_v12  ;;  %v10690_v55 = vld [vmem:[%s19967_s4 + $0xe0] sm:$0xff]  ;;  %v10691_v56 = vld [vmem:[%s19967_s4 + $0xe8] sm:$0xff] }
0x1623   : > { %v14830_v6 = vpack.c.bf16 %v10681_v26, %v10680_v50  ;;  %v10821_v26 = vld [vmem:[%s19965_s2 + $0x628] sm:$0xff] }
0x1624   : > { %14827 = vmatprep.subr.bf16.mxu0 %v14826_v3 }
0x1640   : > { %v12948_v21 = vpop.f32.mrb[50].mxu1 }
0x1641   : > { %v4049_v39 = vadd.f32 %v12948_v21, %v10725_v7  ;;  %v4043_v36 = vpop.f32.mrb[51].mxu1  ;;  %v10692_v21 = vld [vmem:[%s19967_s4 + $0xf0] sm:$0xff] }
0x1642   : > { %v4044_v16 = vadd.f32 %v10725_v7, %v4043_v36 }
0x1644   : > { %v14806_v5 = vpack.c.bf16 %v4049_v39, %v4044_v16  ;;  %v12951_v63 = vpop.f32.mrb[52].mxu1  ;;  %v10693_v39 = vld [vmem:[%s19967_s4 + $0xf8] sm:$0xff]  ;;  %v10816_v16 = vld [vmem:[%s19965_s2 + $0x600] sm:$0xff] }
0x1645   : > { %v4059_v13 = vadd.f32 %v12951_v63, %v10725_v7  ;;  %v4053_v11 = vpop.f32.mrb[53].mxu1  ;;  %v14854_v36 = vpack.c.bf16 %v10693_v39, %v10692_v21  ;;  %v10748_v63 = vld [vmem:[%s19965_s2 + $0x400] sm:$0xff]  ;;  %v10830_v21 = vld [vmem:[%s19965_s2 + $0x670] sm:$0xff]  ;;  %v10831_v39 = vld [vmem:[%s19965_s2 + $0x678] sm:$0xff] }
0x1646   : > { %v4054_v24 = vadd.f32 %v10725_v7, %v4053_v11  ;;  %14808 = vmatprep.subr.msk.bf16.mxu1 %vm16484_vm3, %v14806_v5  ;;  %v14850_v7 = vpack.c.bf16 %v10691_v56, %v10690_v55  ;;  %v10749_v11 = vld [vmem:[%s19965_s2 + $0x408] sm:$0xff]  ;;  %v10760_v55 = vld [vmem:[%s19965_s2 + $0x460] sm:$0xff] }
0x1647   : > { %14811 = vmatpush3.bf16.xpose.msk.msra.mxu1 %vm16484_vm3, %v14806_v5  ;;  %v10817_v5 = vld [vmem:[%s19965_s2 + $0x608] sm:$0xff] }
0x1648   : > { %v14812_v34 = vpack.c.bf16 %v4059_v13, %v4054_v24  ;;  %v14890_v13 = vpack.c.bf16 %v10817_v5, %v10816_v16  ;;  %v14858_v24 = vpack.c.bf16 %v10749_v11, %v10748_v63  ;;  %v10761_v56 = vld [vmem:[%s19965_s2 + $0x468] sm:$0xff]  ;;  %v10762_v16 = vld [vmem:[%s19965_s2 + $0x470] sm:$0xff]  ;;  %v10763_v5 = vld [vmem:[%s19965_s2 + $0x478] sm:$0xff] }
0x1649   : > { %v14886_v63 = vpack.c.bf16 %v10763_v5, %v10762_v16  ;;  %v10833_v11 = vld [vmem:[%s19965_s2 + $0x688] sm:$0xff] }
0x164a   : > { %14814 = vmatprep.subr.msk.bf16.mxu1 %vm16484_vm3, %v14812_v34 }
0x164f   : > { %14817 = vmatpush3.bf16.xpose.msk.msra.mxu1 %vm16484_vm3, %v14812_v34  ;;  %v10750_v34 = vld [vmem:[%s19965_s2 + $0x410] sm:$0xff] }
0x1650   : > { %14859 = vmatprep.subr.bf16.mxu1 %v14858_v24 }
0x1656   : > { %12999 = vmatmul.mubr.msk.f32.vlgmr.msra.gmra.mrb[54].mxu1 %vm628_vm2, %v17041_v23 }
0x1657   : > { %14861 = vmatpush3.bf16.msra.mxu1 %v14858_v24 }
0x1729   : > { %v13000_v31 = vpop.f32.mrb[54].mxu1 }
0x172a   : > { %v4247_v42 = vmul.f32 0.088388346, %v13000_v31  ;;  %v4237_v30 = vpop.f32.mrb[55].mxu1  ;;  %v10751_v31 = vld [vmem:[%s19965_s2 + $0x418] sm:$0xff] }
0x172b   : > { %v4246_v43 = vmul.f32 0.088388346, %v4237_v30  ;;  %v10752_v30 = vld [vmem:[%s19965_s2 + $0x420] sm:$0xff] }
0x172c   : > { %v4251_v19 = vsel %vm628_vm2, %v4247_v42, -inf }
0x172d   : > { %4252 = vmax.xlane.f32.xlu1 %v4251_v19  ;;  %v4248_v4 = vsel %vm628_vm2, %v4246_v43, -inf }
0x172e   : > { %4249 = vmax.xlane.f32.xlu0 %v4248_v4 }
0x17ba   : > { %v4253_v15 = vpop.xlane.xlu1 %4252 }
0x17bb   : > { %v4255_v52 = vsub.f32 %v4247_v42, %v4253_v15  ;;  %v4250_v51 = vpop.xlane.xlu0 %4249  ;;  %v14862_v42 = vpack.c.bf16 %v10751_v31, %v10750_v34  ;;  %v10735_v34 = vld [vmem:[%s19968_s5 + $0x1] ss:$0 sm:$0xff] }
0x17bc   : > { %v4254_v20 = vsub.f32 %v4246_v43, %v4250_v51  ;;  %v10753_v43 = vld [vmem:[%s19965_s2 + $0x428] sm:$0xff] }
0x17bd   : > { %v4258_v29 = vmul.f32 1.442695, %v4255_v52  ;;  %14863 = vmatprep.subr.bf16.mxu1 %v14862_v42  ;;  %v14866_v4 = vpack.c.bf16 %v10753_v43, %v10752_v30 }
0x17be   : > { %v4256_v40 = vmul.f32 1.442695, %v4254_v20  ;;  %14865 = vmatpush3.bf16.msra.mxu1 %v14862_v42  ;;  %v10754_v20 = vld [vmem:[%s19965_s2 + $0x430] sm:$0xff] }
0x17bf   : > { %16147 = vpow2.f32 %v4258_v29  ;;  %14867 = vmatprep.subr.bf16.mxu1 %v14866_v4  ;;  %v10755_v29 = vld [vmem:[%s19965_s2 + $0x438] sm:$0xff] }
0x17c0   : > { %16149 = vpow2.f32 %v4256_v40  ;;  %v14870_v40 = vpack.c.bf16 %v10755_v29, %v10754_v20 }
0x17c2   : > { %14869 = vmatpush3.bf16.msra.mxu1 %v14866_v4 }
0x17c3   : > { %14871 = vmatprep.subr.bf16.mxu1 %v14870_v40 }
0x17c6   : > { %14873 = vmatpush3.bf16.msra.mxu1 %v14870_v40  ;;  %v10836_v40 = vld [vmem:[%s19965_s2 + $0x6a0] sm:$0xff] }
0x17c9   : > { %v16148_v1 = vpop.eup %16147 }
0x17ca   : > { %v16150_v41 = vpop.eup %16149  ;;  %v4263_v17 = vsel %vm628_vm2, %v16148_v1, 0.0 }
0x17cb   : > { %4264 = vadd.xlane.f32.xlu1 %v4263_v17  ;;  %v4260_v22 = vsel %vm628_vm2, %v16150_v41, 0.0  ;;  %v10759_v17 = vld [vmem:[%s19965_s2 + $0x458] sm:$0xff] }
0x17cc   : > { %4261 = vadd.xlane.f32.xlu0 %v4260_v22 }
0x17dc   : > { %4357 = vrot.lane.b32.xlu1 %v3588_v2, %s19992_s12 }
0x17e0   : > { %4363 = vrot.lane.b32.xlu1 %v3969_v59, %s19991_s14 }
0x17e2   : > { %4355 = vrot.lane.b32.xlu0 %v3587_v18, %s19992_s12 }
0x17e4   : > { %4365 = vrot.lane.b32.xlu1 %v3970_v61, %s19991_s14 }
0x1858   : > { %v4265_v62 = vpop.xlane.xlu1 %4264 }
0x1859   : > { %16151 = vrcp.f32 %v4265_v62  ;;  %v4262_v10 = vpop.xlane.xlu0 %4261  ;;  %v3205_v62 = vadd.f32 %v17294_v58, %v17061_v48 }
0x185a   : > { %16153 = vrcp.f32 %v4262_v10  ;;  %v3206_v10 = vadd.f32 %v17292_v57, %v17018_v60 }
0x185c   : > { %v4358_v2 = vpop.permute.xlu1 %4357 }
0x185d   : > { %v4356_v61 = vpop.permute.xlu0 %4355  ;;  %v4378_v12 = vsel %vm628_vm2, %v3206_v10, %v4358_v2  ;;  %v10841_v2 = vld [vmem:[%s19965_s2 + $0x6c8] sm:$0xff]  ;;  %v10844_v10 = vld [vmem:[%s19965_s2 + $0x6e0] sm:$0xff] }
0x1860   : > { %v4364_v59 = vpop.permute.xlu1 %4363 }
0x1863   : > { %v16152_v0 = vpop.eup %16151 }
0x1864   : > { %v16154_v8 = vpop.eup %16153  ;;  %v4269_v25 = vmul.f32 %v16152_v0, %v16148_v1  ;;  %v4366_v18 = vpop.permute.xlu1 %4365  ;;  %v10818_v0 = vld [vmem:[%s19965_s2 + $0x610] sm:$0xff] }
0x1865   : > { %v4268_v14 = vmul.f32 %v16154_v8, %v16150_v41  ;;  %v10758_v41 = vld [vmem:[%s19965_s2 + $0x450] sm:$0xff]  ;;  %v10819_v8 = vld [vmem:[%s19965_s2 + $0x618] sm:$0xff]  ;;  %v4380_v48 = vsel %vm2194_vm5, %v4378_v12, %v4366_v18 }
0x1866   : > { %v14878_v22 = vpack.c.bf16 %v10759_v17, %v10758_v41  ;;  %v14894_v57 = vpack.c.bf16 %v10819_v8, %v10818_v0  ;;  %v10839_v41 = vld [vmem:[%s19965_s2 + $0x6b8] sm:$0xff]  ;;  %v10842_v18 = vld [vmem:[%s19965_s2 + $0x6d0] sm:$0xff]  ;;  %v10845_v0 = vld [vmem:[%s19965_s2 + $0x6e8] sm:$0xff] }
0x1867   : > { %13009 = vmatprep.mubr.msk.f32.mxu0 %vm628_vm2, %v4268_v14  ;;  %v4377_v14 = vsel %vm628_vm2, %v3205_v62, %v4356_v61  ;;  %v10843_v61 = vld [vmem:[%s19965_s2 + $0x6d8] sm:$0xff]  ;;  %v14988_v8 = vpack.c.bf16 %v10845_v0, %v10844_v10  ;;  %v10765_v10 = vld [vmem:[%s19965_s2 + $0x488] sm:$0xff] }
0x1868   : > { %13010 = vmatmul.mubr.msk.f32.vlgmr.msra.gmra.mrb[50].mxu0 %vm628_vm2, %v4269_v25  ;;  %v4379_v46 = vsel %vm2194_vm5, %v4377_v14, %v4364_v59  ;;  %v14984_v62 = vpack.c.bf16 %v10843_v61, %v10842_v18  ;;  %v10846_v14 = vld [vmem:[%s19965_s2 + $0x6f0] sm:$0xff] }
0x1869   : > { %14829 = vmatpush3.bf16.msra.mxu0 %v14826_v3  ;;  %v10820_v3 = vld [vmem:[%s19965_s2 + $0x620] sm:$0xff] }
0x186a   : > { %14831 = vmatprep.subr.bf16.mxu0 %v14830_v6 }
0x186d   : > { %14833 = vmatpush3.bf16.msra.mxu0 %v14830_v6  ;;  %v14898_v6 = vpack.c.bf16 %v10821_v26, %v10820_v3 }
0x186e   : > { %14835 = vmatprep.subr.bf16.mxu0 %v14834_v28 }
0x1871   : > { %14837 = vmatpush3.bf16.msra.mxu0 %v14834_v28  ;;  %v14902_v28 = vpack.c.bf16 %v10823_v35, %v10822_v27 }
0x1872   : > { %14839 = vmatprep.subr.bf16.mxu0 %v14838_v37 }
0x1875   : > { %14841 = vmatpush3.bf16.msra.mxu0 %v14838_v37  ;;  %v14906_v37 = vpack.c.bf16 %v10825_v33, %v10824_v32  ;;  %v4469_v33 = vld [vmem:[%s19972_s9 + $0x8] sm:$0xff] }
0x1876   : > { %14843 = vmatprep.subr.bf16.mxu0 %v14842_v45 }
0x1879   : > { %14845 = vmatpush3.bf16.msra.mxu0 %v14842_v45  ;;  %v14910_v45 = vpack.c.bf16 %v10827_v44, %v10826_v38  ;;  %v4471_v38 = vld [vmem:[%s19972_s9 + $0x18] sm:$0xff] }
0x187a   : > { %14847 = vmatprep.subr.bf16.mxu0 %v14846_v54  ;;  %v10914_v44 = vld [vmem:[%s19966_s3 + $0x19] ss:$0 sm:$0xff] }
0x187d   : > { %14849 = vmatpush3.bf16.msra.mxu0 %v14846_v54  ;;  %v14914_v54 = vpack.c.bf16 %v10829_v53, %v10828_v47 }
0x187e   : > { %14851 = vmatprep.subr.bf16.mxu0 %v14850_v7 }
0x1881   : > { %14853 = vmatpush3.bf16.msra.mxu0 %v14850_v7  ;;  %v14882_v7 = vpack.c.bf16 %v10761_v56, %v10760_v55 }
0x1882   : > { %14855 = vmatprep.subr.bf16.mxu0 %v14854_v36 }
0x1885   : > { %14857 = vmatpush3.bf16.msra.mxu0 %v14854_v36  ;;  %v14918_v36 = vpack.c.bf16 %v10831_v39, %v10830_v21 }
0x1886   : > { %14891 = vmatprep.subr.bf16.mxu0 %v14890_v13 }
0x193b   : > { %v13011_v19 = vpop.f32.mrb[50].mxu0 }
0x193c   : > { %v4352_v15 = vadd.f32 %v13011_v19, %v17041_v23  ;;  %v4342_v52 = vpop.f32.mrb[51].mxu0  ;;  %v10756_v23 = vld [vmem:[%s19965_s2 + $0x440] sm:$0xff] }
0x193d   : > { %v4351_v51 = vadd.f32 %v4342_v52, %v17490_v49  ;;  %v10757_v49 = vld [vmem:[%s19965_s2 + $0x448] sm:$0xff]  ;;  %v10835_v52 = vld [vmem:[%s19965_s2 + $0x698] sm:$0xff] }
0x193e   : > { %4373 = vrot.lane.b32.xlu1 %v4352_v15, %s19993_s25  ;;  %v14874_v1 = vpack.c.bf16 %v10757_v49, %v10756_v23  ;;  %v10834_v15 = vld [vmem:[%s19965_s2 + $0x690] sm:$0xff]  ;;  %v10837_v23 = vld [vmem:[%s19965_s2 + $0x6a8] sm:$0xff] }
0x193f   : > { %4371 = vrot.lane.b32.xlu0 %v4351_v51, %s19993_s25  ;;  %v14968_v29 = vpack.c.bf16 %v10835_v52, %v10834_v15  ;;  %v14972_v49 = vpack.c.bf16 %v10837_v23, %v10836_v40 }
0x1940   : > { %14875 = vmatprep.subr.bf16.mxu1 %v14874_v1 }
0x1941   : > { %14877 = vmatpush3.bf16.msra.mxu1 %v14874_v1  ;;  %v10838_v1 = vld [vmem:[%s19965_s2 + $0x6b0] sm:$0xff] }
0x1942   : > { %14879 = vmatprep.subr.bf16.mxu1 %v14878_v22  ;;  %v14976_v17 = vpack.c.bf16 %v10839_v41, %v10838_v1 }
0x1945   : > { %14881 = vmatpush3.bf16.msra.mxu1 %v14878_v22  ;;  %v10840_v22 = vld [vmem:[%s19965_s2 + $0x6c0] sm:$0xff] }
0x1946   : > { %14883 = vmatprep.subr.bf16.mxu1 %v14882_v7  ;;  %v14980_v59 = vpack.c.bf16 %v10841_v2, %v10840_v22 }
0x1949   : > { %14885 = vmatpush3.bf16.msra.mxu1 %v14882_v7 }
0x194a   : > { %14887 = vmatprep.subr.bf16.mxu1 %v14886_v63 }
0x194d   : > { %14889 = vmatpush3.bf16.msra.mxu1 %v14886_v63 }
0x19b0   : > { %v4374_v25 = vpop.permute.xlu1 %4373 }
0x19b1   : > { %v4372_v50 = vpop.permute.xlu0 %4371  ;;  %v4382_v58 = vsel %vm2199_vm6, %v4380_v48, %v4374_v25  ;;  %v10847_v25 = vld [vmem:[%s19965_s2 + $0x6f8] sm:$0xff] }
0x19b2   : > { %v4381_v60 = vsel %vm2199_vm6, %v4379_v46, %v4372_v50  ;;  %v14992_v12 = vpack.c.bf16 %v10847_v25, %v10846_v14  ;;  %v4468_v46 = vld [vmem:[%s19972_s9] sm:$0xff]  ;;  %v10901_v50 = vld [vmem:[%s19966_s3 + $0x14] ss:$0 sm:$0xff]  ;;  %v10902_v48 = vld [vmem:[%s19966_s3 + $0x18] ss:$0 sm:$0xff] }
0x19b3   : > { %13044 = vmatprep.mubr.f32.mxu0 %v4381_v60 }
0x19b4   : > { %13045 = vmatmul.mubr.f32.vlgmr.msra.gmra.mrb[52].mxu0 %v4382_v58 }
0x19b5   : > { %14893 = vmatpush3.bf16.msra.mxu0 %v14890_v13  ;;  %v10832_v13 = vld [vmem:[%s19965_s2 + $0x680] sm:$0xff] }
0x19b6   : > { %14895 = vmatprep.subr.bf16.mxu0 %v14894_v57  ;;  %v14964_v24 = vpack.c.bf16 %v10833_v11, %v10832_v13 }
0x19b9   : > { %14897 = vmatpush3.bf16.msra.mxu0 %v14894_v57 }
0x19ba   : > { %14899 = vmatprep.subr.bf16.mxu0 %v14898_v6 }
0x19bd   : > { %14901 = vmatpush3.bf16.msra.mxu0 %v14898_v6 }
0x19be   : > { %14903 = vmatprep.subr.bf16.mxu0 %v14902_v28 }
0x19c1   : > { %14905 = vmatpush3.bf16.msra.mxu0 %v14902_v28 }
0x19c2   : > { %14907 = vmatprep.subr.bf16.mxu0 %v14906_v37 }
0x19c5   : > { %14909 = vmatpush3.bf16.msra.mxu0 %v14906_v37  ;;  %v4470_v37 = vld [vmem:[%s19972_s9 + $0x10] sm:$0xff] }
0x19c6   : > { %14911 = vmatprep.subr.bf16.mxu0 %v14910_v45 }
0x19c9   : > { %14913 = vmatpush3.bf16.msra.mxu0 %v14910_v45 }
0x19ca   : > { %14915 = vmatprep.subr.bf16.mxu0 %v14914_v54 }
0x19cd   : > { %14917 = vmatpush3.bf16.msra.mxu0 %v14914_v54 }
0x19ce   : > { %14919 = vmatprep.subr.bf16.mxu0 %v14918_v36 }
0x19d1   : > { %14921 = vmatpush3.bf16.msra.mxu0 %v14918_v36 }
0x19d2   : > { %14965 = vmatprep.subr.bf16.mxu0 %v14964_v24 }
0x1a87   : > { %v13046_v31 = vpop.f32.mrb[52].mxu0 }
0x1a88   : > { %v4461_v42 = vadd.f32 %v13046_v31, %v10735_v34  ;;  %v4455_v30 = vpop.f32.mrb[53].mxu0 }
0x1a89   : > { %v4456_v43 = vadd.f32 %v10735_v34, %v4455_v30 }
0x1a8a   : > { %v4465_v19 = vmax.f32 %v4461_v42, 0.0 }
0x1a8b   : > { %v4464_v4 = vmax.f32 %v4456_v43, 0.0 }
0x1a8c   : > { %v17699_v20 = vadd.f32 %v4465_v19, %v4382_v58 }
0x1a8d   : > { %v17697_v51 = vadd.f32 %v4464_v4, %v4381_v60 }
0x1a8f   : > { %13079 = vmatprep.mubr.f32.mxu1 %v17697_v51  ;;  %13114 = vmatprep.mubr.f32.mxu0 %v17697_v51 }
0x1a90   : > { %13080 = vmatmul.mubr.f32.vlgmr.msra.gmra.mrb[56].mxu1 %v17699_v20  ;;  %13115 = vmatmul.mubr.f32.vlgmr.msra.gmra.mrb[54].mxu0 %v17699_v20 }
0x1a91   : > { %14967 = vmatpush3.bf16.msra.mxu0 %v14964_v24  ;;  %13204 = vmatprep.mubr.f32.mxu0 %v17697_v51 }
0x1a92   : > { %14969 = vmatprep.subr.bf16.mxu0 %v14968_v29  ;;  %13121 = vmatprep.mubr.msk.f32.mxu1 %vm628_vm2, %v4468_v46 }
0x1a95   : > { %14971 = vmatpush3.bf16.msra.mxu0 %v14968_v29 }
0x1a96   : > { %14973 = vmatprep.subr.bf16.mxu0 %v14972_v49 }
0x1a99   : > { %14975 = vmatpush3.bf16.msra.mxu0 %v14972_v49 }
0x1a9a   : > { %14977 = vmatprep.subr.bf16.mxu0 %v14976_v17 }
0x1a9d   : > { %14979 = vmatpush3.bf16.msra.mxu0 %v14976_v17 }
0x1a9e   : > { %14981 = vmatprep.subr.bf16.mxu0 %v14980_v59 }
0x1aa1   : > { %14983 = vmatpush3.bf16.msra.mxu0 %v14980_v59 }
0x1aa2   : > { %14985 = vmatprep.subr.bf16.mxu0 %v14984_v62 }
0x1aa5   : > { %14987 = vmatpush3.bf16.msra.mxu0 %v14984_v62  ;;  %v10764_v62 = vld [vmem:[%s19965_s2 + $0x480] sm:$0xff] }
0x1aa6   : > { %14989 = vmatprep.subr.bf16.mxu0 %v14988_v8  ;;  %v14932_v0 = vpack.c.bf16 %v10765_v10, %v10764_v62  ;;  %v10788_v10 = vld [vmem:[%s19965_s2 + $0x540] sm:$0xff] }
0x1aa9   : > { %14991 = vmatpush3.bf16.msra.mxu0 %v14988_v8 }
0x1aaa   : > { %14993 = vmatprep.subr.bf16.mxu0 %v14992_v12 }
0x1aad   : > { %14995 = vmatpush3.bf16.msra.mxu0 %v14992_v12 }
0x1ab0   : > { %13205 = vmatmul.mubr.f32.vlgmr.msra.gmra.mrb[56].mxu0 %v17699_v20 }
0x1b63   : > { %v13081_v60 = vpop.f32.mrb[56].mxu1  ;;  %v13116_v57 = vpop.f32.mrb[54].mxu0 }
0x1b64   : > { %v4736_v58 = vadd.f32 %v13081_v60, %v10901_v50  ;;  %v4817_v3 = vadd.f32 %v13116_v57, %v10902_v48  ;;  %v4730_v26 = vpop.f32.mrb[57].mxu1  ;;  %v4811_v6 = vpop.f32.mrb[55].mxu0 }
0x1b65   : > { %v4731_v27 = vadd.f32 %v10901_v50, %v4730_v26  ;;  %v4812_v35 = vadd.f32 %v10902_v48, %v4811_v6  ;;  %v10766_v50 = vld [vmem:[%s19965_s2 + $0x490] sm:$0xff]  ;;  %v10767_v48 = vld [vmem:[%s19965_s2 + $0x498] sm:$0xff]  ;;  %v10768_v26 = vld [vmem:[%s19965_s2 + $0x4a0] sm:$0xff] }
0x1b66   : > { %v10769_v6 = vld [vmem:[%s19965_s2 + $0x4a8] sm:$0xff] }
0x1b67   : > { %v14922_v28 = vpack.c.bf16 %v4736_v58, %v4731_v27  ;;  %v14928_v32 = vpack.c.bf16 %v4817_v3, %v4812_v35  ;;  %v14936_v3 = vpack.c.bf16 %v10767_v48, %v10766_v50  ;;  %v10793_v50 = vld [vmem:[%s19965_s2 + $0x568] sm:$0xff] }
0x1b69   : > { %14924 = vmatprep.subr.msk.bf16.mxu1 %vm16484_vm3, %v14922_v28 }
0x1b6a   : > { %14927 = vmatpush3.bf16.xpose.msk.msra.mxu1 %vm16484_vm3, %v14922_v28  ;;  %v14940_v28 = vpack.c.bf16 %v10769_v6, %v10768_v26 }
0x1b6b   : > { %14929 = vmatprep.subr.bf16.mxu1 %v14928_v32 }
0x1b71   : > { %13122 = vmatmul.mubr.msk.f32.vlgmr.msra.gmra.mrb[58].mxu1 %vm628_vm2, %v4469_v33  ;;  %v10771_v33 = vld [vmem:[%s19965_s2 + $0x4b8] sm:$0xff] }
0x1b72   : > { %14931 = vmatpush3.bf16.msra.mxu1 %v14928_v32  ;;  %13124 = vmatprep.mubr.msk.f32.mxu1 %vm628_vm2, %v4470_v37  ;;  %v10770_v32 = vld [vmem:[%s19965_s2 + $0x4b0] sm:$0xff] }
0x1b73   : > { %14933 = vmatprep.subr.bf16.mxu1 %v14932_v0 }
0x1b75   : > { %13125 = vmatmul.mubr.msk.f32.gmra.mrb[60].mxu1 %vm628_vm2, %v4471_v38 }
0x1b83   : > { %v13206_v45 = vpop.f32.mrb[56].mxu0 }
0x1b84   : > { %v5231_v47 = vadd.f32 %v13206_v45, %v10914_v44  ;;  %v5225_v53 = vpop.f32.mrb[57].mxu0  ;;  %v10772_v45 = vld [vmem:[%s19965_s2 + $0x4c0] sm:$0xff] }
0x1b85   : > { %v5226_v54 = vadd.f32 %v10914_v44, %v5225_v53  ;;  %v14944_v44 = vpack.c.bf16 %v10771_v33, %v10770_v32 }
0x1b87   : > { %v15002_v55 = vpack.c.bf16 %v5231_v47, %v5226_v54  ;;  %v10773_v47 = vld [vmem:[%s19965_s2 + $0x4c8] sm:$0xff]  ;;  %v10774_v54 = vld [vmem:[%s19965_s2 + $0x4d0] sm:$0xff] }
0x1b88   : > { %v14948_v53 = vpack.c.bf16 %v10773_v47, %v10772_v45 }
0x1b89   : > { %15003 = vmatprep.subr.bf16.mxu0 %v15002_v55 }
0x1b8a   : > { %15005 = vmatpush3.bf16.msra.mxu0 %v15002_v55  ;;  %v10775_v55 = vld [vmem:[%s19965_s2 + $0x4d8] sm:$0xff] }
0x1c44   : > { %v13123_v56 = vpop.f32.mrb[58].mxu1 }
0x1c45   : > { %v4924_v7 = vmul.f32 0.088388346, %v13123_v56  ;;  %v4904_v21 = vpop.f32.mrb[59].mxu1  ;;  %v14952_v56 = vpack.c.bf16 %v10775_v55, %v10774_v54 }
0x1c46   : > { %v4923_v39 = vmul.f32 0.088388346, %v4904_v21  ;;  %v10777_v21 = vld [vmem:[%s19965_s2 + $0x4e8] sm:$0xff] }
0x1c47   : > { %v4930_v36 = vsel %vm736_vm4, %v4924_v7, -inf }
0x1c48   : > { %4931 = vmax.xlane.f32.xlu1 %v4930_v36  ;;  %v13126_v16 = vpop.f32.mrb[60].mxu1  ;;  %v4927_v5 = vsel %vm736_vm4, %v4923_v39, -inf  ;;  %v10778_v36 = vld [vmem:[%s19965_s2 + $0x4f0] sm:$0xff] }
0x1c49   : > { %4928 = vmax.xlane.f32.xlu0 %v4927_v5  ;;  %v4914_v63 = vpop.f32.mrb[61].mxu1  ;;  %v4926_v13 = vmul.f32 0.088388346, %v13126_v16  ;;  %v10779_v16 = vld [vmem:[%s19965_s2 + $0x4f8] sm:$0xff] }
0x1c4a   : > { %v4925_v11 = vmul.f32 0.088388346, %v4914_v63  ;;  %v14960_v5 = vpack.c.bf16 %v10779_v16, %v10778_v36  ;;  %v17837_v63 = vld [vmem:[%s19972_s9 + $0x20] sm:$0xff] }
0x1c4b   : > { %v4936_v34 = vsel %vm736_vm4, %v4926_v13, -inf }
0x1c4c   : > { %v4933_v24 = vsel %vm736_vm4, %v4925_v11, -inf }
0x1c4d   : > { %4934 = vmax.xlane.f32.xlu0 %v4933_v24 }
0x1c51   : > { %4937 = vmax.xlane.f32.xlu0 %v4936_v34 }
0x1cd5   : > { %v4932_v31 = vpop.xlane.xlu1 %4931 }
0x1cd6   : > { %v4940_v42 = vsub.f32 %v4924_v7, %v4932_v31  ;;  %v4929_v30 = vpop.xlane.xlu0 %4928  ;;  %v10776_v7 = vld [vmem:[%s19965_s2 + $0x4e0] sm:$0xff]  ;;  %v10913_v31 = vld [vmem:[%s19966_s3 + $0x15] ss:$0 sm:$0xff] }
0x1cd7   : > { %v4939_v43 = vsub.f32 %v4923_v39, %v4929_v30  ;;  %v14956_v39 = vpack.c.bf16 %v10777_v21, %v10776_v7  ;;  %v10796_v7 = vld [vmem:[%s19965_s2 + $0x580] sm:$0xff]  ;;  %v10797_v21 = vld [vmem:[%s19965_s2 + $0x588] sm:$0xff] }
0x1cd8   : > { %v4945_v19 = vmul.f32 1.442695, %v4940_v42  ;;  %v15080_v16 = vpack.c.bf16 %v10797_v21, %v10796_v7 }
0x1cd9   : > { %v4943_v4 = vmul.f32 1.442695, %v4939_v43 }
0x1cda   : > { %16155 = vpow2.f32 %v4945_v19  ;;  %v4935_v15 = vpop.xlane.xlu0 %4934  ;;  %v10780_v19 = vld [vmem:[%s19965_s2 + $0x500] sm:$0xff] }
0x1cdb   : > { %16157 = vpow2.f32 %v4943_v4  ;;  %v4941_v52 = vsub.f32 %v4925_v11, %v4935_v15  ;;  %v10781_v4 = vld [vmem:[%s19965_s2 + $0x508] sm:$0xff] }
0x1cdd   : > { %v4947_v29 = vmul.f32 1.442695, %v4941_v52 }
0x1cde   : > { %v4938_v40 = vpop.xlane.xlu0 %4937 }
0x1cdf   : > { %16159 = vpow2.f32 %v4947_v29  ;;  %v4942_v23 = vsub.f32 %v4926_v13, %v4938_v40  ;;  %v15006_v29 = vpack.c.bf16 %v10781_v4, %v10780_v19  ;;  %v10782_v40 = vld [vmem:[%s19965_s2 + $0x510] sm:$0xff]  ;;  %v10800_v19 = vld [vmem:[%s19965_s2 + $0x5a0] sm:$0xff]  ;;  %v10801_v4 = vld [vmem:[%s19965_s2 + $0x5a8] sm:$0xff] }
0x1ce1   : > { %v4949_v49 = vmul.f32 1.442695, %v4942_v23  ;;  %v10783_v23 = vld [vmem:[%s19965_s2 + $0x518] sm:$0xff] }
0x1ce3   : > { %16161 = vpow2.f32 %v4949_v49  ;;  %v17871_v49 = vld [vmem:[%s19972_s9 + $0x28] sm:$0xff] }
0x1ce4   : > { %v16156_v1 = vpop.eup %16155 }
0x1ce5   : > { %v16158_v41 = vpop.eup %16157  ;;  %v4954_v17 = vsel %vm736_vm4, %v16156_v1, 0.0 }
0x1ce6   : > { %4955 = vadd.xlane.f32.xlu1 %v4954_v17  ;;  %v4951_v22 = vsel %vm736_vm4, %v16158_v41, 0.0  ;;  %v10784_v17 = vld [vmem:[%s19965_s2 + $0x520] sm:$0xff] }
0x1ce7   : > { %4952 = vadd.xlane.f32.xlu0 %v4951_v22  ;;  %v10785_v22 = vld [vmem:[%s19965_s2 + $0x528] sm:$0xff] }
0x1ce9   : > { %v16160_v2 = vpop.eup %16159 }
0x1cea   : > { %v4957_v59 = vsel %vm736_vm4, %v16160_v2, 0.0 }
0x1ceb   : > { %4958 = vadd.xlane.f32.xlu0 %v4957_v59  ;;  %v15014_v59 = vpack.c.bf16 %v10785_v22, %v10784_v17  ;;  %v10805_v17 = vld [vmem:[%s19965_s2 + $0x5c8] sm:$0xff] }
0x1ced   : > { %v16162_v18 = vpop.eup %16161 }
0x1cee   : > { %v4960_v61 = vsel %vm736_vm4, %v16162_v18, 0.0 }
0x1cef   : > { %4961 = vadd.xlane.f32.xlu1 %v4960_v61  ;;  %v10787_v61 = vld [vmem:[%s19965_s2 + $0x538] sm:$0xff] }
0x1d73   : > { %v4956_v8 = vpop.xlane.xlu1 %4955 }
0x1d74   : > { %16163 = vrcp.f32 %v4956_v8  ;;  %v4953_v14 = vpop.xlane.xlu0 %4952 }
0x1d75   : > { %16165 = vrcp.f32 %v4953_v14  ;;  %v10790_v14 = vld [vmem:[%s19965_s2 + $0x550] sm:$0xff] }
0x1d78   : > { %v4959_v25 = vpop.xlane.xlu0 %4958 }
0x1d79   : > { %16167 = vrcp.f32 %v4959_v25  ;;  %v10791_v25 = vld [vmem:[%s19965_s2 + $0x558] sm:$0xff] }
0x1d7c   : > { %v4962_v12 = vpop.xlane.xlu1 %4961 }
0x1d7d   : > { %16169 = vrcp.f32 %v4962_v12  ;;  %v15026_v12 = vpack.c.bf16 %v10791_v25, %v10790_v14  ;;  %v10811_v14 = vld [vmem:[%s19965_s2 + $0x5f8] sm:$0xff] }
0x1d7e   : > { %v16164_v46 = vpop.eup %16163 }
0x1d7f   : > { %v16166_v60 = vpop.eup %16165  ;;  %v4968_v58 = vmul.f32 %v16164_v46, %v16156_v1  ;;  %v17876_v1 = vld [vmem:[%s19972_s9 + $0x30] sm:$0xff]  ;;  %v10792_v46 = vld [vmem:[%s19965_s2 + $0x560] sm:$0xff] }
0x1d80   : > { %v4967_v57 = vmul.f32 %v16166_v60, %v16158_v41  ;;  %v15010_v41 = vpack.c.bf16 %v10783_v23, %v10782_v40  ;;  %v15030_v48 = vpack.c.bf16 %v10793_v50, %v10792_v46  ;;  %v10794_v60 = vld [vmem:[%s19965_s2 + $0x570] sm:$0xff]  ;;  %v10803_v40 = vld [vmem:[%s19965_s2 + $0x5b8] sm:$0xff] }
0x1d82   : > { %13131 = vmatprep.mubr.msk.f32.mxu1 %vm736_vm4, %v4967_v57  ;;  %v10795_v57 = vld [vmem:[%s19965_s2 + $0x578] sm:$0xff] }
0x1d83   : > { %v16168_v27 = vpop.eup %16167  ;;  %13132 = vmatmul.mubr.msk.f32.vlgmr.msra.gmra.mrb[62].mxu1 %vm736_vm4, %v4968_v58  ;;  %v15034_v58 = vpack.c.bf16 %v10795_v57, %v10794_v60 }
0x1d84   : > { %14935 = vmatpush3.bf16.msra.mxu1 %v14932_v0  ;;  %v4969_v35 = vmul.f32 %v16168_v27, %v16160_v2  ;;  %v17891_v2 = vld [vmem:[%s19972_s9 + $0x38] sm:$0xff]  ;;  %v10789_v0 = vld [vmem:[%s19965_s2 + $0x548] sm:$0xff] }
0x1d85   : > { %14937 = vmatprep.subr.bf16.mxu1 %v14936_v3  ;;  %v15022_v8 = vpack.c.bf16 %v10789_v0, %v10788_v10  ;;  %v10809_v10 = vld [vmem:[%s19965_s2 + $0x5e8] sm:$0xff] }
0x1d86   : > { %13134 = vmatprep.mubr.msk.f32.mxu1 %vm736_vm4, %v4969_v35 }
0x1d87   : > { %v16170_v37 = vpop.eup %16169 }
0x1d88   : > { %14939 = vmatpush3.bf16.msra.mxu1 %v14936_v3  ;;  %v4970_v38 = vmul.f32 %v16170_v37, %v16162_v18  ;;  %v10786_v18 = vld [vmem:[%s19965_s2 + $0x530] sm:$0xff]  ;;  %v17930_v3 = vld [vmem:[%s19972_s9 + $0x40] sm:$0xff] }
0x1d89   : > { %14941 = vmatprep.subr.bf16.mxu1 %v14940_v28  ;;  %v15018_v62 = vpack.c.bf16 %v10787_v61, %v10786_v18  ;;  %v10807_v18 = vld [vmem:[%s19965_s2 + $0x5d8] sm:$0xff] }
0x1d8a   : > { %13135 = vmatmul.mubr.msk.f32.gmra.mrb[64].mxu1 %vm736_vm4, %v4970_v38 }
0x1d8b   : > { %13169 = vmatprep.mubr.f32.mxu1 %v17697_v51 }
0x1d8c   : > { %14943 = vmatpush3.bf16.msra.mxu1 %v14940_v28 }
0x1d8d   : > { %14945 = vmatprep.subr.bf16.mxu1 %v14944_v44 }
0x1d90   : > { %14947 = vmatpush3.bf16.msra.mxu1 %v14944_v44 }
0x1d91   : > { %14949 = vmatprep.subr.bf16.mxu1 %v14948_v53 }
0x1d94   : > { %14951 = vmatpush3.bf16.msra.mxu1 %v14948_v53  ;;  %v10925_v53 = vld [vmem:[%s19966_s3 + $0x16] ss:$0 sm:$0xff] }
0x1d95   : > { %14953 = vmatprep.subr.bf16.mxu1 %v14952_v56 }
0x1d98   : > { %14955 = vmatpush3.bf16.msra.mxu1 %v14952_v56 }
0x1d99   : > { %14957 = vmatprep.subr.bf16.mxu1 %v14956_v39 }
0x1d9c   : > { %14959 = vmatpush3.bf16.msra.mxu1 %v14956_v39 }
0x1d9d   : > { %14961 = vmatprep.subr.bf16.mxu1 %v14960_v5 }
0x1da0   : > { %14963 = vmatpush3.bf16.msra.mxu1 %v14960_v5  ;;  %v10798_v5 = vld [vmem:[%s19965_s2 + $0x590] sm:$0xff] }
0x1da3   : > { %13170 = vmatmul.mubr.f32.vlgmr.msra.gmra.mrb[66].mxu1 %v17699_v20 }
0x1da4   : > { %13211 = vmatprep.mubr.msk.f32.mxu1 %vm628_vm2, %v17837_v63 }
0x1e56   : > { %v17841_v13 = vpop.f32.mrb[62].mxu1 }
0x1e57   : > { %v17843_v11 = vpop.f32.mrb[63].mxu1 }
0x1e5d   : > { %v17845_v24 = vpop.f32.mrb[64].mxu1 }
0x1e5e   : > { %v17847_v34 = vpop.f32.mrb[65].mxu1 }
0x1e76   : > { %v13171_v42 = vpop.f32.mrb[66].mxu1 }
0x1e77   : > { %v5150_v30 = vadd.f32 %v13171_v42, %v10913_v31  ;;  %v5144_v43 = vpop.f32.mrb[67].mxu1  ;;  %v17972_v42 = vld [vmem:[%s19972_s9 + $0x48] sm:$0xff] }
0x1e78   : > { %v5145_v15 = vadd.f32 %v10913_v31, %v5144_v43  ;;  %v10799_v31 = vld [vmem:[%s19965_s2 + $0x598] sm:$0xff] }
0x1e79   : > { %v15084_v43 = vpack.c.bf16 %v10799_v31, %v10798_v5 }
0x1e7a   : > { %v14996_v52 = vpack.c.bf16 %v5150_v30, %v5145_v15  ;;  %v17977_v30 = vld [vmem:[%s19972_s9 + $0x50] sm:$0xff]  ;;  %v17992_v15 = vld [vmem:[%s19972_s9 + $0x58] sm:$0xff] }
0x1e7c   : > { %14998 = vmatprep.subr.msk.bf16.mxu1 %vm16484_vm3, %v14996_v52 }
0x1e7d   : > { %15001 = vmatpush3.bf16.xpose.msk.msra.mxu1 %vm16484_vm3, %v14996_v52  ;;  %v15088_v52 = vpack.c.bf16 %v10801_v4, %v10800_v19 }
0x1e7e   : > { %15007 = vmatprep.subr.bf16.mxu1 %v15006_v29 }
0x1e84   : > { %13212 = vmatmul.mubr.msk.f32.vlgmr.msra.gmra.mrb[68].mxu1 %vm628_vm2, %v17871_v49 }
0x1e85   : > { %15009 = vmatpush3.bf16.msra.mxu1 %v15006_v29  ;;  %13214 = vmatprep.mubr.msk.f32.mxu1 %vm628_vm2, %v17876_v1  ;;  %v10802_v29 = vld [vmem:[%s19965_s2 + $0x5b0] sm:$0xff] }
0x1e86   : > { %15011 = vmatprep.subr.bf16.mxu1 %v15010_v41  ;;  %v15092_v23 = vpack.c.bf16 %v10803_v40, %v10802_v29 }
0x1e88   : > { %13215 = vmatmul.mubr.msk.f32.gmra.mrb[70].mxu1 %vm628_vm2, %v17891_v2 }
0x1e89   : > { %15013 = vmatpush3.bf16.msra.mxu1 %v15010_v41  ;;  %13259 = vmatprep.mubr.f32.mxu1 %v17697_v51  ;;  %v10804_v41 = vld [vmem:[%s19965_s2 + $0x5c0] sm:$0xff] }
0x1e8a   : > { %15015 = vmatprep.subr.bf16.mxu1 %v15014_v59  ;;  %v15096_v22 = vpack.c.bf16 %v10805_v17, %v10804_v41 }
0x1e8d   : > { %15017 = vmatpush3.bf16.msra.mxu1 %v15014_v59  ;;  %v10806_v59 = vld [vmem:[%s19965_s2 + $0x5d0] sm:$0xff] }
0x1e8e   : > { %15019 = vmatprep.subr.bf16.mxu1 %v15018_v62  ;;  %v15100_v61 = vpack.c.bf16 %v10807_v18, %v10806_v59  ;;  %v10950_v59 = vld [vmem:[%s19965_s2 + $0x800] sm:$0xff]  ;;  %v10951_v18 = vld [vmem:[%s19965_s2 + $0x808] sm:$0xff] }
0x1e91   : > { %15021 = vmatpush3.bf16.msra.mxu1 %v15018_v62  ;;  %v10808_v62 = vld [vmem:[%s19965_s2 + $0x5e0] sm:$0xff] }
0x1e92   : > { %15023 = vmatprep.subr.bf16.mxu1 %v15022_v8  ;;  %v15104_v0 = vpack.c.bf16 %v10809_v10, %v10808_v62  ;;  %v15186_v10 = vpack.c.bf16 %v10951_v18, %v10950_v59 }
0x1e95   : > { %15025 = vmatpush3.bf16.msra.mxu1 %v15022_v8  ;;  %v10810_v8 = vld [vmem:[%s19965_s2 + $0x5f0] sm:$0xff] }
0x1e96   : > { %15027 = vmatprep.subr.bf16.mxu1 %v15026_v12  ;;  %v15108_v25 = vpack.c.bf16 %v10811_v14, %v10810_v8  ;;  %v10953_v8 = vld [vmem:[%s19965_s2 + $0x818] sm:$0xff]  ;;  %v18102_v14 = vld [vmem:[%s19972_s9 + $0x68] sm:$0xff] }
0x1e99   : > { %15029 = vmatpush3.bf16.msra.mxu1 %v15026_v12 }
0x1e9a   : > { %15031 = vmatprep.subr.bf16.mxu1 %v15030_v48 }
0x1e9d   : > { %15033 = vmatpush3.bf16.msra.mxu1 %v15030_v48 }
0x1e9e   : > { %15035 = vmatprep.subr.bf16.mxu1 %v15034_v58 }
0x1ea1   : > { %15037 = vmatpush3.bf16.msra.mxu1 %v15034_v58 }
0x1ea4   : > { %13260 = vmatmul.mubr.f32.vlgmr.msra.gmra.mrb[72].mxu1 %v17699_v20 }
0x1ea5   : > { %13301 = vmatprep.mubr.msk.f32.mxu1 %vm628_vm2, %v17930_v3 }
0x1f57   : > { %v13213_v26 = vpop.f32.mrb[68].mxu1 }
0x1f58   : > { %v17934_v6 = vmul.f32 0.088388346, %v13213_v26  ;;  %v5318_v27 = vpop.f32.mrb[69].mxu1 }
0x1f59   : > { %v17936_v35 = vmul.f32 0.088388346, %v5318_v27 }
0x1f5a   : > { %v5344_v28 = vsel %vm736_vm4, %v17934_v6, -inf }
0x1f5b   : > { %5345 = vmax.xlane.f32.xlu1 %v5344_v28  ;;  %v13216_v32 = vpop.f32.mrb[70].mxu1  ;;  %v5341_v33 = vsel %vm736_vm4, %v17936_v35, -inf }
0x1f5c   : > { %v17942_v37 = vmul.f32 0.088388346, %v13216_v32  ;;  %5342 = vmax.xlane.f32.xlu0 %v5341_v33  ;;  %v5328_v38 = vpop.f32.mrb[71].mxu1 }
0x1f5d   : > { %v17944_v44 = vmul.f32 0.088388346, %v5328_v38 }
0x1f5e   : > { %v5350_v45 = vsel %vm736_vm4, %v17942_v37, -inf }
0x1f5f   : > { %5351 = vmax.xlane.f32.xlu1 %v5350_v45  ;;  %v5347_v47 = vsel %vm736_vm4, %v17944_v44, -inf }
0x1f60   : > { %5348 = vmax.xlane.f32.xlu0 %v5347_v47 }
0x1f77   : > { %v13261_v54 = vpop.f32.mrb[72].mxu1 }
0x1f78   : > { %v5564_v55 = vadd.f32 %v13261_v54, %v10925_v53  ;;  %v5558_v56 = vpop.f32.mrb[73].mxu1  ;;  %v18051_v54 = vld [vmem:[%s19972_s9 + $0x60] sm:$0xff] }
0x1f79   : > { %v5559_v39 = vadd.f32 %v10925_v53, %v5558_v56  ;;  %v10849_v56 = vld [vmem:[%s19965_s2 + $0x708] sm:$0xff] }
0x1f7b   : > { %v15070_v36 = vpack.c.bf16 %v5564_v55, %v5559_v39  ;;  %v10848_v55 = vld [vmem:[%s19965_s2 + $0x700] sm:$0xff] }
0x1f7c   : > { %v18061_v7 = vpack.c.bf16 %v10849_v56, %v10848_v55  ;;  %v10851_v56 = vld [vmem:[%s19965_s2 + $0x718] sm:$0xff] }
0x1f7d   : > { %15072 = vmatprep.subr.msk.bf16.mxu1 %vm16484_vm3, %v15070_v36 }
0x1f7e   : > { %15075 = vmatpush3.bf16.xpose.msk.msra.mxu1 %vm16484_vm3, %v15070_v36  ;;  %15039 = vmatprep.subr.bf16.mxu0 %v18061_v7 }
0x1f7f   : > { %15081 = vmatprep.subr.bf16.mxu1 %v15080_v16 }
0x1f85   : > { %13302 = vmatmul.mubr.msk.f32.vlgmr.msra.gmra.mrb[74].mxu1 %vm628_vm2, %v17972_v42 }
0x1f86   : > { %15083 = vmatpush3.bf16.msra.mxu1 %v15080_v16  ;;  %13304 = vmatprep.mubr.msk.f32.mxu1 %vm628_vm2, %v17977_v30 }
0x1f87   : > { %15085 = vmatprep.subr.bf16.mxu1 %v15084_v43 }
0x1f89   : > { %13305 = vmatmul.mubr.msk.f32.gmra.mrb[76].mxu1 %vm628_vm2, %v17992_v15 }
0x1f8a   : > { %15087 = vmatpush3.bf16.msra.mxu1 %v15084_v43  ;;  %13349 = vmatprep.mubr.f32.mxu1 %v17697_v51 }
0x1f8b   : > { %15089 = vmatprep.subr.bf16.mxu1 %v15088_v52 }
0x1f8e   : > { %15091 = vmatpush3.bf16.msra.mxu1 %v15088_v52 }
0x1f8f   : > { %15093 = vmatprep.subr.bf16.mxu1 %v15092_v23 }
0x1f92   : > { %15095 = vmatpush3.bf16.msra.mxu1 %v15092_v23  ;;  %v10937_v23 = vld [vmem:[%s19966_s3 + $0x17] ss:$0 sm:$0xff] }
0x1f93   : > { %15097 = vmatprep.subr.bf16.mxu1 %v15096_v22 }
0x1f96   : > { %15099 = vmatpush3.bf16.msra.mxu1 %v15096_v22 }
0x1f97   : > { %15101 = vmatprep.subr.bf16.mxu1 %v15100_v61 }
0x1f9a   : > { %15103 = vmatpush3.bf16.msra.mxu1 %v15100_v61 }
0x1f9b   : > { %15105 = vmatprep.subr.bf16.mxu1 %v15104_v0 }
0x1f9e   : > { %15107 = vmatpush3.bf16.msra.mxu1 %v15104_v0  ;;  %v10952_v0 = vld [vmem:[%s19965_s2 + $0x810] sm:$0xff] }
0x1f9f   : > { %15109 = vmatprep.subr.bf16.mxu1 %v15108_v25 }
0x1fa2   : > { %15111 = vmatpush3.bf16.msra.mxu1 %v15108_v25  ;;  %v18107_v25 = vld [vmem:[%s19972_s9 + $0x70] sm:$0xff] }
0x1fa5   : > { %13350 = vmatmul.mubr.f32.vlgmr.msra.gmra.mrb[78].mxu1 %v17699_v20 }
0x1fa6   : > { %13391 = vmatprep.mubr.msk.f32.mxu1 %vm628_vm2, %v18051_v54 }
0x1fe8   : > { %v5346_v12 = vpop.xlane.xlu1 %5345 }
0x1fe9   : > { %v5354_v46 = vsub.f32 %v17934_v6, %v5346_v12  ;;  %v5343_v50 = vpop.xlane.xlu0 %5342  ;;  %v15190_v12 = vpack.c.bf16 %v10953_v8, %v10952_v0  ;;  %v10856_v8 = vld [vmem:[%s19965_s2 + $0x740] sm:$0xff] }
0x1fea   : > { %v5353_v48 = vsub.f32 %v17936_v35, %v5343_v50  ;;  %v10955_v50 = vld [vmem:[%s19965_s2 + $0x828] sm:$0xff] }
0x1feb   : > { %v5359_v60 = vmul.f32 1.442695, %v5354_v46  ;;  %v10954_v46 = vld [vmem:[%s19965_s2 + $0x820] sm:$0xff] }
0x1fec   : > { %v5357_v57 = vmul.f32 1.442695, %v5353_v48  ;;  %v5352_v58 = vpop.xlane.xlu1 %5351 }
0x1fed   : > { %16171 = vpow2.f32 %v5359_v60  ;;  %v5356_v26 = vsub.f32 %v17942_v37, %v5352_v58  ;;  %v5349_v27 = vpop.xlane.xlu0 %5348  ;;  %v15194_v58 = vpack.c.bf16 %v10955_v50, %v10954_v46  ;;  %v10986_v46 = vld [vmem:[%s19965_s2 + $0x900] sm:$0xff]  ;;  %v10987_v50 = vld [vmem:[%s19965_s2 + $0x908] sm:$0xff] }
0x1fee   : > { %16173 = vpow2.f32 %v5357_v57  ;;  %v5355_v28 = vsub.f32 %v17944_v44, %v5349_v27  ;;  %v18122_v57 = vld [vmem:[%s19972_s9 + $0x78] sm:$0xff] }
0x1fef   : > { %v5363_v32 = vmul.f32 1.442695, %v5356_v26  ;;  %v10956_v26 = vld [vmem:[%s19965_s2 + $0x830] sm:$0xff]  ;;  %v10957_v27 = vld [vmem:[%s19965_s2 + $0x838] sm:$0xff] }
0x1ff0   : > { %v5361_v33 = vmul.f32 1.442695, %v5355_v28 }
0x1ff1   : > { %16175 = vpow2.f32 %v5363_v32 }
0x1ff2   : > { %16177 = vpow2.f32 %v5361_v33  ;;  %v15198_v33 = vpack.c.bf16 %v10957_v27, %v10956_v26  ;;  %v10859_v26 = vld [vmem:[%s19965_s2 + $0x758] sm:$0xff]  ;;  %v10988_v27 = vld [vmem:[%s19965_s2 + $0x910] sm:$0xff] }
0x1ff7   : > { %v18032_v38 = vpop.eup %16171 }
0x1ff8   : > { %v18034_v6 = vpop.eup %16173  ;;  %v5368_v35 = vsel %vm736_vm4, %v18032_v38, 0.0 }
0x1ff9   : > { %5369 = vadd.xlane.f32.xlu1 %v5368_v35  ;;  %v5365_v45 = vsel %vm736_vm4, %v18034_v6, 0.0  ;;  %v10958_v35 = vld [vmem:[%s19965_s2 + $0x840] sm:$0xff] }
0x1ffa   : > { %5366 = vadd.xlane.f32.xlu0 %v5365_v45  ;;  %v10959_v45 = vld [vmem:[%s19965_s2 + $0x848] sm:$0xff] }
0x1ffb   : > { %v18040_v37 = vpop.eup %16175 }
0x1ffc   : > { %v18042_v47 = vpop.eup %16177  ;;  %v5374_v44 = vsel %vm736_vm4, %v18040_v37, 0.0 }
0x1ffd   : > { %5375 = vadd.xlane.f32.xlu1 %v5374_v44  ;;  %v5371_v53 = vsel %vm736_vm4, %v18042_v47, 0.0  ;;  %v15202_v44 = vpack.c.bf16 %v10959_v45, %v10958_v35  ;;  %v10860_v35 = vld [vmem:[%s19965_s2 + $0x760] sm:$0xff]  ;;  %v10861_v45 = vld [vmem:[%s19965_s2 + $0x768] sm:$0xff] }
0x1ffe   : > { %5372 = vadd.xlane.f32.xlu0 %v5371_v53  ;;  %v10850_v53 = vld [vmem:[%s19965_s2 + $0x710] sm:$0xff] }
0x2058   : > { %v13303_v21 = vpop.f32.mrb[74].mxu1 }
0x2059   : > { %v18064_v39 = vmul.f32 0.088388346, %v13303_v21  ;;  %v5732_v36 = vpop.f32.mrb[75].mxu1  ;;  %v10960_v21 = vld [vmem:[%s19965_s2 + $0x850] sm:$0xff] }
0x205a   : > { %v18066_v16 = vmul.f32 0.088388346, %v5732_v36  ;;  %v10961_v36 = vld [vmem:[%s19965_s2 + $0x858] sm:$0xff] }
0x205b   : > { %v5758_v5 = vsel %vm736_vm4, %v18064_v39, -inf }
0x205c   : > { %5759 = vmax.xlane.f32.xlu1 %v5758_v5  ;;  %v13306_v31 = vpop.f32.mrb[76].mxu1  ;;  %v5755_v43 = vsel %vm736_vm4, %v18066_v16, -inf }
0x205d   : > { %v18072_v19 = vmul.f32 0.088388346, %v13306_v31  ;;  %v5742_v4 = vpop.f32.mrb[77].mxu1  ;;  %5756 = vmax.xlane.f32.xlu0 %v5755_v43 }
0x205e   : > { %v18074_v52 = vmul.f32 0.088388346, %v5742_v4  ;;  %v15042_v4 = vpack.c.bf16 %v10851_v56, %v10850_v53  ;;  %v10991_v53 = vld [vmem:[%s19965_s2 + $0x928] sm:$0xff] }
0x205f   : > { %v5764_v29 = vsel %vm736_vm4, %v18072_v19, -inf }
0x2060   : > { %5765 = vmax.xlane.f32.xlu1 %v5764_v29  ;;  %v5761_v40 = vsel %vm736_vm4, %v18074_v52, -inf  ;;  %v15206_v29 = vpack.c.bf16 %v10961_v36, %v10960_v21  ;;  %v10862_v21 = vld [vmem:[%s19965_s2 + $0x770] sm:$0xff]  ;;  %v10863_v36 = vld [vmem:[%s19965_s2 + $0x778] sm:$0xff] }
0x2061   : > { %5762 = vmax.xlane.f32.xlu0 %v5761_v40 }
0x2078   : > { %v13351_v41 = vpop.f32.mrb[78].mxu1 }
0x2079   : > { %v5978_v17 = vadd.f32 %v13351_v41, %v10937_v23  ;;  %v5972_v22 = vpop.f32.mrb[79].mxu1  ;;  %v10853_v41 = vld [vmem:[%s19965_s2 + $0x728] sm:$0xff] }
0x207a   : > { %v5973_v61 = vadd.f32 %v10937_v23, %v5972_v22  ;;  %v10852_v23 = vld [vmem:[%s19965_s2 + $0x720] sm:$0xff] }
0x207b   : > { %v15046_v18 = vpack.c.bf16 %v10853_v41, %v10852_v23  ;;  %v10996_v41 = vld [vmem:[%s19965_s2 + $0x950] sm:$0xff] }
0x207c   : > { %v15144_v62 = vpack.c.bf16 %v5978_v17, %v5973_v61 }
0x207e   : > { %15146 = vmatprep.subr.msk.bf16.mxu1 %vm16484_vm3, %v15144_v62 }
0x207f   : > { %15149 = vmatpush3.bf16.xpose.msk.msra.mxu1 %vm16484_vm3, %v15144_v62  ;;  %v10854_v62 = vld [vmem:[%s19965_s2 + $0x730] sm:$0xff] }
0x2080   : > { %15187 = vmatprep.subr.bf16.mxu1 %v15186_v10 }
0x2086   : > { %v5370_v48 = vpop.xlane.xlu1 %5369  ;;  %13392 = vmatmul.mubr.msk.f32.vlgmr.msra.gmra.mrb[80].mxu1 %vm628_vm2, %v18102_v14 }
0x2087   : > { %16179 = vrcp.f32 %v5370_v48  ;;  %15189 = vmatpush3.bf16.msra.mxu1 %v15186_v10  ;;  %v5367_v60 = vpop.xlane.xlu0 %5366  ;;  %13394 = vmatprep.mubr.msk.f32.mxu1 %vm628_vm2, %v18107_v25  ;;  %v10855_v10 = vld [vmem:[%s19965_s2 + $0x738] sm:$0xff] }
0x2088   : > { %16181 = vrcp.f32 %v5367_v60  ;;  %15191 = vmatprep.subr.bf16.mxu1 %v15190_v12  ;;  %v15250_v60 = vpack.c.bf16 %v10987_v50, %v10986_v46 }
0x208a   : > { %v5376_v28 = vpop.xlane.xlu1 %5375  ;;  %13395 = vmatmul.mubr.msk.f32.gmra.mrb[82].mxu1 %vm628_vm2, %v18122_v57 }
0x208b   : > { %16183 = vrcp.f32 %v5376_v28  ;;  %15193 = vmatpush3.bf16.msra.mxu1 %v15190_v12  ;;  %13477 = vmatprep.mubr.f32.mxu1 %v17697_v51  ;;  %v5373_v32 = vpop.xlane.xlu0 %5372  ;;  %v10857_v12 = vld [vmem:[%s19965_s2 + $0x748] sm:$0xff]  ;;  %v10989_v28 = vld [vmem:[%s19965_s2 + $0x918] sm:$0xff] }
0x208c   : > { %16185 = vrcp.f32 %v5373_v32  ;;  %15195 = vmatprep.subr.bf16.mxu1 %v15194_v58  ;;  %v15054_v48 = vpack.c.bf16 %v10857_v12, %v10856_v8 }
0x208f   : > { %15197 = vmatpush3.bf16.msra.mxu1 %v15194_v58  ;;  %v10858_v58 = vld [vmem:[%s19965_s2 + $0x750] sm:$0xff] }
0x2090   : > { %15199 = vmatprep.subr.bf16.mxu1 %v15198_v33  ;;  %v15058_v32 = vpack.c.bf16 %v10859_v26, %v10858_v58 }
0x2091   : > { %v16180_v55 = vpop.eup %16179 }
0x2092   : > { %v16182_v5 = vpop.eup %16181  ;;  %v5382_v43 = vmul.f32 %v16180_v55, %v18032_v38  ;;  %v10962_v38 = vld [vmem:[%s19965_s2 + $0x860] sm:$0xff]  ;;  %v15062_v55 = vpack.c.bf16 %v10861_v45, %v10860_v35 }
0x2093   : > { %15201 = vmatpush3.bf16.msra.mxu1 %v15198_v33  ;;  %v5381_v31 = vmul.f32 %v16182_v5, %v18034_v6  ;;  %v10963_v6 = vld [vmem:[%s19965_s2 + $0x868] sm:$0xff]  ;;  %v15254_v33 = vpack.c.bf16 %v10989_v28, %v10988_v27  ;;  %v10992_v5 = vld [vmem:[%s19965_s2 + $0x930] sm:$0xff] }
0x2094   : > { %15203 = vmatprep.subr.bf16.mxu1 %v15202_v44  ;;  %v15210_v61 = vpack.c.bf16 %v10963_v6, %v10962_v38  ;;  %v10998_v6 = vld [vmem:[%s19965_s2 + $0x960] sm:$0xff] }
0x2095   : > { %v16184_v40 = vpop.eup %16183  ;;  %13221 = vmatprep.mubr.msk.f32.mxu0 %vm736_vm4, %v5381_v31  ;;  %v10993_v31 = vld [vmem:[%s19965_s2 + $0x938] sm:$0xff] }
0x2096   : > { %v16186_v17 = vpop.eup %16185  ;;  %13222 = vmatmul.mubr.msk.f32.vlgmr.msra.gmra.mrb[58].mxu0 %vm736_vm4, %v5382_v43  ;;  %v5384_v59 = vmul.f32 %v16184_v40, %v18040_v37  ;;  %v10965_v37 = vld [vmem:[%s19965_s2 + $0x878] sm:$0xff]  ;;  %v15066_v43 = vpack.c.bf16 %v10863_v36, %v10862_v21  ;;  %v10995_v40 = vld [vmem:[%s19965_s2 + $0x948] sm:$0xff] }
0x2097   : > { %15041 = vmatpush3.bf16.msra.mxu0 %v18061_v7  ;;  %15205 = vmatpush3.bf16.msra.mxu1 %v15202_v44  ;;  %v5383_v22 = vmul.f32 %v16186_v17, %v18042_v47  ;;  %v10964_v47 = vld [vmem:[%s19965_s2 + $0x870] sm:$0xff]  ;;  %v15050_v7 = vpack.c.bf16 %v10855_v10, %v10854_v62  ;;  %v10990_v44 = vld [vmem:[%s19965_s2 + $0x920] sm:$0xff]  ;;  %v10997_v17 = vld [vmem:[%s19965_s2 + $0x958] sm:$0xff] }
0x2098   : > { %15043 = vmatprep.subr.bf16.mxu0 %v15042_v4  ;;  %15207 = vmatprep.subr.bf16.mxu1 %v15206_v29  ;;  %v15214_v0 = vpack.c.bf16 %v10965_v37, %v10964_v47  ;;  %v15258_v56 = vpack.c.bf16 %v10991_v53, %v10990_v44  ;;  %v15270_v38 = vpack.c.bf16 %v10997_v17, %v10996_v41  ;;  %v18302_v41 = vld [vmem:[%s19966_s3 + $0x1c] ss:$0 sm:$0xff] }
0x2099   : > { %13224 = vmatprep.mubr.msk.f32.mxu0 %vm736_vm4, %v5383_v22  ;;  %v10999_v22 = vld [vmem:[%s19965_s2 + $0x968] sm:$0xff] }
0x209a   : > { %13225 = vmatmul.mubr.msk.f32.gmra.mrb[60].mxu0 %vm736_vm4, %v5384_v59  ;;  %v15274_v59 = vpack.c.bf16 %v10999_v22, %v10998_v6 }
0x209b   : > { %15045 = vmatpush3.bf16.msra.mxu0 %v15042_v4  ;;  %13294 = vmatprep.mubr.f32.mxu0 %v17697_v51  ;;  %v15262_v4 = vpack.c.bf16 %v10993_v31, %v10992_v5 }
0x209c   : > { %15209 = vmatpush3.bf16.msra.mxu1 %v15206_v29  ;;  %15047 = vmatprep.subr.bf16.mxu0 %v15046_v18  ;;  %v10994_v29 = vld [vmem:[%s19965_s2 + $0x940] sm:$0xff] }
0x209d   : > { %15211 = vmatprep.subr.bf16.mxu1 %v15210_v61  ;;  %v15266_v23 = vpack.c.bf16 %v10995_v40, %v10994_v29 }
0x209f   : > { %15049 = vmatpush3.bf16.msra.mxu0 %v15046_v18  ;;  %v11000_v18 = vld [vmem:[%s19965_s2 + $0x970] sm:$0xff] }
0x20a0   : > { %15213 = vmatpush3.bf16.msra.mxu1 %v15210_v61  ;;  %15051 = vmatprep.subr.bf16.mxu0 %v15050_v7  ;;  %v11001_v61 = vld [vmem:[%s19965_s2 + $0x978] sm:$0xff] }
0x20a1   : > { %15215 = vmatprep.subr.bf16.mxu1 %v15214_v0  ;;  %v15278_v62 = vpack.c.bf16 %v11001_v61, %v11000_v18 }
0x20a3   : > { %15053 = vmatpush3.bf16.msra.mxu0 %v15050_v7 }
0x20a4   : > { %15217 = vmatpush3.bf16.msra.mxu1 %v15214_v0  ;;  %15055 = vmatprep.subr.bf16.mxu0 %v15054_v48 }
0x20a5   : > { %15251 = vmatprep.subr.bf16.mxu1 %v15250_v60 }
0x20a7   : > { %15057 = vmatpush3.bf16.msra.mxu0 %v15054_v48  ;;  %13478 = vmatmul.mubr.f32.vlgmr.msra.gmra.mrb[84].mxu1 %v17699_v20 }
0x20a8   : > { %15253 = vmatpush3.bf16.msra.mxu1 %v15250_v60  ;;  %13547 = vmatprep.mubr.f32.mxu1 %v17697_v51 }
0x20a9   : > { %15059 = vmatprep.subr.bf16.mxu0 %v15058_v32  ;;  %15255 = vmatprep.subr.bf16.mxu1 %v15254_v33 }
0x20ab   : > { %15061 = vmatpush3.bf16.msra.mxu0 %v15058_v32 }
0x20ac   : > { %15257 = vmatpush3.bf16.msra.mxu1 %v15254_v33  ;;  %15063 = vmatprep.subr.bf16.mxu0 %v15062_v55 }
0x20ad   : > { %15259 = vmatprep.subr.bf16.mxu1 %v15258_v56 }
0x20af   : > { %15065 = vmatpush3.bf16.msra.mxu0 %v15062_v55 }
0x20b0   : > { %15261 = vmatpush3.bf16.msra.mxu1 %v15258_v56  ;;  %15067 = vmatprep.subr.bf16.mxu0 %v15066_v43 }
0x20b1   : > { %15263 = vmatprep.subr.bf16.mxu1 %v15262_v4 }
0x20b3   : > { %15069 = vmatpush3.bf16.msra.mxu0 %v15066_v43 }
0x20b4   : > { %15265 = vmatpush3.bf16.msra.mxu1 %v15262_v4 }
0x20b5   : > { %15267 = vmatprep.subr.bf16.mxu1 %v15266_v23 }
0x20b6   : > { %13295 = vmatmul.mubr.f32.vlgmr.msra.gmra.mrb[62].mxu0 %v17699_v20 }
0x20b8   : > { %15269 = vmatpush3.bf16.msra.mxu1 %v15266_v23 }
0x20b9   : > { %15271 = vmatprep.subr.bf16.mxu1 %v15270_v38 }
0x20bc   : > { %15273 = vmatpush3.bf16.msra.mxu1 %v15270_v38 }
0x20bd   : > { %15275 = vmatprep.subr.bf16.mxu1 %v15274_v59 }
0x20c0   : > { %15277 = vmatpush3.bf16.msra.mxu1 %v15274_v59  ;;  %v10926_v59 = vld [vmem:[%s19966_s3 + $0x1a] ss:$0 sm:$0xff] }
0x20c1   : > { %15279 = vmatprep.subr.bf16.mxu1 %v15278_v62 }
0x20c4   : > { %15281 = vmatpush3.bf16.msra.mxu1 %v15278_v62 }
0x20c7   : > { %13548 = vmatmul.mubr.f32.vlgmr.msra.gmra.mrb[86].mxu1 %v17699_v20 }
0x20e9   : > { %v5760_v10 = vpop.xlane.xlu1 %5759 }
0x20ea   : > { %v5768_v47 = vsub.f32 %v18064_v39, %v5760_v10  ;;  %v5757_v37 = vpop.xlane.xlu0 %5756 }
0x20eb   : > { %v5767_v7 = vsub.f32 %v18066_v16, %v5757_v37  ;;  %v10865_v37 = vld [vmem:[%s19965_s2 + $0x788] sm:$0xff] }
0x20ec   : > { %v5773_v0 = vmul.f32 1.442695, %v5768_v47  ;;  %v10864_v47 = vld [vmem:[%s19965_s2 + $0x780] sm:$0xff] }
0x20ed   : > { %v5771_v8 = vmul.f32 1.442695, %v5767_v7  ;;  %v5766_v12 = vpop.xlane.xlu1 %5765 }
0x20ee   : > { %16187 = vpow2.f32 %v5773_v0  ;;  %v5770_v46 = vsub.f32 %v18072_v19, %v5766_v12  ;;  %v5763_v50 = vpop.xlane.xlu0 %5762 }
0x20ef   : > { %16189 = vpow2.f32 %v5771_v8  ;;  %v5769_v48 = vsub.f32 %v18074_v52, %v5763_v50 }
0x20f0   : > { %v5777_v60 = vmul.f32 1.442695, %v5770_v46  ;;  %v15112_v46 = vpack.c.bf16 %v10865_v37, %v10864_v47  ;;  %v10876_v47 = vld [vmem:[%s19965_s2 + $0x7e0] sm:$0xff]  ;;  %v10877_v37 = vld [vmem:[%s19965_s2 + $0x7e8] sm:$0xff] }
0x20f1   : > { %v5775_v58 = vmul.f32 1.442695, %v5769_v48  ;;  %v10866_v48 = vld [vmem:[%s19965_s2 + $0x790] sm:$0xff] }
0x20f2   : > { %16191 = vpow2.f32 %v5777_v60  ;;  %v10867_v60 = vld [vmem:[%s19965_s2 + $0x798] sm:$0xff] }
0x20f3   : > { %16193 = vpow2.f32 %v5775_v58 }
0x20f8   : > { %v16188_v26 = vpop.eup %16187 }
0x20f9   : > { %v16190_v27 = vpop.eup %16189  ;;  %v5782_v39 = vsel %vm736_vm4, %v16188_v26, 0.0 }
0x20fa   : > { %5783 = vadd.xlane.f32.xlu1 %v5782_v39  ;;  %v5779_v16 = vsel %vm736_vm4, %v16190_v27, 0.0 }
0x20fb   : > { %5780 = vadd.xlane.f32.xlu0 %v5779_v16 }
0x20fc   : > { %v18267_v28 = vpop.eup %16191 }
0x20fd   : > { %v18269_v32 = vpop.eup %16193  ;;  %v5788_v19 = vsel %vm736_vm4, %v18267_v28, 0.0 }
0x20fe   : > { %5789 = vadd.xlane.f32.xlu1 %v5788_v19  ;;  %v5785_v52 = vsel %vm736_vm4, %v18269_v32, 0.0  ;;  %v15116_v19 = vpack.c.bf16 %v10867_v60, %v10866_v48 }
0x20ff   : > { %5786 = vadd.xlane.f32.xlu0 %v5785_v52 }
0x2159   : > { %v13393_v33 = vpop.f32.mrb[80].mxu1 }
0x215a   : > { %v18275_v35 = vmul.f32 0.088388346, %v13393_v33  ;;  %v6146_v45 = vpop.f32.mrb[81].mxu1  ;;  %v10868_v33 = vld [vmem:[%s19965_s2 + $0x7a0] sm:$0xff] }
0x215b   : > { %v18277_v44 = vmul.f32 0.088388346, %v6146_v45  ;;  %v10869_v45 = vld [vmem:[%s19965_s2 + $0x7a8] sm:$0xff] }
0x215c   : > { %v6172_v53 = vsel %vm736_vm4, %v18275_v35, -inf }
0x215d   : > { %6173 = vmax.xlane.f32.xlu1 %v6172_v53  ;;  %v13396_v55 = vpop.f32.mrb[82].mxu1  ;;  %v6169_v56 = vsel %vm736_vm4, %v18277_v44, -inf }
0x215e   : > { %v18283_v21 = vmul.f32 0.088388346, %v13396_v55  ;;  %v6156_v36 = vpop.f32.mrb[83].mxu1  ;;  %6170 = vmax.xlane.f32.xlu0 %v6169_v56  ;;  %v15120_v56 = vpack.c.bf16 %v10869_v45, %v10868_v33 }
0x215f   : > { %v18285_v5 = vmul.f32 0.088388346, %v6156_v36 }
0x2160   : > { %v6178_v31 = vsel %vm736_vm4, %v18283_v21, -inf }
0x2161   : > { %6179 = vmax.xlane.f32.xlu1 %v6178_v31  ;;  %v6175_v43 = vsel %vm736_vm4, %v18285_v5, -inf  ;;  %v10870_v31 = vld [vmem:[%s19965_s2 + $0x7b0] sm:$0xff] }
0x2162   : > { %6176 = vmax.xlane.f32.xlu0 %v6175_v43  ;;  %v10871_v43 = vld [vmem:[%s19965_s2 + $0x7b8] sm:$0xff] }
0x2169   : > { %v18291_v4 = vpop.f32.mrb[58].mxu0 }
0x216a   : > { %v18293_v29 = vpop.f32.mrb[59].mxu0 }
0x216d   : > { %v18295_v40 = vpop.f32.mrb[60].mxu0 }
0x216e   : > { %v18297_v23 = vpop.f32.mrb[61].mxu0 }
0x217a   : > { %v13479_v17 = vpop.f32.mrb[84].mxu1 }
0x217b   : > { %v18305_v38 = vadd.f32 %v13479_v17, %v18302_v41  ;;  %v18307_v6 = vpop.f32.mrb[85].mxu1 }
0x2187   : > { %v5784_v22 = vpop.xlane.xlu1 %5783 }
0x2188   : > { %16195 = vrcp.f32 %v5784_v22  ;;  %v5781_v18 = vpop.xlane.xlu0 %5780 }
0x2189   : > { %v13296_v61 = vpop.f32.mrb[62].mxu0  ;;  %16197 = vrcp.f32 %v5781_v18 }
0x218a   : > { %v5645_v62 = vadd.f32 %v13296_v61, %v10926_v59  ;;  %v5639_v10 = vpop.f32.mrb[63].mxu0  ;;  %v10874_v61 = vld [vmem:[%s19965_s2 + $0x7d0] sm:$0xff] }
0x218b   : > { %v5640_v7 = vadd.f32 %v10926_v59, %v5639_v10  ;;  %v5790_v0 = vpop.xlane.xlu1 %5789  ;;  %v10873_v59 = vld [vmem:[%s19965_s2 + $0x7c8] sm:$0xff] }
0x218c   : > { %16199 = vrcp.f32 %v5790_v0  ;;  %v5787_v8 = vpop.xlane.xlu0 %5786  ;;  %v10878_v0 = vld [vmem:[%s19965_s2 + $0x7f0] sm:$0xff] }
0x218d   : > { %v15076_v12 = vpack.c.bf16 %v5645_v62, %v5640_v7  ;;  %16201 = vrcp.f32 %v5787_v8  ;;  %v10875_v62 = vld [vmem:[%s19965_s2 + $0x7d8] sm:$0xff]  ;;  %v15136_v7 = vpack.c.bf16 %v10877_v37, %v10876_v47 }
0x218e   : > { %v15132_v10 = vpack.c.bf16 %v10875_v62, %v10874_v61  ;;  %v10879_v8 = vld [vmem:[%s19965_s2 + $0x7f8] sm:$0xff] }
0x218f   : > { %15077 = vmatprep.subr.bf16.mxu0 %v15076_v12 }
0x2190   : > { %15079 = vmatpush3.bf16.msra.mxu0 %v15076_v12  ;;  %v15140_v12 = vpack.c.bf16 %v10879_v8, %v10878_v0 }
0x2191   : > { %15113 = vmatprep.subr.bf16.mxu0 %v15112_v46 }
0x2192   : > { %v16196_v50 = vpop.eup %16195 }
0x2193   : > { %v16198_v58 = vpop.eup %16197  ;;  %v5796_v16 = vmul.f32 %v16196_v50, %v16188_v26  ;;  %v11003_v26 = vld [vmem:[%s19966_s3 + $0x1e] ss:$0 sm:$0xff] }
0x2194   : > { %v5795_v39 = vmul.f32 %v16198_v58, %v16190_v27 }
0x2196   : > { %v16200_v52 = vpop.eup %16199  ;;  %13311 = vmatprep.mubr.msk.f32.mxu0 %vm736_vm4, %v5795_v39 }
0x2197   : > { %v16202_v53 = vpop.eup %16201  ;;  %13312 = vmatmul.mubr.msk.f32.vlgmr.msra.gmra.mrb[64].mxu0 %vm736_vm4, %v5796_v16  ;;  %v5798_v55 = vmul.f32 %v16200_v52, %v18267_v28  ;;  %v15124_v28 = vpack.c.bf16 %v10871_v43, %v10870_v31  ;;  %v5485_v31 = vadd.f32 %v18295_v40, %v17891_v2  ;;  %v5482_v43 = vadd.f32 %v17837_v63, %v18293_v29 }
0x2198   : > { %15115 = vmatpush3.bf16.msra.mxu0 %v15112_v46  ;;  %v5797_v27 = vmul.f32 %v16202_v53, %v18269_v32  ;;  %v10872_v32 = vld [vmem:[%s19965_s2 + $0x7c0] sm:$0xff] }
0x2199   : > { %15117 = vmatprep.subr.bf16.mxu0 %v15116_v19  ;;  %v15128_v18 = vpack.c.bf16 %v10873_v59, %v10872_v32 }
0x219a   : > { %v13549_v36 = vpop.f32.mrb[86].mxu1  ;;  %13314 = vmatprep.mubr.msk.f32.mxu0 %vm736_vm4, %v5797_v27 }
0x219b   : > { %v18344_v17 = vadd.f32 %v13549_v36, %v11003_v26  ;;  %v18346_v22 = vpop.f32.mrb[87].mxu1  ;;  %13315 = vmatmul.mubr.msk.f32.gmra.mrb[66].mxu0 %vm736_vm4, %v5798_v55 }
0x219c   : > { %15119 = vmatpush3.bf16.msra.mxu0 %v15116_v19  ;;  %13384 = vmatprep.mubr.f32.mxu0 %v17697_v51 }
0x219d   : > { %15121 = vmatprep.subr.bf16.mxu0 %v15120_v56 }
0x21a0   : > { %15123 = vmatpush3.bf16.msra.mxu0 %v15120_v56 }
0x21a1   : > { %15125 = vmatprep.subr.bf16.mxu0 %v15124_v28 }
0x21a4   : > { %15127 = vmatpush3.bf16.msra.mxu0 %v15124_v28  ;;  %v5484_v28 = vadd.f32 %v17876_v1, %v18297_v23  ;;  %v10938_v1 = vld [vmem:[%s19966_s3 + $0x1b] ss:$0 sm:$0xff] }
0x21a5   : > { %15129 = vmatprep.subr.bf16.mxu0 %v15128_v18 }
0x21a8   : > { %15131 = vmatpush3.bf16.msra.mxu0 %v15128_v18 }
0x21a9   : > { %15133 = vmatprep.subr.bf16.mxu0 %v15132_v10 }
0x21ac   : > { %15135 = vmatpush3.bf16.msra.mxu0 %v15132_v10 }
0x21ad   : > { %15137 = vmatprep.subr.bf16.mxu0 %v15136_v7 }
0x21b0   : > { %15139 = vmatpush3.bf16.msra.mxu0 %v15136_v7 }
0x21b1   : > { %15141 = vmatprep.subr.bf16.mxu0 %v15140_v12 }
0x21b4   : > { %15143 = vmatpush3.bf16.msra.mxu0 %v15140_v12 }
0x21b7   : > { %13385 = vmatmul.mubr.f32.vlgmr.msra.gmra.mrb[68].mxu0 %v17699_v20 }
0x21ea   : > { %v6174_v46 = vpop.xlane.xlu1 %6173 }
0x21eb   : > { %v6182_v50 = vsub.f32 %v18275_v35, %v6174_v46  ;;  %v6171_v48 = vpop.xlane.xlu0 %6170 }
0x21ec   : > { %v6181_v60 = vsub.f32 %v18277_v44, %v6171_v48  ;;  %v10884_v48 = vld [vmem:[%s19967_s4 + $0x100] sm:$0xff] }
0x21ed   : > { %v6187_v58 = vmul.f32 1.442695, %v6182_v50 }
0x21ee   : > { %v6185_v39 = vmul.f32 1.442695, %v6181_v60  ;;  %v6180_v16 = vpop.xlane.xlu1 %6179  ;;  %v10885_v60 = vld [vmem:[%s19967_s4 + $0x108] sm:$0xff] }
0x21ef   : > { %16203 = vpow2.f32 %v6187_v58  ;;  %v6184_v19 = vsub.f32 %v18283_v21, %v6180_v16  ;;  %v6177_v52 = vpop.xlane.xlu0 %6176  ;;  %v10886_v58 = vld [vmem:[%s19967_s4 + $0x110] sm:$0xff]  ;;  %v10887_v16 = vld [vmem:[%s19967_s4 + $0x118] sm:$0xff] }
0x21f0   : > { %16205 = vpow2.f32 %v6185_v39  ;;  %v6183_v33 = vsub.f32 %v18285_v5, %v6177_v52  ;;  %v5483_v5 = vadd.f32 %v18291_v4, %v17871_v49  ;;  %v15154_v39 = vpack.c.bf16 %v10885_v60, %v10884_v48  ;;  %v10888_v52 = vld [vmem:[%s19967_s4 + $0x120] sm:$0xff]  ;;  %v11032_v48 = vld [vmem:[%s19965_s2 + $0xa50] sm:$0xff]  ;;  %v11033_v60 = vld [vmem:[%s19965_s2 + $0xa58] sm:$0xff] }
0x21f1   : > { %v6191_v45 = vmul.f32 1.442695, %v6184_v19  ;;  %v15158_v19 = vpack.c.bf16 %v10887_v16, %v10886_v58  ;;  %v15334_v58 = vpack.c.bf16 %v11033_v60, %v11032_v48  ;;  %v11004_v48 = vld [vmem:[%s19965_s2 + $0x980] sm:$0xff]  ;;  %v11005_v60 = vld [vmem:[%s19965_s2 + $0x988] sm:$0xff] }
0x21f2   : > { %v6189_v53 = vmul.f32 1.442695, %v6183_v33  ;;  %v10889_v33 = vld [vmem:[%s19967_s4 + $0x128] sm:$0xff] }
0x21f3   : > { %16207 = vpow2.f32 %v6191_v45  ;;  %v15162_v45 = vpack.c.bf16 %v10889_v33, %v10888_v52 }
0x21f4   : > { %16209 = vpow2.f32 %v6189_v53  ;;  %v10890_v53 = vld [vmem:[%s19967_s4 + $0x130] sm:$0xff] }
0x21f9   : > { %v16204_v26 = vpop.eup %16203 }
0x21fa   : > { %v16206_v27 = vpop.eup %16205  ;;  %v6196_v35 = vsel %vm736_vm4, %v16204_v26, 0.0 }
0x21fb   : > { %6197 = vadd.xlane.f32.xlu1 %v6196_v35  ;;  %v6193_v44 = vsel %vm736_vm4, %v16206_v27, 0.0  ;;  %v10892_v35 = vld [vmem:[%s19967_s4 + $0x140] sm:$0xff] }
0x21fc   : > { %6194 = vadd.xlane.f32.xlu0 %v6193_v44  ;;  %v10893_v44 = vld [vmem:[%s19967_s4 + $0x148] sm:$0xff] }
0x21fd   : > { %v16208_v55 = vpop.eup %16207 }
0x21fe   : > { %v16210_v56 = vpop.eup %16209  ;;  %v6202_v21 = vsel %vm736_vm4, %v16208_v55, 0.0 }
0x21ff   : > { %6203 = vadd.xlane.f32.xlu1 %v6202_v21  ;;  %v6199_v36 = vsel %vm736_vm4, %v16210_v56, 0.0  ;;  %v10895_v21 = vld [vmem:[%s19967_s4 + $0x158] sm:$0xff] }
0x2200   : > { %6200 = vadd.xlane.f32.xlu0 %v6199_v36 }
0x2210   : > { %6320 = vrot.lane.b32.xlu1 %v5483_v5, %s19992_s12  ;;  %v10896_v5 = vld [vmem:[%s19967_s4 + $0x160] sm:$0xff] }
0x2214   : > { %6324 = vrot.lane.b32.xlu1 %v5485_v31, %s19992_s12  ;;  %v10897_v31 = vld [vmem:[%s19967_s4 + $0x168] sm:$0xff] }
0x2216   : > { %6318 = vrot.lane.b32.xlu0 %v5482_v43, %s19992_s12  ;;  %v15178_v43 = vpack.c.bf16 %v10897_v31, %v10896_v5 }
0x221a   : > { %6322 = vrot.lane.b32.xlu0 %v5484_v28, %s19992_s12  ;;  %v10898_v28 = vld [vmem:[%s19967_s4 + $0x170] sm:$0xff] }
0x226a   : > { %v13313_v32 = vpop.f32.mrb[64].mxu0 }
0x226b   : > { %v5897_v49 = vadd.f32 %v13313_v32, %v17972_v42  ;;  %v5877_v4 = vpop.f32.mrb[65].mxu0  ;;  %v10899_v32 = vld [vmem:[%s19967_s4 + $0x178] sm:$0xff] }
0x226c   : > { %v5896_v2 = vadd.f32 %v17930_v3, %v5877_v4  ;;  %v10968_v4 = vld [vmem:[%s19965_s2 + $0x880] sm:$0xff] }
0x226d   : > { %6336 = vrot.lane.b32.xlu1 %v5897_v49, %s19991_s14  ;;  %v15182_v49 = vpack.c.bf16 %v10899_v32, %v10898_v28  ;;  %v10972_v32 = vld [vmem:[%s19965_s2 + $0x8a0] sm:$0xff] }
0x226e   : > { %v18397_v59 = vpop.f32.mrb[66].mxu0 }
0x226f   : > { %v18400_v63 = vpop.f32.mrb[67].mxu0 }
0x2271   : > { %6334 = vrot.lane.b32.xlu1 %v5896_v2, %s19991_s14  ;;  %v10969_v2 = vld [vmem:[%s19965_s2 + $0x888] sm:$0xff] }
0x2288   : > { %v6198_v29 = vpop.xlane.xlu1 %6197 }
0x2289   : > { %16211 = vrcp.f32 %v6198_v29  ;;  %v6195_v40 = vpop.xlane.xlu0 %6194  ;;  %v18464_v29 = vpack.c.bf16 %v10969_v2, %v10968_v4 }
0x228a   : > { %v13386_v23 = vpop.f32.mrb[68].mxu0  ;;  %16213 = vrcp.f32 %v6195_v40 }
0x228b   : > { %v6059_v42 = vadd.f32 %v13386_v23, %v10938_v1  ;;  %v6053_v18 = vpop.f32.mrb[69].mxu0 }
0x228c   : > { %v6054_v61 = vadd.f32 %v10938_v1, %v6053_v18  ;;  %v6204_v62 = vpop.xlane.xlu1 %6203 }
0x228d   : > { %16215 = vrcp.f32 %v6204_v62  ;;  %v6201_v10 = vpop.xlane.xlu0 %6200 }
0x228e   : > { %v15150_v3 = vpack.c.bf16 %v6059_v42, %v6054_v61  ;;  %16217 = vrcp.f32 %v6201_v10  ;;  %v5899_v61 = vadd.f32 %v18397_v59, %v17992_v15  ;;  %v5898_v10 = vadd.f32 %v17977_v30, %v18400_v63  ;;  %v11022_v15 = vld [vmem:[%s19965_s2 + $0xa00] sm:$0xff]  ;;  %v11023_v30 = vld [vmem:[%s19965_s2 + $0xa08] sm:$0xff]  ;;  %v11024_v63 = vld [vmem:[%s19965_s2 + $0xa10] sm:$0xff] }
0x228f   : > { %v15314_v59 = vpack.c.bf16 %v11023_v30, %v11022_v15 }
0x2290   : > { %15151 = vmatprep.subr.bf16.mxu0 %v15150_v3 }
0x2291   : > { %15153 = vmatpush3.bf16.msra.mxu0 %v15150_v3  ;;  %15315 = vmatprep.subr.bf16.mxu1 %v15314_v59  ;;  %v11026_v3 = vld [vmem:[%s19965_s2 + $0xa20] sm:$0xff]  ;;  %v6319_v52 = vpop.permute.xlu0 %6318 }
0x2292   : > { %15155 = vmatprep.subr.bf16.mxu0 %v15154_v39  ;;  %15317 = vmatpush3.bf16.msra.mxu1 %v15314_v59 }
0x2293   : > { %v16212_v47 = vpop.eup %16211 }
0x2294   : > { %v16214_v37 = vpop.eup %16213  ;;  %v6210_v0 = vmul.f32 %v16212_v47, %v16204_v26  ;;  %v10891_v26 = vld [vmem:[%s19967_s4 + $0x138] sm:$0xff]  ;;  %v11027_v47 = vld [vmem:[%s19965_s2 + $0xa28] sm:$0xff] }
0x2295   : > { %v6209_v7 = vmul.f32 %v16214_v37, %v16206_v27  ;;  %v15166_v27 = vpack.c.bf16 %v10891_v26, %v10890_v53  ;;  %v15322_v37 = vpack.c.bf16 %v11027_v47, %v11026_v3  ;;  %v16271_v53 = vld [vmem:[%s19972_s9] sm:$0xff]  ;;  %v10978_v3 = vld [vmem:[%s19965_s2 + $0x8d0] sm:$0xff]  ;;  %v10979_v47 = vld [vmem:[%s19965_s2 + $0x8d8] sm:$0xff] }
0x2296   : > { %v5068_v26 = vadd.f32 %v16271_v53, %v17843_v11  ;;  %v11010_v53 = vld [vmem:[%s19965_s2 + $0x9b0] sm:$0xff] }
0x2297   : > { %v16216_v8 = vpop.eup %16215  ;;  %13401 = vmatprep.mubr.msk.f32.mxu0 %vm736_vm4, %v6209_v7  ;;  %v11028_v7 = vld [vmem:[%s19965_s2 + $0xa30] sm:$0xff] }
0x2298   : > { %v16218_v12 = vpop.eup %16217  ;;  %13402 = vmatmul.mubr.msk.f32.vlgmr.msra.gmra.mrb[70].mxu0 %vm736_vm4, %v6210_v0  ;;  %v6212_v50 = vmul.f32 %v16216_v8, %v16208_v55  ;;  %v15170_v55 = vpack.c.bf16 %v10893_v44, %v10892_v35  ;;  %v11029_v0 = vld [vmem:[%s19965_s2 + $0xa38] sm:$0xff]  ;;  %v10970_v44 = vld [vmem:[%s19965_s2 + $0x890] sm:$0xff] }
0x2299   : > { %v6211_v46 = vmul.f32 %v16218_v12, %v16210_v56  ;;  %15157 = vmatpush3.bf16.msra.mxu0 %v15154_v39  ;;  %v10894_v56 = vld [vmem:[%s19967_s4 + $0x150] sm:$0xff]  ;;  %v15326_v8 = vpack.c.bf16 %v11029_v0, %v11028_v7  ;;  %v11030_v12 = vld [vmem:[%s19965_s2 + $0xa40] sm:$0xff]  ;;  %v6321_v39 = vpop.permute.xlu1 %6320  ;;  %v10981_v0 = vld [vmem:[%s19965_s2 + $0x8e8] sm:$0xff] }
0x229a   : > { %15159 = vmatprep.subr.bf16.mxu0 %v15158_v19  ;;  %v15174_v36 = vpack.c.bf16 %v10895_v21, %v10894_v56  ;;  %v6362_v56 = vsel %vm628_vm2, %v5068_v26, %v6319_v52  ;;  %v10980_v7 = vld [vmem:[%s19965_s2 + $0x8e0] sm:$0xff]  ;;  %v11011_v26 = vld [vmem:[%s19965_s2 + $0x9b8] sm:$0xff] }
0x229b   : > { %13404 = vmatprep.mubr.msk.f32.mxu0 %vm736_vm4, %v6211_v46  ;;  %v11031_v46 = vld [vmem:[%s19965_s2 + $0xa48] sm:$0xff]  ;;  %v11008_v52 = vld [vmem:[%s19965_s2 + $0x9a0] sm:$0xff] }
0x229c   : > { %13405 = vmatmul.mubr.msk.f32.gmra.mrb[72].mxu0 %vm736_vm4, %v6212_v50  ;;  %v15330_v50 = vpack.c.bf16 %v11031_v46, %v11030_v12  ;;  %v10982_v12 = vld [vmem:[%s19965_s2 + $0x8f0] sm:$0xff]  ;;  %v10983_v46 = vld [vmem:[%s19965_s2 + $0x8f8] sm:$0xff] }
0x229d   : > { %15161 = vmatpush3.bf16.msra.mxu0 %v15158_v19  ;;  %v6325_v16 = vpop.permute.xlu1 %6324 }
0x229e   : > { %15163 = vmatprep.subr.bf16.mxu0 %v15162_v45 }
0x22a1   : > { %15165 = vmatpush3.bf16.msra.mxu0 %v15162_v45  ;;  %v6323_v45 = vpop.permute.xlu0 %6322 }
0x22a2   : > { %15167 = vmatprep.subr.bf16.mxu0 %v15166_v27 }
0x22a5   : > { %15169 = vmatpush3.bf16.msra.mxu0 %v15166_v27  ;;  %v16272_v27 = vld [vmem:[%s19972_s9 + $0x8] sm:$0xff] }
0x22a6   : > { %15171 = vmatprep.subr.bf16.mxu0 %v15170_v55  ;;  %v5069_v35 = vadd.f32 %v16272_v27, %v17841_v13  ;;  %v15294_v27 = vpack.c.bf16 %v11011_v26, %v11010_v53  ;;  %v11108_v26 = vld [vmem:[%s19965_s2 + $0xc90] sm:$0xff] }
0x22a9   : > { %15173 = vmatpush3.bf16.msra.mxu0 %v15170_v55  ;;  %v10971_v55 = vld [vmem:[%s19965_s2 + $0x898] sm:$0xff] }
0x22aa   : > { %15175 = vmatprep.subr.bf16.mxu0 %v15174_v36 }
0x22ad   : > { %15177 = vmatpush3.bf16.msra.mxu0 %v15174_v36  ;;  %v6363_v36 = vsel %vm628_vm2, %v5069_v35, %v6321_v39  ;;  %v11006_v39 = vld [vmem:[%s19965_s2 + $0x990] sm:$0xff]  ;;  %v11012_v35 = vld [vmem:[%s19965_s2 + $0x9c0] sm:$0xff] }
0x22ae   : > { %15179 = vmatprep.subr.bf16.mxu0 %v15178_v43 }
0x22b1   : > { %15181 = vmatpush3.bf16.msra.mxu0 %v15178_v43  ;;  %v15222_v43 = vpack.c.bf16 %v10971_v55, %v10970_v44  ;;  %v11014_v55 = vld [vmem:[%s19965_s2 + $0x9d0] sm:$0xff] }
0x22b2   : > { %15183 = vmatprep.subr.bf16.mxu0 %v15182_v49 }
0x22b5   : > { %15185 = vmatpush3.bf16.msra.mxu0 %v15182_v49  ;;  %v10973_v49 = vld [vmem:[%s19965_s2 + $0x8a8] sm:$0xff] }
0x22b6   : > { %15219 = vmatprep.subr.bf16.mxu0 %v18464_v29 }
0x22df   : > { %v6337_v19 = vpop.permute.xlu1 %6336 }
0x22e0   : > { %v6367_v31 = vsel %vm2194_vm5, %v6363_v36, %v6337_v19  ;;  %v11016_v36 = vld [vmem:[%s19965_s2 + $0x9e0] sm:$0xff] }
0x22e3   : > { %v6335_v33 = vpop.permute.xlu1 %6334 }
0x22e4   : > { %v6366_v11 = vsel %vm2194_vm5, %v6362_v56, %v6335_v33  ;;  %v11009_v33 = vld [vmem:[%s19965_s2 + $0x9a8] sm:$0xff]  ;;  %v11015_v56 = vld [vmem:[%s19965_s2 + $0x9d8] sm:$0xff] }
0x236b   : > { %v13403_v1 = vpop.f32.mrb[70].mxu0 }
0x236c   : > { %v6311_v40 = vadd.f32 %v13403_v1, %v18102_v14  ;;  %v6291_v23 = vpop.f32.mrb[71].mxu0  ;;  %v16273_v1 = vld [vmem:[%s19972_s9 + $0x10] sm:$0xff] }
0x236d   : > { %v6310_v42 = vadd.f32 %v18051_v54, %v6291_v23  ;;  %v15226_v23 = vpack.c.bf16 %v10973_v49, %v10972_v32  ;;  %v11090_v49 = vld [vmem:[%s19965_s2 + $0xc00] sm:$0xff] }
0x236e   : > { %6352 = vrot.lane.b32.xlu1 %v6311_v40, %s19993_s25  ;;  %v5070_v40 = vadd.f32 %v16273_v1, %v17847_v34  ;;  %v11092_v1 = vld [vmem:[%s19965_s2 + $0xc10] sm:$0xff] }
0x236f   : > { %6350 = vrot.lane.b32.xlu0 %v6310_v42, %s19993_s25  ;;  %v13406_v18 = vpop.f32.mrb[72].mxu0  ;;  %v16274_v42 = vld [vmem:[%s19972_s9 + $0x18] sm:$0xff] }
0x2370   : > { %v6301_v62 = vpop.f32.mrb[73].mxu0  ;;  %v6313_v14 = vadd.f32 %v13406_v18, %v18122_v57  ;;  %v5071_v18 = vadd.f32 %v16274_v42, %v17845_v24  ;;  %v11094_v42 = vld [vmem:[%s19965_s2 + $0xc20] sm:$0xff] }
0x2371   : > { %v6312_v54 = vadd.f32 %v18107_v25, %v6301_v62  ;;  %v11025_v25 = vld [vmem:[%s19965_s2 + $0xa18] sm:$0xff]  ;;  %v6364_v62 = vsel %vm628_vm2, %v5070_v40, %v6323_v45  ;;  %v15290_v45 = vpack.c.bf16 %v11009_v33, %v11008_v52 }
0x2372   : > { %6340 = vrot.lane.b32.xlu1 %v5899_v61, %s19991_s14  ;;  %v15318_v57 = vpack.c.bf16 %v11025_v25, %v11024_v63  ;;  %v10974_v61 = vld [vmem:[%s19965_s2 + $0x8b0] sm:$0xff]  ;;  %v6365_v34 = vsel %vm628_vm2, %v5071_v18, %v6325_v16  ;;  %v10976_v63 = vld [vmem:[%s19965_s2 + $0x8c0] sm:$0xff]  ;;  %v10977_v25 = vld [vmem:[%s19965_s2 + $0x8c8] sm:$0xff] }
0x2373   : > { %6338 = vrot.lane.b32.xlu0 %v5898_v10, %s19991_s14  ;;  %v11007_v16 = vld [vmem:[%s19965_s2 + $0x998] sm:$0xff]  ;;  %v11095_v18 = vld [vmem:[%s19965_s2 + $0xc28] sm:$0xff] }
0x2374   : > { %15319 = vmatprep.subr.bf16.mxu1 %v15318_v57  ;;  %v15286_v19 = vpack.c.bf16 %v11007_v16, %v11006_v39  ;;  %v11093_v40 = vld [vmem:[%s19965_s2 + $0xc18] sm:$0xff]  ;;  %v10949_v39 = vld [vmem:[%s19968_s5 + $0x2] ss:$0 sm:$0xff] }
0x2375   : > { %15321 = vmatpush3.bf16.msra.mxu1 %v15318_v57  ;;  %v15234_v57 = vpack.c.bf16 %v10977_v25, %v10976_v63  ;;  %v11102_v63 = vld [vmem:[%s19965_s2 + $0xc60] sm:$0xff]  ;;  %v11103_v25 = vld [vmem:[%s19965_s2 + $0xc68] sm:$0xff] }
0x2376   : > { %6356 = vrot.lane.b32.xlu1 %v6313_v14, %s19993_s25  ;;  %15323 = vmatprep.subr.bf16.mxu1 %v15322_v37 }
0x2377   : > { %6354 = vrot.lane.b32.xlu0 %v6312_v54, %s19993_s25 }
0x2379   : > { %15325 = vmatpush3.bf16.msra.mxu1 %v15322_v37  ;;  %v15238_v37 = vpack.c.bf16 %v10979_v47, %v10978_v3  ;;  %v11034_v3 = vld [vmem:[%s19965_s2 + $0xa60] sm:$0xff]  ;;  %v11035_v47 = vld [vmem:[%s19965_s2 + $0xa68] sm:$0xff] }
0x237a   : > { %15327 = vmatprep.subr.bf16.mxu1 %v15326_v8 }
0x237d   : > { %15329 = vmatpush3.bf16.msra.mxu1 %v15326_v8  ;;  %v15242_v8 = vpack.c.bf16 %v10981_v0, %v10980_v7  ;;  %v11104_v7 = vld [vmem:[%s19965_s2 + $0xc70] sm:$0xff]  ;;  %v11105_v0 = vld [vmem:[%s19965_s2 + $0xc78] sm:$0xff] }
0x237e   : > { %15331 = vmatprep.subr.bf16.mxu1 %v15330_v50 }
0x2381   : > { %15333 = vmatpush3.bf16.msra.mxu1 %v15330_v50  ;;  %v15246_v50 = vpack.c.bf16 %v10983_v46, %v10982_v12  ;;  %v11036_v12 = vld [vmem:[%s19965_s2 + $0xa70] sm:$0xff]  ;;  %v11037_v46 = vld [vmem:[%s19965_s2 + $0xa78] sm:$0xff] }
0x2382   : > { %15335 = vmatprep.subr.bf16.mxu1 %v15334_v58 }
0x2385   : > { %15337 = vmatpush3.bf16.msra.mxu1 %v15334_v58  ;;  %v15282_v58 = vpack.c.bf16 %v11005_v60, %v11004_v48  ;;  %v11106_v48 = vld [vmem:[%s19965_s2 + $0xc80] sm:$0xff]  ;;  %v11107_v60 = vld [vmem:[%s19965_s2 + $0xc88] sm:$0xff] }
0x23e0   : > { %v6353_v21 = vpop.permute.xlu1 %6352 }
0x23e1   : > { %v6351_v5 = vpop.permute.xlu0 %6350  ;;  %v18539_v28 = vsel %vm2199_vm6, %v6367_v31, %v6353_v21  ;;  %v15302_v21 = vpack.c.bf16 %v11015_v56, %v11014_v55  ;;  %v11018_v31 = vld [vmem:[%s19965_s2 + $0x9f0] sm:$0xff]  ;;  %v11110_v56 = vld [vmem:[%s19965_s2 + $0xca0] sm:$0xff] }
0x23e2   : > { %v18536_v13 = vsel %vm2199_vm6, %v6366_v11, %v6351_v5  ;;  %v11017_v11 = vld [vmem:[%s19965_s2 + $0x9e8] sm:$0xff] }
0x23e3   : > { %13439 = vmatprep.mubr.f32.mxu0 %v18536_v13  ;;  %v15306_v5 = vpack.c.bf16 %v11017_v11, %v11016_v36 }
0x23e4   : > { %v6341_v4 = vpop.permute.xlu1 %6340  ;;  %13440 = vmatmul.mubr.f32.vlgmr.msra.gmra.mrb[74].mxu0 %v18539_v28 }
0x23e5   : > { %15221 = vmatpush3.bf16.msra.mxu0 %v18464_v29  ;;  %v6339_v2 = vpop.permute.xlu0 %6338  ;;  %v10975_v29 = vld [vmem:[%s19965_s2 + $0x8b8] sm:$0xff]  ;;  %v6369_v15 = vsel %vm2194_vm5, %v6365_v34, %v6341_v4  ;;  %v11091_v4 = vld [vmem:[%s19965_s2 + $0xc08] sm:$0xff]  ;;  %v11098_v34 = vld [vmem:[%s19965_s2 + $0xc40] sm:$0xff] }
0x23e6   : > { %15223 = vmatprep.subr.bf16.mxu0 %v15222_v43  ;;  %v6368_v14 = vsel %vm2194_vm5, %v6364_v62, %v6339_v2  ;;  %v15230_v30 = vpack.c.bf16 %v10975_v29, %v10974_v61  ;;  %v15346_v2 = vpack.c.bf16 %v11091_v4, %v11090_v49  ;;  %v15354_v61 = vpack.c.bf16 %v11095_v18, %v11094_v42  ;;  %v11096_v29 = vld [vmem:[%s19965_s2 + $0xc30] sm:$0xff]  ;;  %v11097_v62 = vld [vmem:[%s19965_s2 + $0xc38] sm:$0xff]  ;;  %v11118_v42 = vld [vmem:[%s19965_s2 + $0xce0] sm:$0xff] }
0x23e7   : > { %v11119_v18 = vld [vmem:[%s19965_s2 + $0xce8] sm:$0xff] }
0x23e8   : > { %v6357_v10 = vpop.permute.xlu1 %6356 }
0x23e9   : > { %15225 = vmatpush3.bf16.msra.mxu0 %v15222_v43  ;;  %v6355_v54 = vpop.permute.xlu0 %6354  ;;  %v18573_v59 = vsel %vm2199_vm6, %v6369_v15, %v6357_v10  ;;  %v11019_v43 = vld [vmem:[%s19965_s2 + $0x9f8] sm:$0xff]  ;;  %v15358_v10 = vpack.c.bf16 %v11097_v62, %v11096_v29  ;;  %v11120_v29 = vld [vmem:[%s19965_s2 + $0xcf0] sm:$0xff] }
0x23ea   : > { %v18569_v24 = vsel %vm2199_vm6, %v6368_v14, %v6355_v54  ;;  %15227 = vmatprep.subr.bf16.mxu0 %v15226_v23  ;;  %v15310_v32 = vpack.c.bf16 %v11019_v43, %v11018_v31  ;;  %v11100_v54 = vld [vmem:[%s19965_s2 + $0xc50] sm:$0xff]  ;;  %v11101_v15 = vld [vmem:[%s19965_s2 + $0xc58] sm:$0xff] }
0x23eb   : > { %13442 = vmatprep.mubr.f32.mxu0 %v18569_v24  ;;  %v11112_v43 = vld [vmem:[%s19965_s2 + $0xcb0] sm:$0xff]  ;;  %v11121_v62 = vld [vmem:[%s19965_s2 + $0xcf8] sm:$0xff] }
0x23ec   : > { %13443 = vmatmul.mubr.f32.gmra.mrb[76].mxu0 %v18573_v59 }
0x23ed   : > { %15229 = vmatpush3.bf16.msra.mxu0 %v15226_v23  ;;  %13512 = vmatprep.mubr.f32.mxu0 %v17697_v51  ;;  %v15350_v23 = vpack.c.bf16 %v11093_v40, %v11092_v1  ;;  %v18757_v1 = vadd.f32 %v18302_v41, %v18307_v6  ;;  %v11114_v40 = vld [vmem:[%s19965_s2 + $0xcc0] sm:$0xff]  ;;  %v11116_v6 = vld [vmem:[%s19965_s2 + $0xcd0] sm:$0xff] }
0x23ee   : > { %15231 = vmatprep.subr.bf16.mxu0 %v15230_v30 }
0x23f1   : > { %15233 = vmatpush3.bf16.msra.mxu0 %v15230_v30  ;;  %v15366_v30 = vpack.c.bf16 %v11101_v15, %v11100_v54  ;;  %v18806_v15 = vld [vmem:[%s19966_s3 + $0x1f] ss:$0 sm:$0xff] }
0x23f2   : > { %15235 = vmatprep.subr.bf16.mxu0 %v15234_v57 }
0x23f5   : > { %15237 = vmatpush3.bf16.msra.mxu0 %v15234_v57  ;;  %v15370_v57 = vpack.c.bf16 %v11103_v25, %v11102_v63 }
0x23f6   : > { %15239 = vmatprep.subr.bf16.mxu0 %v15238_v37 }
0x23f9   : > { %15241 = vmatpush3.bf16.msra.mxu0 %v15238_v37  ;;  %v15338_v37 = vpack.c.bf16 %v11035_v47, %v11034_v3  ;;  %v11176_v3 = vld [vmem:[%s19966_s3 + $0x24] ss:$0 sm:$0xff] }
0x23fa   : > { %15243 = vmatprep.subr.bf16.mxu0 %v15242_v8 }
0x23fb   : > { %15339 = vmatprep.subr.bf16.mxu1 %v15338_v37 }
0x23fc   : > { %15341 = vmatpush3.bf16.msra.mxu1 %v15338_v37 }
0x23fd   : > { %15245 = vmatpush3.bf16.msra.mxu0 %v15242_v8  ;;  %v15374_v8 = vpack.c.bf16 %v11105_v0, %v11104_v7 }
0x23fe   : > { %15247 = vmatprep.subr.bf16.mxu0 %v15246_v50 }
0x2401   : > { %15249 = vmatpush3.bf16.msra.mxu0 %v15246_v50  ;;  %v15342_v50 = vpack.c.bf16 %v11037_v46, %v11036_v12 }
0x2402   : > { %15283 = vmatprep.subr.bf16.mxu0 %v15282_v58 }
0x2403   : > { %15343 = vmatprep.subr.bf16.mxu1 %v15342_v50 }
0x2404   : > { %13513 = vmatmul.mubr.f32.vlgmr.msra.gmra.mrb[78].mxu0 %v17699_v20  ;;  %15345 = vmatpush3.bf16.msra.mxu1 %v15342_v50 }
0x2405   : > { %15285 = vmatpush3.bf16.msra.mxu0 %v15282_v58  ;;  %13582 = vmatprep.mubr.f32.mxu0 %v17697_v51  ;;  %v11013_v51 = vld [vmem:[%s19965_s2 + $0x9c8] sm:$0xff]  ;;  %v15430_v58 = vpack.c.bf16 %v11107_v60, %v11106_v48 }
0x2406   : > { %15287 = vmatprep.subr.bf16.mxu0 %v15286_v19  ;;  %v15298_v44 = vpack.c.bf16 %v11013_v51, %v11012_v35 }
0x2409   : > { %15289 = vmatpush3.bf16.msra.mxu0 %v15286_v19 }
0x240a   : > { %15291 = vmatprep.subr.bf16.mxu0 %v15290_v45 }
0x240d   : > { %15293 = vmatpush3.bf16.msra.mxu0 %v15290_v45 }
0x240e   : > { %15295 = vmatprep.subr.bf16.mxu0 %v15294_v27 }
0x2411   : > { %15297 = vmatpush3.bf16.msra.mxu0 %v15294_v27  ;;  %v11109_v27 = vld [vmem:[%s19965_s2 + $0xc98] sm:$0xff] }
0x2412   : > { %15299 = vmatprep.subr.bf16.mxu0 %v15298_v44 }
0x2415   : > { %15301 = vmatpush3.bf16.msra.mxu0 %v15298_v44  ;;  %v15434_v44 = vpack.c.bf16 %v11109_v27, %v11108_v26 }
0x2416   : > { %15303 = vmatprep.subr.bf16.mxu0 %v15302_v21 }
0x2419   : > { %15305 = vmatpush3.bf16.msra.mxu0 %v15302_v21  ;;  %v11111_v21 = vld [vmem:[%s19965_s2 + $0xca8] sm:$0xff] }
0x241a   : > { %15307 = vmatprep.subr.bf16.mxu0 %v15306_v5 }
0x241d   : > { %15309 = vmatpush3.bf16.msra.mxu0 %v15306_v5  ;;  %v15438_v5 = vpack.c.bf16 %v11111_v21, %v11110_v56 }
0x241e   : > { %15311 = vmatprep.subr.bf16.mxu0 %v15310_v32 }
0x2421   : > { %15313 = vmatpush3.bf16.msra.mxu0 %v15310_v32  ;;  %v11113_v32 = vld [vmem:[%s19965_s2 + $0xcb8] sm:$0xff] }
0x2422   : > { %15347 = vmatprep.subr.bf16.mxu0 %v15346_v2 }
0x2424   : > { %13583 = vmatmul.mubr.f32.vlgmr.msra.gmra.mrb[80].mxu0 %v17699_v20  ;;  %v11099_v20 = vld [vmem:[%s19965_s2 + $0xc48] sm:$0xff] }
0x2425   : > { %15349 = vmatpush3.bf16.msra.mxu0 %v15346_v2  ;;  %v15362_v14 = vpack.c.bf16 %v11099_v20, %v11098_v34  ;;  %v15442_v2 = vpack.c.bf16 %v11113_v32, %v11112_v43  ;;  %v15458_v34 = vpack.c.bf16 %v11121_v62, %v11120_v29 }
0x2426   : > { %15351 = vmatprep.subr.bf16.mxu0 %v15350_v23 }
0x2429   : > { %15353 = vmatpush3.bf16.msra.mxu0 %v15350_v23 }
0x242a   : > { %15355 = vmatprep.subr.bf16.mxu0 %v15354_v61 }
0x242d   : > { %15357 = vmatpush3.bf16.msra.mxu0 %v15354_v61  ;;  %v15454_v61 = vpack.c.bf16 %v11119_v18, %v11118_v42 }
0x242e   : > { %15359 = vmatprep.subr.bf16.mxu0 %v15358_v10 }
0x2431   : > { %15361 = vmatpush3.bf16.msra.mxu0 %v15358_v10  ;;  %v18793_v10 = vld [vmem:[%s19966_s3 + $0x1d] ss:$0 sm:$0xff] }
0x2432   : > { %15363 = vmatprep.subr.bf16.mxu0 %v15362_v14 }
0x2435   : > { %15365 = vmatpush3.bf16.msra.mxu0 %v15362_v14 }
0x2436   : > { %15367 = vmatprep.subr.bf16.mxu0 %v15366_v30 }
0x2439   : > { %15369 = vmatpush3.bf16.msra.mxu0 %v15366_v30 }
0x243a   : > { %15371 = vmatprep.subr.bf16.mxu0 %v15370_v57 }
0x243d   : > { %15373 = vmatpush3.bf16.msra.mxu0 %v15370_v57  ;;  %v11175_v57 = vld [vmem:[%s19966_s3 + $0x20] ss:$0 sm:$0xff] }
0x243e   : > { %15375 = vmatprep.subr.bf16.mxu0 %v15374_v8 }
0x2441   : > { %15377 = vmatpush3.bf16.msra.mxu0 %v15374_v8 }
0x2442   : > { %15431 = vmatprep.subr.bf16.mxu0 %v15430_v58 }
0x24b7   : > { %v13441_v16 = vpop.f32.mrb[74].mxu0 }
0x24b8   : > { %v6452_v19 = vadd.f32 %v13441_v16, %v10949_v39  ;;  %v6446_v52 = vpop.f32.mrb[75].mxu0 }
0x24b9   : > { %v6447_v33 = vadd.f32 %v10949_v39, %v6446_v52 }
0x24ba   : > { %v6466_v45 = vmax.f32 %v6452_v19, 0.0 }
0x24bb   : > { %v6465_v53 = vmax.f32 %v6447_v33, 0.0 }
0x24bc   : > { %v18731_v51 = vadd.f32 %v6466_v45, %v18539_v28 }
0x24bd   : > { %v18728_v35 = vadd.f32 %v6465_v53, %v18536_v13 }
0x24bf   : > { %v13444_v55 = vpop.f32.mrb[76].mxu0  ;;  %13617 = vmatprep.mubr.f32.mxu1 %v18728_v35  ;;  %13655 = vmatprep.mubr.f32.mxu0 %v18728_v35 }
0x24c0   : > { %v6462_v36 = vadd.f32 %v13444_v55, %v10949_v39  ;;  %v6456_v13 = vpop.f32.mrb[77].mxu0  ;;  %13618 = vmatmul.mubr.f32.vlgmr.msra.gmra.mrb[88].mxu1 %v18731_v51  ;;  %13656 = vmatmul.mubr.f32.vlgmr.msra.gmra.mrb[82].mxu0 %v18731_v51 }
0x24c1   : > { %v6457_v28 = vadd.f32 %v10949_v39, %v6456_v13  ;;  %15433 = vmatpush3.bf16.msra.mxu0 %v15430_v58 }
0x24c2   : > { %v6468_v11 = vmax.f32 %v6462_v36, 0.0  ;;  %15435 = vmatprep.subr.bf16.mxu0 %v15434_v44 }
0x24c3   : > { %v6467_v31 = vmax.f32 %v6457_v28, 0.0 }
0x24c4   : > { %v18753_v4 = vadd.f32 %v6468_v11, %v18573_v59  ;;  %v11117_v59 = vld [vmem:[%s19965_s2 + $0xcd8] sm:$0xff] }
0x24c5   : > { %v18750_v49 = vadd.f32 %v6467_v31, %v18569_v24  ;;  %15437 = vmatpush3.bf16.msra.mxu0 %v15434_v44  ;;  %v11115_v24 = vld [vmem:[%s19965_s2 + $0xcc8] sm:$0xff]  ;;  %v15450_v23 = vpack.c.bf16 %v11117_v59, %v11116_v6  ;;  %v11186_v44 = vld [vmem:[%s19966_s3 + $0x25] ss:$0 sm:$0xff] }
0x24c6   : > { %15439 = vmatprep.subr.bf16.mxu0 %v15438_v5  ;;  %v15446_v41 = vpack.c.bf16 %v11115_v24, %v11114_v40 }
0x24c7   : > { %13620 = vmatprep.mubr.f32.mxu1 %v18750_v49  ;;  %13658 = vmatprep.mubr.f32.mxu0 %v18750_v49 }
0x24c8   : > { %13621 = vmatmul.mubr.f32.gmra.mrb[90].mxu1 %v18753_v4  ;;  %13659 = vmatmul.mubr.f32.gmra.mrb[84].mxu0 %v18753_v4 }
0x24c9   : > { %15441 = vmatpush3.bf16.msra.mxu0 %v15438_v5  ;;  %13669 = vmatprep.mubr.msk.f32.mxu1 %vm628_vm2, %v18757_v1 }
0x24ca   : > { %13753 = vmatprep.mubr.f32.mxu0 %v18728_v35  ;;  %15443 = vmatprep.subr.bf16.mxu0 %v15442_v2 }
0x24cd   : > { %15445 = vmatpush3.bf16.msra.mxu0 %v15442_v2 }
0x24ce   : > { %15447 = vmatprep.subr.bf16.mxu0 %v15446_v41 }
0x24d1   : > { %15449 = vmatpush3.bf16.msra.mxu0 %v15446_v41 }
0x24d2   : > { %15451 = vmatprep.subr.bf16.mxu0 %v15450_v23 }
0x24d5   : > { %15453 = vmatpush3.bf16.msra.mxu0 %v15450_v23 }
0x24d6   : > { %15455 = vmatprep.subr.bf16.mxu0 %v15454_v61 }
0x24d7   : > { %v13514_v20 = vpop.f32.mrb[78].mxu0 }
0x24d8   : > { %v18796_v14 = vadd.f32 %v13514_v20, %v18793_v10  ;;  %v18798_v54 = vpop.f32.mrb[79].mxu0 }
0x24d9   : > { %15457 = vmatpush3.bf16.msra.mxu0 %v15454_v61 }
0x24da   : > { %15459 = vmatprep.subr.bf16.mxu0 %v15458_v34 }
0x24dd   : > { %15461 = vmatpush3.bf16.msra.mxu0 %v15458_v34 }
0x24e0   : > { %13754 = vmatmul.mubr.f32.vlgmr.msra.gmra.mrb[86].mxu0 %v18731_v51 }
0x24e1   : > { %13756 = vmatprep.mubr.f32.mxu0 %v18750_v49 }
0x24e4   : > { %13757 = vmatmul.mubr.f32.gmra.mrb[88].mxu0 %v18753_v4 }
0x24f7   : > { %v13584_v30 = vpop.f32.mrb[80].mxu0 }
0x24f8   : > { %v18809_v63 = vadd.f32 %v13584_v30, %v18806_v15  ;;  %v18811_v25 = vpop.f32.mrb[81].mxu0 }
0x2593   : > { %v13619_v47 = vpop.f32.mrb[88].mxu1  ;;  %v13657_v37 = vpop.f32.mrb[82].mxu0 }
0x2594   : > { %v7122_v7 = vadd.f32 %v13619_v47, %v11175_v57  ;;  %v7213_v0 = vadd.f32 %v13657_v37, %v11176_v3  ;;  %v7116_v8 = vpop.f32.mrb[89].mxu1  ;;  %v7207_v12 = vpop.f32.mrb[83].mxu0 }
0x2595   : > { %v7117_v46 = vadd.f32 %v11175_v57, %v7116_v8  ;;  %v7208_v50 = vadd.f32 %v11176_v3, %v7207_v12  ;;  %v11040_v12 = vld [vmem:[%s19965_s2 + $0xa90] sm:$0xff] }
0x2597   : > { %v15378_v48 = vpack.c.bf16 %v7122_v7, %v7117_v46  ;;  %v15390_v60 = vpack.c.bf16 %v7213_v0, %v7208_v50  ;;  %v11041_v46 = vld [vmem:[%s19965_s2 + $0xa98] sm:$0xff] }
0x2599   : > { %15380 = vmatprep.subr.msk.bf16.mxu1 %vm16484_vm3, %v15378_v48 }
0x259a   : > { %15383 = vmatpush3.bf16.xpose.msk.msra.mxu1 %vm16484_vm3, %v15378_v48 }
0x259b   : > { %v13622_v58 = vpop.f32.mrb[90].mxu1  ;;  %v13660_v39 = vpop.f32.mrb[84].mxu0 }
0x259c   : > { %v7132_v16 = vadd.f32 %v13622_v58, %v11175_v57  ;;  %v7223_v19 = vadd.f32 %v13660_v39, %v11176_v3  ;;  %v7126_v52 = vpop.f32.mrb[91].mxu1  ;;  %v7217_v33 = vpop.f32.mrb[85].mxu0  ;;  %v11042_v58 = vld [vmem:[%s19965_s2 + $0xaa0] sm:$0xff]  ;;  %v11043_v39 = vld [vmem:[%s19965_s2 + $0xaa8] sm:$0xff] }
0x259d   : > { %v7127_v45 = vadd.f32 %v11175_v57, %v7126_v52  ;;  %v7218_v53 = vadd.f32 %v11176_v3, %v7217_v33  ;;  %v11038_v57 = vld [vmem:[%s19965_s2 + $0xa80] sm:$0xff]  ;;  %v11039_v3 = vld [vmem:[%s19965_s2 + $0xa88] sm:$0xff]  ;;  %v11045_v52 = vld [vmem:[%s19965_s2 + $0xab8] sm:$0xff] }
0x259e   : > { %v15398_v47 = vpack.c.bf16 %v11039_v3, %v11038_v57  ;;  %v11127_v57 = vld [vmem:[%s19965_s2 + $0xd28] sm:$0xff] }
0x259f   : > { %v15384_v26 = vpack.c.bf16 %v7132_v16, %v7127_v45  ;;  %v15394_v27 = vpack.c.bf16 %v7223_v19, %v7218_v53  ;;  %v15406_v16 = vpack.c.bf16 %v11043_v39, %v11042_v58  ;;  %v11044_v19 = vld [vmem:[%s19965_s2 + $0xab0] sm:$0xff]  ;;  %v11046_v45 = vld [vmem:[%s19965_s2 + $0xac0] sm:$0xff]  ;;  %v11047_v53 = vld [vmem:[%s19965_s2 + $0xac8] sm:$0xff] }
0x25a0   : > { %v15410_v33 = vpack.c.bf16 %v11045_v52, %v11044_v19  ;;  %v11135_v58 = vld [vmem:[%s19965_s2 + $0xd68] sm:$0xff]  ;;  %v11137_v19 = vld [vmem:[%s19965_s2 + $0xd78] sm:$0xff] }
0x25a1   : > { %15386 = vmatprep.subr.msk.bf16.mxu1 %vm16484_vm3, %v15384_v26 }
0x25a2   : > { %15389 = vmatpush3.bf16.xpose.msk.msra.mxu1 %vm16484_vm3, %v15384_v26  ;;  %v15414_v26 = vpack.c.bf16 %v11047_v53, %v11046_v45 }
0x25a3   : > { %15391 = vmatprep.subr.bf16.mxu1 %v15390_v60 }
0x25a9   : > { %13670 = vmatmul.mubr.msk.f32.vlgmr.msra.gmra.mrb[92].mxu1 %vm628_vm2, %v18305_v38 }
0x25aa   : > { %15393 = vmatpush3.bf16.msra.mxu1 %v15390_v60  ;;  %v15402_v60 = vpack.c.bf16 %v11041_v46, %v11040_v12  ;;  %v11132_v46 = vld [vmem:[%s19965_s2 + $0xd50] sm:$0xff] }
0x25ab   : > { %15395 = vmatprep.subr.bf16.mxu1 %v15394_v27 }
0x25ae   : > { %15397 = vmatpush3.bf16.msra.mxu1 %v15394_v27  ;;  %v11048_v27 = vld [vmem:[%s19965_s2 + $0xad0] sm:$0xff] }
0x25af   : > { %15399 = vmatprep.subr.bf16.mxu1 %v15398_v47 }
0x25b3   : > { %v13755_v55 = vpop.f32.mrb[86].mxu0 }
0x25b4   : > { %v7595_v56 = vadd.f32 %v13755_v55, %v11186_v44  ;;  %v7589_v21 = vpop.f32.mrb[87].mxu0 }
0x25b5   : > { %v7590_v36 = vadd.f32 %v11186_v44, %v7589_v21  ;;  %v11051_v21 = vld [vmem:[%s19965_s2 + $0xae8] sm:$0xff] }
0x25b7   : > { %v15474_v13 = vpack.c.bf16 %v7595_v56, %v7590_v36  ;;  %v13758_v28 = vpop.f32.mrb[88].mxu0  ;;  %v11050_v56 = vld [vmem:[%s19965_s2 + $0xae0] sm:$0xff] }
0x25b8   : > { %v7605_v11 = vadd.f32 %v13758_v28, %v11186_v44  ;;  %v7599_v5 = vpop.f32.mrb[89].mxu0  ;;  %v15422_v36 = vpack.c.bf16 %v11051_v21, %v11050_v56  ;;  %v11053_v28 = vld [vmem:[%s19965_s2 + $0xaf8] sm:$0xff] }
0x25b9   : > { %v7600_v31 = vadd.f32 %v11186_v44, %v7599_v5  ;;  %15475 = vmatprep.subr.bf16.mxu0 %v15474_v13  ;;  %v11049_v44 = vld [vmem:[%s19965_s2 + $0xad8] sm:$0xff]  ;;  %v18891_v5 = vadd.f32 %v18793_v10, %v18798_v54 }
0x25ba   : > { %15477 = vmatpush3.bf16.msra.mxu0 %v15474_v13  ;;  %v15418_v55 = vpack.c.bf16 %v11049_v44, %v11048_v27  ;;  %v11052_v13 = vld [vmem:[%s19965_s2 + $0xaf0] sm:$0xff] }
0x25bb   : > { %v15478_v43 = vpack.c.bf16 %v7605_v11, %v7600_v31  ;;  %v15426_v11 = vpack.c.bf16 %v11053_v28, %v11052_v13 }
0x25bd   : > { %15479 = vmatprep.subr.bf16.mxu0 %v15478_v43 }
0x25be   : > { %15481 = vmatpush3.bf16.msra.mxu0 %v15478_v43 }
0x267c   : > { %v13671_v32 = vpop.f32.mrb[92].mxu1 }
0x267d   : > { %v7320_v2 = vmul.f32 0.088388346, %v13671_v32  ;;  %v7310_v40 = vpop.f32.mrb[93].mxu1  ;;  %v11185_v32 = vld [vmem:[%s19966_s3 + $0x21] ss:$0 sm:$0xff] }
0x267e   : > { %v7319_v24 = vmul.f32 0.088388346, %v7310_v40 }
0x267f   : > { %v7324_v41 = vsel %vm628_vm2, %v7320_v2, -inf }
0x2680   : > { %7325 = vmax.xlane.f32.xlu1 %v7324_v41  ;;  %v7321_v6 = vsel %vm628_vm2, %v7319_v24, -inf }
0x2681   : > { %7322 = vmax.xlane.f32.xlu0 %v7321_v6 }
0x270d   : > { %v7326_v59 = vpop.xlane.xlu1 %7325 }
0x270e   : > { %v7328_v23 = vsub.f32 %v7320_v2, %v7326_v59  ;;  %v7323_v42 = vpop.xlane.xlu0 %7322 }
0x270f   : > { %v7327_v18 = vsub.f32 %v7319_v24, %v7323_v42 }
0x2710   : > { %v7331_v61 = vmul.f32 1.442695, %v7328_v23 }
0x2711   : > { %v7329_v29 = vmul.f32 1.442695, %v7327_v18  ;;  %v11122_v18 = vld [vmem:[%s19965_s2 + $0xd00] sm:$0xff] }
0x2713   : > { %16219 = vpow2.f32 %v7329_v29 }
0x2714   : > { %16221 = vpow2.f32 %v7331_v61  ;;  %v11123_v61 = vld [vmem:[%s19965_s2 + $0xd08] sm:$0xff] }
0x2715   : > { %v15514_v29 = vpack.c.bf16 %v11123_v61, %v11122_v18 }
0x271d   : > { %v16220_v62 = vpop.eup %16219 }
0x271e   : > { %v7333_v34 = vsel %vm628_vm2, %v16220_v62, 0.0  ;;  %v16222_v20 = vpop.eup %16221 }
0x271f   : > { %7334 = vadd.xlane.f32.xlu0 %v7333_v34  ;;  %v7336_v30 = vsel %vm628_vm2, %v16222_v20, 0.0  ;;  %v11125_v34 = vld [vmem:[%s19965_s2 + $0xd18] sm:$0xff] }
0x2723   : > { %7337 = vadd.xlane.f32.xlu0 %v7336_v30  ;;  %v11126_v30 = vld [vmem:[%s19965_s2 + $0xd20] sm:$0xff] }
0x2724   : > { %v15522_v3 = vpack.c.bf16 %v11127_v57, %v11126_v30 }
0x27ac   : > { %v7335_v37 = vpop.xlane.xlu0 %7334 }
0x27ad   : > { %16223 = vrcp.f32 %v7335_v37  ;;  %v11129_v37 = vld [vmem:[%s19965_s2 + $0xd38] sm:$0xff] }
0x27b0   : > { %v7338_v7 = vpop.xlane.xlu0 %7337 }
0x27b1   : > { %16225 = vrcp.f32 %v7338_v7 }
0x27b7   : > { %v16224_v0 = vpop.eup %16223 }
0x27b8   : > { %v7341_v8 = vmul.f32 %v16224_v0, %v16220_v62  ;;  %v11124_v62 = vld [vmem:[%s19965_s2 + $0xd10] sm:$0xff]  ;;  %v11130_v0 = vld [vmem:[%s19965_s2 + $0xd40] sm:$0xff] }
0x27ba   : > { %13680 = vmatprep.mubr.msk.f32.mxu1 %vm628_vm2, %v7341_v8  ;;  %v11131_v8 = vld [vmem:[%s19965_s2 + $0xd48] sm:$0xff] }
0x27bb   : > { %v16226_v50 = vpop.eup %16225  ;;  %v15530_v12 = vpack.c.bf16 %v11131_v8, %v11130_v0 }
0x27bc   : > { %v7342_v48 = vmul.f32 %v16226_v50, %v16222_v20  ;;  %v15518_v20 = vpack.c.bf16 %v11125_v34, %v11124_v62  ;;  %v11133_v50 = vld [vmem:[%s19965_s2 + $0xd58] sm:$0xff]  ;;  %v11054_v62 = vld [vmem:[%s19965_s2 + $0xb00] sm:$0xff]  ;;  %v11055_v34 = vld [vmem:[%s19965_s2 + $0xb08] sm:$0xff] }
0x27be   : > { %13681 = vmatmul.mubr.msk.f32.vlgmr.msra.gmra.mrb[94].mxu1 %vm628_vm2, %v7342_v48  ;;  %v15534_v48 = vpack.c.bf16 %v11133_v50, %v11132_v46  ;;  %v11058_v46 = vld [vmem:[%s19965_s2 + $0xb20] sm:$0xff]  ;;  %v11059_v50 = vld [vmem:[%s19965_s2 + $0xb28] sm:$0xff] }
0x27bf   : > { %15401 = vmatpush3.bf16.msra.mxu1 %v15398_v47  ;;  %13715 = vmatprep.mubr.f32.mxu1 %v18728_v35  ;;  %v11128_v47 = vld [vmem:[%s19965_s2 + $0xd30] sm:$0xff] }
0x27c0   : > { %15403 = vmatprep.subr.bf16.mxu1 %v15402_v60  ;;  %v15526_v7 = vpack.c.bf16 %v11129_v37, %v11128_v47  ;;  %v11056_v47 = vld [vmem:[%s19965_s2 + $0xb10] sm:$0xff]  ;;  %v11057_v37 = vld [vmem:[%s19965_s2 + $0xb18] sm:$0xff] }
0x27c3   : > { %15405 = vmatpush3.bf16.msra.mxu1 %v15402_v60  ;;  %v11134_v60 = vld [vmem:[%s19965_s2 + $0xd60] sm:$0xff] }
0x27c4   : > { %15407 = vmatprep.subr.bf16.mxu1 %v15406_v16  ;;  %v15538_v39 = vpack.c.bf16 %v11135_v58, %v11134_v60  ;;  %v11060_v60 = vld [vmem:[%s19965_s2 + $0xb30] sm:$0xff]  ;;  %v11061_v58 = vld [vmem:[%s19965_s2 + $0xb38] sm:$0xff] }
0x27c7   : > { %15409 = vmatpush3.bf16.msra.mxu1 %v15406_v16  ;;  %v11136_v16 = vld [vmem:[%s19965_s2 + $0xd70] sm:$0xff] }
0x27c8   : > { %15411 = vmatprep.subr.bf16.mxu1 %v15410_v33  ;;  %v15542_v52 = vpack.c.bf16 %v11137_v19, %v11136_v16  ;;  %v11062_v16 = vld [vmem:[%s19965_s2 + $0xb40] sm:$0xff]  ;;  %v11063_v19 = vld [vmem:[%s19965_s2 + $0xb48] sm:$0xff] }
0x27cb   : > { %15413 = vmatpush3.bf16.msra.mxu1 %v15410_v33 }
0x27cc   : > { %15415 = vmatprep.subr.bf16.mxu1 %v15414_v26 }
0x27cf   : > { %15417 = vmatpush3.bf16.msra.mxu1 %v15414_v26 }
0x27d0   : > { %15419 = vmatprep.subr.bf16.mxu1 %v15418_v55 }
0x27d3   : > { %15421 = vmatpush3.bf16.msra.mxu1 %v15418_v55  ;;  %v11196_v55 = vld [vmem:[%s19966_s3 + $0x26] ss:$0 sm:$0xff] }
0x27d4   : > { %15423 = vmatprep.subr.bf16.mxu1 %v15422_v36 }
0x27d7   : > { %15425 = vmatpush3.bf16.msra.mxu1 %v15422_v36 }
0x27d8   : > { %15427 = vmatprep.subr.bf16.mxu1 %v15426_v11 }
0x27db   : > { %15429 = vmatpush3.bf16.msra.mxu1 %v15426_v11 }
0x27de   : > { %13716 = vmatmul.mubr.f32.vlgmr.msra.gmra.mrb[96].mxu1 %v18731_v51 }
0x27df   : > { %13718 = vmatprep.mubr.f32.mxu1 %v18750_v49 }
0x27e2   : > { %13719 = vmatmul.mubr.f32.gmra.mrb[98].mxu1 %v18753_v4 }
0x27e3   : > { %13767 = vmatprep.mubr.msk.f32.mxu1 %vm628_vm2, %v18891_v5 }
0x2891   : > { %v18896_v31 = vpop.f32.mrb[94].mxu1 }
0x2892   : > { %v18898_v43 = vpop.f32.mrb[95].mxu1 }
0x28b1   : > { %v13717_v2 = vpop.f32.mrb[96].mxu1 }
0x28b2   : > { %v7504_v40 = vadd.f32 %v13717_v2, %v11185_v32  ;;  %v7498_v24 = vpop.f32.mrb[97].mxu1 }
0x28b3   : > { %v7499_v41 = vadd.f32 %v11185_v32, %v7498_v24 }
0x28b5   : > { %v15462_v6 = vpack.c.bf16 %v7504_v40, %v7499_v41  ;;  %v13720_v10 = vpop.f32.mrb[98].mxu1 }
0x28b6   : > { %v7514_v54 = vadd.f32 %v13720_v10, %v11185_v32  ;;  %v7508_v59 = vpop.f32.mrb[99].mxu1 }
0x28b7   : > { %v7509_v23 = vadd.f32 %v11185_v32, %v7508_v59  ;;  %15464 = vmatprep.subr.msk.bf16.mxu1 %vm16484_vm3, %v15462_v6 }
0x28b8   : > { %15467 = vmatpush3.bf16.xpose.msk.msra.mxu1 %vm16484_vm3, %v15462_v6 }
0x28b9   : > { %v15468_v42 = vpack.c.bf16 %v7514_v54, %v7509_v23 }
0x28bb   : > { %15470 = vmatprep.subr.msk.bf16.mxu1 %vm16484_vm3, %v15468_v42 }
0x28c0   : > { %15473 = vmatpush3.bf16.xpose.msk.msra.mxu1 %vm16484_vm3, %v15468_v42 }
0x28c1   : > { %15515 = vmatprep.subr.bf16.mxu1 %v15514_v29 }
0x28c7   : > { %13768 = vmatmul.mubr.msk.f32.vlgmr.msra.gmra.mrb[100].mxu1 %vm628_vm2, %v18796_v14 }
0x28c8   : > { %15517 = vmatpush3.bf16.msra.mxu1 %v15514_v29  ;;  %13851 = vmatprep.mubr.f32.mxu1 %v18728_v35 }
0x28c9   : > { %15519 = vmatprep.subr.bf16.mxu1 %v15518_v20 }
0x28cc   : > { %15521 = vmatpush3.bf16.msra.mxu1 %v15518_v20  ;;  %v15482_v20 = vpack.c.bf16 %v11055_v34, %v11054_v62  ;;  %v11141_v62 = vld [vmem:[%s19965_s2 + $0xd98] sm:$0xff] }
0x28cd   : > { %15523 = vmatprep.subr.bf16.mxu1 %v15522_v3 }
0x28ce   : > { %15483 = vmatprep.subr.bf16.mxu0 %v15482_v20 }
0x28d0   : > { %15525 = vmatpush3.bf16.msra.mxu1 %v15522_v3 }
0x28d1   : > { %15527 = vmatprep.subr.bf16.mxu1 %v15526_v7 }
0x28d4   : > { %15529 = vmatpush3.bf16.msra.mxu1 %v15526_v7 }
0x28d5   : > { %15531 = vmatprep.subr.bf16.mxu1 %v15530_v12 }
0x28d8   : > { %15533 = vmatpush3.bf16.msra.mxu1 %v15530_v12  ;;  %v15486_v12 = vpack.c.bf16 %v11057_v37, %v11056_v47  ;;  %v11145_v47 = vld [vmem:[%s19965_s2 + $0xdb8] sm:$0xff] }
0x28d9   : > { %15535 = vmatprep.subr.bf16.mxu1 %v15534_v48 }
0x28dc   : > { %15537 = vmatpush3.bf16.msra.mxu1 %v15534_v48  ;;  %v15490_v48 = vpack.c.bf16 %v11059_v50, %v11058_v46  ;;  %v11149_v46 = vld [vmem:[%s19965_s2 + $0xdd8] sm:$0xff] }
0x28dd   : > { %15539 = vmatprep.subr.bf16.mxu1 %v15538_v39 }
0x28e0   : > { %15541 = vmatpush3.bf16.msra.mxu1 %v15538_v39  ;;  %v15494_v39 = vpack.c.bf16 %v11061_v58, %v11060_v60  ;;  %v11151_v60 = vld [vmem:[%s19965_s2 + $0xde8] sm:$0xff] }
0x28e1   : > { %15543 = vmatprep.subr.bf16.mxu1 %v15542_v52 }
0x28e4   : > { %15545 = vmatpush3.bf16.msra.mxu1 %v15542_v52  ;;  %v15498_v52 = vpack.c.bf16 %v11063_v19, %v11062_v16  ;;  %v11153_v16 = vld [vmem:[%s19965_s2 + $0xdf8] sm:$0xff] }
0x28e7   : > { %13852 = vmatmul.mubr.f32.vlgmr.msra.gmra.mrb[102].mxu1 %v18731_v51 }
0x28e8   : > { %13854 = vmatprep.mubr.f32.mxu1 %v18750_v49 }
0x28eb   : > { %13855 = vmatmul.mubr.f32.gmra.mrb[104].mxu1 %v18753_v4 }
0x299a   : > { %v13769_v33 = vpop.f32.mrb[100].mxu1 }
0x299b   : > { %v7702_v45 = vmul.f32 0.088388346, %v13769_v33  ;;  %v7692_v53 = vpop.f32.mrb[101].mxu1  ;;  %v11064_v33 = vld [vmem:[%s19965_s2 + $0xb50] sm:$0xff] }
0x299c   : > { %v7701_v26 = vmul.f32 0.088388346, %v7692_v53 }
0x299d   : > { %v7706_v27 = vsel %vm628_vm2, %v7702_v45, -inf }
0x299e   : > { %7707 = vmax.xlane.f32.xlu1 %v7706_v27  ;;  %v7703_v44 = vsel %vm628_vm2, %v7701_v26, -inf  ;;  %v11067_v27 = vld [vmem:[%s19965_s2 + $0xb68] sm:$0xff] }
0x299f   : > { %7704 = vmax.xlane.f32.xlu0 %v7703_v44 }
0x29ba   : > { %v13853_v56 = vpop.f32.mrb[102].mxu1 }
0x29bb   : > { %v7977_v21 = vadd.f32 %v13853_v56, %v11196_v55  ;;  %v7971_v36 = vpop.f32.mrb[103].mxu1  ;;  %v11069_v56 = vld [vmem:[%s19965_s2 + $0xb78] sm:$0xff] }
0x29bc   : > { %v7972_v13 = vadd.f32 %v11196_v55, %v7971_v36  ;;  %v16275_v36 = vld [vmem:[%s19966_s3 + $0x1e] ss:$0 sm:$0xff] }
0x29be   : > { %v15558_v28 = vpack.c.bf16 %v7977_v21, %v7972_v13  ;;  %v13856_v11 = vpop.f32.mrb[104].mxu1  ;;  %v19029_v13 = vadd.f32 %v16275_v36, %v18346_v22 }
0x29bf   : > { %v7987_v32 = vadd.f32 %v13856_v11, %v11196_v55  ;;  %v7981_v2 = vpop.f32.mrb[105].mxu1 }
0x29c0   : > { %v7982_v40 = vadd.f32 %v11196_v55, %v7981_v2  ;;  %15559 = vmatprep.subr.bf16.mxu1 %v15558_v28  ;;  %v11068_v55 = vld [vmem:[%s19965_s2 + $0xb70] sm:$0xff] }
0x29c1   : > { %15561 = vmatpush3.bf16.msra.mxu1 %v15558_v28  ;;  %v15510_v21 = vpack.c.bf16 %v11069_v56, %v11068_v55 }
0x29c2   : > { %v15562_v24 = vpack.c.bf16 %v7987_v32, %v7982_v40  ;;  %v11195_v32 = vld [vmem:[%s19966_s3 + $0x22] ss:$0 sm:$0xff] }
0x29c4   : > { %15563 = vmatprep.subr.bf16.mxu1 %v15562_v24 }
0x29c5   : > { %15565 = vmatpush3.bf16.msra.mxu1 %v15562_v24 }
0x2a2b   : > { %v7708_v41 = vpop.xlane.xlu1 %7707 }
0x2a2c   : > { %v7710_v6 = vsub.f32 %v7702_v45, %v7708_v41  ;;  %v7705_v10 = vpop.xlane.xlu0 %7704  ;;  %v11065_v45 = vld [vmem:[%s19965_s2 + $0xb58] sm:$0xff] }
0x2a2d   : > { %v7709_v54 = vsub.f32 %v7701_v26, %v7705_v10  ;;  %v15502_v53 = vpack.c.bf16 %v11065_v45, %v11064_v33  ;;  %v11066_v26 = vld [vmem:[%s19965_s2 + $0xb60] sm:$0xff] }
0x2a2e   : > { %v7713_v59 = vmul.f32 1.442695, %v7710_v6  ;;  %v15506_v44 = vpack.c.bf16 %v11067_v27, %v11066_v26 }
0x2a2f   : > { %v7711_v23 = vmul.f32 1.442695, %v7709_v54 }
0x2a30   : > { %16227 = vpow2.f32 %v7713_v59 }
0x2a31   : > { %16229 = vpow2.f32 %v7711_v23 }
0x2a3a   : > { %v16228_v42 = vpop.eup %16227 }
0x2a3b   : > { %v16230_v18 = vpop.eup %16229  ;;  %v7718_v61 = vsel %vm628_vm2, %v16228_v42, 0.0 }
0x2a3c   : > { %7719 = vadd.xlane.f32.xlu1 %v7718_v61  ;;  %v7715_v29 = vsel %vm628_vm2, %v16230_v18, 0.0 }
0x2a3d   : > { %7716 = vadd.xlane.f32.xlu0 %v7715_v29  ;;  %v11140_v29 = vld [vmem:[%s19965_s2 + $0xd90] sm:$0xff] }
0x2a3e   : > { %v15602_v34 = vpack.c.bf16 %v11141_v62, %v11140_v29 }
0x2ac9   : > { %v7720_v30 = vpop.xlane.xlu1 %7719 }
0x2aca   : > { %16231 = vrcp.f32 %v7720_v30  ;;  %v7717_v57 = vpop.xlane.xlu0 %7716  ;;  %v11143_v30 = vld [vmem:[%s19965_s2 + $0xda8] sm:$0xff] }
0x2acb   : > { %16233 = vrcp.f32 %v7717_v57 }
0x2ad4   : > { %v16232_v3 = vpop.eup %16231 }
0x2ad5   : > { %v16234_v7 = vpop.eup %16233  ;;  %v7724_v8 = vmul.f32 %v16232_v3, %v16228_v42  ;;  %v11138_v42 = vld [vmem:[%s19965_s2 + $0xd80] sm:$0xff]  ;;  %v11144_v3 = vld [vmem:[%s19965_s2 + $0xdb0] sm:$0xff] }
0x2ad6   : > { %v7723_v0 = vmul.f32 %v16234_v7, %v16230_v18  ;;  %v11139_v18 = vld [vmem:[%s19965_s2 + $0xd88] sm:$0xff]  ;;  %v15610_v37 = vpack.c.bf16 %v11145_v47, %v11144_v3  ;;  %v11146_v7 = vld [vmem:[%s19965_s2 + $0xdc0] sm:$0xff] }
0x2ad7   : > { %v15598_v61 = vpack.c.bf16 %v11139_v18, %v11138_v42 }
0x2ad8   : > { %13778 = vmatprep.mubr.msk.f32.mxu0 %vm628_vm2, %v7723_v0  ;;  %v11147_v0 = vld [vmem:[%s19965_s2 + $0xdc8] sm:$0xff] }
0x2ad9   : > { %13779 = vmatmul.mubr.msk.f32.vlgmr.msra.gmra.mrb[90].mxu0 %vm628_vm2, %v7724_v8  ;;  %v15614_v8 = vpack.c.bf16 %v11147_v0, %v11146_v7  ;;  %v11073_v7 = vld [vmem:[%s19965_s2 + $0xb98] sm:$0xff] }
0x2ada   : > { %15485 = vmatpush3.bf16.msra.mxu0 %v15482_v20  ;;  %13813 = vmatprep.mubr.f32.mxu0 %v18728_v35  ;;  %v11142_v20 = vld [vmem:[%s19965_s2 + $0xda0] sm:$0xff] }
0x2adb   : > { %15487 = vmatprep.subr.bf16.mxu0 %v15486_v12  ;;  %v15606_v57 = vpack.c.bf16 %v11143_v30, %v11142_v20  ;;  %v11071_v20 = vld [vmem:[%s19965_s2 + $0xb88] sm:$0xff] }
0x2ade   : > { %15489 = vmatpush3.bf16.msra.mxu0 %v15486_v12  ;;  %v11148_v12 = vld [vmem:[%s19965_s2 + $0xdd0] sm:$0xff] }
0x2adf   : > { %15491 = vmatprep.subr.bf16.mxu0 %v15490_v48  ;;  %v15618_v50 = vpack.c.bf16 %v11149_v46, %v11148_v12 }
0x2ae2   : > { %15493 = vmatpush3.bf16.msra.mxu0 %v15490_v48  ;;  %v11150_v48 = vld [vmem:[%s19965_s2 + $0xde0] sm:$0xff] }
0x2ae3   : > { %15495 = vmatprep.subr.bf16.mxu0 %v15494_v39  ;;  %v15622_v58 = vpack.c.bf16 %v11151_v60, %v11150_v48  ;;  %v11075_v48 = vld [vmem:[%s19965_s2 + $0xba8] sm:$0xff] }
0x2ae6   : > { %15497 = vmatpush3.bf16.msra.mxu0 %v15494_v39  ;;  %v11152_v39 = vld [vmem:[%s19965_s2 + $0xdf0] sm:$0xff] }
0x2ae7   : > { %15499 = vmatprep.subr.bf16.mxu0 %v15498_v52  ;;  %v15626_v19 = vpack.c.bf16 %v11153_v16, %v11152_v39  ;;  %v11077_v39 = vld [vmem:[%s19965_s2 + $0xbb8] sm:$0xff] }
0x2aea   : > { %15501 = vmatpush3.bf16.msra.mxu0 %v15498_v52 }
0x2aeb   : > { %15503 = vmatprep.subr.bf16.mxu0 %v15502_v53 }
0x2aee   : > { %15505 = vmatpush3.bf16.msra.mxu0 %v15502_v53 }
0x2aef   : > { %15507 = vmatprep.subr.bf16.mxu0 %v15506_v44 }
0x2af2   : > { %15509 = vmatpush3.bf16.msra.mxu0 %v15506_v44  ;;  %v11206_v44 = vld [vmem:[%s19966_s3 + $0x27] ss:$0 sm:$0xff] }
0x2af3   : > { %15511 = vmatprep.subr.bf16.mxu0 %v15510_v21 }
0x2af6   : > { %15513 = vmatpush3.bf16.msra.mxu0 %v15510_v21 }
0x2af9   : > { %13814 = vmatmul.mubr.f32.vlgmr.msra.gmra.mrb[92].mxu0 %v18731_v51 }
0x2afa   : > { %13816 = vmatprep.mubr.f32.mxu0 %v18750_v49 }
0x2afd   : > { %13817 = vmatmul.mubr.f32.gmra.mrb[94].mxu0 %v18753_v4 }
0x2afe   : > { %13865 = vmatprep.mubr.msk.f32.mxu0 %vm628_vm2, %v19029_v13 }
0x2bac   : > { %v19034_v28 = vpop.f32.mrb[90].mxu0 }
0x2bad   : > { %v19036_v11 = vpop.f32.mrb[91].mxu0 }
0x2bcc   : > { %v13815_v2 = vpop.f32.mrb[92].mxu0 }
0x2bcd   : > { %v7886_v40 = vadd.f32 %v13815_v2, %v11195_v32  ;;  %v7880_v24 = vpop.f32.mrb[93].mxu0 }
0x2bce   : > { %v7881_v41 = vadd.f32 %v11195_v32, %v7880_v24 }
0x2bd0   : > { %v15546_v6 = vpack.c.bf16 %v7886_v40, %v7881_v41  ;;  %v13818_v22 = vpop.f32.mrb[94].mxu0 }
0x2bd1   : > { %v7896_v10 = vadd.f32 %v13818_v22, %v11195_v32  ;;  %v7890_v54 = vpop.f32.mrb[95].mxu0 }
0x2bd2   : > { %v7891_v59 = vadd.f32 %v11195_v32, %v7890_v54  ;;  %15548 = vmatprep.subr.msk.bf16.mxu0 %vm16484_vm3, %v15546_v6 }
0x2bd3   : > { %15551 = vmatpush3.bf16.xpose.msk.msra.mxu0 %vm16484_vm3, %v15546_v6 }
0x2bd4   : > { %v15552_v23 = vpack.c.bf16 %v7896_v10, %v7891_v59 }
0x2bd6   : > { %15554 = vmatprep.subr.msk.bf16.mxu0 %vm16484_vm3, %v15552_v23 }
0x2bdb   : > { %15557 = vmatpush3.bf16.xpose.msk.msra.mxu0 %vm16484_vm3, %v15552_v23 }
0x2bdc   : > { %15599 = vmatprep.subr.bf16.mxu0 %v15598_v61 }
0x2be2   : > { %13866 = vmatmul.mubr.msk.f32.vlgmr.msra.gmra.mrb[96].mxu0 %vm628_vm2, %v18344_v17 }
0x2be3   : > { %15601 = vmatpush3.bf16.msra.mxu0 %v15598_v61  ;;  %13949 = vmatprep.mubr.f32.mxu0 %v18728_v35 }
0x2be4   : > { %15603 = vmatprep.subr.bf16.mxu0 %v15602_v34 }
0x2be7   : > { %15605 = vmatpush3.bf16.msra.mxu0 %v15602_v34  ;;  %v11070_v34 = vld [vmem:[%s19965_s2 + $0xb80] sm:$0xff] }
0x2be8   : > { %15607 = vmatprep.subr.bf16.mxu0 %v15606_v57  ;;  %v15566_v30 = vpack.c.bf16 %v11071_v20, %v11070_v34 }
0x2bea   : > { %15567 = vmatprep.subr.bf16.mxu1 %v15566_v30 }
0x2beb   : > { %15609 = vmatpush3.bf16.msra.mxu0 %v15606_v57 }
0x2bec   : > { %15611 = vmatprep.subr.bf16.mxu0 %v15610_v37 }
0x2bef   : > { %15613 = vmatpush3.bf16.msra.mxu0 %v15610_v37  ;;  %v11072_v37 = vld [vmem:[%s19965_s2 + $0xb90] sm:$0xff] }
0x2bf0   : > { %15615 = vmatprep.subr.bf16.mxu0 %v15614_v8  ;;  %v15570_v46 = vpack.c.bf16 %v11073_v7, %v11072_v37 }
0x2bf3   : > { %15617 = vmatpush3.bf16.msra.mxu0 %v15614_v8 }
0x2bf4   : > { %15619 = vmatprep.subr.bf16.mxu0 %v15618_v50 }
0x2bf7   : > { %15621 = vmatpush3.bf16.msra.mxu0 %v15618_v50  ;;  %v11074_v50 = vld [vmem:[%s19965_s2 + $0xba0] sm:$0xff] }
0x2bf8   : > { %15623 = vmatprep.subr.bf16.mxu0 %v15622_v58  ;;  %v15574_v60 = vpack.c.bf16 %v11075_v48, %v11074_v50 }
0x2bfb   : > { %15625 = vmatpush3.bf16.msra.mxu0 %v15622_v58  ;;  %v11076_v58 = vld [vmem:[%s19965_s2 + $0xbb0] sm:$0xff] }
0x2bfc   : > { %15627 = vmatprep.subr.bf16.mxu0 %v15626_v19  ;;  %v15578_v16 = vpack.c.bf16 %v11077_v39, %v11076_v58  ;;  %v11161_v39 = vld [vmem:[%s19967_s4 + $0x198] sm:$0xff] }
0x2bff   : > { %15629 = vmatpush3.bf16.msra.mxu0 %v15626_v19  ;;  %v11078_v19 = vld [vmem:[%s19965_s2 + $0xbc0] sm:$0xff] }
0x2c02   : > { %13950 = vmatmul.mubr.f32.vlgmr.msra.gmra.mrb[98].mxu0 %v18731_v51 }
0x2c03   : > { %13952 = vmatprep.mubr.f32.mxu0 %v18750_v49 }
0x2c06   : > { %13953 = vmatmul.mubr.f32.gmra.mrb[100].mxu0 %v18753_v4 }
0x2cb5   : > { %v13867_v52 = vpop.f32.mrb[96].mxu0 }
0x2cb6   : > { %v8084_v33 = vmul.f32 0.088388346, %v13867_v52  ;;  %v8074_v45 = vpop.f32.mrb[97].mxu0 }
0x2cb7   : > { %v8083_v53 = vmul.f32 0.088388346, %v8074_v45  ;;  %v11081_v45 = vld [vmem:[%s19965_s2 + $0xbd8] sm:$0xff] }
0x2cb8   : > { %v8088_v26 = vsel %vm628_vm2, %v8084_v33, -inf }
0x2cb9   : > { %8089 = vmax.xlane.f32.xlu1 %v8088_v26  ;;  %v8085_v27 = vsel %vm628_vm2, %v8083_v53, -inf  ;;  %v11082_v26 = vld [vmem:[%s19965_s2 + $0xbe0] sm:$0xff] }
0x2cba   : > { %8086 = vmax.xlane.f32.xlu0 %v8085_v27  ;;  %v11083_v27 = vld [vmem:[%s19965_s2 + $0xbe8] sm:$0xff] }
0x2cd5   : > { %v13951_v55 = vpop.f32.mrb[98].mxu0 }
0x2cd6   : > { %v8359_v56 = vadd.f32 %v13951_v55, %v11206_v44  ;;  %v8353_v21 = vpop.f32.mrb[99].mxu0  ;;  %v11084_v55 = vld [vmem:[%s19965_s2 + $0xbf0] sm:$0xff] }
0x2cd7   : > { %v8354_v36 = vadd.f32 %v11206_v44, %v8353_v21 }
0x2cd9   : > { %v15642_v32 = vpack.c.bf16 %v8359_v56, %v8354_v36  ;;  %v13954_v2 = vpop.f32.mrb[100].mxu0  ;;  %v11085_v56 = vld [vmem:[%s19965_s2 + $0xbf8] sm:$0xff]  ;;  %v19165_v36 = vadd.f32 %v18806_v15, %v18811_v25 }
0x2cda   : > { %v8369_v40 = vadd.f32 %v13954_v2, %v11206_v44  ;;  %v8363_v24 = vpop.f32.mrb[101].mxu0  ;;  %v15594_v21 = vpack.c.bf16 %v11085_v56, %v11084_v55  ;;  %v11168_v55 = vld [vmem:[%s19967_s4 + $0x1d0] sm:$0xff]  ;;  %v11169_v56 = vld [vmem:[%s19967_s4 + $0x1d8] sm:$0xff] }
0x2cdb   : > { %v8364_v41 = vadd.f32 %v11206_v44, %v8363_v24  ;;  %15643 = vmatprep.subr.bf16.mxu0 %v15642_v32  ;;  %v15590_v44 = vpack.c.bf16 %v11083_v27, %v11082_v26  ;;  %v11166_v26 = vld [vmem:[%s19967_s4 + $0x1c0] sm:$0xff]  ;;  %v11167_v27 = vld [vmem:[%s19967_s4 + $0x1c8] sm:$0xff] }
0x2cdc   : > { %15645 = vmatpush3.bf16.msra.mxu0 %v15642_v32 }
0x2cdd   : > { %v15646_v6 = vpack.c.bf16 %v8369_v40, %v8364_v41  ;;  %v11205_v40 = vld [vmem:[%s19966_s3 + $0x23] ss:$0 sm:$0xff] }
0x2cdf   : > { %15647 = vmatprep.subr.bf16.mxu0 %v15646_v6 }
0x2ce0   : > { %15649 = vmatpush3.bf16.msra.mxu0 %v15646_v6 }
0x2d46   : > { %v8090_v22 = vpop.xlane.xlu1 %8089 }
0x2d47   : > { %v8092_v10 = vsub.f32 %v8084_v33, %v8090_v22  ;;  %v8087_v54 = vpop.xlane.xlu0 %8086  ;;  %v11080_v33 = vld [vmem:[%s19965_s2 + $0xbd0] sm:$0xff] }
0x2d48   : > { %v8091_v59 = vsub.f32 %v8083_v53, %v8087_v54  ;;  %v15586_v53 = vpack.c.bf16 %v11081_v45, %v11080_v33  ;;  %v11164_v33 = vld [vmem:[%s19967_s4 + $0x1b0] sm:$0xff]  ;;  %v11165_v45 = vld [vmem:[%s19967_s4 + $0x1b8] sm:$0xff] }
0x2d49   : > { %v8095_v23 = vmul.f32 1.442695, %v8092_v10 }
0x2d4a   : > { %v8093_v42 = vmul.f32 1.442695, %v8091_v59 }
0x2d4b   : > { %16235 = vpow2.f32 %v8095_v23 }
0x2d4c   : > { %16237 = vpow2.f32 %v8093_v42 }
0x2d55   : > { %v16236_v18 = vpop.eup %16235 }
0x2d56   : > { %v16238_v61 = vpop.eup %16237  ;;  %v8100_v29 = vsel %vm628_vm2, %v16236_v18, 0.0 }
0x2d57   : > { %8101 = vadd.xlane.f32.xlu1 %v8100_v29  ;;  %v8097_v62 = vsel %vm628_vm2, %v16238_v61, 0.0 }
0x2d58   : > { %8098 = vadd.xlane.f32.xlu0 %v8097_v62 }
0x2de4   : > { %v8102_v57 = vpop.xlane.xlu1 %8101 }
0x2de5   : > { %16239 = vrcp.f32 %v8102_v57  ;;  %v8099_v3 = vpop.xlane.xlu0 %8098 }
0x2de6   : > { %16241 = vrcp.f32 %v8099_v3 }
0x2def   : > { %v16240_v47 = vpop.eup %16239 }
0x2df0   : > { %v16242_v0 = vpop.eup %16241  ;;  %v8106_v12 = vmul.f32 %v16240_v47, %v16236_v18 }
0x2df1   : > { %v8105_v8 = vmul.f32 %v16242_v0, %v16238_v61  ;;  %v7807_v0 = vadd.f32 %v19034_v28, %v18796_v14 }
0x2df3   : > { %13876 = vmatprep.mubr.msk.f32.mxu1 %vm628_vm2, %v8105_v8 }
0x2df4   : > { %13877 = vmatmul.mubr.msk.f32.vlgmr.msra.gmra.mrb[106].mxu1 %vm628_vm2, %v8106_v12  ;;  %v7806_v12 = vadd.f32 %v19036_v11, %v18891_v5  ;;  %v11159_v5 = vld [vmem:[%s19967_s4 + $0x188] sm:$0xff] }
0x2df5   : > { %15569 = vmatpush3.bf16.msra.mxu1 %v15566_v30  ;;  %13911 = vmatprep.mubr.f32.mxu1 %v18728_v35  ;;  %v11079_v35 = vld [vmem:[%s19965_s2 + $0xbc8] sm:$0xff] }
0x2df6   : > { %15571 = vmatprep.subr.bf16.mxu1 %v15570_v46  ;;  %v15582_v52 = vpack.c.bf16 %v11079_v35, %v11078_v19  ;;  %v11162_v19 = vld [vmem:[%s19967_s4 + $0x1a0] sm:$0xff]  ;;  %v11163_v35 = vld [vmem:[%s19967_s4 + $0x1a8] sm:$0xff] }
0x2df9   : > { %15573 = vmatpush3.bf16.msra.mxu1 %v15570_v46 }
0x2dfa   : > { %15575 = vmatprep.subr.bf16.mxu1 %v15574_v60 }
0x2dfd   : > { %15577 = vmatpush3.bf16.msra.mxu1 %v15574_v60 }
0x2dfe   : > { %15579 = vmatprep.subr.bf16.mxu1 %v15578_v16 }
0x2e01   : > { %15581 = vmatpush3.bf16.msra.mxu1 %v15578_v16 }
0x2e02   : > { %15583 = vmatprep.subr.bf16.mxu1 %v15582_v52 }
0x2e05   : > { %15585 = vmatpush3.bf16.msra.mxu1 %v15582_v52  ;;  %v15658_v52 = vpack.c.bf16 %v11163_v35, %v11162_v19  ;;  %v11293_v19 = vld [vmem:[%s19965_s2 + $0x1030] sm:$0xff]  ;;  %v11294_v35 = vld [vmem:[%s19965_s2 + $0x1038] sm:$0xff] }
0x2e06   : > { %15587 = vmatprep.subr.bf16.mxu1 %v15586_v53 }
0x2e09   : > { %15589 = vmatpush3.bf16.msra.mxu1 %v15586_v53  ;;  %v15662_v53 = vpack.c.bf16 %v11165_v45, %v11164_v33  ;;  %v11295_v33 = vld [vmem:[%s19965_s2 + $0x1040] sm:$0xff]  ;;  %v11296_v45 = vld [vmem:[%s19965_s2 + $0x1048] sm:$0xff] }
0x2e0a   : > { %15591 = vmatprep.subr.bf16.mxu1 %v15590_v44 }
0x2e0d   : > { %15593 = vmatpush3.bf16.msra.mxu1 %v15590_v44  ;;  %v15666_v44 = vpack.c.bf16 %v11167_v27, %v11166_v26  ;;  %v11297_v26 = vld [vmem:[%s19965_s2 + $0x1050] sm:$0xff]  ;;  %v11298_v27 = vld [vmem:[%s19965_s2 + $0x1058] sm:$0xff] }
0x2e0e   : > { %15595 = vmatprep.subr.bf16.mxu1 %v15594_v21 }
0x2e11   : > { %15597 = vmatpush3.bf16.msra.mxu1 %v15594_v21  ;;  %v15670_v21 = vpack.c.bf16 %v11169_v56, %v11168_v55  ;;  %v11299_v55 = vld [vmem:[%s19965_s2 + $0x1060] sm:$0xff]  ;;  %v11300_v56 = vld [vmem:[%s19965_s2 + $0x1068] sm:$0xff] }
0x2e14   : > { %13912 = vmatmul.mubr.f32.vlgmr.msra.gmra.mrb[108].mxu1 %v18731_v51 }
0x2e15   : > { %13914 = vmatprep.mubr.f32.mxu1 %v18750_v49 }
0x2e18   : > { %13915 = vmatmul.mubr.f32.gmra.mrb[110].mxu1 %v18753_v4 }
0x2e19   : > { %13963 = vmatprep.mubr.msk.f32.mxu1 %vm628_vm2, %v19165_v36 }
0x2ec7   : > { %v13878_v32 = vpop.f32.mrb[106].mxu1 }
0x2ec8   : > { %v8179_v2 = vpop.f32.mrb[107].mxu1  ;;  %v8189_v46 = vadd.f32 %v13878_v32, %v18344_v17  ;;  %v11158_v17 = vld [vmem:[%s19967_s4 + $0x180] sm:$0xff] }
0x2ec9   : > { %v8188_v8 = vadd.f32 %v8179_v2, %v19029_v13  ;;  %v11160_v13 = vld [vmem:[%s19967_s4 + $0x190] sm:$0xff]  ;;  %v15650_v11 = vpack.c.bf16 %v11159_v5, %v11158_v17  ;;  %v11170_v32 = vld [vmem:[%s19967_s4 + $0x1e0] sm:$0xff]  ;;  %v11171_v2 = vld [vmem:[%s19967_s4 + $0x1e8] sm:$0xff] }
0x2eca   : > { %v15654_v16 = vpack.c.bf16 %v11161_v39, %v11160_v13  ;;  %v11292_v39 = vld [vmem:[%s19965_s2 + $0x1028] sm:$0xff] }
0x2ecb   : > { %15651 = vmatprep.subr.bf16.mxu0 %v15650_v11 }
0x2ee7   : > { %v13913_v24 = vpop.f32.mrb[108].mxu1 }
0x2ee8   : > { %v8268_v41 = vadd.f32 %v13913_v24, %v11205_v40  ;;  %v8262_v51 = vpop.f32.mrb[109].mxu1  ;;  %v11172_v24 = vld [vmem:[%s19967_s4 + $0x1f0] sm:$0xff] }
0x2ee9   : > { %v8263_v6 = vadd.f32 %v11205_v40, %v8262_v51 }
0x2eeb   : > { %v15630_v49 = vpack.c.bf16 %v8268_v41, %v8263_v6  ;;  %v13916_v22 = vpop.f32.mrb[110].mxu1  ;;  %v11173_v41 = vld [vmem:[%s19967_s4 + $0x1f8] sm:$0xff]  ;;  %v11287_v6 = vld [vmem:[%s19965_s2 + $0x1000] sm:$0xff] }
0x2eec   : > { %v8278_v10 = vadd.f32 %v13916_v22, %v11205_v40  ;;  %v8272_v15 = vpop.f32.mrb[111].mxu1  ;;  %v15678_v51 = vpack.c.bf16 %v11173_v41, %v11172_v24  ;;  %v11219_v22 = vld [vmem:[%s19965_s2 + $0xe00] sm:$0xff]  ;;  %v11301_v24 = vld [vmem:[%s19965_s2 + $0x1070] sm:$0xff]  ;;  %v11302_v41 = vld [vmem:[%s19965_s2 + $0x1078] sm:$0xff] }
0x2eed   : > { %v8273_v25 = vadd.f32 %v11205_v40, %v8272_v15  ;;  %15632 = vmatprep.subr.msk.bf16.mxu1 %vm16484_vm3, %v15630_v49  ;;  %v15674_v40 = vpack.c.bf16 %v11171_v2, %v11170_v32  ;;  %v11220_v15 = vld [vmem:[%s19965_s2 + $0xe08] sm:$0xff]  ;;  %v11231_v32 = vld [vmem:[%s19965_s2 + $0xe60] sm:$0xff] }
0x2eee   : > { %15635 = vmatpush3.bf16.xpose.msk.msra.mxu1 %vm16484_vm3, %v15630_v49  ;;  %v11288_v49 = vld [vmem:[%s19965_s2 + $0x1008] sm:$0xff] }
0x2eef   : > { %v15636_v4 = vpack.c.bf16 %v8278_v10, %v8273_v25  ;;  %v15714_v10 = vpack.c.bf16 %v11288_v49, %v11287_v6  ;;  %v15682_v25 = vpack.c.bf16 %v11220_v15, %v11219_v22  ;;  %v11232_v2 = vld [vmem:[%s19965_s2 + $0xe68] sm:$0xff]  ;;  %v11233_v6 = vld [vmem:[%s19965_s2 + $0xe70] sm:$0xff]  ;;  %v11234_v49 = vld [vmem:[%s19965_s2 + $0xe78] sm:$0xff] }
0x2ef0   : > { %v15710_v22 = vpack.c.bf16 %v11234_v49, %v11233_v6  ;;  %v11304_v15 = vld [vmem:[%s19965_s2 + $0x1088] sm:$0xff] }
0x2ef1   : > { %15638 = vmatprep.subr.msk.bf16.mxu1 %vm16484_vm3, %v15636_v4  ;;  %v11373_v6 = vld [vmem:[%s19966_s3 + $0x2c] ss:$0 sm:$0xff] }
0x2ef6   : > { %15641 = vmatpush3.bf16.xpose.msk.msra.mxu1 %vm16484_vm3, %v15636_v4  ;;  %v11221_v4 = vld [vmem:[%s19965_s2 + $0xe10] sm:$0xff] }
0x2ef7   : > { %15683 = vmatprep.subr.bf16.mxu1 %v15682_v25 }
0x2efd   : > { %13964 = vmatmul.mubr.msk.f32.vlgmr.msra.gmra.mrb[112].mxu1 %vm628_vm2, %v18809_v63 }
0x2efe   : > { %15685 = vmatpush3.bf16.msra.mxu1 %v15682_v25 }
0x2fd0   : > { %v13965_v54 = vpop.f32.mrb[112].mxu1 }
0x2fd1   : > { %v8466_v59 = vmul.f32 0.088388346, %v13965_v54  ;;  %v8456_v23 = vpop.f32.mrb[113].mxu1  ;;  %v11222_v54 = vld [vmem:[%s19965_s2 + $0xe18] sm:$0xff] }
0x2fd2   : > { %v8465_v42 = vmul.f32 0.088388346, %v8456_v23  ;;  %v11223_v23 = vld [vmem:[%s19965_s2 + $0xe20] sm:$0xff] }
0x2fd3   : > { %v8470_v18 = vsel %vm628_vm2, %v8466_v59, -inf }
0x2fd4   : > { %8471 = vmax.xlane.f32.xlu1 %v8470_v18  ;;  %v8467_v61 = vsel %vm628_vm2, %v8465_v42, -inf }
0x2fd5   : > { %8468 = vmax.xlane.f32.xlu0 %v8467_v61 }
0x3061   : > { %v8472_v29 = vpop.xlane.xlu1 %8471 }
0x3062   : > { %v8474_v62 = vsub.f32 %v8466_v59, %v8472_v29  ;;  %v8469_v34 = vpop.xlane.xlu0 %8468  ;;  %v15686_v59 = vpack.c.bf16 %v11222_v54, %v11221_v4  ;;  %v11215_v4 = vld [vmem:[%s19968_s5 + $0x3] ss:$0 sm:$0xff] }
0x3063   : > { %v8473_v20 = vsub.f32 %v8465_v42, %v8469_v34  ;;  %v11224_v42 = vld [vmem:[%s19965_s2 + $0xe28] sm:$0xff] }
0x3064   : > { %v8477_v30 = vmul.f32 1.442695, %v8474_v62  ;;  %15687 = vmatprep.subr.bf16.mxu1 %v15686_v59  ;;  %v15690_v61 = vpack.c.bf16 %v11224_v42, %v11223_v23 }
0x3065   : > { %v8475_v57 = vmul.f32 1.442695, %v8473_v20  ;;  %15689 = vmatpush3.bf16.msra.mxu1 %v15686_v59  ;;  %v11225_v20 = vld [vmem:[%s19965_s2 + $0xe30] sm:$0xff] }
0x3066   : > { %16243 = vpow2.f32 %v8477_v30  ;;  %15691 = vmatprep.subr.bf16.mxu1 %v15690_v61  ;;  %v11226_v30 = vld [vmem:[%s19965_s2 + $0xe38] sm:$0xff] }
0x3067   : > { %16245 = vpow2.f32 %v8475_v57  ;;  %v15694_v57 = vpack.c.bf16 %v11226_v30, %v11225_v20 }
0x3069   : > { %15693 = vmatpush3.bf16.msra.mxu1 %v15690_v61 }
0x306a   : > { %15695 = vmatprep.subr.bf16.mxu1 %v15694_v57 }
0x306d   : > { %15697 = vmatpush3.bf16.msra.mxu1 %v15694_v57  ;;  %v11307_v57 = vld [vmem:[%s19965_s2 + $0x10a0] sm:$0xff] }
0x3070   : > { %v16244_v3 = vpop.eup %16243 }
0x3071   : > { %v16246_v47 = vpop.eup %16245  ;;  %v8482_v37 = vsel %vm628_vm2, %v16244_v3, 0.0 }
0x3072   : > { %8483 = vadd.xlane.f32.xlu1 %v8482_v37  ;;  %v8479_v7 = vsel %vm628_vm2, %v16246_v47, 0.0  ;;  %v11230_v37 = vld [vmem:[%s19965_s2 + $0xe58] sm:$0xff] }
0x3073   : > { %8480 = vadd.xlane.f32.xlu0 %v8479_v7 }
0x3083   : > { %8576 = vrot.lane.b32.xlu1 %v7807_v0, %s19992_s12 }
0x3087   : > { %8582 = vrot.lane.b32.xlu1 %v8188_v8, %s19991_s14 }
0x3089   : > { %8574 = vrot.lane.b32.xlu0 %v7806_v12, %s19992_s12 }
0x308b   : > { %8584 = vrot.lane.b32.xlu1 %v8189_v46, %s19991_s14 }
0x30ff   : > { %v8484_v50 = vpop.xlane.xlu1 %8483 }
0x3100   : > { %16247 = vrcp.f32 %v8484_v50  ;;  %v8481_v48 = vpop.xlane.xlu0 %8480  ;;  %v7424_v50 = vadd.f32 %v18898_v43, %v18757_v1 }
0x3101   : > { %16249 = vrcp.f32 %v8481_v48  ;;  %v7425_v48 = vadd.f32 %v18896_v31, %v18305_v38 }
0x3103   : > { %v8577_v0 = vpop.permute.xlu1 %8576 }
0x3104   : > { %v8575_v46 = vpop.permute.xlu0 %8574  ;;  %v8597_v17 = vsel %vm628_vm2, %v7425_v48, %v8577_v0  ;;  %v11312_v0 = vld [vmem:[%s19965_s2 + $0x10c8] sm:$0xff]  ;;  %v11315_v48 = vld [vmem:[%s19965_s2 + $0x10e0] sm:$0xff] }
0x3107   : > { %v8583_v8 = vpop.permute.xlu1 %8582 }
0x310a   : > { %v16248_v14 = vpop.eup %16247 }
0x310b   : > { %v16250_v28 = vpop.eup %16249  ;;  %v8488_v58 = vmul.f32 %v16248_v14, %v16244_v3  ;;  %v8585_v12 = vpop.permute.xlu1 %8584  ;;  %v11289_v14 = vld [vmem:[%s19965_s2 + $0x1010] sm:$0xff] }
0x310c   : > { %v8487_v60 = vmul.f32 %v16250_v28, %v16246_v47  ;;  %v11229_v47 = vld [vmem:[%s19965_s2 + $0xe50] sm:$0xff]  ;;  %v11290_v28 = vld [vmem:[%s19965_s2 + $0x1018] sm:$0xff]  ;;  %v8599_v1 = vsel %vm2194_vm5, %v8597_v17, %v8585_v12 }
0x310d   : > { %v15702_v7 = vpack.c.bf16 %v11230_v37, %v11229_v47  ;;  %v15718_v31 = vpack.c.bf16 %v11290_v28, %v11289_v14  ;;  %v11310_v47 = vld [vmem:[%s19965_s2 + $0x10b8] sm:$0xff]  ;;  %v11313_v12 = vld [vmem:[%s19965_s2 + $0x10d0] sm:$0xff]  ;;  %v11316_v14 = vld [vmem:[%s19965_s2 + $0x10e8] sm:$0xff] }
0x310e   : > { %13974 = vmatprep.mubr.msk.f32.mxu0 %vm628_vm2, %v8487_v60  ;;  %v8596_v60 = vsel %vm628_vm2, %v7424_v50, %v8575_v46  ;;  %v11314_v46 = vld [vmem:[%s19965_s2 + $0x10d8] sm:$0xff]  ;;  %v15809_v28 = vpack.c.bf16 %v11316_v14, %v11315_v48 }
0x310f   : > { %13975 = vmatmul.mubr.msk.f32.vlgmr.msra.gmra.mrb[102].mxu0 %vm628_vm2, %v8488_v58  ;;  %v8598_v5 = vsel %vm2194_vm5, %v8596_v60, %v8583_v8  ;;  %v15805_v50 = vpack.c.bf16 %v11314_v46, %v11313_v12  ;;  %v11317_v60 = vld [vmem:[%s19965_s2 + $0x10f0] sm:$0xff] }
0x3110   : > { %15653 = vmatpush3.bf16.msra.mxu0 %v15650_v11  ;;  %v11291_v11 = vld [vmem:[%s19965_s2 + $0x1020] sm:$0xff] }
0x3111   : > { %15655 = vmatprep.subr.bf16.mxu0 %v15654_v16 }
0x3114   : > { %15657 = vmatpush3.bf16.msra.mxu0 %v15654_v16  ;;  %v15722_v16 = vpack.c.bf16 %v11292_v39, %v11291_v11  ;;  %v11323_v11 = vld [vmem:[%s19965_s2 + $0x1120] sm:$0xff]  ;;  %v11324_v39 = vld [vmem:[%s19965_s2 + $0x1128] sm:$0xff] }
0x3115   : > { %15659 = vmatprep.subr.bf16.mxu0 %v15658_v52 }
0x3118   : > { %15661 = vmatpush3.bf16.msra.mxu0 %v15658_v52  ;;  %v15726_v52 = vpack.c.bf16 %v11294_v35, %v11293_v19  ;;  %v11325_v19 = vld [vmem:[%s19965_s2 + $0x1130] sm:$0xff]  ;;  %v11326_v35 = vld [vmem:[%s19965_s2 + $0x1138] sm:$0xff] }
0x3119   : > { %15663 = vmatprep.subr.bf16.mxu0 %v15662_v53 }
0x311c   : > { %15665 = vmatpush3.bf16.msra.mxu0 %v15662_v53  ;;  %v15730_v53 = vpack.c.bf16 %v11296_v45, %v11295_v33  ;;  %v11327_v33 = vld [vmem:[%s19965_s2 + $0x1140] sm:$0xff]  ;;  %v11328_v45 = vld [vmem:[%s19965_s2 + $0x1148] sm:$0xff] }
0x311d   : > { %15667 = vmatprep.subr.bf16.mxu0 %v15666_v44 }
0x3120   : > { %15669 = vmatpush3.bf16.msra.mxu0 %v15666_v44  ;;  %v15734_v44 = vpack.c.bf16 %v11298_v27, %v11297_v26  ;;  %v11329_v26 = vld [vmem:[%s19965_s2 + $0x1150] sm:$0xff]  ;;  %v11330_v27 = vld [vmem:[%s19965_s2 + $0x1158] sm:$0xff] }
0x3121   : > { %15671 = vmatprep.subr.bf16.mxu0 %v15670_v21 }
0x3124   : > { %15673 = vmatpush3.bf16.msra.mxu0 %v15670_v21  ;;  %v15738_v21 = vpack.c.bf16 %v11300_v56, %v11299_v55  ;;  %v11331_v55 = vld [vmem:[%s19965_s2 + $0x1160] sm:$0xff]  ;;  %v11332_v56 = vld [vmem:[%s19965_s2 + $0x1168] sm:$0xff] }
0x3125   : > { %15675 = vmatprep.subr.bf16.mxu0 %v15674_v40 }
0x3128   : > { %15677 = vmatpush3.bf16.msra.mxu0 %v15674_v40  ;;  %v15706_v40 = vpack.c.bf16 %v11232_v2, %v11231_v32  ;;  %v11333_v32 = vld [vmem:[%s19965_s2 + $0x1170] sm:$0xff]  ;;  %v11334_v2 = vld [vmem:[%s19965_s2 + $0x1178] sm:$0xff] }
0x3129   : > { %15679 = vmatprep.subr.bf16.mxu0 %v15678_v51 }
0x312c   : > { %15681 = vmatpush3.bf16.msra.mxu0 %v15678_v51  ;;  %v15742_v51 = vpack.c.bf16 %v11302_v41, %v11301_v24  ;;  %v16343_v24 = vmov 0.0|0.0   ;;  %v16345_v41 = vmov 0.0  }
0x312d   : > { %15715 = vmatprep.subr.bf16.mxu0 %v15714_v10 }
0x31e2   : > { %v13976_v18 = vpop.f32.mrb[102].mxu0 }
0x31e3   : > { %v8571_v29 = vadd.f32 %v13976_v18, %v18809_v63  ;;  %v8561_v62 = vpop.f32.mrb[103].mxu0  ;;  %v11227_v63 = vld [vmem:[%s19965_s2 + $0xe40] sm:$0xff] }
0x31e4   : > { %v8570_v34 = vadd.f32 %v8561_v62, %v19165_v36  ;;  %v11228_v36 = vld [vmem:[%s19965_s2 + $0xe48] sm:$0xff]  ;;  %v11306_v62 = vld [vmem:[%s19965_s2 + $0x1098] sm:$0xff] }
0x31e5   : > { %8592 = vrot.lane.b32.xlu1 %v8571_v29, %s19993_s25  ;;  %v15698_v3 = vpack.c.bf16 %v11228_v36, %v11227_v63  ;;  %v11305_v29 = vld [vmem:[%s19965_s2 + $0x1090] sm:$0xff]  ;;  %v11308_v63 = vld [vmem:[%s19965_s2 + $0x10a8] sm:$0xff] }
0x31e6   : > { %8590 = vrot.lane.b32.xlu0 %v8570_v34, %s19993_s25  ;;  %v15789_v30 = vpack.c.bf16 %v11306_v62, %v11305_v29  ;;  %v15793_v36 = vpack.c.bf16 %v11308_v63, %v11307_v57 }
0x31e7   : > { %15699 = vmatprep.subr.bf16.mxu1 %v15698_v3 }
0x31e8   : > { %15701 = vmatpush3.bf16.msra.mxu1 %v15698_v3  ;;  %v11309_v3 = vld [vmem:[%s19965_s2 + $0x10b0] sm:$0xff] }
0x31e9   : > { %15703 = vmatprep.subr.bf16.mxu1 %v15702_v7  ;;  %v15797_v37 = vpack.c.bf16 %v11310_v47, %v11309_v3 }
0x31ec   : > { %15705 = vmatpush3.bf16.msra.mxu1 %v15702_v7  ;;  %v11311_v7 = vld [vmem:[%s19965_s2 + $0x10c0] sm:$0xff] }
0x31ed   : > { %15707 = vmatprep.subr.bf16.mxu1 %v15706_v40  ;;  %v15801_v8 = vpack.c.bf16 %v11312_v0, %v11311_v7 }
0x31f0   : > { %15709 = vmatpush3.bf16.msra.mxu1 %v15706_v40  ;;  %v15884_v40 = vpack.c.bf16 %v11334_v2, %v11333_v32  ;;  %v11248_v32 = vld [vmem:[%s19965_s2 + $0xee8] sm:$0xff] }
0x31f1   : > { %15711 = vmatprep.subr.bf16.mxu1 %v15710_v22 }
0x31f4   : > { %15713 = vmatpush3.bf16.msra.mxu1 %v15710_v22 }
0x31f5   : > { %15746 = vmatprep.subr.bf16.mxu1 %v16343_v24 }
0x3257   : > { %v8593_v58 = vpop.permute.xlu1 %8592 }
0x3258   : > { %v8591_v13 = vpop.permute.xlu0 %8590  ;;  %v8601_v43 = vsel %vm2199_vm6, %v8599_v1, %v8593_v58  ;;  %v11318_v58 = vld [vmem:[%s19965_s2 + $0x10f8] sm:$0xff] }
0x3259   : > { %v8600_v38 = vsel %vm2199_vm6, %v8598_v5, %v8591_v13  ;;  %v15813_v17 = vpack.c.bf16 %v11318_v58, %v11317_v60  ;;  %v11319_v5 = vld [vmem:[%s19965_s2 + $0x1100] sm:$0xff]  ;;  %v11320_v13 = vld [vmem:[%s19965_s2 + $0x1108] sm:$0xff] }
0x325a   : > { %14009 = vmatprep.mubr.f32.mxu0 %v8600_v38  ;;  %v15856_v1 = vpack.c.bf16 %v11320_v13, %v11319_v5  ;;  %v11236_v5 = vld [vmem:[%s19965_s2 + $0xe88] sm:$0xff] }
0x325b   : > { %14010 = vmatmul.mubr.f32.vlgmr.msra.gmra.mrb[104].mxu0 %v8601_v43 }
0x325c   : > { %15717 = vmatpush3.bf16.msra.mxu0 %v15714_v10  ;;  %v11303_v10 = vld [vmem:[%s19965_s2 + $0x1080] sm:$0xff] }
0x325d   : > { %15719 = vmatprep.subr.bf16.mxu0 %v15718_v31  ;;  %v15785_v25 = vpack.c.bf16 %v11304_v15, %v11303_v10 }
0x3260   : > { %15721 = vmatpush3.bf16.msra.mxu0 %v15718_v31  ;;  %v11322_v31 = vld [vmem:[%s19965_s2 + $0x1118] sm:$0xff] }
0x3261   : > { %15723 = vmatprep.subr.bf16.mxu0 %v15722_v16 }
0x3264   : > { %15725 = vmatpush3.bf16.msra.mxu0 %v15722_v16  ;;  %v15864_v16 = vpack.c.bf16 %v11324_v39, %v11323_v11 }
0x3265   : > { %15727 = vmatprep.subr.bf16.mxu0 %v15726_v52 }
0x3268   : > { %15729 = vmatpush3.bf16.msra.mxu0 %v15726_v52  ;;  %v15868_v52 = vpack.c.bf16 %v11326_v35, %v11325_v19  ;;  %v11240_v19 = vld [vmem:[%s19965_s2 + $0xea8] sm:$0xff] }
0x3269   : > { %15731 = vmatprep.subr.bf16.mxu0 %v15730_v53 }
0x326c   : > { %15733 = vmatpush3.bf16.msra.mxu0 %v15730_v53  ;;  %v15872_v53 = vpack.c.bf16 %v11328_v45, %v11327_v33  ;;  %v11242_v33 = vld [vmem:[%s19965_s2 + $0xeb8] sm:$0xff] }
0x326d   : > { %15735 = vmatprep.subr.bf16.mxu0 %v15734_v44 }
0x3270   : > { %15737 = vmatpush3.bf16.msra.mxu0 %v15734_v44  ;;  %v15876_v44 = vpack.c.bf16 %v11330_v27, %v11329_v26  ;;  %v11244_v26 = vld [vmem:[%s19965_s2 + $0xec8] sm:$0xff] }
0x3271   : > { %15739 = vmatprep.subr.bf16.mxu0 %v15738_v21 }
0x3274   : > { %15741 = vmatpush3.bf16.msra.mxu0 %v15738_v21  ;;  %v15880_v21 = vpack.c.bf16 %v11332_v56, %v11331_v55  ;;  %v11246_v55 = vld [vmem:[%s19965_s2 + $0xed8] sm:$0xff] }
0x3275   : > { %15743 = vmatprep.subr.bf16.mxu0 %v15742_v51 }
0x3278   : > { %15745 = vmatpush3.bf16.msra.mxu0 %v15742_v51  ;;  %v11372_v51 = vld [vmem:[%s19966_s3 + $0x28] ss:$0 sm:$0xff] }
0x3279   : > { %15786 = vmatprep.subr.bf16.mxu0 %v15785_v25 }
0x332e   : > { %v14011_v54 = vpop.f32.mrb[104].mxu0 }
0x332f   : > { %v8680_v59 = vadd.f32 %v14011_v54, %v11215_v4  ;;  %v8674_v23 = vpop.f32.mrb[105].mxu0 }
0x3330   : > { %v8675_v42 = vadd.f32 %v11215_v4, %v8674_v23 }
0x3331   : > { %v8684_v18 = vmax.f32 %v8680_v59, 0.0 }
0x3332   : > { %v8683_v61 = vmax.f32 %v8675_v42, 0.0 }
0x3333   : > { %v19374_v20 = vadd.f32 %v8684_v18, %v8601_v43  ;;  %v19486_v18 = vld [vmem:[%s19973_s10] sm:$0x1] }
0x3334   : > { %v19372_v34 = vadd.f32 %v8683_v61, %v8600_v38  ;;  %v11321_v38 = vld [vmem:[%s19965_s2 + $0x1110] sm:$0xff]  ;;  %v11379_v61 = vld [vmem:[%s19966_s3 + $0x2d] ss:$0 sm:$0xff] }
0x3335   : > { %v15860_v43 = vpack.c.bf16 %v11322_v31, %v11321_v38  ;;  %v11237_v38 = vld [vmem:[%s19965_s2 + $0xe90] sm:$0xff]  ;;  %v11238_v31 = vld [vmem:[%s19965_s2 + $0xe98] sm:$0xff] }
0x3336   : > { %14044 = vmatprep.mubr.f32.mxu1 %v19372_v34  ;;  %14079 = vmatprep.mubr.f32.mxu0 %v19372_v34  ;;  %v15757_v39 = vpack.c.bf16 %v11238_v31, %v11237_v38  ;;  %v11261_v31 = vld [vmem:[%s19965_s2 + $0xf50] sm:$0xff] }
0x3337   : > { %14045 = vmatmul.mubr.f32.vlgmr.msra.gmra.mrb[114].mxu1 %v19374_v20  ;;  %14080 = vmatmul.mubr.f32.vlgmr.msra.gmra.mrb[106].mxu0 %v19374_v20 }
0x3338   : > { %15788 = vmatpush3.bf16.msra.mxu0 %v15785_v25  ;;  %14163 = vmatprep.mubr.f32.mxu0 %v19372_v34 }
0x3339   : > { %15790 = vmatprep.subr.bf16.mxu0 %v15789_v30  ;;  %14086 = vmatprep.mubr.msk.f32.mxu1 %vm16344_vm7, %v16345_v41 }
0x333c   : > { %15792 = vmatpush3.bf16.msra.mxu0 %v15789_v30 }
0x333d   : > { %15794 = vmatprep.subr.bf16.mxu0 %v15793_v36 }
0x3340   : > { %15796 = vmatpush3.bf16.msra.mxu0 %v15793_v36  ;;  %v11385_v36 = vld [vmem:[%s19966_s3 + $0x2e] ss:$0 sm:$0xff] }
0x3341   : > { %15798 = vmatprep.subr.bf16.mxu0 %v15797_v37 }
0x3344   : > { %15800 = vmatpush3.bf16.msra.mxu0 %v15797_v37 }
0x3345   : > { %15802 = vmatprep.subr.bf16.mxu0 %v15801_v8 }
0x3348   : > { %15804 = vmatpush3.bf16.msra.mxu0 %v15801_v8 }
0x3349   : > { %15806 = vmatprep.subr.bf16.mxu0 %v15805_v50 }
0x334c   : > { %15808 = vmatpush3.bf16.msra.mxu0 %v15805_v50 }
0x334d   : > { %15810 = vmatprep.subr.bf16.mxu0 %v15809_v28 }
0x3350   : > { %15812 = vmatpush3.bf16.msra.mxu0 %v15809_v28 }
0x3351   : > { %15814 = vmatprep.subr.bf16.mxu0 %v15813_v17 }
0x3354   : > { %15816 = vmatpush3.bf16.msra.mxu0 %v15813_v17  ;;  %v11235_v17 = vld [vmem:[%s19965_s2 + $0xe80] sm:$0xff] }
0x3355   : > { %15857 = vmatprep.subr.bf16.mxu0 %v15856_v1  ;;  %v15753_v13 = vpack.c.bf16 %v11236_v5, %v11235_v17  ;;  %v11258_v17 = vld [vmem:[%s19965_s2 + $0xf38] sm:$0xff] }
0x3357   : > { %14164 = vmatmul.mubr.f32.vlgmr.msra.gmra.mrb[108].mxu0 %v19374_v20 }
0x3358   : > { %15859 = vmatpush3.bf16.msra.mxu0 %v15856_v1  ;;  %14247 = vmatprep.mubr.f32.mxu0 %v19372_v34 }
0x3359   : > { %15861 = vmatprep.subr.bf16.mxu0 %v15860_v43 }
0x335c   : > { %15863 = vmatpush3.bf16.msra.mxu0 %v15860_v43 }
0x335d   : > { %15865 = vmatprep.subr.bf16.mxu0 %v15864_v16 }
0x3360   : > { %15867 = vmatpush3.bf16.msra.mxu0 %v15864_v16  ;;  %v11239_v16 = vld [vmem:[%s19965_s2 + $0xea0] sm:$0xff] }
0x3361   : > { %15869 = vmatprep.subr.bf16.mxu0 %v15868_v52  ;;  %v15761_v35 = vpack.c.bf16 %v11240_v19, %v11239_v16  ;;  %v11264_v16 = vld [vmem:[%s19965_s2 + $0xf68] sm:$0xff] }
0x3364   : > { %15871 = vmatpush3.bf16.msra.mxu0 %v15868_v52  ;;  %v11241_v52 = vld [vmem:[%s19965_s2 + $0xeb0] sm:$0xff] }
0x3365   : > { %15873 = vmatprep.subr.bf16.mxu0 %v15872_v53  ;;  %v15765_v45 = vpack.c.bf16 %v11242_v33, %v11241_v52  ;;  %v11266_v52 = vld [vmem:[%s19965_s2 + $0xf78] sm:$0xff] }
0x3368   : > { %15875 = vmatpush3.bf16.msra.mxu0 %v15872_v53  ;;  %v11243_v53 = vld [vmem:[%s19965_s2 + $0xec0] sm:$0xff] }
0x3369   : > { %15877 = vmatprep.subr.bf16.mxu0 %v15876_v44  ;;  %v15769_v27 = vpack.c.bf16 %v11244_v26, %v11243_v53  ;;  %v11384_v26 = vld [vmem:[%s19966_s3 + $0x2a] ss:$0 sm:$0xff] }
0x336c   : > { %15879 = vmatpush3.bf16.msra.mxu0 %v15876_v44  ;;  %v11245_v44 = vld [vmem:[%s19965_s2 + $0xed0] sm:$0xff] }
0x336d   : > { %15881 = vmatprep.subr.bf16.mxu0 %v15880_v21  ;;  %v15773_v56 = vpack.c.bf16 %v11246_v55, %v11245_v44  ;;  %v11267_v44 = vld [vmem:[%s19965_s2 + $0xf80] sm:$0xff]  ;;  %v11268_v55 = vld [vmem:[%s19965_s2 + $0xf88] sm:$0xff] }
0x3370   : > { %15883 = vmatpush3.bf16.msra.mxu0 %v15880_v21  ;;  %v11247_v21 = vld [vmem:[%s19965_s2 + $0xee0] sm:$0xff] }
0x3371   : > { %15885 = vmatprep.subr.bf16.mxu0 %v15884_v40  ;;  %v15777_v2 = vpack.c.bf16 %v11248_v32, %v11247_v21 }
0x3374   : > { %15887 = vmatpush3.bf16.msra.mxu0 %v15884_v40  ;;  %v11249_v40 = vld [vmem:[%s19965_s2 + $0xef0] sm:$0xff] }
0x3375   : > { %15892 = vmatprep.subr.bf16.mxu0 %v16343_v24 }
0x3377   : > { %14248 = vmatmul.mubr.f32.vlgmr.msra.gmra.mrb[110].mxu0 %v19374_v20 }
0x3378   : > { %14261 = vmatprep.mubr.msk.f32.mxu0 %vm16344_vm7, %v16345_v41 }
0x340a   : > { %v14046_v49 = vpop.f32.mrb[114].mxu1  ;;  %v14081_v22 = vpop.f32.mrb[106].mxu0 }
0x340b   : > { %v8943_v10 = vadd.f32 %v14046_v49, %v11372_v51  ;;  %v9024_v15 = vadd.f32 %v14081_v22, %v11373_v6  ;;  %v8937_v25 = vpop.f32.mrb[115].mxu1  ;;  %v9018_v4 = vpop.f32.mrb[107].mxu0 }
0x340c   : > { %v8938_v54 = vadd.f32 %v11372_v51, %v8937_v25  ;;  %v9019_v59 = vadd.f32 %v11373_v6, %v9018_v4  ;;  %v11250_v51 = vld [vmem:[%s19965_s2 + $0xef8] sm:$0xff] }
0x340d   : > { %v15781_v6 = vpack.c.bf16 %v11250_v51, %v11249_v40  ;;  %v11269_v51 = vld [vmem:[%s19965_s2 + $0xf90] sm:$0xff] }
0x340e   : > { %v15747_v23 = vpack.c.bf16 %v8943_v10, %v8938_v54  ;;  %v15751_v42 = vpack.c.bf16 %v9024_v15, %v9019_v59  ;;  %v11378_v10 = vld [vmem:[%s19966_s3 + $0x29] ss:$0 sm:$0xff] }
0x3410   : > { %15749 = vmatpush3.bf16.xpose.msk.msra.mxu1 %vm16484_vm3, %v15747_v23  ;;  %v19571_v23 = vld [vmem:[%s19973_s10 + $0x1] sm:$0x1] }
0x3411   : > { %15750 = vmatprep.subr.bf16.mxu1 %v16343_v24 }
0x3417   : > { %14087 = vmatmul.mubr.msk.f32.vlgmr.msra.gmra.mrb[116].mxu1 %vm628_vm2, %v19486_v18 }
0x3418   : > { %15752 = vmatpush3.bf16.msra.mxu1 %v15751_v42  ;;  %14093 = vmatprep.mubr.msk.f32.mxu1 %vm16344_vm7, %v16345_v41 }
0x3419   : > { %15754 = vmatprep.subr.bf16.mxu1 %v15753_v13 }
0x342a   : > { %v14165_v29 = vpop.f32.mrb[108].mxu0 }
0x342b   : > { %v19495_v62 = vadd.f32 %v14165_v29, %v11379_v61  ;;  %v9346_v30 = vpop.f32.mrb[109].mxu0 }
0x342c   : > { %v19497_v57 = vadd.f32 %v11379_v61, %v9346_v30 }
0x342e   : > { %v15822_v63 = vpack.c.bf16 %v19495_v62, %v19497_v57  ;;  %v11251_v62 = vld [vmem:[%s19965_s2 + $0xf00] sm:$0xff]  ;;  %v11252_v57 = vld [vmem:[%s19965_s2 + $0xf08] sm:$0xff] }
0x344a   : > { %v14249_v3 = vpop.f32.mrb[110].mxu0 }
0x344b   : > { %v9679_v47 = vadd.f32 %v14249_v3, %v11385_v36  ;;  %v9673_v37 = vpop.f32.mrb[111].mxu0 }
0x344c   : > { %v9674_v7 = vadd.f32 %v11385_v36, %v9673_v37 }
0x344e   : > { %v15893_v0 = vpack.c.bf16 %v9679_v47, %v9674_v7 }
0x3450   : > { %15894 = vmatpush3.bf16.msra.mxu0 %v15893_v0 }
0x34ea   : > { %v9102_v8 = vpop.f32.mrb[116].mxu1 }
0x34eb   : > { %v9106_v12 = vmul.f32 0.088388346, %v9102_v8  ;;  %v14088_v46 = vpop.f32.mrb[117].mxu1  ;;  %v11253_v8 = vld [vmem:[%s19965_s2 + $0xf10] sm:$0xff] }
0x34ed   : > { %v9108_v50 = vsel %vm9107_vm8, %v9106_v12, -inf }
0x34ee   : > { %9109 = vmax.xlane.f32.xlu0 %v9108_v50 }
0x357b   : > { %v9110_v48 = vpop.xlane.xlu0 %9109 }
0x357c   : > { %v9111_v14 = vsub.f32 %v9106_v12, %v9110_v48  ;;  %v11254_v12 = vld [vmem:[%s19965_s2 + $0xf18] sm:$0xff] }
0x357d   : > { %v15828_v48 = vpack.c.bf16 %v11254_v12, %v11253_v8 }
0x357e   : > { %v9112_v28 = vmul.f32 1.442695, %v9111_v14  ;;  %v11255_v14 = vld [vmem:[%s19965_s2 + $0xf20] sm:$0xff] }
0x3580   : > { %16251 = vpow2.f32 %v9112_v28  ;;  %v11256_v28 = vld [vmem:[%s19965_s2 + $0xf28] sm:$0xff] }
0x358a   : > { %v16252_v60 = vpop.eup %16251 }
0x358b   : > { %v9114_v58 = vsel %vm9107_vm8, %v16252_v60, 0.0 }
0x358c   : > { %9115 = vadd.xlane.f32.xlu1 %v9114_v58  ;;  %v11257_v58 = vld [vmem:[%s19965_s2 + $0xf30] sm:$0xff] }
0x358d   : > { %v15836_v5 = vpack.c.bf16 %v11258_v17, %v11257_v58 }
0x3619   : > { %v9116_v1 = vpop.xlane.xlu1 %9115 }
0x361a   : > { %16253 = vrcp.f32 %v9116_v1  ;;  %v11260_v1 = vld [vmem:[%s19965_s2 + $0xf48] sm:$0xff] }
0x3624   : > { %v16254_v43 = vpop.eup %16253 }
0x3625   : > { %v9118_v11 = vmul.f32 %v16254_v43, %v16252_v60  ;;  %v15832_v60 = vpack.c.bf16 %v11256_v28, %v11255_v14  ;;  %v11262_v43 = vld [vmem:[%s19965_s2 + $0xf58] sm:$0xff] }
0x3627   : > { %14094 = vmatmul.mubr.msk.f32.vlgmr.msra.gmra.mrb[118].mxu1 %vm736_vm4, %v9118_v11  ;;  %v15844_v11 = vpack.c.bf16 %v11262_v43, %v11261_v31  ;;  %v11335_v43 = vld [vmem:[%s19965_s2 + $0x1180] sm:$0xff] }
0x3628   : > { %15756 = vmatpush3.bf16.msra.mxu1 %v15753_v13  ;;  %14128 = vmatprep.mubr.f32.mxu1 %v19372_v34  ;;  %v11259_v13 = vld [vmem:[%s19965_s2 + $0xf40] sm:$0xff] }
0x3629   : > { %15758 = vmatprep.subr.bf16.mxu1 %v15757_v39  ;;  %v15840_v38 = vpack.c.bf16 %v11260_v1, %v11259_v13 }
0x362c   : > { %15760 = vmatpush3.bf16.msra.mxu1 %v15757_v39  ;;  %v11263_v39 = vld [vmem:[%s19965_s2 + $0xf60] sm:$0xff] }
0x362d   : > { %15762 = vmatprep.subr.bf16.mxu1 %v15761_v35  ;;  %v15848_v19 = vpack.c.bf16 %v11264_v16, %v11263_v39 }
0x3630   : > { %15764 = vmatpush3.bf16.msra.mxu1 %v15761_v35  ;;  %v11265_v35 = vld [vmem:[%s19965_s2 + $0xf70] sm:$0xff] }
0x3631   : > { %15766 = vmatprep.subr.bf16.mxu1 %v15765_v45  ;;  %v15852_v33 = vpack.c.bf16 %v11266_v52, %v11265_v35 }
0x3634   : > { %15768 = vmatpush3.bf16.msra.mxu1 %v15765_v45 }
0x3635   : > { %15770 = vmatprep.subr.bf16.mxu1 %v15769_v27 }
0x3638   : > { %15772 = vmatpush3.bf16.msra.mxu1 %v15769_v27 }
0x3639   : > { %15774 = vmatprep.subr.bf16.mxu1 %v15773_v56 }
0x363c   : > { %15776 = vmatpush3.bf16.msra.mxu1 %v15773_v56 }
0x363d   : > { %15778 = vmatprep.subr.bf16.mxu1 %v15777_v2 }
0x3640   : > { %15780 = vmatpush3.bf16.msra.mxu1 %v15777_v2  ;;  %v15895_v2 = vpack.c.bf16 %v11268_v55, %v11267_v44 }
0x3641   : > { %15782 = vmatprep.subr.bf16.mxu1 %v15781_v6 }
0x3644   : > { %15784 = vmatpush3.bf16.msra.mxu1 %v15781_v6  ;;  %v11270_v6 = vld [vmem:[%s19965_s2 + $0xf98] sm:$0xff] }
0x3645   : > { %15817 = vmatprep.subr.bf16.mxu1 %v16343_v24 }
0x3647   : > { %14129 = vmatmul.mubr.f32.vlgmr.msra.gmra.mrb[120].mxu1 %v19374_v20 }
0x3648   : > { %14170 = vmatprep.mubr.msk.f32.mxu1 %vm16344_vm7, %v16345_v41 }
0x36fa   : > { %v19560_v49 = vpop.f32.mrb[118].mxu1 }
0x36fb   : > { %v14095_v22 = vpop.f32.mrb[119].mxu1 }
0x36fc   : > { %v19658_v22 = vld [vmem:[%s19973_s10 + $0x2] sm:$0x1] }
0x371a   : > { %v14130_v15 = vpop.f32.mrb[120].mxu1 }
0x371b   : > { %v9271_v25 = vadd.f32 %v14130_v15, %v11378_v10  ;;  %v9265_v4 = vpop.f32.mrb[121].mxu1  ;;  %v11271_v15 = vld [vmem:[%s19965_s2 + $0xfa0] sm:$0xff] }
0x371c   : > { %v9266_v54 = vadd.f32 %v11378_v10, %v9265_v4  ;;  %v15899_v10 = vpack.c.bf16 %v11270_v6, %v11269_v51  ;;  %v11341_v6 = vld [vmem:[%s19965_s2 + $0x11b0] sm:$0xff] }
0x371e   : > { %v15818_v59 = vpack.c.bf16 %v9271_v25, %v9266_v54  ;;  %v11272_v25 = vld [vmem:[%s19965_s2 + $0xfa8] sm:$0xff]  ;;  %v11273_v54 = vld [vmem:[%s19965_s2 + $0xfb0] sm:$0xff] }
0x371f   : > { %v15903_v4 = vpack.c.bf16 %v11272_v25, %v11271_v15  ;;  %v11343_v25 = vld [vmem:[%s19965_s2 + $0x11c0] sm:$0xff] }
0x3720   : > { %15820 = vmatpush3.bf16.xpose.msk.msra.mxu1 %vm16484_vm3, %v15818_v59  ;;  %v11274_v59 = vld [vmem:[%s19965_s2 + $0xfb8] sm:$0xff] }
0x3721   : > { %15821 = vmatprep.subr.bf16.mxu1 %v16343_v24 }
0x3727   : > { %14171 = vmatmul.mubr.msk.f32.vlgmr.msra.gmra.mrb[122].mxu1 %vm628_vm2, %v19571_v23 }
0x3728   : > { %15823 = vmatpush3.bf16.msra.mxu1 %v15822_v63  ;;  %14177 = vmatprep.mubr.msk.f32.mxu1 %vm16344_vm7, %v16345_v41  ;;  %v15824_v63 = vpack.c.bf16 %v11252_v57, %v11251_v62  ;;  %v11281_v57 = vld [vmem:[%s19965_s2 + $0xff0] sm:$0xff] }
0x372a   : > { %15825 = vmatprep.subr.bf16.mxu1 %v15824_v63 }
0x37fa   : > { %v9430_v42 = vpop.f32.mrb[122].mxu1 }
0x37fb   : > { %v9434_v61 = vmul.f32 0.088388346, %v9430_v42  ;;  %v14172_v29 = vpop.f32.mrb[123].mxu1  ;;  %v15907_v42 = vpack.c.bf16 %v11274_v59, %v11273_v54  ;;  %v11345_v54 = vld [vmem:[%s19965_s2 + $0x11d0] sm:$0xff]  ;;  %v11346_v59 = vld [vmem:[%s19965_s2 + $0x11d8] sm:$0xff] }
0x37fc   : > { %v11276_v29 = vld [vmem:[%s19965_s2 + $0xfc8] sm:$0xff] }
0x37fd   : > { %v9435_v30 = vsel %vm9107_vm8, %v9434_v61, -inf }
0x37fe   : > { %9436 = vmax.xlane.f32.xlu0 %v9435_v30 }
0x388b   : > { %v9437_v36 = vpop.xlane.xlu0 %9436 }
0x388c   : > { %v9438_v3 = vsub.f32 %v9434_v61, %v9437_v36  ;;  %v11275_v61 = vld [vmem:[%s19965_s2 + $0xfc0] sm:$0xff]  ;;  %v11277_v36 = vld [vmem:[%s19965_s2 + $0xfd0] sm:$0xff] }
0x388d   : > { %v15911_v30 = vpack.c.bf16 %v11276_v29, %v11275_v61  ;;  %v11347_v61 = vld [vmem:[%s19965_s2 + $0x11e0] sm:$0xff]  ;;  %v11348_v29 = vld [vmem:[%s19965_s2 + $0x11e8] sm:$0xff] }
0x388e   : > { %v9439_v47 = vmul.f32 1.442695, %v9438_v3  ;;  %v11278_v3 = vld [vmem:[%s19965_s2 + $0xfd8] sm:$0xff] }
0x3890   : > { %16255 = vpow2.f32 %v9439_v47  ;;  %v15915_v47 = vpack.c.bf16 %v11278_v3, %v11277_v36  ;;  %v11349_v36 = vld [vmem:[%s19965_s2 + $0x11f0] sm:$0xff]  ;;  %v11350_v3 = vld [vmem:[%s19965_s2 + $0x11f8] sm:$0xff] }
0x389a   : > { %v16256_v37 = vpop.eup %16255 }
0x389b   : > { %v9441_v7 = vsel %vm9107_vm8, %v16256_v37, 0.0 }
0x389c   : > { %9442 = vadd.xlane.f32.xlu0 %v9441_v7  ;;  %v11280_v7 = vld [vmem:[%s19965_s2 + $0xfe8] sm:$0xff] }
0x3929   : > { %v9443_v0 = vpop.xlane.xlu0 %9442 }
0x392a   : > { %16257 = vrcp.f32 %v9443_v0 }
0x3934   : > { %v16258_v46 = vpop.eup %16257 }
0x3935   : > { %v9445_v50 = vmul.f32 %v16258_v46, %v16256_v37  ;;  %v11279_v37 = vld [vmem:[%s19965_s2 + $0xfe0] sm:$0xff] }
0x3936   : > { %v15919_v62 = vpack.c.bf16 %v11280_v7, %v11279_v37 }
0x3937   : > { %14178 = vmatmul.mubr.msk.f32.vlgmr.msra.gmra.mrb[124].mxu1 %vm736_vm4, %v9445_v50 }
0x3938   : > { %15827 = vmatpush3.bf16.msra.mxu1 %v15824_v63  ;;  %14212 = vmatprep.mubr.f32.mxu1 %v19372_v34  ;;  %v11282_v63 = vld [vmem:[%s19965_s2 + $0xff8] sm:$0xff] }
0x3939   : > { %15829 = vmatprep.subr.bf16.mxu1 %v15828_v48  ;;  %v15923_v0 = vpack.c.bf16 %v11282_v63, %v11281_v57 }
0x393c   : > { %15831 = vmatpush3.bf16.msra.mxu1 %v15828_v48  ;;  %v11390_v48 = vld [vmem:[%s19966_s3 + $0x2b] ss:$0 sm:$0xff] }
0x393d   : > { %15833 = vmatprep.subr.bf16.mxu1 %v15832_v60 }
0x3940   : > { %15835 = vmatpush3.bf16.msra.mxu1 %v15832_v60 }
0x3941   : > { %15837 = vmatprep.subr.bf16.mxu1 %v15836_v5 }
0x3944   : > { %15839 = vmatpush3.bf16.msra.mxu1 %v15836_v5  ;;  %v19713_v5 = vld [vmem:[%s19973_s10 + $0x3] sm:$0x1] }
0x3945   : > { %15841 = vmatprep.subr.bf16.mxu1 %v15840_v38 }
0x3948   : > { %15843 = vmatpush3.bf16.msra.mxu1 %v15840_v38 }
0x3949   : > { %15845 = vmatprep.subr.bf16.mxu1 %v15844_v11 }
0x394c   : > { %15847 = vmatpush3.bf16.msra.mxu1 %v15844_v11  ;;  %v11336_v11 = vld [vmem:[%s19965_s2 + $0x1188] sm:$0xff] }
0x394d   : > { %15849 = vmatprep.subr.bf16.mxu1 %v15848_v19  ;;  %v15927_v39 = vpack.c.bf16 %v11336_v11, %v11335_v43  ;;  %v11360_v11 = vld [vmem:[%s19967_s4 + $0x228] sm:$0xff] }
0x394f   : > { %15928 = vmatprep.subr.bf16.mxu0 %v15927_v39 }
0x3950   : > { %15851 = vmatpush3.bf16.msra.mxu1 %v15848_v19 }
0x3951   : > { %15853 = vmatprep.subr.bf16.mxu1 %v15852_v33 }
0x3954   : > { %15855 = vmatpush3.bf16.msra.mxu1 %v15852_v33  ;;  %v10175_v33 = vlaneseq }
0x3955   : > { %15888 = vmatprep.subr.bf16.mxu1 %v16343_v24 }
0x3957   : > { %14213 = vmatmul.mubr.f32.vlgmr.msra.gmra.mrb[126].mxu1 %v19374_v20 }
0x3958   : > { %14254 = vmatprep.mubr.msk.f32.mxu1 %vm16344_vm7, %v16345_v41 }
0x3a0a   : > { %v19636_v45 = vpop.f32.mrb[124].mxu1 }
0x3a0b   : > { %v14179_v53 = vpop.f32.mrb[125].mxu1 }
0x3a0c   : > { %v10176_v53 = vshrl.u32 %v10175_v33, 7  ;;  %v11364_v33 = vld [vmem:[%s19967_s4 + $0x248] sm:$0xff] }
0x3a2a   : > { %v14214_v27 = vpop.f32.mrb[126].mxu1 }
0x3a2b   : > { %v9598_v56 = vadd.f32 %v14214_v27, %v11384_v26  ;;  %v9592_v21 = vpop.f32.mrb[127].mxu1  ;;  %v19729_v27 = vsub.s32 0, %v10176_v53 }
0x3a2c   : > { %v9593_v32 = vadd.f32 %v11384_v26, %v9592_v21  ;;  %v9519_v26 = vadd.f32 %v19571_v23, %v19636_v45  ;;  %v11338_v21 = vld [vmem:[%s19965_s2 + $0x1198] sm:$0xff]  ;;  %v11339_v23 = vld [vmem:[%s19965_s2 + $0x11a0] sm:$0xff]  ;;  %v11340_v45 = vld [vmem:[%s19965_s2 + $0x11a8] sm:$0xff] }
0x3a2d   : > { %v15935_v51 = vpack.c.bf16 %v11340_v45, %v11339_v23  ;;  %v10273_v45 = vld [vmem:[%s19969_s6] sm:$0xff] }
0x3a2e   : > { %v15889_v40 = vpack.c.bf16 %v9598_v56, %v9593_v32  ;;  %v10178_v44 = vrot.slane %v9519_v26, %v19729_v27  ;;  %v11337_v56 = vld [vmem:[%s19965_s2 + $0x1190] sm:$0xff] }
0x3a2f   : > { %v11365_v26 = vld [vmem:[%s19967_s4 + $0x250] sm:$0xff] }
0x3a30   : > { %15891 = vmatpush3.bf16.xpose.msk.msra.mxu1 %vm16484_vm3, %v15889_v40  ;;  %v15931_v40 = vpack.c.bf16 %v11338_v21, %v11337_v56  ;;  %v11367_v56 = vld [vmem:[%s19967_s4 + $0x260] sm:$0xff]  ;;  %v11368_v21 = vld [vmem:[%s19967_s4 + $0x268] sm:$0xff] }
0x3a31   : > { %15896 = vmatprep.subr.bf16.mxu1 %v15895_v2 }
0x3a37   : > { %14255 = vmatmul.mubr.msk.f32.vlgmr.msra.gmra.mrb[128].mxu1 %vm628_vm2, %v19658_v22 }
0x3a38   : > { %15898 = vmatpush3.bf16.msra.mxu1 %v15895_v2  ;;  %14296 = vmatprep.mubr.f32.mxu1 %v19372_v34 }
0x3a39   : > { %15900 = vmatprep.subr.bf16.mxu1 %v15899_v10 }
0x3a3c   : > { %15902 = vmatpush3.bf16.msra.mxu1 %v15899_v10  ;;  %v11342_v10 = vld [vmem:[%s19965_s2 + $0x11b8] sm:$0xff] }
0x3a3d   : > { %15904 = vmatprep.subr.bf16.mxu1 %v15903_v4  ;;  %v15939_v15 = vpack.c.bf16 %v11342_v10, %v11341_v6  ;;  %v10275_v6 = vld [vmem:[%s19969_s6 + $0x10] sm:$0xff] }
0x3a40   : > { %15906 = vmatpush3.bf16.msra.mxu1 %v15903_v4 }
0x3a41   : > { %15908 = vmatprep.subr.bf16.mxu1 %v15907_v42 }
0x3a44   : > { %15910 = vmatpush3.bf16.msra.mxu1 %v15907_v42  ;;  %v15947_v42 = vpack.c.bf16 %v11346_v59, %v11345_v54 }
0x3a45   : > { %15912 = vmatprep.subr.bf16.mxu1 %v15911_v30 }
0x3a48   : > { %15914 = vmatpush3.bf16.msra.mxu1 %v15911_v30  ;;  %v15951_v30 = vpack.c.bf16 %v11348_v29, %v11347_v61  ;;  %v10279_v29 = vld [vmem:[%s19969_s6 + $0x30] sm:$0xff] }
0x3a49   : > { %15916 = vmatprep.subr.bf16.mxu1 %v15915_v47 }
0x3a4c   : > { %15918 = vmatpush3.bf16.msra.mxu1 %v15915_v47  ;;  %v15955_v47 = vpack.c.bf16 %v11350_v3, %v11349_v36 }
0x3a4d   : > { %15920 = vmatprep.subr.bf16.mxu1 %v15919_v62 }
0x3a50   : > { %15922 = vmatpush3.bf16.msra.mxu1 %v15919_v62 }
0x3a51   : > { %15924 = vmatprep.subr.bf16.mxu1 %v15923_v0 }
0x3a54   : > { %15926 = vmatpush3.bf16.msra.mxu1 %v15923_v0 }
0x3a55   : > { %15959 = vmatprep.subr.bf16.mxu1 %v16343_v24 }
0x3a57   : > { %14297 = vmatmul.mubr.f32.vlgmr.msra.gmra.mrb[130].mxu1 %v19374_v20 }
0x3a58   : > { %14338 = vmatprep.mubr.msk.f32.mxu1 %vm16344_vm7, %v16345_v41 }
0x3b0a   : > { %v9757_v8 = vpop.f32.mrb[128].mxu1 }
0x3b0b   : > { %v9761_v12 = vmul.f32 0.088388346, %v9757_v8  ;;  %v14256_v46 = vpop.f32.mrb[129].mxu1 }
0x3b0d   : > { %v9762_v50 = vsel %vm9107_vm8, %v9761_v12, -inf }
0x3b0e   : > { %9763 = vmax.xlane.f32.xlu0 %v9762_v50 }
0x3b2a   : > { %v14298_v14 = vpop.f32.mrb[130].mxu1 }
0x3b2b   : > { %v9925_v28 = vadd.f32 %v14298_v14, %v11390_v48  ;;  %v9919_v60 = vpop.f32.mrb[131].mxu1 }
0x3b2c   : > { %v9920_v58 = vadd.f32 %v11390_v48, %v9919_v60 }
0x3b2e   : > { %v15960_v17 = vpack.c.bf16 %v9925_v28, %v9920_v58 }
0x3b30   : > { %15962 = vmatpush3.bf16.xpose.msk.msra.mxu1 %vm16484_vm3, %v15960_v17 }
0x3b31   : > { %15990 = vmatprep.subr.bf16.mxu1 %v16343_v24 }
0x3b37   : > { %14339 = vmatmul.mubr.msk.f32.vlgmr.msra.gmra.mrb[132].mxu1 %vm628_vm2, %v19713_v5 }
0x3b38   : > { %14415 = vmatprep.mubr.msk.f32.mxu1 %vm16344_vm7, %v16345_v41 }
0x3b9b   : > { %v9764_v13 = vpop.xlane.xlu0 %9763 }
0x3b9c   : > { %v9765_v1 = vsub.f32 %v9761_v12, %v9764_v13  ;;  %v11355_v13 = vld [vmem:[%s19967_s4 + $0x200] sm:$0xff] }
0x3b9e   : > { %v9766_v38 = vmul.f32 1.442695, %v9765_v1  ;;  %v11356_v1 = vld [vmem:[%s19967_s4 + $0x208] sm:$0xff] }
0x3ba0   : > { %16259 = vpow2.f32 %v9766_v38  ;;  %v11357_v38 = vld [vmem:[%s19967_s4 + $0x210] sm:$0xff] }
0x3baa   : > { %v16260_v31 = vpop.eup %16259 }
0x3bab   : > { %v9768_v9 = vsel %vm9107_vm8, %v16260_v31, 0.0 }
0x3bac   : > { %9769 = vadd.xlane.f32.xlu1 %v9768_v9  ;;  %v11358_v9 = vld [vmem:[%s19967_s4 + $0x218] sm:$0xff] }
0x3bad   : > { %v15970_v43 = vpack.c.bf16 %v11358_v9, %v11357_v38 }
0x3c0a   : > { %v10084_v16 = vpop.f32.mrb[132].mxu1 }
0x3c0b   : > { %v10088_v19 = vmul.f32 0.088388346, %v10084_v16  ;;  %v14340_v35 = vpop.f32.mrb[133].mxu1  ;;  %v11361_v16 = vld [vmem:[%s19967_s4 + $0x230] sm:$0xff] }
0x3c0d   : > { %v10089_v52 = vsel %vm9107_vm8, %v10088_v19, -inf }
0x3c0e   : > { %10090 = vmax.xlane.f32.xlu0 %v10089_v52  ;;  %v11363_v52 = vld [vmem:[%s19967_s4 + $0x240] sm:$0xff] }
0x3c0f   : > { %v15979_v53 = vpack.c.bf16 %v11364_v33, %v11363_v52 }
0x3c24   : > { %10179 = vrot.lane.b32.xlu0 %v10178_v44, %s19992_s12  ;;  %v11366_v44 = vld [vmem:[%s19967_s4 + $0x258] sm:$0xff]  ;;  %s10362_s12 = scalar_lea.sflag [#allocation3], %s377_s15 }
0x3c39   : > { %v9770_v55 = vpop.xlane.xlu1 %9769 }
0x3c3a   : > { %16261 = vrcp.f32 %v9770_v55  ;;  %v15982_v55 = vpack.c.bf16 %v11366_v44, %v11365_v26 }
0x3c44   : > { %v16262_v32 = vpop.eup %16261 }
0x3c45   : > { %v9772_v2 = vmul.f32 %v16262_v32, %v16260_v31  ;;  %v15967_v31 = vpack.c.bf16 %v11356_v1, %v11355_v13  ;;  %v15985_v32 = vpack.c.bf16 %v11368_v21, %v11367_v56 }
0x3c47   : > { %14262 = vmatmul.mubr.msk.f32.vlgmr.msra.gmra.mrb[112].mxu0 %vm736_vm4, %v9772_v2  ;;  %v11369_v2 = vld [vmem:[%s19967_s4 + $0x270] sm:$0xff] }
0x3c48   : > { %15930 = vmatpush3.bf16.msra.mxu0 %v15927_v39  ;;  %14331 = vmatprep.mubr.f32.mxu0 %v19372_v34  ;;  %v11344_v34 = vld [vmem:[%s19965_s2 + $0x11c8] sm:$0xff] }
0x3c49   : > { %15932 = vmatprep.subr.bf16.mxu0 %v15931_v40  ;;  %v15943_v4 = vpack.c.bf16 %v11344_v34, %v11343_v25  ;;  %v10277_v34 = vld [vmem:[%s19969_s6 + $0x20] sm:$0xff] }
0x3c4c   : > { %15934 = vmatpush3.bf16.msra.mxu0 %v15931_v40  ;;  %v11370_v40 = vld [vmem:[%s19967_s4 + $0x278] sm:$0xff] }
0x3c4d   : > { %15936 = vmatprep.subr.bf16.mxu0 %v15935_v51  ;;  %v15988_v23 = vpack.c.bf16 %v11370_v40, %v11369_v2 }
0x3c50   : > { %15938 = vmatpush3.bf16.msra.mxu0 %v15935_v51  ;;  %v10274_v51 = vld [vmem:[%s19969_s6 + $0x8] sm:$0xff] }
0x3c51   : > { %15940 = vmatprep.subr.bf16.mxu0 %v15939_v15  ;;  %v15991_v10 = vpack.c.bf16 %v10274_v51, %v10273_v45 }
0x3c53   : > { %15992 = vmatpush3.bf16.msra.mxu1 %v15991_v10 }
0x3c54   : > { %15942 = vmatpush3.bf16.msra.mxu0 %v15939_v15  ;;  %v10276_v15 = vld [vmem:[%s19969_s6 + $0x18] sm:$0xff]  ;;  %15993 = vmatprep.subr.bf16.mxu1 %v16343_v24 }
0x3c55   : > { %15944 = vmatprep.subr.bf16.mxu0 %v15943_v4  ;;  %v15994_v25 = vpack.c.bf16 %v10276_v15, %v10275_v6 }
0x3c57   : > { %15995 = vmatpush3.bf16.msra.mxu1 %v15994_v25 }
0x3c58   : > { %15946 = vmatpush3.bf16.msra.mxu0 %v15943_v4  ;;  %v10278_v4 = vld [vmem:[%s19969_s6 + $0x28] sm:$0xff]  ;;  %15996 = vmatprep.subr.bf16.mxu1 %v16343_v24 }
0x3c59   : > { %15948 = vmatprep.subr.bf16.mxu0 %v15947_v42  ;;  %v15997_v59 = vpack.c.bf16 %v10278_v4, %v10277_v34 }
0x3c5b   : > { %15998 = vmatpush3.bf16.msra.mxu1 %v15997_v59 }
0x3c5c   : > { %15950 = vmatpush3.bf16.msra.mxu0 %v15947_v42  ;;  %15999 = vmatprep.subr.bf16.mxu1 %v16343_v24 }
0x3c5d   : > { %15952 = vmatprep.subr.bf16.mxu0 %v15951_v30 }
0x3c60   : > { %15954 = vmatpush3.bf16.msra.mxu0 %v15951_v30  ;;  %v10280_v30 = vld [vmem:[%s19969_s6 + $0x38] sm:$0xff] }
0x3c61   : > { %15956 = vmatprep.subr.bf16.mxu0 %v15955_v47  ;;  %v16000_v3 = vpack.c.bf16 %v10280_v30, %v10279_v29 }
0x3c63   : > { %16001 = vmatpush3.bf16.msra.mxu1 %v16000_v3 }
0x3c64   : > { %15958 = vmatpush3.bf16.msra.mxu0 %v15955_v47  ;;  %v10282_v47 = vld [vmem:[%s19969_s6 + $0x48] sm:$0xff]  ;;  %16002 = vmatprep.subr.bf16.mxu1 %v16343_v24 }
0x3c65   : > { %15963 = vmatprep.subr.bf16.mxu0 %v16343_v24 }
0x3c67   : > { %14332 = vmatmul.mubr.f32.vlgmr.msra.gmra.mrb[114].mxu0 %v19374_v20  ;;  %v11391_v20 = vld [vmem:[%s19966_s3 + $0x2f] ss:$0 sm:$0xff] }
0x3c68   : > { %14345 = vmatprep.mubr.msk.f32.mxu0 %vm16344_vm7, %v16345_v41 }
0x3c9b   : > { %v10091_v37 = vpop.xlane.xlu0 %10090 }
0x3c9c   : > { %v10092_v7 = vsub.f32 %v10088_v19, %v10091_v37  ;;  %v11362_v19 = vld [vmem:[%s19967_s4 + $0x238] sm:$0xff] }
0x3c9d   : > { %v15976_v35 = vpack.c.bf16 %v11362_v19, %v11361_v16 }
0x3c9e   : > { %v10093_v62 = vmul.f32 1.442695, %v10092_v7  ;;  %v10284_v7 = vld [vmem:[%s19969_s6 + $0x58] sm:$0xff] }
0x3ca0   : > { %16263 = vpow2.f32 %v10093_v62 }
0x3caa   : > { %v16264_v57 = vpop.eup %16263 }
0x3cab   : > { %v10095_v63 = vsel %vm9107_vm8, %v16264_v57, 0.0 }
0x3cac   : > { %10096 = vadd.xlane.f32.xlu1 %v10095_v63 }
0x3d1a   : > { %v9842_v0 = vpop.f32.mrb[112].mxu0 }
0x3d1b   : > { %v9846_v8 = vadd.f32 %v19658_v22, %v9842_v0  ;;  %v14263_v12 = vpop.f32.mrb[113].mxu0  ;;  %v9192_v0 = vadd.f32 %v19560_v49, %v19486_v18  ;;  %v10287_v18 = vld [vmem:[%s19969_s6 + $0x70] sm:$0xff]  ;;  %v10288_v49 = vld [vmem:[%s19969_s6 + $0x78] sm:$0xff] }
0x3d1d   : > { %v10186_v46 = vrot.slane %v9846_v8, %v19729_v27 }
0x3d1f   : > { %10187 = vrot.lane.b32.xlu1 %v10186_v46, %s19991_s14  ;;  %s19921_s14 = scalar_lea.hbm %s19974_s11, %s11396_s29 }
0x3d39   : > { %v10097_v50 = vpop.xlane.xlu1 %10096 }
0x3d3a   : > { %v14333_v48 = vpop.f32.mrb[114].mxu0  ;;  %16265 = vrcp.f32 %v10097_v50  ;;  %v10285_v50 = vld [vmem:[%s19969_s6 + $0x60] sm:$0xff] }
0x3d3b   : > { %v10006_v14 = vadd.f32 %v14333_v48, %v11391_v20  ;;  %v10000_v28 = vpop.f32.mrb[115].mxu0  ;;  %v10286_v48 = vld [vmem:[%s19969_s6 + $0x68] sm:$0xff] }
0x3d3c   : > { %v10001_v60 = vadd.f32 %v11391_v20, %v10000_v28  ;;  %v16012_v28 = vpack.c.bf16 %v10288_v49, %v10287_v18 }
0x3d3e   : > { %v15964_v58 = vpack.c.bf16 %v10006_v14, %v10001_v60  ;;  %v16009_v14 = vpack.c.bf16 %v10286_v48, %v10285_v50  ;;  %v11371_v60 = vld [vmem:[%s19968_s5 + $0x4] sm:$0x1] }
0x3d40   : > { %15965 = vmatpush3.bf16.msra.mxu0 %v15964_v58 }
0x3d41   : > { %15966 = vmatprep.subr.bf16.mxu0 %v16343_v24 }
0x3d44   : > { %v16266_v22 = vpop.eup %16265 }
0x3d45   : > { %v10099_v17 = vmul.f32 %v16266_v22, %v16264_v57  ;;  %v10180_v57 = vpop.permute.xlu0 %10179 }
0x3d46   : > { %v10198_v8 = vsel %vm628_vm2, %v9192_v0, %v10180_v57 }
0x3d47   : > { %14346 = vmatmul.mubr.msk.f32.vlgmr.msra.gmra.mrb[116].mxu0 %vm736_vm4, %v10099_v17 }
0x3d48   : > { %14380 = vmatprep.mubr.msk.f32.mxu0 %vm16344_vm7, %v16345_v41  ;;  %15968 = vmatpush3.bf16.msra.mxu0 %v15967_v31  ;;  %v11359_v41 = vld [vmem:[%s19967_s4 + $0x220] sm:$0xff] }
0x3d49   : > { %15969 = vmatprep.subr.bf16.mxu0 %v16343_v24  ;;  %v15973_v39 = vpack.c.bf16 %v11360_v11, %v11359_v41 }
0x3d4c   : > { %15971 = vmatpush3.bf16.msra.mxu0 %v15970_v43 }
0x3d4d   : > { %15972 = vmatprep.subr.bf16.mxu0 %v16343_v24 }
0x3d50   : > { %15974 = vmatpush3.bf16.msra.mxu0 %v15973_v39 }
0x3d51   : > { %15975 = vmatprep.subr.bf16.mxu0 %v16343_v24 }
0x3d54   : > { %15977 = vmatpush3.bf16.msra.mxu0 %v15976_v35 }
0x3d55   : > { %15978 = vmatprep.subr.bf16.mxu0 %v16343_v24 }
0x3d58   : > { %15980 = vmatpush3.bf16.msra.mxu0 %v15979_v53 }
0x3d59   : > { %15981 = vmatprep.subr.bf16.mxu0 %v16343_v24 }
0x3d5c   : > { %15983 = vmatpush3.bf16.msra.mxu0 %v15982_v55 }
0x3d5d   : > { %15984 = vmatprep.subr.bf16.mxu0 %v16343_v24 }
0x3d60   : > { %15986 = vmatpush3.bf16.msra.mxu0 %v15985_v32 }
0x3d61   : > { %15987 = vmatprep.subr.bf16.mxu0 %v16343_v24 }
0x3d64   : > { %15989 = vmatpush3.bf16.msra.mxu0 %v15988_v23 }
0x3d91   : > { %v10188_v63 = vpop.permute.xlu1 %10187 }
0x3d92   : > { %v10199_v12 = vsel %vm2194_vm5, %v10198_v8, %v10188_v63 }
0x3e1a   : > { %v10169_v54 = vpop.f32.mrb[116].mxu0 }
0x3e1b   : > { %v10173_v42 = vadd.f32 %v19713_v5, %v10169_v54  ;;  %v14347_v61 = vpop.f32.mrb[117].mxu0  ;;  %v10281_v5 = vld [vmem:[%s19969_s6 + $0x40] sm:$0xff] }
0x3e1c   : > { %v16003_v37 = vpack.c.bf16 %v10282_v47, %v10281_v5 }
0x3e1d   : > { %v10194_v36 = vrot.slane %v10173_v42, %v19729_v27  ;;  %v10283_v27 = vld [vmem:[%s19969_s6 + $0x50] sm:$0xff] }
0x3e1e   : > { %16004 = vmatpush3.bf16.msra.mxu1 %v16003_v37  ;;  %v16006_v62 = vpack.c.bf16 %v10284_v7, %v10283_v27 }
0x3e1f   : > { %10195 = vrot.lane.b32.xlu1 %v10194_v36, %s19993_s25  ;;  %16005 = vmatprep.subr.bf16.mxu1 %v16343_v24 }
0x3e22   : > { %16007 = vmatpush3.bf16.msra.mxu1 %v16006_v62 }
0x3e23   : > { %16008 = vmatprep.subr.bf16.mxu1 %v16343_v24 }
0x3e26   : > { %16010 = vmatpush3.bf16.msra.mxu1 %v16009_v14 }
0x3e27   : > { %16011 = vmatprep.subr.bf16.mxu1 %v16343_v24  ;;  %v10289_v24 = vld [vmem:[%s19970_s7] sm:$0x1] }
0x3e2a   : > { %16013 = vmatpush3.bf16.msra.mxu1 %v16012_v28 }
0x3e91   : > { %v10196_v46 = vpop.permute.xlu1 %10195 }
0x3e92   : > { %v10200_v20 = vsel %vm2199_vm6, %v10199_v12, %v10196_v46 }
0x3e93   : > { %14381 = vmatmul.mubr.f32.vlgmr.msra.gmra.mrb[118].mxu0 %v10200_v20 }
0x3f66   : > { %v10267_v58 = vpop.f32.mrb[118].mxu0 }
0x3f67   : > { %v10268_v22 = vadd.f32 %v11371_v60, %v10267_v58  ;;  %v14382_v17 = vpop.f32.mrb[119].mxu0 }
0x3f69   : > { %v10271_v13 = vmax.f32 %v10268_v22, 0.0 }
0x3f6b   : > { %v10272_v1 = vadd.f32 %v10271_v13, %v10200_v20 }
0x3f6d   : > { %14416 = vmatmul.mubr.f32.vlgmr.msra.gmra.mrb[134].mxu1 %v10272_v1 }
0x4040   : > { %v10356_v38 = vpop.f32.mrb[134].mxu1 }
0x4041   : > { %v10357_v31 = vadd.f32 %v10356_v38, %v10289_v24  ;;  %v14417_v9 = vpop.f32.mrb[135].mxu1 }
0x4043   : > { %10360 = vst [vmem:[%s378_s8] sm:$0x1] %v10357_v31 }
0x4044   : > { %16289 = shalt.err (!%p16286_p3)
}
0x4045   : > { %s16290_s15 = scalar_lea.hbm %s19921_s14, 16  ;;  %s16294_s29 = scalar_lea.hbm %s19974_s11, 32 }
0x4046   : > { %p16291_p4 = scmp.ne.s32.totalorder %s19921_s14, %s16290_s15  ;;  %p16295_p9 = scmp.lt.u32.totalorder %s19921_s14, %s19974_s11 }
0x4047   : > { %p16296_p10 = scmp.lt.u32.totalorder %s16294_s29, %s16290_s15  ;;  %p16298_p12 = scmp.lt.u32.totalorder %s16290_s15, %s19921_s14 }
0x4048   : > { %p16292_p7 = pnand %p16291_p4, %p16445_p5 }
0x4049   : > { %p16297_p11 = por %p16296_p10, %p16295_p9 }
0x404a   : > { %p16293_p8 = pneg %p16292_p7 }
0x404b   : > { %p16299_p13 = por %p16298_p12, %p16297_p11 }
0x404d   : > { %p16300_p0 = pnand %p16299_p13, %p16293_p8 }
0x404f   : > { %16303 = shalt.err (!%p16300_p0)
}
0x4050   : > { %16014 = dma.vmem_to_hbm [thread:$0]  (%p16445_p5), %s19923_s22, 16, %s19921_s14, %s10362_s12  }
0x4051 PF: > { %p16020_p1 = scmp.ge.s32.totalorder %s16338_s20, 2  ;;  %s10386_s0 = sand.u32 1, %s16326_s17  }
0x4052   : > { %s10387_s1 = scalar_lea.sflag [#allocation3], %s10386_s0 }
0x4053   : > { %p16017_p2 = pnand %p16020_p1, %p16449_p6 }
0x4055   : > { %16321 = dma.done.wait (!%p16017_p2), %s10387_s1, 16  }
0x4056   : > { %16323 = vsyncadd (!%p16017_p2), %s10387_s1, 4294967280  ;;  %p21_p3 = scmp.ge.s32.totalorder %s16432_s23, 4   ;;  %s19994_s17 = smov %s16330_s18 }
0x4057   : > { %s19995_s18 = smov %s16334_s19  ;;  %s19996_s19 = smov %s16443_s26 }
0x4058   : > { %s19997_s20 = smov %s16432_s23  ;;  %23 = sbr.rel (!%p21_p3) target bundleno = 7 (0x7), region = 209 }
0x405f   :  { %10391 = vsyncpa [#allocation3], 1 }
0x4060   :  { %10393 = vsyncpa [#allocation3 + $0x1], 1 }

</bundles_post_ra>
